<compile_context>
chip_gen: v7x
topology: tpu7x:2x2x1
jax: 0.10.0
libtpu: 0.0.40
codegen_flags: <defaults>
</compile_context>

<pallas_src>
import jax
import jax.numpy as jnp
from jax import lax
from jax.experimental import pallas as pl
from jax.experimental.pallas import tpu as pltpu


# ----------------------------- fused Pallas kernel ----------------------------- #

def _fused_forward_kernel(p1_ref, w1_ref, b1_ref, w2_ref, b2_ref,
                          wf1_ref, bf1_ref, wf2_ref, bf2_ref, wf3_ref, bf3_ref,
                          out_ref, pooled1_scr):
    f32 = jnp.float32
    w1 = w1_ref[...]          # [32, 128] bf16
    b1 = b1_ref[...]          # [1, 128] f32

    # --- Stage A: conv1 (1->6, 5x5) + bias + ReLU + 2x2 maxpool, row-blocked ----------
    # p1 rows are ordered (oh, ow, b8); block ph covers oh in {2ph, 2ph+1}.
    def conv1_pool1(ph, carry):
        a1 = jnp.dot(p1_ref[ph], w1, preferred_element_type=f32)        # [384, 128]
        a1 = jnp.maximum(a1 + b1, 0.0)
        a1 = a1.reshape(2, 12, 2, 8, 128)                                # (dh, pw, dw, b, c)
        pooled = jnp.maximum(jnp.maximum(a1[0, :, 0], a1[0, :, 1]),
                             jnp.maximum(a1[1, :, 0], a1[1, :, 1]))      # [12, 8, 128]
        pooled1_scr[ph] = pooled                                         # lane-dense store
        return carry

    lax.fori_loop(0, 12, conv1_pool1, 0)

    # --- Stage B: conv2 (6->16, 5x5) as 2 chunks x 25 accumulated matmuls + maxpool2,
    #     fused with the fc1 flatten (16 accumulated [8,16]x[16,128] matmuls). ----------
    b2 = b2_ref[...]
    fc1_acc = jnp.zeros((8, 128), f32)
    for c in range(2):                         # output rows oh2 in [4c, 4c+4)
        h0 = 4 * c
        acc = jnp.zeros((256, 128), f32)       # rows = (oh2_rel, ow2, b8) -> 32 vregs
        for i in range(5):
            for j in range(5):
                blk = pooled1_scr[h0 + i:h0 + i + 4, j:j + 8, :, :]      # [4,8,8,128] f32
                lhs = blk.reshape(256, 128)[:, 0:8]                      # keep 6(+2 pad) ci
                acc = acc + jnp.dot(lhs, w2_ref[i * 5 + j],
                                    preferred_element_type=f32)
        a2 = jnp.maximum(acc + b2, 0.0)
        a2 = a2.reshape(2, 2, 4, 2, 8, 128)                              # (h2r, dh, w2, dw, b, c)
        p2 = jnp.maximum(jnp.maximum(a2[:, 0, :, 0], a2[:, 0, :, 1]),
                         jnp.maximum(a2[:, 1, :, 0], a2[:, 1, :, 1]))    # [2, 4, 8, 128]
        for h2r in range(2):
            for w2i in range(4):
                idx = (2 * c + h2r) * 4 + w2i                            # NCHW flatten pos
                fc1_acc = fc1_acc + jnp.dot(p2[h2r, w2i][:, 0:16], wf1_ref[idx],
                                            preferred_element_type=f32)

    # --- Stage C: f32 head ---------------------------------------------------------------
    h1 = jnp.maximum(fc1_acc + bf1_ref[...], 0.0)                                  # pre_layer
    h2 = jnp.dot(h1, wf2_ref[...], preferred_element_type=f32) + bf2_ref[...]      # r_layer
    h3 = jnp.dot(h2, wf3_ref[...], preferred_element_type=f32) + bf3_ref[...]      # pos_layer
    out_ref[...] = jnp.maximum(h3, 0.0).astype(out_ref.dtype)


# ------------------------------- parameter prep -------------------------------- #

def prepare_kernel_params(p):
    """One-time repack of PyTorch-layout params into compact, lane-dense kernel weights."""
    f32, bf16 = jnp.float32, jnp.bfloat16
    # conv1: [6,1,5,5] -> [32,128] bf16; row = i*5+j (25->32), col = out channel (6->128).
    w1 = jnp.pad(p["conv1_w"].reshape(6, 25).T, ((0, 7), (0, 122))).astype(bf16)
    b1 = jnp.pad(p["conv1_b"], (0, 122)).reshape(1, 128).astype(f32)
    # conv2: [16,6,5,5] -> per-offset [25,8,128] f32; w2[k, ci, co], k = i*5+j.
    w2 = jnp.transpose(p["conv2_w"], (2, 3, 1, 0)).reshape(25, 6, 16)
    w2 = jnp.pad(w2, ((0, 0), (0, 2), (0, 112))).astype(f32)
    b2 = jnp.pad(p["conv2_b"], (0, 112)).reshape(1, 128).astype(f32)
    # fc1: [120,256] -> per-position [16,16,128] f32; wf1[h*4+w, ci, o] = fc1_w[o, ci*16+h*4+w]
    # (absorbs PyTorch's NCHW flatten).
    wf1 = jnp.transpose(p["fc1_w"].reshape(120, 16, 4, 4), (2, 3, 1, 0))   # [4,4,16,120]
    wf1 = jnp.pad(wf1.reshape(16, 16, 120), ((0, 0), (0, 0), (0, 8))).astype(f32)
    bf1 = jnp.pad(p["fc1_b"], (0, 8)).reshape(1, 128).astype(f32)
    # fc2: [84,120] -> [128,128] f32
    wf2 = jnp.pad(p["fc2_w"].T, ((0, 8), (0, 44))).astype(f32)
    bf2 = jnp.pad(p["fc2_b"], (0, 44)).reshape(1, 128).astype(f32)
    # fc3: [10,84] -> [128,128] f32
    wf3 = jnp.pad(p["fc3_w"].T, ((0, 44), (0, 118))).astype(f32)
    bf3 = jnp.pad(p["fc3_b"], (0, 118)).reshape(1, 128).astype(f32)
    return dict(w1=w1, b1=b1, w2=w2, b2=b2, wf1=wf1, bf1=bf1,
                wf2=wf2, bf2=bf2, wf3=wf3, bf3=bf3)


# --------------------------------- forward ------------------------------------- #

def recurrent_model_forward(x, kp):
    """x: [B,1,28,28] NCHW (B<=8). Returns [B,10]."""
    B = x.shape[0]
    assert x.shape[1:] == (1, 28, 28) and B <= 8

    # conv1 patch gather: transpose to (H,W,B) once and cast to bf16 BEFORE slicing so the
    # stacked result is already in (oh, ow, b) order (no post-stack transpose, half bytes).
    xs = jnp.transpose(x[:, 0], (1, 2, 0)).astype(jnp.bfloat16)         # [28,28,B]
    xs = jnp.pad(xs, ((0, 0), (0, 0), (0, 8 - B)))                      # [28,28,8]
    cols = [xs[i:i + 24, j:j + 24, :] for i in range(5) for j in range(5)]
    p1 = jnp.stack(cols, axis=-1)                                       # [24,24,8,25]
    p1 = jnp.pad(p1, ((0, 0), (0, 0), (0, 0), (0, 7)))                  # [24,24,8,32]
    p1 = p1.reshape(12, 384, 32)                                        # blocks of 2 oh-rows

    inputs = [p1, kp["w1"], kp["b1"], kp["w2"], kp["b2"],
              kp["wf1"], kp["bf1"], kp["wf2"], kp["bf2"], kp["wf3"], kp["bf3"]]

    def full_spec(a):
        nd = a.ndim
        return pl.BlockSpec(a.shape, lambda i, _nd=nd: (0,) * _nd)

    out = pl.pallas_call(
        _fused_forward_kernel,
        out_shape=jax.ShapeDtypeStruct((8, 128), jnp.float32),
        grid=(1,),
        in_specs=[full_spec(a) for a in inputs],
        out_specs=pl.BlockSpec((8, 128), lambda i: (0, 0)),
        scratch_shapes=[pltpu.VMEM((12, 12, 8, 128), jnp.float32)],     # pooled conv1 map
        compiler_params=pltpu.CompilerParams(dimension_semantics=("arbitrary",)),
    )(*inputs)
    return out[:B, :10]


# ------------------------------ init & reference ------------------------------- #

def init_params(key):
    """Deterministic PyTorch-style uniform(-1/sqrt(fan_in), 1/sqrt(fan_in))."""
    ks = jax.random.split(key, 10)

    def u(k, shape, fan_in):
        bound = 1.0 / (fan_in ** 0.5)
        return jax.random.uniform(k, shape, jnp.float32, -bound, bound)

    return dict(
        conv1_w=u(ks[0], (6, 1, 5, 5), 1 * 5 * 5),
        conv1_b=u(ks[1], (6,), 1 * 5 * 5),
        conv2_w=u(ks[2], (16, 6, 5, 5), 6 * 5 * 5),
        conv2_b=u(ks[3], (16,), 6 * 5 * 5),
        fc1_w=u(ks[4], (120, 256), 256),
        fc1_b=u(ks[5], (120,), 256),
        fc2_w=u(ks[6], (84, 120), 120),
        fc2_b=u(ks[7], (84,), 120),
        fc3_w=u(ks[8], (10, 84), 84),
        fc3_b=u(ks[9], (10,), 84),
    )


def reference_forward(x, p):
    """Pure-JAX f32 reference of the PyTorch forward (sanity check)."""
    dn = ("NCHW", "OIHW", "NCHW")
    y = jax.lax.conv_general_dilated(x, p["conv1_w"], (1, 1), "VALID",
                                     dimension_numbers=dn)
    y = jnp.maximum(y + p["conv1_b"][None, :, None, None], 0.0)
    y = jax.lax.reduce_window(y, -jnp.inf, jax.lax.max,
                              (1, 1, 2, 2), (1, 1, 2, 2), "VALID")
    y = jax.lax.conv_general_dilated(y, p["conv2_w"], (1, 1), "VALID",
                                     dimension_numbers=dn)
    y = jnp.maximum(y + p["conv2_b"][None, :, None, None], 0.0)
    y = jax.lax.reduce_window(y, -jnp.inf, jax.lax.max,
                              (1, 1, 2, 2), (1, 1, 2, 2), "VALID")
    y = y.reshape(y.shape[0], -1)
    y = jnp.maximum(y @ p["fc1_w"].T + p["fc1_b"], 0.0)
    y = y @ p["fc2_w"].T + p["fc2_b"]
    y = jnp.maximum(y @ p["fc3_w"].T + p["fc3_b"], 0.0)
    return y


if __name__ == "__main__":
    key = jax.random.PRNGKey(0)
    pkey, xkey = jax.random.split(key)
    params = init_params(pkey)
    kparams = jax.tree_util.tree_map(jnp.asarray, prepare_kernel_params(params))

    # Input implied by Linear(256,120) after two (conv5 -> pool2): 1x28x28.
    x = jax.random.normal(xkey, (2, 1, 28, 28), jnp.float32)

    fwd = jax.jit(recurrent_model_forward)
    out = jax.block_until_ready(fwd(x, kparams))
    assert out.shape == (2, 10), out.shape

    ref = reference_forward(x, params)
    if not bool(jnp.allclose(out, ref, atol=2e-2, rtol=2e-2)):
        raise AssertionError("Pallas output does not match JAX reference")

    print("KERNEL_OK")
</pallas_src>

<mosaic_0001>
module attributes {stable_mosaic.version = 11 : i64} {
  func.func @_fused_forward_kernel(%arg0: i32, %arg1: memref<12x384x32xbf16, #tpu.memory_space<vmem>>, %arg2: memref<32x128xbf16, #tpu.memory_space<vmem>>, %arg3: memref<1x128xf32, #tpu.memory_space<vmem>>, %arg4: memref<25x8x128xf32, #tpu.memory_space<vmem>>, %arg5: memref<1x128xf32, #tpu.memory_space<vmem>>, %arg6: memref<16x16x128xf32, #tpu.memory_space<vmem>>, %arg7: memref<1x128xf32, #tpu.memory_space<vmem>>, %arg8: memref<128x128xf32, #tpu.memory_space<vmem>>, %arg9: memref<1x128xf32, #tpu.memory_space<vmem>>, %arg10: memref<128x128xf32, #tpu.memory_space<vmem>>, %arg11: memref<1x128xf32, #tpu.memory_space<vmem>>, %arg12: memref<8x128xf32, #tpu.memory_space<vmem>>, %arg13: memref<12x12x8x128xf32, #tpu.memory_space<vmem>>) attributes {dimension_semantics = [#tpu.dimension_semantics<arbitrary>], iteration_bounds = array<i64: 1>, scalar_prefetch = 0 : i64, scratch_operands = 1 : i64, tpu.core_type = #tpu.core_type<tc>, window_params = [{pipeline_mode = #tpu.pipeline_mode<synchronous>, transform_indices = @transform_0, window_bounds = array<i64: 12, 384, 32>}, {pipeline_mode = #tpu.pipeline_mode<synchronous>, transform_indices = @transform_1, window_bounds = array<i64: 32, 128>}, {pipeline_mode = #tpu.pipeline_mode<synchronous>, transform_indices = @transform_2, window_bounds = array<i64: 1, 128>}, {pipeline_mode = #tpu.pipeline_mode<synchronous>, transform_indices = @transform_3, window_bounds = array<i64: 25, 8, 128>}, {pipeline_mode = #tpu.pipeline_mode<synchronous>, transform_indices = @transform_4, window_bounds = array<i64: 1, 128>}, {pipeline_mode = #tpu.pipeline_mode<synchronous>, transform_indices = @transform_5, window_bounds = array<i64: 16, 16, 128>}, {pipeline_mode = #tpu.pipeline_mode<synchronous>, transform_indices = @transform_6, window_bounds = array<i64: 1, 128>}, {pipeline_mode = #tpu.pipeline_mode<synchronous>, transform_indices = @transform_7, window_bounds = array<i64: 128, 128>}, {pipeline_mode = #tpu.pipeline_mode<synchronous>, transform_indices = @transform_8, window_bounds = array<i64: 1, 128>}, {pipeline_mode = #tpu.pipeline_mode<synchronous>, transform_indices = @transform_9, window_bounds = array<i64: 128, 128>}, {pipeline_mode = #tpu.pipeline_mode<synchronous>, transform_indices = @transform_10, window_bounds = array<i64: 1, 128>}, {pipeline_mode = #tpu.pipeline_mode<synchronous>, transform_indices = @transform_11, window_bounds = array<i64: 8, 128>}]} {
    %c0 = arith.constant 0 : index
    %c0_0 = arith.constant 0 : index
    %0 = vector.load %arg2[%c0, %c0_0] : memref<32x128xbf16, #tpu.memory_space<vmem>>, vector<32x128xbf16>
    %c0_1 = arith.constant 0 : index
    %c0_2 = arith.constant 0 : index
    %1 = vector.load %arg3[%c0_1, %c0_2] : memref<1x128xf32, #tpu.memory_space<vmem>>, vector<1x128xf32>
    %c0_i32 = arith.constant 0 : i32
    %c12_i32 = arith.constant 12 : i32
    %2 = arith.addi %c0_i32, %c12_i32 : i32
    %c1_i32 = arith.constant 1 : i32
    scf.for %arg14 = %c0_i32 to %2 step %c1_i32  : i32 {
      %519 = arith.index_cast %arg14 : i32 to index
      %c0_466 = arith.constant 0 : index
      %c0_467 = arith.constant 0 : index
      %520 = vector.load %arg1[%519, %c0_466, %c0_467] : memref<12x384x32xbf16, #tpu.memory_space<vmem>>, vector<1x384x32xbf16>
      %521 = vector.shape_cast %520 : vector<1x384x32xbf16> to vector<384x32xbf16>
      %cst_468 = arith.constant dense<0.000000e+00> : vector<384x128xf32>
      %522 = tpu.matmul %521, %0, %cst_468 {dimension_numbers = #tpu.dot_dimension_numbers<[1], [0], [0], [1], [0, 0, 1, 1], [], []>} : vector<384x32xbf16>, vector<32x128xbf16>, vector<384x128xf32> -> vector<384x128xf32>
      %523 = vector.broadcast %1 : vector<1x128xf32> to vector<384x128xf32>
      %524 = arith.addf %522, %523 : vector<384x128xf32>
      %cst_469 = arith.constant 0.000000e+00 : f32
      %525 = vector.broadcast %cst_469 : f32 to vector<384x128xf32>
      %526 = arith.maximumf %524, %525 : vector<384x128xf32>
      %527 = vector.shape_cast %526 : vector<384x128xf32> to vector<2x12x2x8x128xf32>
      %528 = vector.extract_strided_slice %527 {offsets = [0, 0, 0, 0, 0], sizes = [1, 12, 1, 8, 128], strides = [1, 1, 1, 1, 1]} : vector<2x12x2x8x128xf32> to vector<1x12x1x8x128xf32>
      %529 = vector.shape_cast %528 : vector<1x12x1x8x128xf32> to vector<12x8x128xf32>
      %530 = vector.extract_strided_slice %527 {offsets = [0, 0, 1, 0, 0], sizes = [1, 12, 1, 8, 128], strides = [1, 1, 1, 1, 1]} : vector<2x12x2x8x128xf32> to vector<1x12x1x8x128xf32>
      %531 = vector.shape_cast %530 : vector<1x12x1x8x128xf32> to vector<12x8x128xf32>
      %532 = arith.maximumf %529, %531 : vector<12x8x128xf32>
      %533 = vector.extract_strided_slice %527 {offsets = [1, 0, 0, 0, 0], sizes = [1, 12, 1, 8, 128], strides = [1, 1, 1, 1, 1]} : vector<2x12x2x8x128xf32> to vector<1x12x1x8x128xf32>
      %534 = vector.shape_cast %533 : vector<1x12x1x8x128xf32> to vector<12x8x128xf32>
      %535 = vector.extract_strided_slice %527 {offsets = [1, 0, 1, 0, 0], sizes = [1, 12, 1, 8, 128], strides = [1, 1, 1, 1, 1]} : vector<2x12x2x8x128xf32> to vector<1x12x1x8x128xf32>
      %536 = vector.shape_cast %535 : vector<1x12x1x8x128xf32> to vector<12x8x128xf32>
      %537 = arith.maximumf %534, %536 : vector<12x8x128xf32>
      %538 = arith.maximumf %532, %537 : vector<12x8x128xf32>
      %539 = arith.index_cast %arg14 : i32 to index
      %c0_470 = arith.constant 0 : index
      %c0_471 = arith.constant 0 : index
      %c0_472 = arith.constant 0 : index
      %540 = vector.load %arg13[%539, %c0_470, %c0_471, %c0_472] : memref<12x12x8x128xf32, #tpu.memory_space<vmem>>, vector<1x12x8x128xf32>
      %541 = vector.shape_cast %540 : vector<1x12x8x128xf32> to vector<12x8x128xf32>
      %542 = vector.shape_cast %538 : vector<12x8x128xf32> to vector<1x12x8x128xf32>
      tpu.vector_store %arg13[%539, %c0_470, %c0_471, %c0_472], %542 {strides = array<i32>} : memref<12x12x8x128xf32, #tpu.memory_space<vmem>>, vector<1x12x8x128xf32>,
    }
    %c12_i32_3 = arith.constant 12 : i32
    %c0_4 = arith.constant 0 : index
    %c0_5 = arith.constant 0 : index
    %3 = vector.load %arg5[%c0_4, %c0_5] : memref<1x128xf32, #tpu.memory_space<vmem>>, vector<1x128xf32>
    %cst = arith.constant 0.000000e+00 : f32
    %4 = vector.broadcast %cst : f32 to vector<8x128xf32>
    %cst_6 = arith.constant 0.000000e+00 : f32
    %5 = vector.broadcast %cst_6 : f32 to vector<256x128xf32>
    %c0_7 = arith.constant 0 : index
    %c0_8 = arith.constant 0 : index
    %c0_9 = arith.constant 0 : index
    %c0_10 = arith.constant 0 : index
    %6 = vector.load %arg13[%c0_7, %c0_8, %c0_9, %c0_10] : memref<12x12x8x128xf32, #tpu.memory_space<vmem>>, vector<4x8x8x128xf32>
    %7 = vector.shape_cast %6 : vector<4x8x8x128xf32> to vector<256x128xf32>
    %8 = vector.extract_strided_slice %7 {offsets = [0, 0], sizes = [256, 8], strides = [1, 1]} : vector<256x128xf32> to vector<256x8xf32>
    %c0_11 = arith.constant 0 : index
    %c0_12 = arith.constant 0 : index
    %c0_13 = arith.constant 0 : index
    %9 = vector.load %arg4[%c0_11, %c0_12, %c0_13] : memref<25x8x128xf32, #tpu.memory_space<vmem>>, vector<1x8x128xf32>
    %10 = vector.shape_cast %9 : vector<1x8x128xf32> to vector<8x128xf32>
    %cst_14 = arith.constant dense<0.000000e+00> : vector<256x128xf32>
    %11 = tpu.matmul %8, %10, %cst_14 {dimension_numbers = #tpu.dot_dimension_numbers<[1], [0], [0], [1], [0, 0, 1, 1], [], []>} : vector<256x8xf32>, vector<8x128xf32>, vector<256x128xf32> -> vector<256x128xf32>
    %12 = arith.addf %5, %11 : vector<256x128xf32>
    %c0_15 = arith.constant 0 : index
    %c1 = arith.constant 1 : index
    %c0_16 = arith.constant 0 : index
    %c0_17 = arith.constant 0 : index
    %13 = vector.load %arg13[%c0_15, %c1, %c0_16, %c0_17] : memref<12x12x8x128xf32, #tpu.memory_space<vmem>>, vector<4x8x8x128xf32>
    %14 = vector.shape_cast %13 : vector<4x8x8x128xf32> to vector<256x128xf32>
    %15 = vector.extract_strided_slice %14 {offsets = [0, 0], sizes = [256, 8], strides = [1, 1]} : vector<256x128xf32> to vector<256x8xf32>
    %c1_18 = arith.constant 1 : index
    %c0_19 = arith.constant 0 : index
    %c0_20 = arith.constant 0 : index
    %16 = vector.load %arg4[%c1_18, %c0_19, %c0_20] : memref<25x8x128xf32, #tpu.memory_space<vmem>>, vector<1x8x128xf32>
    %17 = vector.shape_cast %16 : vector<1x8x128xf32> to vector<8x128xf32>
    %cst_21 = arith.constant dense<0.000000e+00> : vector<256x128xf32>
    %18 = tpu.matmul %15, %17, %cst_21 {dimension_numbers = #tpu.dot_dimension_numbers<[1], [0], [0], [1], [0, 0, 1, 1], [], []>} : vector<256x8xf32>, vector<8x128xf32>, vector<256x128xf32> -> vector<256x128xf32>
    %19 = arith.addf %12, %18 : vector<256x128xf32>
    %c0_22 = arith.constant 0 : index
    %c2 = arith.constant 2 : index
    %c0_23 = arith.constant 0 : index
    %c0_24 = arith.constant 0 : index
    %20 = vector.load %arg13[%c0_22, %c2, %c0_23, %c0_24] : memref<12x12x8x128xf32, #tpu.memory_space<vmem>>, vector<4x8x8x128xf32>
    %21 = vector.shape_cast %20 : vector<4x8x8x128xf32> to vector<256x128xf32>
    %22 = vector.extract_strided_slice %21 {offsets = [0, 0], sizes = [256, 8], strides = [1, 1]} : vector<256x128xf32> to vector<256x8xf32>
    %c2_25 = arith.constant 2 : index
    %c0_26 = arith.constant 0 : index
    %c0_27 = arith.constant 0 : index
    %23 = vector.load %arg4[%c2_25, %c0_26, %c0_27] : memref<25x8x128xf32, #tpu.memory_space<vmem>>, vector<1x8x128xf32>
    %24 = vector.shape_cast %23 : vector<1x8x128xf32> to vector<8x128xf32>
    %cst_28 = arith.constant dense<0.000000e+00> : vector<256x128xf32>
    %25 = tpu.matmul %22, %24, %cst_28 {dimension_numbers = #tpu.dot_dimension_numbers<[1], [0], [0], [1], [0, 0, 1, 1], [], []>} : vector<256x8xf32>, vector<8x128xf32>, vector<256x128xf32> -> vector<256x128xf32>
    %26 = arith.addf %19, %25 : vector<256x128xf32>
    %c0_29 = arith.constant 0 : index
    %c3 = arith.constant 3 : index
    %c0_30 = arith.constant 0 : index
    %c0_31 = arith.constant 0 : index
    %27 = vector.load %arg13[%c0_29, %c3, %c0_30, %c0_31] : memref<12x12x8x128xf32, #tpu.memory_space<vmem>>, vector<4x8x8x128xf32>
    %28 = vector.shape_cast %27 : vector<4x8x8x128xf32> to vector<256x128xf32>
    %29 = vector.extract_strided_slice %28 {offsets = [0, 0], sizes = [256, 8], strides = [1, 1]} : vector<256x128xf32> to vector<256x8xf32>
    %c3_32 = arith.constant 3 : index
    %c0_33 = arith.constant 0 : index
    %c0_34 = arith.constant 0 : index
    %30 = vector.load %arg4[%c3_32, %c0_33, %c0_34] : memref<25x8x128xf32, #tpu.memory_space<vmem>>, vector<1x8x128xf32>
    %31 = vector.shape_cast %30 : vector<1x8x128xf32> to vector<8x128xf32>
    %cst_35 = arith.constant dense<0.000000e+00> : vector<256x128xf32>
    %32 = tpu.matmul %29, %31, %cst_35 {dimension_numbers = #tpu.dot_dimension_numbers<[1], [0], [0], [1], [0, 0, 1, 1], [], []>} : vector<256x8xf32>, vector<8x128xf32>, vector<256x128xf32> -> vector<256x128xf32>
    %33 = arith.addf %26, %32 : vector<256x128xf32>
    %c0_36 = arith.constant 0 : index
    %c4 = arith.constant 4 : index
    %c0_37 = arith.constant 0 : index
    %c0_38 = arith.constant 0 : index
    %34 = vector.load %arg13[%c0_36, %c4, %c0_37, %c0_38] : memref<12x12x8x128xf32, #tpu.memory_space<vmem>>, vector<4x8x8x128xf32>
    %35 = vector.shape_cast %34 : vector<4x8x8x128xf32> to vector<256x128xf32>
    %36 = vector.extract_strided_slice %35 {offsets = [0, 0], sizes = [256, 8], strides = [1, 1]} : vector<256x128xf32> to vector<256x8xf32>
    %c4_39 = arith.constant 4 : index
    %c0_40 = arith.constant 0 : index
    %c0_41 = arith.constant 0 : index
    %37 = vector.load %arg4[%c4_39, %c0_40, %c0_41] : memref<25x8x128xf32, #tpu.memory_space<vmem>>, vector<1x8x128xf32>
    %38 = vector.shape_cast %37 : vector<1x8x128xf32> to vector<8x128xf32>
    %cst_42 = arith.constant dense<0.000000e+00> : vector<256x128xf32>
    %39 = tpu.matmul %36, %38, %cst_42 {dimension_numbers = #tpu.dot_dimension_numbers<[1], [0], [0], [1], [0, 0, 1, 1], [], []>} : vector<256x8xf32>, vector<8x128xf32>, vector<256x128xf32> -> vector<256x128xf32>
    %40 = arith.addf %33, %39 : vector<256x128xf32>
    %c1_43 = arith.constant 1 : index
    %c0_44 = arith.constant 0 : index
    %c0_45 = arith.constant 0 : index
    %c0_46 = arith.constant 0 : index
    %41 = vector.load %arg13[%c1_43, %c0_44, %c0_45, %c0_46] : memref<12x12x8x128xf32, #tpu.memory_space<vmem>>, vector<4x8x8x128xf32>
    %42 = vector.shape_cast %41 : vector<4x8x8x128xf32> to vector<256x128xf32>
    %43 = vector.extract_strided_slice %42 {offsets = [0, 0], sizes = [256, 8], strides = [1, 1]} : vector<256x128xf32> to vector<256x8xf32>
    %c5 = arith.constant 5 : index
    %c0_47 = arith.constant 0 : index
    %c0_48 = arith.constant 0 : index
    %44 = vector.load %arg4[%c5, %c0_47, %c0_48] : memref<25x8x128xf32, #tpu.memory_space<vmem>>, vector<1x8x128xf32>
    %45 = vector.shape_cast %44 : vector<1x8x128xf32> to vector<8x128xf32>
    %cst_49 = arith.constant dense<0.000000e+00> : vector<256x128xf32>
    %46 = tpu.matmul %43, %45, %cst_49 {dimension_numbers = #tpu.dot_dimension_numbers<[1], [0], [0], [1], [0, 0, 1, 1], [], []>} : vector<256x8xf32>, vector<8x128xf32>, vector<256x128xf32> -> vector<256x128xf32>
    %47 = arith.addf %40, %46 : vector<256x128xf32>
    %c1_50 = arith.constant 1 : index
    %c1_51 = arith.constant 1 : index
    %c0_52 = arith.constant 0 : index
    %c0_53 = arith.constant 0 : index
    %48 = vector.load %arg13[%c1_50, %c1_51, %c0_52, %c0_53] : memref<12x12x8x128xf32, #tpu.memory_space<vmem>>, vector<4x8x8x128xf32>
    %49 = vector.shape_cast %48 : vector<4x8x8x128xf32> to vector<256x128xf32>
    %50 = vector.extract_strided_slice %49 {offsets = [0, 0], sizes = [256, 8], strides = [1, 1]} : vector<256x128xf32> to vector<256x8xf32>
    %c6 = arith.constant 6 : index
    %c0_54 = arith.constant 0 : index
    %c0_55 = arith.constant 0 : index
    %51 = vector.load %arg4[%c6, %c0_54, %c0_55] : memref<25x8x128xf32, #tpu.memory_space<vmem>>, vector<1x8x128xf32>
    %52 = vector.shape_cast %51 : vector<1x8x128xf32> to vector<8x128xf32>
    %cst_56 = arith.constant dense<0.000000e+00> : vector<256x128xf32>
    %53 = tpu.matmul %50, %52, %cst_56 {dimension_numbers = #tpu.dot_dimension_numbers<[1], [0], [0], [1], [0, 0, 1, 1], [], []>} : vector<256x8xf32>, vector<8x128xf32>, vector<256x128xf32> -> vector<256x128xf32>
    %54 = arith.addf %47, %53 : vector<256x128xf32>
    %c1_57 = arith.constant 1 : index
    %c2_58 = arith.constant 2 : index
    %c0_59 = arith.constant 0 : index
    %c0_60 = arith.constant 0 : index
    %55 = vector.load %arg13[%c1_57, %c2_58, %c0_59, %c0_60] : memref<12x12x8x128xf32, #tpu.memory_space<vmem>>, vector<4x8x8x128xf32>
    %56 = vector.shape_cast %55 : vector<4x8x8x128xf32> to vector<256x128xf32>
    %57 = vector.extract_strided_slice %56 {offsets = [0, 0], sizes = [256, 8], strides = [1, 1]} : vector<256x128xf32> to vector<256x8xf32>
    %c7 = arith.constant 7 : index
    %c0_61 = arith.constant 0 : index
    %c0_62 = arith.constant 0 : index
    %58 = vector.load %arg4[%c7, %c0_61, %c0_62] : memref<25x8x128xf32, #tpu.memory_space<vmem>>, vector<1x8x128xf32>
    %59 = vector.shape_cast %58 : vector<1x8x128xf32> to vector<8x128xf32>
    %cst_63 = arith.constant dense<0.000000e+00> : vector<256x128xf32>
    %60 = tpu.matmul %57, %59, %cst_63 {dimension_numbers = #tpu.dot_dimension_numbers<[1], [0], [0], [1], [0, 0, 1, 1], [], []>} : vector<256x8xf32>, vector<8x128xf32>, vector<256x128xf32> -> vector<256x128xf32>
    %61 = arith.addf %54, %60 : vector<256x128xf32>
    %c1_64 = arith.constant 1 : index
    %c3_65 = arith.constant 3 : index
    %c0_66 = arith.constant 0 : index
    %c0_67 = arith.constant 0 : index
    %62 = vector.load %arg13[%c1_64, %c3_65, %c0_66, %c0_67] : memref<12x12x8x128xf32, #tpu.memory_space<vmem>>, vector<4x8x8x128xf32>
    %63 = vector.shape_cast %62 : vector<4x8x8x128xf32> to vector<256x128xf32>
    %64 = vector.extract_strided_slice %63 {offsets = [0, 0], sizes = [256, 8], strides = [1, 1]} : vector<256x128xf32> to vector<256x8xf32>
    %c8 = arith.constant 8 : index
    %c0_68 = arith.constant 0 : index
    %c0_69 = arith.constant 0 : index
    %65 = vector.load %arg4[%c8, %c0_68, %c0_69] : memref<25x8x128xf32, #tpu.memory_space<vmem>>, vector<1x8x128xf32>
    %66 = vector.shape_cast %65 : vector<1x8x128xf32> to vector<8x128xf32>
    %cst_70 = arith.constant dense<0.000000e+00> : vector<256x128xf32>
    %67 = tpu.matmul %64, %66, %cst_70 {dimension_numbers = #tpu.dot_dimension_numbers<[1], [0], [0], [1], [0, 0, 1, 1], [], []>} : vector<256x8xf32>, vector<8x128xf32>, vector<256x128xf32> -> vector<256x128xf32>
    %68 = arith.addf %61, %67 : vector<256x128xf32>
    %c1_71 = arith.constant 1 : index
    %c4_72 = arith.constant 4 : index
    %c0_73 = arith.constant 0 : index
    %c0_74 = arith.constant 0 : index
    %69 = vector.load %arg13[%c1_71, %c4_72, %c0_73, %c0_74] : memref<12x12x8x128xf32, #tpu.memory_space<vmem>>, vector<4x8x8x128xf32>
    %70 = vector.shape_cast %69 : vector<4x8x8x128xf32> to vector<256x128xf32>
    %71 = vector.extract_strided_slice %70 {offsets = [0, 0], sizes = [256, 8], strides = [1, 1]} : vector<256x128xf32> to vector<256x8xf32>
    %c9 = arith.constant 9 : index
    %c0_75 = arith.constant 0 : index
    %c0_76 = arith.constant 0 : index
    %72 = vector.load %arg4[%c9, %c0_75, %c0_76] : memref<25x8x128xf32, #tpu.memory_space<vmem>>, vector<1x8x128xf32>
    %73 = vector.shape_cast %72 : vector<1x8x128xf32> to vector<8x128xf32>
    %cst_77 = arith.constant dense<0.000000e+00> : vector<256x128xf32>
    %74 = tpu.matmul %71, %73, %cst_77 {dimension_numbers = #tpu.dot_dimension_numbers<[1], [0], [0], [1], [0, 0, 1, 1], [], []>} : vector<256x8xf32>, vector<8x128xf32>, vector<256x128xf32> -> vector<256x128xf32>
    %75 = arith.addf %68, %74 : vector<256x128xf32>
    %c2_78 = arith.constant 2 : index
    %c0_79 = arith.constant 0 : index
    %c0_80 = arith.constant 0 : index
    %c0_81 = arith.constant 0 : index
    %76 = vector.load %arg13[%c2_78, %c0_79, %c0_80, %c0_81] : memref<12x12x8x128xf32, #tpu.memory_space<vmem>>, vector<4x8x8x128xf32>
    %77 = vector.shape_cast %76 : vector<4x8x8x128xf32> to vector<256x128xf32>
    %78 = vector.extract_strided_slice %77 {offsets = [0, 0], sizes = [256, 8], strides = [1, 1]} : vector<256x128xf32> to vector<256x8xf32>
    %c10 = arith.constant 10 : index
    %c0_82 = arith.constant 0 : index
    %c0_83 = arith.constant 0 : index
    %79 = vector.load %arg4[%c10, %c0_82, %c0_83] : memref<25x8x128xf32, #tpu.memory_space<vmem>>, vector<1x8x128xf32>
    %80 = vector.shape_cast %79 : vector<1x8x128xf32> to vector<8x128xf32>
    %cst_84 = arith.constant dense<0.000000e+00> : vector<256x128xf32>
    %81 = tpu.matmul %78, %80, %cst_84 {dimension_numbers = #tpu.dot_dimension_numbers<[1], [0], [0], [1], [0, 0, 1, 1], [], []>} : vector<256x8xf32>, vector<8x128xf32>, vector<256x128xf32> -> vector<256x128xf32>
    %82 = arith.addf %75, %81 : vector<256x128xf32>
    %c2_85 = arith.constant 2 : index
    %c1_86 = arith.constant 1 : index
    %c0_87 = arith.constant 0 : index
    %c0_88 = arith.constant 0 : index
    %83 = vector.load %arg13[%c2_85, %c1_86, %c0_87, %c0_88] : memref<12x12x8x128xf32, #tpu.memory_space<vmem>>, vector<4x8x8x128xf32>
    %84 = vector.shape_cast %83 : vector<4x8x8x128xf32> to vector<256x128xf32>
    %85 = vector.extract_strided_slice %84 {offsets = [0, 0], sizes = [256, 8], strides = [1, 1]} : vector<256x128xf32> to vector<256x8xf32>
    %c11 = arith.constant 11 : index
    %c0_89 = arith.constant 0 : index
    %c0_90 = arith.constant 0 : index
    %86 = vector.load %arg4[%c11, %c0_89, %c0_90] : memref<25x8x128xf32, #tpu.memory_space<vmem>>, vector<1x8x128xf32>
    %87 = vector.shape_cast %86 : vector<1x8x128xf32> to vector<8x128xf32>
    %cst_91 = arith.constant dense<0.000000e+00> : vector<256x128xf32>
    %88 = tpu.matmul %85, %87, %cst_91 {dimension_numbers = #tpu.dot_dimension_numbers<[1], [0], [0], [1], [0, 0, 1, 1], [], []>} : vector<256x8xf32>, vector<8x128xf32>, vector<256x128xf32> -> vector<256x128xf32>
    %89 = arith.addf %82, %88 : vector<256x128xf32>
    %c2_92 = arith.constant 2 : index
    %c2_93 = arith.constant 2 : index
    %c0_94 = arith.constant 0 : index
    %c0_95 = arith.constant 0 : index
    %90 = vector.load %arg13[%c2_92, %c2_93, %c0_94, %c0_95] : memref<12x12x8x128xf32, #tpu.memory_space<vmem>>, vector<4x8x8x128xf32>
    %91 = vector.shape_cast %90 : vector<4x8x8x128xf32> to vector<256x128xf32>
    %92 = vector.extract_strided_slice %91 {offsets = [0, 0], sizes = [256, 8], strides = [1, 1]} : vector<256x128xf32> to vector<256x8xf32>
    %c12 = arith.constant 12 : index
    %c0_96 = arith.constant 0 : index
    %c0_97 = arith.constant 0 : index
    %93 = vector.load %arg4[%c12, %c0_96, %c0_97] : memref<25x8x128xf32, #tpu.memory_space<vmem>>, vector<1x8x128xf32>
    %94 = vector.shape_cast %93 : vector<1x8x128xf32> to vector<8x128xf32>
    %cst_98 = arith.constant dense<0.000000e+00> : vector<256x128xf32>
    %95 = tpu.matmul %92, %94, %cst_98 {dimension_numbers = #tpu.dot_dimension_numbers<[1], [0], [0], [1], [0, 0, 1, 1], [], []>} : vector<256x8xf32>, vector<8x128xf32>, vector<256x128xf32> -> vector<256x128xf32>
    %96 = arith.addf %89, %95 : vector<256x128xf32>
    %c2_99 = arith.constant 2 : index
    %c3_100 = arith.constant 3 : index
    %c0_101 = arith.constant 0 : index
    %c0_102 = arith.constant 0 : index
    %97 = vector.load %arg13[%c2_99, %c3_100, %c0_101, %c0_102] : memref<12x12x8x128xf32, #tpu.memory_space<vmem>>, vector<4x8x8x128xf32>
    %98 = vector.shape_cast %97 : vector<4x8x8x128xf32> to vector<256x128xf32>
    %99 = vector.extract_strided_slice %98 {offsets = [0, 0], sizes = [256, 8], strides = [1, 1]} : vector<256x128xf32> to vector<256x8xf32>
    %c13 = arith.constant 13 : index
    %c0_103 = arith.constant 0 : index
    %c0_104 = arith.constant 0 : index
    %100 = vector.load %arg4[%c13, %c0_103, %c0_104] : memref<25x8x128xf32, #tpu.memory_space<vmem>>, vector<1x8x128xf32>
    %101 = vector.shape_cast %100 : vector<1x8x128xf32> to vector<8x128xf32>
    %cst_105 = arith.constant dense<0.000000e+00> : vector<256x128xf32>
    %102 = tpu.matmul %99, %101, %cst_105 {dimension_numbers = #tpu.dot_dimension_numbers<[1], [0], [0], [1], [0, 0, 1, 1], [], []>} : vector<256x8xf32>, vector<8x128xf32>, vector<256x128xf32> -> vector<256x128xf32>
    %103 = arith.addf %96, %102 : vector<256x128xf32>
    %c2_106 = arith.constant 2 : index
    %c4_107 = arith.constant 4 : index
    %c0_108 = arith.constant 0 : index
    %c0_109 = arith.constant 0 : index
    %104 = vector.load %arg13[%c2_106, %c4_107, %c0_108, %c0_109] : memref<12x12x8x128xf32, #tpu.memory_space<vmem>>, vector<4x8x8x128xf32>
    %105 = vector.shape_cast %104 : vector<4x8x8x128xf32> to vector<256x128xf32>
    %106 = vector.extract_strided_slice %105 {offsets = [0, 0], sizes = [256, 8], strides = [1, 1]} : vector<256x128xf32> to vector<256x8xf32>
    %c14 = arith.constant 14 : index
    %c0_110 = arith.constant 0 : index
    %c0_111 = arith.constant 0 : index
    %107 = vector.load %arg4[%c14, %c0_110, %c0_111] : memref<25x8x128xf32, #tpu.memory_space<vmem>>, vector<1x8x128xf32>
    %108 = vector.shape_cast %107 : vector<1x8x128xf32> to vector<8x128xf32>
    %cst_112 = arith.constant dense<0.000000e+00> : vector<256x128xf32>
    %109 = tpu.matmul %106, %108, %cst_112 {dimension_numbers = #tpu.dot_dimension_numbers<[1], [0], [0], [1], [0, 0, 1, 1], [], []>} : vector<256x8xf32>, vector<8x128xf32>, vector<256x128xf32> -> vector<256x128xf32>
    %110 = arith.addf %103, %109 : vector<256x128xf32>
    %c3_113 = arith.constant 3 : index
    %c0_114 = arith.constant 0 : index
    %c0_115 = arith.constant 0 : index
    %c0_116 = arith.constant 0 : index
    %111 = vector.load %arg13[%c3_113, %c0_114, %c0_115, %c0_116] : memref<12x12x8x128xf32, #tpu.memory_space<vmem>>, vector<4x8x8x128xf32>
    %112 = vector.shape_cast %111 : vector<4x8x8x128xf32> to vector<256x128xf32>
    %113 = vector.extract_strided_slice %112 {offsets = [0, 0], sizes = [256, 8], strides = [1, 1]} : vector<256x128xf32> to vector<256x8xf32>
    %c15 = arith.constant 15 : index
    %c0_117 = arith.constant 0 : index
    %c0_118 = arith.constant 0 : index
    %114 = vector.load %arg4[%c15, %c0_117, %c0_118] : memref<25x8x128xf32, #tpu.memory_space<vmem>>, vector<1x8x128xf32>
    %115 = vector.shape_cast %114 : vector<1x8x128xf32> to vector<8x128xf32>
    %cst_119 = arith.constant dense<0.000000e+00> : vector<256x128xf32>
    %116 = tpu.matmul %113, %115, %cst_119 {dimension_numbers = #tpu.dot_dimension_numbers<[1], [0], [0], [1], [0, 0, 1, 1], [], []>} : vector<256x8xf32>, vector<8x128xf32>, vector<256x128xf32> -> vector<256x128xf32>
    %117 = arith.addf %110, %116 : vector<256x128xf32>
    %c3_120 = arith.constant 3 : index
    %c1_121 = arith.constant 1 : index
    %c0_122 = arith.constant 0 : index
    %c0_123 = arith.constant 0 : index
    %118 = vector.load %arg13[%c3_120, %c1_121, %c0_122, %c0_123] : memref<12x12x8x128xf32, #tpu.memory_space<vmem>>, vector<4x8x8x128xf32>
    %119 = vector.shape_cast %118 : vector<4x8x8x128xf32> to vector<256x128xf32>
    %120 = vector.extract_strided_slice %119 {offsets = [0, 0], sizes = [256, 8], strides = [1, 1]} : vector<256x128xf32> to vector<256x8xf32>
    %c16 = arith.constant 16 : index
    %c0_124 = arith.constant 0 : index
    %c0_125 = arith.constant 0 : index
    %121 = vector.load %arg4[%c16, %c0_124, %c0_125] : memref<25x8x128xf32, #tpu.memory_space<vmem>>, vector<1x8x128xf32>
    %122 = vector.shape_cast %121 : vector<1x8x128xf32> to vector<8x128xf32>
    %cst_126 = arith.constant dense<0.000000e+00> : vector<256x128xf32>
    %123 = tpu.matmul %120, %122, %cst_126 {dimension_numbers = #tpu.dot_dimension_numbers<[1], [0], [0], [1], [0, 0, 1, 1], [], []>} : vector<256x8xf32>, vector<8x128xf32>, vector<256x128xf32> -> vector<256x128xf32>
    %124 = arith.addf %117, %123 : vector<256x128xf32>
    %c3_127 = arith.constant 3 : index
    %c2_128 = arith.constant 2 : index
    %c0_129 = arith.constant 0 : index
    %c0_130 = arith.constant 0 : index
    %125 = vector.load %arg13[%c3_127, %c2_128, %c0_129, %c0_130] : memref<12x12x8x128xf32, #tpu.memory_space<vmem>>, vector<4x8x8x128xf32>
    %126 = vector.shape_cast %125 : vector<4x8x8x128xf32> to vector<256x128xf32>
    %127 = vector.extract_strided_slice %126 {offsets = [0, 0], sizes = [256, 8], strides = [1, 1]} : vector<256x128xf32> to vector<256x8xf32>
    %c17 = arith.constant 17 : index
    %c0_131 = arith.constant 0 : index
    %c0_132 = arith.constant 0 : index
    %128 = vector.load %arg4[%c17, %c0_131, %c0_132] : memref<25x8x128xf32, #tpu.memory_space<vmem>>, vector<1x8x128xf32>
    %129 = vector.shape_cast %128 : vector<1x8x128xf32> to vector<8x128xf32>
    %cst_133 = arith.constant dense<0.000000e+00> : vector<256x128xf32>
    %130 = tpu.matmul %127, %129, %cst_133 {dimension_numbers = #tpu.dot_dimension_numbers<[1], [0], [0], [1], [0, 0, 1, 1], [], []>} : vector<256x8xf32>, vector<8x128xf32>, vector<256x128xf32> -> vector<256x128xf32>
    %131 = arith.addf %124, %130 : vector<256x128xf32>
    %c3_134 = arith.constant 3 : index
    %c3_135 = arith.constant 3 : index
    %c0_136 = arith.constant 0 : index
    %c0_137 = arith.constant 0 : index
    %132 = vector.load %arg13[%c3_134, %c3_135, %c0_136, %c0_137] : memref<12x12x8x128xf32, #tpu.memory_space<vmem>>, vector<4x8x8x128xf32>
    %133 = vector.shape_cast %132 : vector<4x8x8x128xf32> to vector<256x128xf32>
    %134 = vector.extract_strided_slice %133 {offsets = [0, 0], sizes = [256, 8], strides = [1, 1]} : vector<256x128xf32> to vector<256x8xf32>
    %c18 = arith.constant 18 : index
    %c0_138 = arith.constant 0 : index
    %c0_139 = arith.constant 0 : index
    %135 = vector.load %arg4[%c18, %c0_138, %c0_139] : memref<25x8x128xf32, #tpu.memory_space<vmem>>, vector<1x8x128xf32>
    %136 = vector.shape_cast %135 : vector<1x8x128xf32> to vector<8x128xf32>
    %cst_140 = arith.constant dense<0.000000e+00> : vector<256x128xf32>
    %137 = tpu.matmul %134, %136, %cst_140 {dimension_numbers = #tpu.dot_dimension_numbers<[1], [0], [0], [1], [0, 0, 1, 1], [], []>} : vector<256x8xf32>, vector<8x128xf32>, vector<256x128xf32> -> vector<256x128xf32>
    %138 = arith.addf %131, %137 : vector<256x128xf32>
    %c3_141 = arith.constant 3 : index
    %c4_142 = arith.constant 4 : index
    %c0_143 = arith.constant 0 : index
    %c0_144 = arith.constant 0 : index
    %139 = vector.load %arg13[%c3_141, %c4_142, %c0_143, %c0_144] : memref<12x12x8x128xf32, #tpu.memory_space<vmem>>, vector<4x8x8x128xf32>
    %140 = vector.shape_cast %139 : vector<4x8x8x128xf32> to vector<256x128xf32>
    %141 = vector.extract_strided_slice %140 {offsets = [0, 0], sizes = [256, 8], strides = [1, 1]} : vector<256x128xf32> to vector<256x8xf32>
    %c19 = arith.constant 19 : index
    %c0_145 = arith.constant 0 : index
    %c0_146 = arith.constant 0 : index
    %142 = vector.load %arg4[%c19, %c0_145, %c0_146] : memref<25x8x128xf32, #tpu.memory_space<vmem>>, vector<1x8x128xf32>
    %143 = vector.shape_cast %142 : vector<1x8x128xf32> to vector<8x128xf32>
    %cst_147 = arith.constant dense<0.000000e+00> : vector<256x128xf32>
    %144 = tpu.matmul %141, %143, %cst_147 {dimension_numbers = #tpu.dot_dimension_numbers<[1], [0], [0], [1], [0, 0, 1, 1], [], []>} : vector<256x8xf32>, vector<8x128xf32>, vector<256x128xf32> -> vector<256x128xf32>
    %145 = arith.addf %138, %144 : vector<256x128xf32>
    %c4_148 = arith.constant 4 : index
    %c0_149 = arith.constant 0 : index
    %c0_150 = arith.constant 0 : index
    %c0_151 = arith.constant 0 : index
    %146 = vector.load %arg13[%c4_148, %c0_149, %c0_150, %c0_151] : memref<12x12x8x128xf32, #tpu.memory_space<vmem>>, vector<4x8x8x128xf32>
    %147 = vector.shape_cast %146 : vector<4x8x8x128xf32> to vector<256x128xf32>
    %148 = vector.extract_strided_slice %147 {offsets = [0, 0], sizes = [256, 8], strides = [1, 1]} : vector<256x128xf32> to vector<256x8xf32>
    %c20 = arith.constant 20 : index
    %c0_152 = arith.constant 0 : index
    %c0_153 = arith.constant 0 : index
    %149 = vector.load %arg4[%c20, %c0_152, %c0_153] : memref<25x8x128xf32, #tpu.memory_space<vmem>>, vector<1x8x128xf32>
    %150 = vector.shape_cast %149 : vector<1x8x128xf32> to vector<8x128xf32>
    %cst_154 = arith.constant dense<0.000000e+00> : vector<256x128xf32>
    %151 = tpu.matmul %148, %150, %cst_154 {dimension_numbers = #tpu.dot_dimension_numbers<[1], [0], [0], [1], [0, 0, 1, 1], [], []>} : vector<256x8xf32>, vector<8x128xf32>, vector<256x128xf32> -> vector<256x128xf32>
    %152 = arith.addf %145, %151 : vector<256x128xf32>
    %c4_155 = arith.constant 4 : index
    %c1_156 = arith.constant 1 : index
    %c0_157 = arith.constant 0 : index
    %c0_158 = arith.constant 0 : index
    %153 = vector.load %arg13[%c4_155, %c1_156, %c0_157, %c0_158] : memref<12x12x8x128xf32, #tpu.memory_space<vmem>>, vector<4x8x8x128xf32>
    %154 = vector.shape_cast %153 : vector<4x8x8x128xf32> to vector<256x128xf32>
    %155 = vector.extract_strided_slice %154 {offsets = [0, 0], sizes = [256, 8], strides = [1, 1]} : vector<256x128xf32> to vector<256x8xf32>
    %c21 = arith.constant 21 : index
    %c0_159 = arith.constant 0 : index
    %c0_160 = arith.constant 0 : index
    %156 = vector.load %arg4[%c21, %c0_159, %c0_160] : memref<25x8x128xf32, #tpu.memory_space<vmem>>, vector<1x8x128xf32>
    %157 = vector.shape_cast %156 : vector<1x8x128xf32> to vector<8x128xf32>
    %cst_161 = arith.constant dense<0.000000e+00> : vector<256x128xf32>
    %158 = tpu.matmul %155, %157, %cst_161 {dimension_numbers = #tpu.dot_dimension_numbers<[1], [0], [0], [1], [0, 0, 1, 1], [], []>} : vector<256x8xf32>, vector<8x128xf32>, vector<256x128xf32> -> vector<256x128xf32>
    %159 = arith.addf %152, %158 : vector<256x128xf32>
    %c4_162 = arith.constant 4 : index
    %c2_163 = arith.constant 2 : index
    %c0_164 = arith.constant 0 : index
    %c0_165 = arith.constant 0 : index
    %160 = vector.load %arg13[%c4_162, %c2_163, %c0_164, %c0_165] : memref<12x12x8x128xf32, #tpu.memory_space<vmem>>, vector<4x8x8x128xf32>
    %161 = vector.shape_cast %160 : vector<4x8x8x128xf32> to vector<256x128xf32>
    %162 = vector.extract_strided_slice %161 {offsets = [0, 0], sizes = [256, 8], strides = [1, 1]} : vector<256x128xf32> to vector<256x8xf32>
    %c22 = arith.constant 22 : index
    %c0_166 = arith.constant 0 : index
    %c0_167 = arith.constant 0 : index
    %163 = vector.load %arg4[%c22, %c0_166, %c0_167] : memref<25x8x128xf32, #tpu.memory_space<vmem>>, vector<1x8x128xf32>
    %164 = vector.shape_cast %163 : vector<1x8x128xf32> to vector<8x128xf32>
    %cst_168 = arith.constant dense<0.000000e+00> : vector<256x128xf32>
    %165 = tpu.matmul %162, %164, %cst_168 {dimension_numbers = #tpu.dot_dimension_numbers<[1], [0], [0], [1], [0, 0, 1, 1], [], []>} : vector<256x8xf32>, vector<8x128xf32>, vector<256x128xf32> -> vector<256x128xf32>
    %166 = arith.addf %159, %165 : vector<256x128xf32>
    %c4_169 = arith.constant 4 : index
    %c3_170 = arith.constant 3 : index
    %c0_171 = arith.constant 0 : index
    %c0_172 = arith.constant 0 : index
    %167 = vector.load %arg13[%c4_169, %c3_170, %c0_171, %c0_172] : memref<12x12x8x128xf32, #tpu.memory_space<vmem>>, vector<4x8x8x128xf32>
    %168 = vector.shape_cast %167 : vector<4x8x8x128xf32> to vector<256x128xf32>
    %169 = vector.extract_strided_slice %168 {offsets = [0, 0], sizes = [256, 8], strides = [1, 1]} : vector<256x128xf32> to vector<256x8xf32>
    %c23 = arith.constant 23 : index
    %c0_173 = arith.constant 0 : index
    %c0_174 = arith.constant 0 : index
    %170 = vector.load %arg4[%c23, %c0_173, %c0_174] : memref<25x8x128xf32, #tpu.memory_space<vmem>>, vector<1x8x128xf32>
    %171 = vector.shape_cast %170 : vector<1x8x128xf32> to vector<8x128xf32>
    %cst_175 = arith.constant dense<0.000000e+00> : vector<256x128xf32>
    %172 = tpu.matmul %169, %171, %cst_175 {dimension_numbers = #tpu.dot_dimension_numbers<[1], [0], [0], [1], [0, 0, 1, 1], [], []>} : vector<256x8xf32>, vector<8x128xf32>, vector<256x128xf32> -> vector<256x128xf32>
    %173 = arith.addf %166, %172 : vector<256x128xf32>
    %c4_176 = arith.constant 4 : index
    %c4_177 = arith.constant 4 : index
    %c0_178 = arith.constant 0 : index
    %c0_179 = arith.constant 0 : index
    %174 = vector.load %arg13[%c4_176, %c4_177, %c0_178, %c0_179] : memref<12x12x8x128xf32, #tpu.memory_space<vmem>>, vector<4x8x8x128xf32>
    %175 = vector.shape_cast %174 : vector<4x8x8x128xf32> to vector<256x128xf32>
    %176 = vector.extract_strided_slice %175 {offsets = [0, 0], sizes = [256, 8], strides = [1, 1]} : vector<256x128xf32> to vector<256x8xf32>
    %c24 = arith.constant 24 : index
    %c0_180 = arith.constant 0 : index
    %c0_181 = arith.constant 0 : index
    %177 = vector.load %arg4[%c24, %c0_180, %c0_181] : memref<25x8x128xf32, #tpu.memory_space<vmem>>, vector<1x8x128xf32>
    %178 = vector.shape_cast %177 : vector<1x8x128xf32> to vector<8x128xf32>
    %cst_182 = arith.constant dense<0.000000e+00> : vector<256x128xf32>
    %179 = tpu.matmul %176, %178, %cst_182 {dimension_numbers = #tpu.dot_dimension_numbers<[1], [0], [0], [1], [0, 0, 1, 1], [], []>} : vector<256x8xf32>, vector<8x128xf32>, vector<256x128xf32> -> vector<256x128xf32>
    %180 = arith.addf %173, %179 : vector<256x128xf32>
    %181 = vector.broadcast %3 : vector<1x128xf32> to vector<256x128xf32>
    %182 = arith.addf %180, %181 : vector<256x128xf32>
    %cst_183 = arith.constant 0.000000e+00 : f32
    %183 = vector.broadcast %cst_183 : f32 to vector<256x128xf32>
    %184 = arith.maximumf %182, %183 : vector<256x128xf32>
    %185 = vector.shape_cast %184 : vector<256x128xf32> to vector<2x2x4x2x8x128xf32>
    %186 = vector.extract_strided_slice %185 {offsets = [0, 0, 0, 0, 0, 0], sizes = [2, 1, 4, 1, 8, 128], strides = [1, 1, 1, 1, 1, 1]} : vector<2x2x4x2x8x128xf32> to vector<2x1x4x1x8x128xf32>
    %187 = vector.shape_cast %186 : vector<2x1x4x1x8x128xf32> to vector<2x4x8x128xf32>
    %188 = vector.extract_strided_slice %185 {offsets = [0, 0, 0, 1, 0, 0], sizes = [2, 1, 4, 1, 8, 128], strides = [1, 1, 1, 1, 1, 1]} : vector<2x2x4x2x8x128xf32> to vector<2x1x4x1x8x128xf32>
    %189 = vector.shape_cast %188 : vector<2x1x4x1x8x128xf32> to vector<2x4x8x128xf32>
    %190 = arith.maximumf %187, %189 : vector<2x4x8x128xf32>
    %191 = vector.extract_strided_slice %185 {offsets = [0, 1, 0, 0, 0, 0], sizes = [2, 1, 4, 1, 8, 128], strides = [1, 1, 1, 1, 1, 1]} : vector<2x2x4x2x8x128xf32> to vector<2x1x4x1x8x128xf32>
    %192 = vector.shape_cast %191 : vector<2x1x4x1x8x128xf32> to vector<2x4x8x128xf32>
    %193 = vector.extract_strided_slice %185 {offsets = [0, 1, 0, 1, 0, 0], sizes = [2, 1, 4, 1, 8, 128], strides = [1, 1, 1, 1, 1, 1]} : vector<2x2x4x2x8x128xf32> to vector<2x1x4x1x8x128xf32>
    %194 = vector.shape_cast %193 : vector<2x1x4x1x8x128xf32> to vector<2x4x8x128xf32>
    %195 = arith.maximumf %192, %194 : vector<2x4x8x128xf32>
    %196 = arith.maximumf %190, %195 : vector<2x4x8x128xf32>
    %197 = vector.extract_strided_slice %196 {offsets = [0, 0, 0, 0], sizes = [1, 1, 8, 128], strides = [1, 1, 1, 1]} : vector<2x4x8x128xf32> to vector<1x1x8x128xf32>
    %198 = vector.shape_cast %197 : vector<1x1x8x128xf32> to vector<8x128xf32>
    %199 = vector.extract_strided_slice %198 {offsets = [0, 0], sizes = [8, 16], strides = [1, 1]} : vector<8x128xf32> to vector<8x16xf32>
    %c0_184 = arith.constant 0 : index
    %c0_185 = arith.constant 0 : index
    %c0_186 = arith.constant 0 : index
    %200 = vector.load %arg6[%c0_184, %c0_185, %c0_186] : memref<16x16x128xf32, #tpu.memory_space<vmem>>, vector<1x16x128xf32>
    %201 = vector.shape_cast %200 : vector<1x16x128xf32> to vector<16x128xf32>
    %cst_187 = arith.constant dense<0.000000e+00> : vector<8x128xf32>
    %202 = tpu.matmul %199, %201, %cst_187 {dimension_numbers = #tpu.dot_dimension_numbers<[1], [0], [0], [1], [0, 0, 1, 1], [], []>} : vector<8x16xf32>, vector<16x128xf32>, vector<8x128xf32> -> vector<8x128xf32>
    %203 = arith.addf %4, %202 : vector<8x128xf32>
    %204 = vector.extract_strided_slice %196 {offsets = [0, 1, 0, 0], sizes = [1, 1, 8, 128], strides = [1, 1, 1, 1]} : vector<2x4x8x128xf32> to vector<1x1x8x128xf32>
    %205 = vector.shape_cast %204 : vector<1x1x8x128xf32> to vector<8x128xf32>
    %206 = vector.extract_strided_slice %205 {offsets = [0, 0], sizes = [8, 16], strides = [1, 1]} : vector<8x128xf32> to vector<8x16xf32>
    %c1_188 = arith.constant 1 : index
    %c0_189 = arith.constant 0 : index
    %c0_190 = arith.constant 0 : index
    %207 = vector.load %arg6[%c1_188, %c0_189, %c0_190] : memref<16x16x128xf32, #tpu.memory_space<vmem>>, vector<1x16x128xf32>
    %208 = vector.shape_cast %207 : vector<1x16x128xf32> to vector<16x128xf32>
    %cst_191 = arith.constant dense<0.000000e+00> : vector<8x128xf32>
    %209 = tpu.matmul %206, %208, %cst_191 {dimension_numbers = #tpu.dot_dimension_numbers<[1], [0], [0], [1], [0, 0, 1, 1], [], []>} : vector<8x16xf32>, vector<16x128xf32>, vector<8x128xf32> -> vector<8x128xf32>
    %210 = arith.addf %203, %209 : vector<8x128xf32>
    %211 = vector.extract_strided_slice %196 {offsets = [0, 2, 0, 0], sizes = [1, 1, 8, 128], strides = [1, 1, 1, 1]} : vector<2x4x8x128xf32> to vector<1x1x8x128xf32>
    %212 = vector.shape_cast %211 : vector<1x1x8x128xf32> to vector<8x128xf32>
    %213 = vector.extract_strided_slice %212 {offsets = [0, 0], sizes = [8, 16], strides = [1, 1]} : vector<8x128xf32> to vector<8x16xf32>
    %c2_192 = arith.constant 2 : index
    %c0_193 = arith.constant 0 : index
    %c0_194 = arith.constant 0 : index
    %214 = vector.load %arg6[%c2_192, %c0_193, %c0_194] : memref<16x16x128xf32, #tpu.memory_space<vmem>>, vector<1x16x128xf32>
    %215 = vector.shape_cast %214 : vector<1x16x128xf32> to vector<16x128xf32>
    %cst_195 = arith.constant dense<0.000000e+00> : vector<8x128xf32>
    %216 = tpu.matmul %213, %215, %cst_195 {dimension_numbers = #tpu.dot_dimension_numbers<[1], [0], [0], [1], [0, 0, 1, 1], [], []>} : vector<8x16xf32>, vector<16x128xf32>, vector<8x128xf32> -> vector<8x128xf32>
    %217 = arith.addf %210, %216 : vector<8x128xf32>
    %218 = vector.extract_strided_slice %196 {offsets = [0, 3, 0, 0], sizes = [1, 1, 8, 128], strides = [1, 1, 1, 1]} : vector<2x4x8x128xf32> to vector<1x1x8x128xf32>
    %219 = vector.shape_cast %218 : vector<1x1x8x128xf32> to vector<8x128xf32>
    %220 = vector.extract_strided_slice %219 {offsets = [0, 0], sizes = [8, 16], strides = [1, 1]} : vector<8x128xf32> to vector<8x16xf32>
    %c3_196 = arith.constant 3 : index
    %c0_197 = arith.constant 0 : index
    %c0_198 = arith.constant 0 : index
    %221 = vector.load %arg6[%c3_196, %c0_197, %c0_198] : memref<16x16x128xf32, #tpu.memory_space<vmem>>, vector<1x16x128xf32>
    %222 = vector.shape_cast %221 : vector<1x16x128xf32> to vector<16x128xf32>
    %cst_199 = arith.constant dense<0.000000e+00> : vector<8x128xf32>
    %223 = tpu.matmul %220, %222, %cst_199 {dimension_numbers = #tpu.dot_dimension_numbers<[1], [0], [0], [1], [0, 0, 1, 1], [], []>} : vector<8x16xf32>, vector<16x128xf32>, vector<8x128xf32> -> vector<8x128xf32>
    %224 = arith.addf %217, %223 : vector<8x128xf32>
    %225 = vector.extract_strided_slice %196 {offsets = [1, 0, 0, 0], sizes = [1, 1, 8, 128], strides = [1, 1, 1, 1]} : vector<2x4x8x128xf32> to vector<1x1x8x128xf32>
    %226 = vector.shape_cast %225 : vector<1x1x8x128xf32> to vector<8x128xf32>
    %227 = vector.extract_strided_slice %226 {offsets = [0, 0], sizes = [8, 16], strides = [1, 1]} : vector<8x128xf32> to vector<8x16xf32>
    %c4_200 = arith.constant 4 : index
    %c0_201 = arith.constant 0 : index
    %c0_202 = arith.constant 0 : index
    %228 = vector.load %arg6[%c4_200, %c0_201, %c0_202] : memref<16x16x128xf32, #tpu.memory_space<vmem>>, vector<1x16x128xf32>
    %229 = vector.shape_cast %228 : vector<1x16x128xf32> to vector<16x128xf32>
    %cst_203 = arith.constant dense<0.000000e+00> : vector<8x128xf32>
    %230 = tpu.matmul %227, %229, %cst_203 {dimension_numbers = #tpu.dot_dimension_numbers<[1], [0], [0], [1], [0, 0, 1, 1], [], []>} : vector<8x16xf32>, vector<16x128xf32>, vector<8x128xf32> -> vector<8x128xf32>
    %231 = arith.addf %224, %230 : vector<8x128xf32>
    %232 = vector.extract_strided_slice %196 {offsets = [1, 1, 0, 0], sizes = [1, 1, 8, 128], strides = [1, 1, 1, 1]} : vector<2x4x8x128xf32> to vector<1x1x8x128xf32>
    %233 = vector.shape_cast %232 : vector<1x1x8x128xf32> to vector<8x128xf32>
    %234 = vector.extract_strided_slice %233 {offsets = [0, 0], sizes = [8, 16], strides = [1, 1]} : vector<8x128xf32> to vector<8x16xf32>
    %c5_204 = arith.constant 5 : index
    %c0_205 = arith.constant 0 : index
    %c0_206 = arith.constant 0 : index
    %235 = vector.load %arg6[%c5_204, %c0_205, %c0_206] : memref<16x16x128xf32, #tpu.memory_space<vmem>>, vector<1x16x128xf32>
    %236 = vector.shape_cast %235 : vector<1x16x128xf32> to vector<16x128xf32>
    %cst_207 = arith.constant dense<0.000000e+00> : vector<8x128xf32>
    %237 = tpu.matmul %234, %236, %cst_207 {dimension_numbers = #tpu.dot_dimension_numbers<[1], [0], [0], [1], [0, 0, 1, 1], [], []>} : vector<8x16xf32>, vector<16x128xf32>, vector<8x128xf32> -> vector<8x128xf32>
    %238 = arith.addf %231, %237 : vector<8x128xf32>
    %239 = vector.extract_strided_slice %196 {offsets = [1, 2, 0, 0], sizes = [1, 1, 8, 128], strides = [1, 1, 1, 1]} : vector<2x4x8x128xf32> to vector<1x1x8x128xf32>
    %240 = vector.shape_cast %239 : vector<1x1x8x128xf32> to vector<8x128xf32>
    %241 = vector.extract_strided_slice %240 {offsets = [0, 0], sizes = [8, 16], strides = [1, 1]} : vector<8x128xf32> to vector<8x16xf32>
    %c6_208 = arith.constant 6 : index
    %c0_209 = arith.constant 0 : index
    %c0_210 = arith.constant 0 : index
    %242 = vector.load %arg6[%c6_208, %c0_209, %c0_210] : memref<16x16x128xf32, #tpu.memory_space<vmem>>, vector<1x16x128xf32>
    %243 = vector.shape_cast %242 : vector<1x16x128xf32> to vector<16x128xf32>
    %cst_211 = arith.constant dense<0.000000e+00> : vector<8x128xf32>
    %244 = tpu.matmul %241, %243, %cst_211 {dimension_numbers = #tpu.dot_dimension_numbers<[1], [0], [0], [1], [0, 0, 1, 1], [], []>} : vector<8x16xf32>, vector<16x128xf32>, vector<8x128xf32> -> vector<8x128xf32>
    %245 = arith.addf %238, %244 : vector<8x128xf32>
    %246 = vector.extract_strided_slice %196 {offsets = [1, 3, 0, 0], sizes = [1, 1, 8, 128], strides = [1, 1, 1, 1]} : vector<2x4x8x128xf32> to vector<1x1x8x128xf32>
    %247 = vector.shape_cast %246 : vector<1x1x8x128xf32> to vector<8x128xf32>
    %248 = vector.extract_strided_slice %247 {offsets = [0, 0], sizes = [8, 16], strides = [1, 1]} : vector<8x128xf32> to vector<8x16xf32>
    %c7_212 = arith.constant 7 : index
    %c0_213 = arith.constant 0 : index
    %c0_214 = arith.constant 0 : index
    %249 = vector.load %arg6[%c7_212, %c0_213, %c0_214] : memref<16x16x128xf32, #tpu.memory_space<vmem>>, vector<1x16x128xf32>
    %250 = vector.shape_cast %249 : vector<1x16x128xf32> to vector<16x128xf32>
    %cst_215 = arith.constant dense<0.000000e+00> : vector<8x128xf32>
    %251 = tpu.matmul %248, %250, %cst_215 {dimension_numbers = #tpu.dot_dimension_numbers<[1], [0], [0], [1], [0, 0, 1, 1], [], []>} : vector<8x16xf32>, vector<16x128xf32>, vector<8x128xf32> -> vector<8x128xf32>
    %252 = arith.addf %245, %251 : vector<8x128xf32>
    %cst_216 = arith.constant 0.000000e+00 : f32
    %253 = vector.broadcast %cst_216 : f32 to vector<256x128xf32>
    %c4_217 = arith.constant 4 : index
    %c0_218 = arith.constant 0 : index
    %c0_219 = arith.constant 0 : index
    %c0_220 = arith.constant 0 : index
    %254 = vector.load %arg13[%c4_217, %c0_218, %c0_219, %c0_220] : memref<12x12x8x128xf32, #tpu.memory_space<vmem>>, vector<4x8x8x128xf32>
    %255 = vector.shape_cast %254 : vector<4x8x8x128xf32> to vector<256x128xf32>
    %256 = vector.extract_strided_slice %255 {offsets = [0, 0], sizes = [256, 8], strides = [1, 1]} : vector<256x128xf32> to vector<256x8xf32>
    %c0_221 = arith.constant 0 : index
    %c0_222 = arith.constant 0 : index
    %c0_223 = arith.constant 0 : index
    %257 = vector.load %arg4[%c0_221, %c0_222, %c0_223] : memref<25x8x128xf32, #tpu.memory_space<vmem>>, vector<1x8x128xf32>
    %258 = vector.shape_cast %257 : vector<1x8x128xf32> to vector<8x128xf32>
    %cst_224 = arith.constant dense<0.000000e+00> : vector<256x128xf32>
    %259 = tpu.matmul %256, %258, %cst_224 {dimension_numbers = #tpu.dot_dimension_numbers<[1], [0], [0], [1], [0, 0, 1, 1], [], []>} : vector<256x8xf32>, vector<8x128xf32>, vector<256x128xf32> -> vector<256x128xf32>
    %260 = arith.addf %253, %259 : vector<256x128xf32>
    %c4_225 = arith.constant 4 : index
    %c1_226 = arith.constant 1 : index
    %c0_227 = arith.constant 0 : index
    %c0_228 = arith.constant 0 : index
    %261 = vector.load %arg13[%c4_225, %c1_226, %c0_227, %c0_228] : memref<12x12x8x128xf32, #tpu.memory_space<vmem>>, vector<4x8x8x128xf32>
    %262 = vector.shape_cast %261 : vector<4x8x8x128xf32> to vector<256x128xf32>
    %263 = vector.extract_strided_slice %262 {offsets = [0, 0], sizes = [256, 8], strides = [1, 1]} : vector<256x128xf32> to vector<256x8xf32>
    %c1_229 = arith.constant 1 : index
    %c0_230 = arith.constant 0 : index
    %c0_231 = arith.constant 0 : index
    %264 = vector.load %arg4[%c1_229, %c0_230, %c0_231] : memref<25x8x128xf32, #tpu.memory_space<vmem>>, vector<1x8x128xf32>
    %265 = vector.shape_cast %264 : vector<1x8x128xf32> to vector<8x128xf32>
    %cst_232 = arith.constant dense<0.000000e+00> : vector<256x128xf32>
    %266 = tpu.matmul %263, %265, %cst_232 {dimension_numbers = #tpu.dot_dimension_numbers<[1], [0], [0], [1], [0, 0, 1, 1], [], []>} : vector<256x8xf32>, vector<8x128xf32>, vector<256x128xf32> -> vector<256x128xf32>
    %267 = arith.addf %260, %266 : vector<256x128xf32>
    %c4_233 = arith.constant 4 : index
    %c2_234 = arith.constant 2 : index
    %c0_235 = arith.constant 0 : index
    %c0_236 = arith.constant 0 : index
    %268 = vector.load %arg13[%c4_233, %c2_234, %c0_235, %c0_236] : memref<12x12x8x128xf32, #tpu.memory_space<vmem>>, vector<4x8x8x128xf32>
    %269 = vector.shape_cast %268 : vector<4x8x8x128xf32> to vector<256x128xf32>
    %270 = vector.extract_strided_slice %269 {offsets = [0, 0], sizes = [256, 8], strides = [1, 1]} : vector<256x128xf32> to vector<256x8xf32>
    %c2_237 = arith.constant 2 : index
    %c0_238 = arith.constant 0 : index
    %c0_239 = arith.constant 0 : index
    %271 = vector.load %arg4[%c2_237, %c0_238, %c0_239] : memref<25x8x128xf32, #tpu.memory_space<vmem>>, vector<1x8x128xf32>
    %272 = vector.shape_cast %271 : vector<1x8x128xf32> to vector<8x128xf32>
    %cst_240 = arith.constant dense<0.000000e+00> : vector<256x128xf32>
    %273 = tpu.matmul %270, %272, %cst_240 {dimension_numbers = #tpu.dot_dimension_numbers<[1], [0], [0], [1], [0, 0, 1, 1], [], []>} : vector<256x8xf32>, vector<8x128xf32>, vector<256x128xf32> -> vector<256x128xf32>
    %274 = arith.addf %267, %273 : vector<256x128xf32>
    %c4_241 = arith.constant 4 : index
    %c3_242 = arith.constant 3 : index
    %c0_243 = arith.constant 0 : index
    %c0_244 = arith.constant 0 : index
    %275 = vector.load %arg13[%c4_241, %c3_242, %c0_243, %c0_244] : memref<12x12x8x128xf32, #tpu.memory_space<vmem>>, vector<4x8x8x128xf32>
    %276 = vector.shape_cast %275 : vector<4x8x8x128xf32> to vector<256x128xf32>
    %277 = vector.extract_strided_slice %276 {offsets = [0, 0], sizes = [256, 8], strides = [1, 1]} : vector<256x128xf32> to vector<256x8xf32>
    %c3_245 = arith.constant 3 : index
    %c0_246 = arith.constant 0 : index
    %c0_247 = arith.constant 0 : index
    %278 = vector.load %arg4[%c3_245, %c0_246, %c0_247] : memref<25x8x128xf32, #tpu.memory_space<vmem>>, vector<1x8x128xf32>
    %279 = vector.shape_cast %278 : vector<1x8x128xf32> to vector<8x128xf32>
    %cst_248 = arith.constant dense<0.000000e+00> : vector<256x128xf32>
    %280 = tpu.matmul %277, %279, %cst_248 {dimension_numbers = #tpu.dot_dimension_numbers<[1], [0], [0], [1], [0, 0, 1, 1], [], []>} : vector<256x8xf32>, vector<8x128xf32>, vector<256x128xf32> -> vector<256x128xf32>
    %281 = arith.addf %274, %280 : vector<256x128xf32>
    %c4_249 = arith.constant 4 : index
    %c4_250 = arith.constant 4 : index
    %c0_251 = arith.constant 0 : index
    %c0_252 = arith.constant 0 : index
    %282 = vector.load %arg13[%c4_249, %c4_250, %c0_251, %c0_252] : memref<12x12x8x128xf32, #tpu.memory_space<vmem>>, vector<4x8x8x128xf32>
    %283 = vector.shape_cast %282 : vector<4x8x8x128xf32> to vector<256x128xf32>
    %284 = vector.extract_strided_slice %283 {offsets = [0, 0], sizes = [256, 8], strides = [1, 1]} : vector<256x128xf32> to vector<256x8xf32>
    %c4_253 = arith.constant 4 : index
    %c0_254 = arith.constant 0 : index
    %c0_255 = arith.constant 0 : index
    %285 = vector.load %arg4[%c4_253, %c0_254, %c0_255] : memref<25x8x128xf32, #tpu.memory_space<vmem>>, vector<1x8x128xf32>
    %286 = vector.shape_cast %285 : vector<1x8x128xf32> to vector<8x128xf32>
    %cst_256 = arith.constant dense<0.000000e+00> : vector<256x128xf32>
    %287 = tpu.matmul %284, %286, %cst_256 {dimension_numbers = #tpu.dot_dimension_numbers<[1], [0], [0], [1], [0, 0, 1, 1], [], []>} : vector<256x8xf32>, vector<8x128xf32>, vector<256x128xf32> -> vector<256x128xf32>
    %288 = arith.addf %281, %287 : vector<256x128xf32>
    %c5_257 = arith.constant 5 : index
    %c0_258 = arith.constant 0 : index
    %c0_259 = arith.constant 0 : index
    %c0_260 = arith.constant 0 : index
    %289 = vector.load %arg13[%c5_257, %c0_258, %c0_259, %c0_260] : memref<12x12x8x128xf32, #tpu.memory_space<vmem>>, vector<4x8x8x128xf32>
    %290 = vector.shape_cast %289 : vector<4x8x8x128xf32> to vector<256x128xf32>
    %291 = vector.extract_strided_slice %290 {offsets = [0, 0], sizes = [256, 8], strides = [1, 1]} : vector<256x128xf32> to vector<256x8xf32>
    %c5_261 = arith.constant 5 : index
    %c0_262 = arith.constant 0 : index
    %c0_263 = arith.constant 0 : index
    %292 = vector.load %arg4[%c5_261, %c0_262, %c0_263] : memref<25x8x128xf32, #tpu.memory_space<vmem>>, vector<1x8x128xf32>
    %293 = vector.shape_cast %292 : vector<1x8x128xf32> to vector<8x128xf32>
    %cst_264 = arith.constant dense<0.000000e+00> : vector<256x128xf32>
    %294 = tpu.matmul %291, %293, %cst_264 {dimension_numbers = #tpu.dot_dimension_numbers<[1], [0], [0], [1], [0, 0, 1, 1], [], []>} : vector<256x8xf32>, vector<8x128xf32>, vector<256x128xf32> -> vector<256x128xf32>
    %295 = arith.addf %288, %294 : vector<256x128xf32>
    %c5_265 = arith.constant 5 : index
    %c1_266 = arith.constant 1 : index
    %c0_267 = arith.constant 0 : index
    %c0_268 = arith.constant 0 : index
    %296 = vector.load %arg13[%c5_265, %c1_266, %c0_267, %c0_268] : memref<12x12x8x128xf32, #tpu.memory_space<vmem>>, vector<4x8x8x128xf32>
    %297 = vector.shape_cast %296 : vector<4x8x8x128xf32> to vector<256x128xf32>
    %298 = vector.extract_strided_slice %297 {offsets = [0, 0], sizes = [256, 8], strides = [1, 1]} : vector<256x128xf32> to vector<256x8xf32>
    %c6_269 = arith.constant 6 : index
    %c0_270 = arith.constant 0 : index
    %c0_271 = arith.constant 0 : index
    %299 = vector.load %arg4[%c6_269, %c0_270, %c0_271] : memref<25x8x128xf32, #tpu.memory_space<vmem>>, vector<1x8x128xf32>
    %300 = vector.shape_cast %299 : vector<1x8x128xf32> to vector<8x128xf32>
    %cst_272 = arith.constant dense<0.000000e+00> : vector<256x128xf32>
    %301 = tpu.matmul %298, %300, %cst_272 {dimension_numbers = #tpu.dot_dimension_numbers<[1], [0], [0], [1], [0, 0, 1, 1], [], []>} : vector<256x8xf32>, vector<8x128xf32>, vector<256x128xf32> -> vector<256x128xf32>
    %302 = arith.addf %295, %301 : vector<256x128xf32>
    %c5_273 = arith.constant 5 : index
    %c2_274 = arith.constant 2 : index
    %c0_275 = arith.constant 0 : index
    %c0_276 = arith.constant 0 : index
    %303 = vector.load %arg13[%c5_273, %c2_274, %c0_275, %c0_276] : memref<12x12x8x128xf32, #tpu.memory_space<vmem>>, vector<4x8x8x128xf32>
    %304 = vector.shape_cast %303 : vector<4x8x8x128xf32> to vector<256x128xf32>
    %305 = vector.extract_strided_slice %304 {offsets = [0, 0], sizes = [256, 8], strides = [1, 1]} : vector<256x128xf32> to vector<256x8xf32>
    %c7_277 = arith.constant 7 : index
    %c0_278 = arith.constant 0 : index
    %c0_279 = arith.constant 0 : index
    %306 = vector.load %arg4[%c7_277, %c0_278, %c0_279] : memref<25x8x128xf32, #tpu.memory_space<vmem>>, vector<1x8x128xf32>
    %307 = vector.shape_cast %306 : vector<1x8x128xf32> to vector<8x128xf32>
    %cst_280 = arith.constant dense<0.000000e+00> : vector<256x128xf32>
    %308 = tpu.matmul %305, %307, %cst_280 {dimension_numbers = #tpu.dot_dimension_numbers<[1], [0], [0], [1], [0, 0, 1, 1], [], []>} : vector<256x8xf32>, vector<8x128xf32>, vector<256x128xf32> -> vector<256x128xf32>
    %309 = arith.addf %302, %308 : vector<256x128xf32>
    %c5_281 = arith.constant 5 : index
    %c3_282 = arith.constant 3 : index
    %c0_283 = arith.constant 0 : index
    %c0_284 = arith.constant 0 : index
    %310 = vector.load %arg13[%c5_281, %c3_282, %c0_283, %c0_284] : memref<12x12x8x128xf32, #tpu.memory_space<vmem>>, vector<4x8x8x128xf32>
    %311 = vector.shape_cast %310 : vector<4x8x8x128xf32> to vector<256x128xf32>
    %312 = vector.extract_strided_slice %311 {offsets = [0, 0], sizes = [256, 8], strides = [1, 1]} : vector<256x128xf32> to vector<256x8xf32>
    %c8_285 = arith.constant 8 : index
    %c0_286 = arith.constant 0 : index
    %c0_287 = arith.constant 0 : index
    %313 = vector.load %arg4[%c8_285, %c0_286, %c0_287] : memref<25x8x128xf32, #tpu.memory_space<vmem>>, vector<1x8x128xf32>
    %314 = vector.shape_cast %313 : vector<1x8x128xf32> to vector<8x128xf32>
    %cst_288 = arith.constant dense<0.000000e+00> : vector<256x128xf32>
    %315 = tpu.matmul %312, %314, %cst_288 {dimension_numbers = #tpu.dot_dimension_numbers<[1], [0], [0], [1], [0, 0, 1, 1], [], []>} : vector<256x8xf32>, vector<8x128xf32>, vector<256x128xf32> -> vector<256x128xf32>
    %316 = arith.addf %309, %315 : vector<256x128xf32>
    %c5_289 = arith.constant 5 : index
    %c4_290 = arith.constant 4 : index
    %c0_291 = arith.constant 0 : index
    %c0_292 = arith.constant 0 : index
    %317 = vector.load %arg13[%c5_289, %c4_290, %c0_291, %c0_292] : memref<12x12x8x128xf32, #tpu.memory_space<vmem>>, vector<4x8x8x128xf32>
    %318 = vector.shape_cast %317 : vector<4x8x8x128xf32> to vector<256x128xf32>
    %319 = vector.extract_strided_slice %318 {offsets = [0, 0], sizes = [256, 8], strides = [1, 1]} : vector<256x128xf32> to vector<256x8xf32>
    %c9_293 = arith.constant 9 : index
    %c0_294 = arith.constant 0 : index
    %c0_295 = arith.constant 0 : index
    %320 = vector.load %arg4[%c9_293, %c0_294, %c0_295] : memref<25x8x128xf32, #tpu.memory_space<vmem>>, vector<1x8x128xf32>
    %321 = vector.shape_cast %320 : vector<1x8x128xf32> to vector<8x128xf32>
    %cst_296 = arith.constant dense<0.000000e+00> : vector<256x128xf32>
    %322 = tpu.matmul %319, %321, %cst_296 {dimension_numbers = #tpu.dot_dimension_numbers<[1], [0], [0], [1], [0, 0, 1, 1], [], []>} : vector<256x8xf32>, vector<8x128xf32>, vector<256x128xf32> -> vector<256x128xf32>
    %323 = arith.addf %316, %322 : vector<256x128xf32>
    %c6_297 = arith.constant 6 : index
    %c0_298 = arith.constant 0 : index
    %c0_299 = arith.constant 0 : index
    %c0_300 = arith.constant 0 : index
    %324 = vector.load %arg13[%c6_297, %c0_298, %c0_299, %c0_300] : memref<12x12x8x128xf32, #tpu.memory_space<vmem>>, vector<4x8x8x128xf32>
    %325 = vector.shape_cast %324 : vector<4x8x8x128xf32> to vector<256x128xf32>
    %326 = vector.extract_strided_slice %325 {offsets = [0, 0], sizes = [256, 8], strides = [1, 1]} : vector<256x128xf32> to vector<256x8xf32>
    %c10_301 = arith.constant 10 : index
    %c0_302 = arith.constant 0 : index
    %c0_303 = arith.constant 0 : index
    %327 = vector.load %arg4[%c10_301, %c0_302, %c0_303] : memref<25x8x128xf32, #tpu.memory_space<vmem>>, vector<1x8x128xf32>
    %328 = vector.shape_cast %327 : vector<1x8x128xf32> to vector<8x128xf32>
    %cst_304 = arith.constant dense<0.000000e+00> : vector<256x128xf32>
    %329 = tpu.matmul %326, %328, %cst_304 {dimension_numbers = #tpu.dot_dimension_numbers<[1], [0], [0], [1], [0, 0, 1, 1], [], []>} : vector<256x8xf32>, vector<8x128xf32>, vector<256x128xf32> -> vector<256x128xf32>
    %330 = arith.addf %323, %329 : vector<256x128xf32>
    %c6_305 = arith.constant 6 : index
    %c1_306 = arith.constant 1 : index
    %c0_307 = arith.constant 0 : index
    %c0_308 = arith.constant 0 : index
    %331 = vector.load %arg13[%c6_305, %c1_306, %c0_307, %c0_308] : memref<12x12x8x128xf32, #tpu.memory_space<vmem>>, vector<4x8x8x128xf32>
    %332 = vector.shape_cast %331 : vector<4x8x8x128xf32> to vector<256x128xf32>
    %333 = vector.extract_strided_slice %332 {offsets = [0, 0], sizes = [256, 8], strides = [1, 1]} : vector<256x128xf32> to vector<256x8xf32>
    %c11_309 = arith.constant 11 : index
    %c0_310 = arith.constant 0 : index
    %c0_311 = arith.constant 0 : index
    %334 = vector.load %arg4[%c11_309, %c0_310, %c0_311] : memref<25x8x128xf32, #tpu.memory_space<vmem>>, vector<1x8x128xf32>
    %335 = vector.shape_cast %334 : vector<1x8x128xf32> to vector<8x128xf32>
    %cst_312 = arith.constant dense<0.000000e+00> : vector<256x128xf32>
    %336 = tpu.matmul %333, %335, %cst_312 {dimension_numbers = #tpu.dot_dimension_numbers<[1], [0], [0], [1], [0, 0, 1, 1], [], []>} : vector<256x8xf32>, vector<8x128xf32>, vector<256x128xf32> -> vector<256x128xf32>
    %337 = arith.addf %330, %336 : vector<256x128xf32>
    %c6_313 = arith.constant 6 : index
    %c2_314 = arith.constant 2 : index
    %c0_315 = arith.constant 0 : index
    %c0_316 = arith.constant 0 : index
    %338 = vector.load %arg13[%c6_313, %c2_314, %c0_315, %c0_316] : memref<12x12x8x128xf32, #tpu.memory_space<vmem>>, vector<4x8x8x128xf32>
    %339 = vector.shape_cast %338 : vector<4x8x8x128xf32> to vector<256x128xf32>
    %340 = vector.extract_strided_slice %339 {offsets = [0, 0], sizes = [256, 8], strides = [1, 1]} : vector<256x128xf32> to vector<256x8xf32>
    %c12_317 = arith.constant 12 : index
    %c0_318 = arith.constant 0 : index
    %c0_319 = arith.constant 0 : index
    %341 = vector.load %arg4[%c12_317, %c0_318, %c0_319] : memref<25x8x128xf32, #tpu.memory_space<vmem>>, vector<1x8x128xf32>
    %342 = vector.shape_cast %341 : vector<1x8x128xf32> to vector<8x128xf32>
    %cst_320 = arith.constant dense<0.000000e+00> : vector<256x128xf32>
    %343 = tpu.matmul %340, %342, %cst_320 {dimension_numbers = #tpu.dot_dimension_numbers<[1], [0], [0], [1], [0, 0, 1, 1], [], []>} : vector<256x8xf32>, vector<8x128xf32>, vector<256x128xf32> -> vector<256x128xf32>
    %344 = arith.addf %337, %343 : vector<256x128xf32>
    %c6_321 = arith.constant 6 : index
    %c3_322 = arith.constant 3 : index
    %c0_323 = arith.constant 0 : index
    %c0_324 = arith.constant 0 : index
    %345 = vector.load %arg13[%c6_321, %c3_322, %c0_323, %c0_324] : memref<12x12x8x128xf32, #tpu.memory_space<vmem>>, vector<4x8x8x128xf32>
    %346 = vector.shape_cast %345 : vector<4x8x8x128xf32> to vector<256x128xf32>
    %347 = vector.extract_strided_slice %346 {offsets = [0, 0], sizes = [256, 8], strides = [1, 1]} : vector<256x128xf32> to vector<256x8xf32>
    %c13_325 = arith.constant 13 : index
    %c0_326 = arith.constant 0 : index
    %c0_327 = arith.constant 0 : index
    %348 = vector.load %arg4[%c13_325, %c0_326, %c0_327] : memref<25x8x128xf32, #tpu.memory_space<vmem>>, vector<1x8x128xf32>
    %349 = vector.shape_cast %348 : vector<1x8x128xf32> to vector<8x128xf32>
    %cst_328 = arith.constant dense<0.000000e+00> : vector<256x128xf32>
    %350 = tpu.matmul %347, %349, %cst_328 {dimension_numbers = #tpu.dot_dimension_numbers<[1], [0], [0], [1], [0, 0, 1, 1], [], []>} : vector<256x8xf32>, vector<8x128xf32>, vector<256x128xf32> -> vector<256x128xf32>
    %351 = arith.addf %344, %350 : vector<256x128xf32>
    %c6_329 = arith.constant 6 : index
    %c4_330 = arith.constant 4 : index
    %c0_331 = arith.constant 0 : index
    %c0_332 = arith.constant 0 : index
    %352 = vector.load %arg13[%c6_329, %c4_330, %c0_331, %c0_332] : memref<12x12x8x128xf32, #tpu.memory_space<vmem>>, vector<4x8x8x128xf32>
    %353 = vector.shape_cast %352 : vector<4x8x8x128xf32> to vector<256x128xf32>
    %354 = vector.extract_strided_slice %353 {offsets = [0, 0], sizes = [256, 8], strides = [1, 1]} : vector<256x128xf32> to vector<256x8xf32>
    %c14_333 = arith.constant 14 : index
    %c0_334 = arith.constant 0 : index
    %c0_335 = arith.constant 0 : index
    %355 = vector.load %arg4[%c14_333, %c0_334, %c0_335] : memref<25x8x128xf32, #tpu.memory_space<vmem>>, vector<1x8x128xf32>
    %356 = vector.shape_cast %355 : vector<1x8x128xf32> to vector<8x128xf32>
    %cst_336 = arith.constant dense<0.000000e+00> : vector<256x128xf32>
    %357 = tpu.matmul %354, %356, %cst_336 {dimension_numbers = #tpu.dot_dimension_numbers<[1], [0], [0], [1], [0, 0, 1, 1], [], []>} : vector<256x8xf32>, vector<8x128xf32>, vector<256x128xf32> -> vector<256x128xf32>
    %358 = arith.addf %351, %357 : vector<256x128xf32>
    %c7_337 = arith.constant 7 : index
    %c0_338 = arith.constant 0 : index
    %c0_339 = arith.constant 0 : index
    %c0_340 = arith.constant 0 : index
    %359 = vector.load %arg13[%c7_337, %c0_338, %c0_339, %c0_340] : memref<12x12x8x128xf32, #tpu.memory_space<vmem>>, vector<4x8x8x128xf32>
    %360 = vector.shape_cast %359 : vector<4x8x8x128xf32> to vector<256x128xf32>
    %361 = vector.extract_strided_slice %360 {offsets = [0, 0], sizes = [256, 8], strides = [1, 1]} : vector<256x128xf32> to vector<256x8xf32>
    %c15_341 = arith.constant 15 : index
    %c0_342 = arith.constant 0 : index
    %c0_343 = arith.constant 0 : index
    %362 = vector.load %arg4[%c15_341, %c0_342, %c0_343] : memref<25x8x128xf32, #tpu.memory_space<vmem>>, vector<1x8x128xf32>
    %363 = vector.shape_cast %362 : vector<1x8x128xf32> to vector<8x128xf32>
    %cst_344 = arith.constant dense<0.000000e+00> : vector<256x128xf32>
    %364 = tpu.matmul %361, %363, %cst_344 {dimension_numbers = #tpu.dot_dimension_numbers<[1], [0], [0], [1], [0, 0, 1, 1], [], []>} : vector<256x8xf32>, vector<8x128xf32>, vector<256x128xf32> -> vector<256x128xf32>
    %365 = arith.addf %358, %364 : vector<256x128xf32>
    %c7_345 = arith.constant 7 : index
    %c1_346 = arith.constant 1 : index
    %c0_347 = arith.constant 0 : index
    %c0_348 = arith.constant 0 : index
    %366 = vector.load %arg13[%c7_345, %c1_346, %c0_347, %c0_348] : memref<12x12x8x128xf32, #tpu.memory_space<vmem>>, vector<4x8x8x128xf32>
    %367 = vector.shape_cast %366 : vector<4x8x8x128xf32> to vector<256x128xf32>
    %368 = vector.extract_strided_slice %367 {offsets = [0, 0], sizes = [256, 8], strides = [1, 1]} : vector<256x128xf32> to vector<256x8xf32>
    %c16_349 = arith.constant 16 : index
    %c0_350 = arith.constant 0 : index
    %c0_351 = arith.constant 0 : index
    %369 = vector.load %arg4[%c16_349, %c0_350, %c0_351] : memref<25x8x128xf32, #tpu.memory_space<vmem>>, vector<1x8x128xf32>
    %370 = vector.shape_cast %369 : vector<1x8x128xf32> to vector<8x128xf32>
    %cst_352 = arith.constant dense<0.000000e+00> : vector<256x128xf32>
    %371 = tpu.matmul %368, %370, %cst_352 {dimension_numbers = #tpu.dot_dimension_numbers<[1], [0], [0], [1], [0, 0, 1, 1], [], []>} : vector<256x8xf32>, vector<8x128xf32>, vector<256x128xf32> -> vector<256x128xf32>
    %372 = arith.addf %365, %371 : vector<256x128xf32>
    %c7_353 = arith.constant 7 : index
    %c2_354 = arith.constant 2 : index
    %c0_355 = arith.constant 0 : index
    %c0_356 = arith.constant 0 : index
    %373 = vector.load %arg13[%c7_353, %c2_354, %c0_355, %c0_356] : memref<12x12x8x128xf32, #tpu.memory_space<vmem>>, vector<4x8x8x128xf32>
    %374 = vector.shape_cast %373 : vector<4x8x8x128xf32> to vector<256x128xf32>
    %375 = vector.extract_strided_slice %374 {offsets = [0, 0], sizes = [256, 8], strides = [1, 1]} : vector<256x128xf32> to vector<256x8xf32>
    %c17_357 = arith.constant 17 : index
    %c0_358 = arith.constant 0 : index
    %c0_359 = arith.constant 0 : index
    %376 = vector.load %arg4[%c17_357, %c0_358, %c0_359] : memref<25x8x128xf32, #tpu.memory_space<vmem>>, vector<1x8x128xf32>
    %377 = vector.shape_cast %376 : vector<1x8x128xf32> to vector<8x128xf32>
    %cst_360 = arith.constant dense<0.000000e+00> : vector<256x128xf32>
    %378 = tpu.matmul %375, %377, %cst_360 {dimension_numbers = #tpu.dot_dimension_numbers<[1], [0], [0], [1], [0, 0, 1, 1], [], []>} : vector<256x8xf32>, vector<8x128xf32>, vector<256x128xf32> -> vector<256x128xf32>
    %379 = arith.addf %372, %378 : vector<256x128xf32>
    %c7_361 = arith.constant 7 : index
    %c3_362 = arith.constant 3 : index
    %c0_363 = arith.constant 0 : index
    %c0_364 = arith.constant 0 : index
    %380 = vector.load %arg13[%c7_361, %c3_362, %c0_363, %c0_364] : memref<12x12x8x128xf32, #tpu.memory_space<vmem>>, vector<4x8x8x128xf32>
    %381 = vector.shape_cast %380 : vector<4x8x8x128xf32> to vector<256x128xf32>
    %382 = vector.extract_strided_slice %381 {offsets = [0, 0], sizes = [256, 8], strides = [1, 1]} : vector<256x128xf32> to vector<256x8xf32>
    %c18_365 = arith.constant 18 : index
    %c0_366 = arith.constant 0 : index
    %c0_367 = arith.constant 0 : index
    %383 = vector.load %arg4[%c18_365, %c0_366, %c0_367] : memref<25x8x128xf32, #tpu.memory_space<vmem>>, vector<1x8x128xf32>
    %384 = vector.shape_cast %383 : vector<1x8x128xf32> to vector<8x128xf32>
    %cst_368 = arith.constant dense<0.000000e+00> : vector<256x128xf32>
    %385 = tpu.matmul %382, %384, %cst_368 {dimension_numbers = #tpu.dot_dimension_numbers<[1], [0], [0], [1], [0, 0, 1, 1], [], []>} : vector<256x8xf32>, vector<8x128xf32>, vector<256x128xf32> -> vector<256x128xf32>
    %386 = arith.addf %379, %385 : vector<256x128xf32>
    %c7_369 = arith.constant 7 : index
    %c4_370 = arith.constant 4 : index
    %c0_371 = arith.constant 0 : index
    %c0_372 = arith.constant 0 : index
    %387 = vector.load %arg13[%c7_369, %c4_370, %c0_371, %c0_372] : memref<12x12x8x128xf32, #tpu.memory_space<vmem>>, vector<4x8x8x128xf32>
    %388 = vector.shape_cast %387 : vector<4x8x8x128xf32> to vector<256x128xf32>
    %389 = vector.extract_strided_slice %388 {offsets = [0, 0], sizes = [256, 8], strides = [1, 1]} : vector<256x128xf32> to vector<256x8xf32>
    %c19_373 = arith.constant 19 : index
    %c0_374 = arith.constant 0 : index
    %c0_375 = arith.constant 0 : index
    %390 = vector.load %arg4[%c19_373, %c0_374, %c0_375] : memref<25x8x128xf32, #tpu.memory_space<vmem>>, vector<1x8x128xf32>
    %391 = vector.shape_cast %390 : vector<1x8x128xf32> to vector<8x128xf32>
    %cst_376 = arith.constant dense<0.000000e+00> : vector<256x128xf32>
    %392 = tpu.matmul %389, %391, %cst_376 {dimension_numbers = #tpu.dot_dimension_numbers<[1], [0], [0], [1], [0, 0, 1, 1], [], []>} : vector<256x8xf32>, vector<8x128xf32>, vector<256x128xf32> -> vector<256x128xf32>
    %393 = arith.addf %386, %392 : vector<256x128xf32>
    %c8_377 = arith.constant 8 : index
    %c0_378 = arith.constant 0 : index
    %c0_379 = arith.constant 0 : index
    %c0_380 = arith.constant 0 : index
    %394 = vector.load %arg13[%c8_377, %c0_378, %c0_379, %c0_380] : memref<12x12x8x128xf32, #tpu.memory_space<vmem>>, vector<4x8x8x128xf32>
    %395 = vector.shape_cast %394 : vector<4x8x8x128xf32> to vector<256x128xf32>
    %396 = vector.extract_strided_slice %395 {offsets = [0, 0], sizes = [256, 8], strides = [1, 1]} : vector<256x128xf32> to vector<256x8xf32>
    %c20_381 = arith.constant 20 : index
    %c0_382 = arith.constant 0 : index
    %c0_383 = arith.constant 0 : index
    %397 = vector.load %arg4[%c20_381, %c0_382, %c0_383] : memref<25x8x128xf32, #tpu.memory_space<vmem>>, vector<1x8x128xf32>
    %398 = vector.shape_cast %397 : vector<1x8x128xf32> to vector<8x128xf32>
    %cst_384 = arith.constant dense<0.000000e+00> : vector<256x128xf32>
    %399 = tpu.matmul %396, %398, %cst_384 {dimension_numbers = #tpu.dot_dimension_numbers<[1], [0], [0], [1], [0, 0, 1, 1], [], []>} : vector<256x8xf32>, vector<8x128xf32>, vector<256x128xf32> -> vector<256x128xf32>
    %400 = arith.addf %393, %399 : vector<256x128xf32>
    %c8_385 = arith.constant 8 : index
    %c1_386 = arith.constant 1 : index
    %c0_387 = arith.constant 0 : index
    %c0_388 = arith.constant 0 : index
    %401 = vector.load %arg13[%c8_385, %c1_386, %c0_387, %c0_388] : memref<12x12x8x128xf32, #tpu.memory_space<vmem>>, vector<4x8x8x128xf32>
    %402 = vector.shape_cast %401 : vector<4x8x8x128xf32> to vector<256x128xf32>
    %403 = vector.extract_strided_slice %402 {offsets = [0, 0], sizes = [256, 8], strides = [1, 1]} : vector<256x128xf32> to vector<256x8xf32>
    %c21_389 = arith.constant 21 : index
    %c0_390 = arith.constant 0 : index
    %c0_391 = arith.constant 0 : index
    %404 = vector.load %arg4[%c21_389, %c0_390, %c0_391] : memref<25x8x128xf32, #tpu.memory_space<vmem>>, vector<1x8x128xf32>
    %405 = vector.shape_cast %404 : vector<1x8x128xf32> to vector<8x128xf32>
    %cst_392 = arith.constant dense<0.000000e+00> : vector<256x128xf32>
    %406 = tpu.matmul %403, %405, %cst_392 {dimension_numbers = #tpu.dot_dimension_numbers<[1], [0], [0], [1], [0, 0, 1, 1], [], []>} : vector<256x8xf32>, vector<8x128xf32>, vector<256x128xf32> -> vector<256x128xf32>
    %407 = arith.addf %400, %406 : vector<256x128xf32>
    %c8_393 = arith.constant 8 : index
    %c2_394 = arith.constant 2 : index
    %c0_395 = arith.constant 0 : index
    %c0_396 = arith.constant 0 : index
    %408 = vector.load %arg13[%c8_393, %c2_394, %c0_395, %c0_396] : memref<12x12x8x128xf32, #tpu.memory_space<vmem>>, vector<4x8x8x128xf32>
    %409 = vector.shape_cast %408 : vector<4x8x8x128xf32> to vector<256x128xf32>
    %410 = vector.extract_strided_slice %409 {offsets = [0, 0], sizes = [256, 8], strides = [1, 1]} : vector<256x128xf32> to vector<256x8xf32>
    %c22_397 = arith.constant 22 : index
    %c0_398 = arith.constant 0 : index
    %c0_399 = arith.constant 0 : index
    %411 = vector.load %arg4[%c22_397, %c0_398, %c0_399] : memref<25x8x128xf32, #tpu.memory_space<vmem>>, vector<1x8x128xf32>
    %412 = vector.shape_cast %411 : vector<1x8x128xf32> to vector<8x128xf32>
    %cst_400 = arith.constant dense<0.000000e+00> : vector<256x128xf32>
    %413 = tpu.matmul %410, %412, %cst_400 {dimension_numbers = #tpu.dot_dimension_numbers<[1], [0], [0], [1], [0, 0, 1, 1], [], []>} : vector<256x8xf32>, vector<8x128xf32>, vector<256x128xf32> -> vector<256x128xf32>
    %414 = arith.addf %407, %413 : vector<256x128xf32>
    %c8_401 = arith.constant 8 : index
    %c3_402 = arith.constant 3 : index
    %c0_403 = arith.constant 0 : index
    %c0_404 = arith.constant 0 : index
    %415 = vector.load %arg13[%c8_401, %c3_402, %c0_403, %c0_404] : memref<12x12x8x128xf32, #tpu.memory_space<vmem>>, vector<4x8x8x128xf32>
    %416 = vector.shape_cast %415 : vector<4x8x8x128xf32> to vector<256x128xf32>
    %417 = vector.extract_strided_slice %416 {offsets = [0, 0], sizes = [256, 8], strides = [1, 1]} : vector<256x128xf32> to vector<256x8xf32>
    %c23_405 = arith.constant 23 : index
    %c0_406 = arith.constant 0 : index
    %c0_407 = arith.constant 0 : index
    %418 = vector.load %arg4[%c23_405, %c0_406, %c0_407] : memref<25x8x128xf32, #tpu.memory_space<vmem>>, vector<1x8x128xf32>
    %419 = vector.shape_cast %418 : vector<1x8x128xf32> to vector<8x128xf32>
    %cst_408 = arith.constant dense<0.000000e+00> : vector<256x128xf32>
    %420 = tpu.matmul %417, %419, %cst_408 {dimension_numbers = #tpu.dot_dimension_numbers<[1], [0], [0], [1], [0, 0, 1, 1], [], []>} : vector<256x8xf32>, vector<8x128xf32>, vector<256x128xf32> -> vector<256x128xf32>
    %421 = arith.addf %414, %420 : vector<256x128xf32>
    %c8_409 = arith.constant 8 : index
    %c4_410 = arith.constant 4 : index
    %c0_411 = arith.constant 0 : index
    %c0_412 = arith.constant 0 : index
    %422 = vector.load %arg13[%c8_409, %c4_410, %c0_411, %c0_412] : memref<12x12x8x128xf32, #tpu.memory_space<vmem>>, vector<4x8x8x128xf32>
    %423 = vector.shape_cast %422 : vector<4x8x8x128xf32> to vector<256x128xf32>
    %424 = vector.extract_strided_slice %423 {offsets = [0, 0], sizes = [256, 8], strides = [1, 1]} : vector<256x128xf32> to vector<256x8xf32>
    %c24_413 = arith.constant 24 : index
    %c0_414 = arith.constant 0 : index
    %c0_415 = arith.constant 0 : index
    %425 = vector.load %arg4[%c24_413, %c0_414, %c0_415] : memref<25x8x128xf32, #tpu.memory_space<vmem>>, vector<1x8x128xf32>
    %426 = vector.shape_cast %425 : vector<1x8x128xf32> to vector<8x128xf32>
    %cst_416 = arith.constant dense<0.000000e+00> : vector<256x128xf32>
    %427 = tpu.matmul %424, %426, %cst_416 {dimension_numbers = #tpu.dot_dimension_numbers<[1], [0], [0], [1], [0, 0, 1, 1], [], []>} : vector<256x8xf32>, vector<8x128xf32>, vector<256x128xf32> -> vector<256x128xf32>
    %428 = arith.addf %421, %427 : vector<256x128xf32>
    %429 = vector.broadcast %3 : vector<1x128xf32> to vector<256x128xf32>
    %430 = arith.addf %428, %429 : vector<256x128xf32>
    %cst_417 = arith.constant 0.000000e+00 : f32
    %431 = vector.broadcast %cst_417 : f32 to vector<256x128xf32>
    %432 = arith.maximumf %430, %431 : vector<256x128xf32>
    %433 = vector.shape_cast %432 : vector<256x128xf32> to vector<2x2x4x2x8x128xf32>
    %434 = vector.extract_strided_slice %433 {offsets = [0, 0, 0, 0, 0, 0], sizes = [2, 1, 4, 1, 8, 128], strides = [1, 1, 1, 1, 1, 1]} : vector<2x2x4x2x8x128xf32> to vector<2x1x4x1x8x128xf32>
    %435 = vector.shape_cast %434 : vector<2x1x4x1x8x128xf32> to vector<2x4x8x128xf32>
    %436 = vector.extract_strided_slice %433 {offsets = [0, 0, 0, 1, 0, 0], sizes = [2, 1, 4, 1, 8, 128], strides = [1, 1, 1, 1, 1, 1]} : vector<2x2x4x2x8x128xf32> to vector<2x1x4x1x8x128xf32>
    %437 = vector.shape_cast %436 : vector<2x1x4x1x8x128xf32> to vector<2x4x8x128xf32>
    %438 = arith.maximumf %435, %437 : vector<2x4x8x128xf32>
    %439 = vector.extract_strided_slice %433 {offsets = [0, 1, 0, 0, 0, 0], sizes = [2, 1, 4, 1, 8, 128], strides = [1, 1, 1, 1, 1, 1]} : vector<2x2x4x2x8x128xf32> to vector<2x1x4x1x8x128xf32>
    %440 = vector.shape_cast %439 : vector<2x1x4x1x8x128xf32> to vector<2x4x8x128xf32>
    %441 = vector.extract_strided_slice %433 {offsets = [0, 1, 0, 1, 0, 0], sizes = [2, 1, 4, 1, 8, 128], strides = [1, 1, 1, 1, 1, 1]} : vector<2x2x4x2x8x128xf32> to vector<2x1x4x1x8x128xf32>
    %442 = vector.shape_cast %441 : vector<2x1x4x1x8x128xf32> to vector<2x4x8x128xf32>
    %443 = arith.maximumf %440, %442 : vector<2x4x8x128xf32>
    %444 = arith.maximumf %438, %443 : vector<2x4x8x128xf32>
    %445 = vector.extract_strided_slice %444 {offsets = [0, 0, 0, 0], sizes = [1, 1, 8, 128], strides = [1, 1, 1, 1]} : vector<2x4x8x128xf32> to vector<1x1x8x128xf32>
    %446 = vector.shape_cast %445 : vector<1x1x8x128xf32> to vector<8x128xf32>
    %447 = vector.extract_strided_slice %446 {offsets = [0, 0], sizes = [8, 16], strides = [1, 1]} : vector<8x128xf32> to vector<8x16xf32>
    %c8_418 = arith.constant 8 : index
    %c0_419 = arith.constant 0 : index
    %c0_420 = arith.constant 0 : index
    %448 = vector.load %arg6[%c8_418, %c0_419, %c0_420] : memref<16x16x128xf32, #tpu.memory_space<vmem>>, vector<1x16x128xf32>
    %449 = vector.shape_cast %448 : vector<1x16x128xf32> to vector<16x128xf32>
    %cst_421 = arith.constant dense<0.000000e+00> : vector<8x128xf32>
    %450 = tpu.matmul %447, %449, %cst_421 {dimension_numbers = #tpu.dot_dimension_numbers<[1], [0], [0], [1], [0, 0, 1, 1], [], []>} : vector<8x16xf32>, vector<16x128xf32>, vector<8x128xf32> -> vector<8x128xf32>
    %451 = arith.addf %252, %450 : vector<8x128xf32>
    %452 = vector.extract_strided_slice %444 {offsets = [0, 1, 0, 0], sizes = [1, 1, 8, 128], strides = [1, 1, 1, 1]} : vector<2x4x8x128xf32> to vector<1x1x8x128xf32>
    %453 = vector.shape_cast %452 : vector<1x1x8x128xf32> to vector<8x128xf32>
    %454 = vector.extract_strided_slice %453 {offsets = [0, 0], sizes = [8, 16], strides = [1, 1]} : vector<8x128xf32> to vector<8x16xf32>
    %c9_422 = arith.constant 9 : index
    %c0_423 = arith.constant 0 : index
    %c0_424 = arith.constant 0 : index
    %455 = vector.load %arg6[%c9_422, %c0_423, %c0_424] : memref<16x16x128xf32, #tpu.memory_space<vmem>>, vector<1x16x128xf32>
    %456 = vector.shape_cast %455 : vector<1x16x128xf32> to vector<16x128xf32>
    %cst_425 = arith.constant dense<0.000000e+00> : vector<8x128xf32>
    %457 = tpu.matmul %454, %456, %cst_425 {dimension_numbers = #tpu.dot_dimension_numbers<[1], [0], [0], [1], [0, 0, 1, 1], [], []>} : vector<8x16xf32>, vector<16x128xf32>, vector<8x128xf32> -> vector<8x128xf32>
    %458 = arith.addf %451, %457 : vector<8x128xf32>
    %459 = vector.extract_strided_slice %444 {offsets = [0, 2, 0, 0], sizes = [1, 1, 8, 128], strides = [1, 1, 1, 1]} : vector<2x4x8x128xf32> to vector<1x1x8x128xf32>
    %460 = vector.shape_cast %459 : vector<1x1x8x128xf32> to vector<8x128xf32>
    %461 = vector.extract_strided_slice %460 {offsets = [0, 0], sizes = [8, 16], strides = [1, 1]} : vector<8x128xf32> to vector<8x16xf32>
    %c10_426 = arith.constant 10 : index
    %c0_427 = arith.constant 0 : index
    %c0_428 = arith.constant 0 : index
    %462 = vector.load %arg6[%c10_426, %c0_427, %c0_428] : memref<16x16x128xf32, #tpu.memory_space<vmem>>, vector<1x16x128xf32>
    %463 = vector.shape_cast %462 : vector<1x16x128xf32> to vector<16x128xf32>
    %cst_429 = arith.constant dense<0.000000e+00> : vector<8x128xf32>
    %464 = tpu.matmul %461, %463, %cst_429 {dimension_numbers = #tpu.dot_dimension_numbers<[1], [0], [0], [1], [0, 0, 1, 1], [], []>} : vector<8x16xf32>, vector<16x128xf32>, vector<8x128xf32> -> vector<8x128xf32>
    %465 = arith.addf %458, %464 : vector<8x128xf32>
    %466 = vector.extract_strided_slice %444 {offsets = [0, 3, 0, 0], sizes = [1, 1, 8, 128], strides = [1, 1, 1, 1]} : vector<2x4x8x128xf32> to vector<1x1x8x128xf32>
    %467 = vector.shape_cast %466 : vector<1x1x8x128xf32> to vector<8x128xf32>
    %468 = vector.extract_strided_slice %467 {offsets = [0, 0], sizes = [8, 16], strides = [1, 1]} : vector<8x128xf32> to vector<8x16xf32>
    %c11_430 = arith.constant 11 : index
    %c0_431 = arith.constant 0 : index
    %c0_432 = arith.constant 0 : index
    %469 = vector.load %arg6[%c11_430, %c0_431, %c0_432] : memref<16x16x128xf32, #tpu.memory_space<vmem>>, vector<1x16x128xf32>
    %470 = vector.shape_cast %469 : vector<1x16x128xf32> to vector<16x128xf32>
    %cst_433 = arith.constant dense<0.000000e+00> : vector<8x128xf32>
    %471 = tpu.matmul %468, %470, %cst_433 {dimension_numbers = #tpu.dot_dimension_numbers<[1], [0], [0], [1], [0, 0, 1, 1], [], []>} : vector<8x16xf32>, vector<16x128xf32>, vector<8x128xf32> -> vector<8x128xf32>
    %472 = arith.addf %465, %471 : vector<8x128xf32>
    %473 = vector.extract_strided_slice %444 {offsets = [1, 0, 0, 0], sizes = [1, 1, 8, 128], strides = [1, 1, 1, 1]} : vector<2x4x8x128xf32> to vector<1x1x8x128xf32>
    %474 = vector.shape_cast %473 : vector<1x1x8x128xf32> to vector<8x128xf32>
    %475 = vector.extract_strided_slice %474 {offsets = [0, 0], sizes = [8, 16], strides = [1, 1]} : vector<8x128xf32> to vector<8x16xf32>
    %c12_434 = arith.constant 12 : index
    %c0_435 = arith.constant 0 : index
    %c0_436 = arith.constant 0 : index
    %476 = vector.load %arg6[%c12_434, %c0_435, %c0_436] : memref<16x16x128xf32, #tpu.memory_space<vmem>>, vector<1x16x128xf32>
    %477 = vector.shape_cast %476 : vector<1x16x128xf32> to vector<16x128xf32>
    %cst_437 = arith.constant dense<0.000000e+00> : vector<8x128xf32>
    %478 = tpu.matmul %475, %477, %cst_437 {dimension_numbers = #tpu.dot_dimension_numbers<[1], [0], [0], [1], [0, 0, 1, 1], [], []>} : vector<8x16xf32>, vector<16x128xf32>, vector<8x128xf32> -> vector<8x128xf32>
    %479 = arith.addf %472, %478 : vector<8x128xf32>
    %480 = vector.extract_strided_slice %444 {offsets = [1, 1, 0, 0], sizes = [1, 1, 8, 128], strides = [1, 1, 1, 1]} : vector<2x4x8x128xf32> to vector<1x1x8x128xf32>
    %481 = vector.shape_cast %480 : vector<1x1x8x128xf32> to vector<8x128xf32>
    %482 = vector.extract_strided_slice %481 {offsets = [0, 0], sizes = [8, 16], strides = [1, 1]} : vector<8x128xf32> to vector<8x16xf32>
    %c13_438 = arith.constant 13 : index
    %c0_439 = arith.constant 0 : index
    %c0_440 = arith.constant 0 : index
    %483 = vector.load %arg6[%c13_438, %c0_439, %c0_440] : memref<16x16x128xf32, #tpu.memory_space<vmem>>, vector<1x16x128xf32>
    %484 = vector.shape_cast %483 : vector<1x16x128xf32> to vector<16x128xf32>
    %cst_441 = arith.constant dense<0.000000e+00> : vector<8x128xf32>
    %485 = tpu.matmul %482, %484, %cst_441 {dimension_numbers = #tpu.dot_dimension_numbers<[1], [0], [0], [1], [0, 0, 1, 1], [], []>} : vector<8x16xf32>, vector<16x128xf32>, vector<8x128xf32> -> vector<8x128xf32>
    %486 = arith.addf %479, %485 : vector<8x128xf32>
    %487 = vector.extract_strided_slice %444 {offsets = [1, 2, 0, 0], sizes = [1, 1, 8, 128], strides = [1, 1, 1, 1]} : vector<2x4x8x128xf32> to vector<1x1x8x128xf32>
    %488 = vector.shape_cast %487 : vector<1x1x8x128xf32> to vector<8x128xf32>
    %489 = vector.extract_strided_slice %488 {offsets = [0, 0], sizes = [8, 16], strides = [1, 1]} : vector<8x128xf32> to vector<8x16xf32>
    %c14_442 = arith.constant 14 : index
    %c0_443 = arith.constant 0 : index
    %c0_444 = arith.constant 0 : index
    %490 = vector.load %arg6[%c14_442, %c0_443, %c0_444] : memref<16x16x128xf32, #tpu.memory_space<vmem>>, vector<1x16x128xf32>
    %491 = vector.shape_cast %490 : vector<1x16x128xf32> to vector<16x128xf32>
    %cst_445 = arith.constant dense<0.000000e+00> : vector<8x128xf32>
    %492 = tpu.matmul %489, %491, %cst_445 {dimension_numbers = #tpu.dot_dimension_numbers<[1], [0], [0], [1], [0, 0, 1, 1], [], []>} : vector<8x16xf32>, vector<16x128xf32>, vector<8x128xf32> -> vector<8x128xf32>
    %493 = arith.addf %486, %492 : vector<8x128xf32>
    %494 = vector.extract_strided_slice %444 {offsets = [1, 3, 0, 0], sizes = [1, 1, 8, 128], strides = [1, 1, 1, 1]} : vector<2x4x8x128xf32> to vector<1x1x8x128xf32>
    %495 = vector.shape_cast %494 : vector<1x1x8x128xf32> to vector<8x128xf32>
    %496 = vector.extract_strided_slice %495 {offsets = [0, 0], sizes = [8, 16], strides = [1, 1]} : vector<8x128xf32> to vector<8x16xf32>
    %c15_446 = arith.constant 15 : index
    %c0_447 = arith.constant 0 : index
    %c0_448 = arith.constant 0 : index
    %497 = vector.load %arg6[%c15_446, %c0_447, %c0_448] : memref<16x16x128xf32, #tpu.memory_space<vmem>>, vector<1x16x128xf32>
    %498 = vector.shape_cast %497 : vector<1x16x128xf32> to vector<16x128xf32>
    %cst_449 = arith.constant dense<0.000000e+00> : vector<8x128xf32>
    %499 = tpu.matmul %496, %498, %cst_449 {dimension_numbers = #tpu.dot_dimension_numbers<[1], [0], [0], [1], [0, 0, 1, 1], [], []>} : vector<8x16xf32>, vector<16x128xf32>, vector<8x128xf32> -> vector<8x128xf32>
    %500 = arith.addf %493, %499 : vector<8x128xf32>
    %c0_450 = arith.constant 0 : index
    %c0_451 = arith.constant 0 : index
    %501 = vector.load %arg7[%c0_450, %c0_451] : memref<1x128xf32, #tpu.memory_space<vmem>>, vector<1x128xf32>
    %502 = vector.broadcast %501 : vector<1x128xf32> to vector<8x128xf32>
    %503 = arith.addf %500, %502 : vector<8x128xf32>
    %cst_452 = arith.constant 0.000000e+00 : f32
    %504 = vector.broadcast %cst_452 : f32 to vector<8x128xf32>
    %505 = arith.maximumf %503, %504 : vector<8x128xf32>
    %c0_453 = arith.constant 0 : index
    %c0_454 = arith.constant 0 : index
    %506 = vector.load %arg8[%c0_453, %c0_454] : memref<128x128xf32, #tpu.memory_space<vmem>>, vector<128x128xf32>
    %cst_455 = arith.constant dense<0.000000e+00> : vector<8x128xf32>
    %507 = tpu.matmul %505, %506, %cst_455 {dimension_numbers = #tpu.dot_dimension_numbers<[1], [0], [0], [1], [0, 0, 1, 1], [], []>} : vector<8x128xf32>, vector<128x128xf32>, vector<8x128xf32> -> vector<8x128xf32>
    %c0_456 = arith.constant 0 : index
    %c0_457 = arith.constant 0 : index
    %508 = vector.load %arg9[%c0_456, %c0_457] : memref<1x128xf32, #tpu.memory_space<vmem>>, vector<1x128xf32>
    %509 = vector.broadcast %508 : vector<1x128xf32> to vector<8x128xf32>
    %510 = arith.addf %507, %509 : vector<8x128xf32>
    %c0_458 = arith.constant 0 : index
    %c0_459 = arith.constant 0 : index
    %511 = vector.load %arg10[%c0_458, %c0_459] : memref<128x128xf32, #tpu.memory_space<vmem>>, vector<128x128xf32>
    %cst_460 = arith.constant dense<0.000000e+00> : vector<8x128xf32>
    %512 = tpu.matmul %510, %511, %cst_460 {dimension_numbers = #tpu.dot_dimension_numbers<[1], [0], [0], [1], [0, 0, 1, 1], [], []>} : vector<8x128xf32>, vector<128x128xf32>, vector<8x128xf32> -> vector<8x128xf32>
    %c0_461 = arith.constant 0 : index
    %c0_462 = arith.constant 0 : index
    %513 = vector.load %arg11[%c0_461, %c0_462] : memref<1x128xf32, #tpu.memory_space<vmem>>, vector<1x128xf32>
    %514 = vector.broadcast %513 : vector<1x128xf32> to vector<8x128xf32>
    %515 = arith.addf %512, %514 : vector<8x128xf32>
    %cst_463 = arith.constant 0.000000e+00 : f32
    %516 = vector.broadcast %cst_463 : f32 to vector<8x128xf32>
    %517 = arith.maximumf %515, %516 : vector<8x128xf32>
    %c0_464 = arith.constant 0 : index
    %c0_465 = arith.constant 0 : index
    %518 = vector.load %arg12[%c0_464, %c0_465] : memref<8x128xf32, #tpu.memory_space<vmem>>, vector<8x128xf32>
    tpu.vector_store %arg12[%c0_464, %c0_465], %517 {strides = array<i32>} : memref<8x128xf32, #tpu.memory_space<vmem>>, vector<8x128xf32>,
    return
  }
  func.func @transform_0(%arg0: i32) -> (i32, i32, i32) {
    %c0_i32 = arith.constant 0 : i32
    %c0_i32_0 = arith.constant 0 : i32
    %c0_i32_1 = arith.constant 0 : i32
    %c0_i32_2 = arith.constant 0 : i32
    return %c0_i32, %c0_i32_0, %c0_i32_1 : i32, i32, i32
  }
  func.func @transform_1(%arg0: i32) -> (i32, i32) {
    %c0_i32 = arith.constant 0 : i32
    %c0_i32_0 = arith.constant 0 : i32
    %c0_i32_1 = arith.constant 0 : i32
    return %c0_i32, %c0_i32_0 : i32, i32
  }
  func.func @transform_2(%arg0: i32) -> (i32, i32) {
    %c0_i32 = arith.constant 0 : i32
    %c0_i32_0 = arith.constant 0 : i32
    %c0_i32_1 = arith.constant 0 : i32
    return %c0_i32, %c0_i32_0 : i32, i32
  }
  func.func @transform_3(%arg0: i32) -> (i32, i32, i32) {
    %c0_i32 = arith.constant 0 : i32
    %c0_i32_0 = arith.constant 0 : i32
    %c0_i32_1 = arith.constant 0 : i32
    %c0_i32_2 = arith.constant 0 : i32
    return %c0_i32, %c0_i32_0, %c0_i32_1 : i32, i32, i32
  }
  func.func @transform_4(%arg0: i32) -> (i32, i32) {
    %c0_i32 = arith.constant 0 : i32
    %c0_i32_0 = arith.constant 0 : i32
    %c0_i32_1 = arith.constant 0 : i32
    return %c0_i32, %c0_i32_0 : i32, i32
  }
  func.func @transform_5(%arg0: i32) -> (i32, i32, i32) {
    %c0_i32 = arith.constant 0 : i32
    %c0_i32_0 = arith.constant 0 : i32
    %c0_i32_1 = arith.constant 0 : i32
    %c0_i32_2 = arith.constant 0 : i32
    return %c0_i32, %c0_i32_0, %c0_i32_1 : i32, i32, i32
  }
  func.func @transform_6(%arg0: i32) -> (i32, i32) {
    %c0_i32 = arith.constant 0 : i32
    %c0_i32_0 = arith.constant 0 : i32
    %c0_i32_1 = arith.constant 0 : i32
    return %c0_i32, %c0_i32_0 : i32, i32
  }
  func.func @transform_7(%arg0: i32) -> (i32, i32) {
    %c0_i32 = arith.constant 0 : i32
    %c0_i32_0 = arith.constant 0 : i32
    %c0_i32_1 = arith.constant 0 : i32
    return %c0_i32, %c0_i32_0 : i32, i32
  }
  func.func @transform_8(%arg0: i32) -> (i32, i32) {
    %c0_i32 = arith.constant 0 : i32
    %c0_i32_0 = arith.constant 0 : i32
    %c0_i32_1 = arith.constant 0 : i32
    return %c0_i32, %c0_i32_0 : i32, i32
  }
  func.func @transform_9(%arg0: i32) -> (i32, i32) {
    %c0_i32 = arith.constant 0 : i32
    %c0_i32_0 = arith.constant 0 : i32
    %c0_i32_1 = arith.constant 0 : i32
    return %c0_i32, %c0_i32_0 : i32, i32
  }
  func.func @transform_10(%arg0: i32) -> (i32, i32) {
    %c0_i32 = arith.constant 0 : i32
    %c0_i32_0 = arith.constant 0 : i32
    %c0_i32_1 = arith.constant 0 : i32
    return %c0_i32, %c0_i32_0 : i32, i32
  }
  func.func @transform_11(%arg0: i32) -> (i32, i32) {
    %c0_i32 = arith.constant 0 : i32
    %c0_i32_0 = arith.constant 0 : i32
    %c0_i32_1 = arith.constant 0 : i32
    return %c0_i32, %c0_i32_0 : i32, i32
  }
}

</mosaic_0001>

<bundles_post_ra>
// kernel: recurrent_model_forward.1
= control target key start
LH: loop header
LB: loop body
LE: loop exit
PB: predicated region body
PF: predicated region fallthrough
CT: control target
= control target key end

     0   :  { %s28884_s27 = smov 0   ;;  %s33218_s0 = inlined_call_operand.vmem [shape: bf16[12,384,32], index: 0, kind: input, shape index: {}]   ;;  %s33219_s1 = inlined_call_operand.vmem [shape: bf16[32,128], index: 1, kind: input, shape index: {}]   ;;  %s33220_s2 = inlined_call_operand.vmem [shape: f32[1,128], index: 2, kind: input, shape index: {}]   ;;  %s33221_s3 = inlined_call_operand.vmem [shape: f32[25,8,128], index: 3, kind: input, shape index: {}]   ;;  %s33222_s4 = inlined_call_operand.vmem [shape: f32[1,128], index: 4, kind: input, shape index: {}]   ;;  %s33223_s5 = inlined_call_operand.vmem [shape: f32[16,16,128], index: 5, kind: input, shape index: {}]   ;;  %s33224_s6 = inlined_call_operand.vmem [shape: f32[1,128], index: 6, kind: input, shape index: {}]   ;;  %s33225_s7 = inlined_call_operand.vmem [shape: f32[128,128], index: 7, kind: input, shape index: {}]   ;;  %s33226_s8 = inlined_call_operand.vmem [shape: f32[1,128], index: 8, kind: input, shape index: {}]   ;;  %s33227_s9 = inlined_call_operand.vmem [shape: f32[128,128], index: 9, kind: input, shape index: {}]   ;;  %s33228_s10 = inlined_call_operand.vmem [shape: f32[1,128], index: 10, kind: input, shape index: {}]   ;;  %s33229_s11 = inlined_call_operand.vmem [shape: f32[8,128], index: 11, kind: output, shape index: {}]  }
   0x1   :  { %v28862_v0 = vld [vmem:[%s33219_s1] sm:$0xf]  ;;  %v28867_v1 = vld [vmem:[%s33219_s1 + $0x4] sm:$0xf]  ;;  %v28872_v2 = vld [vmem:[%s33219_s1 + $0x8] sm:$0xf] }
   0x2   :  { %v28877_v3 = vld [vmem:[%s33219_s1 + $0xc] sm:$0xf]  ;;  %v28882_v4 = vld [vmem:[%s33220_s2] ss:$0 sm:$0xff] }
   0x3 LB: > { %v20860_v5 = vcombine.low %v28862_v0, %v28867_v1  ;;  %v20861_v6 = vcombine.low %v28872_v2, %v28877_v3  ;;  %s22560_s1 = smul.u32 192, %s28794_s27  ;;  %vm239_vm0 = vcmask 261120   ;;  %s28794_s27 = sphi %s28884_s27, %s49_s27  }
   0x4   : > { %s621_s30 = smul.u32 96, %s28794_s27  ;;  %s49_s27 = sadd.s32 1, %s28794_s27  }
   0x5   : > { %24319 = vmatprep.subr.bf16.mxu0 %v20860_v5  ;;  %27149 = vmatprep.subr.bf16.mxu1 %v20860_v5  ;;  %s28897_s29 = scalar_lea.vmem %s33218_s0, %s22560_s1  ;;  %p46_p0 = scmp.ge.s32.totalorder %s49_s27, 12  }
   0x6   : > { %24320 = vmatpush3.bf16.msra.mxu0 %v20860_v5  ;;  %27151 = vmatpush3.bf16.msra.mxu1 %v20860_v5  ;;  %v28702_v7 = vld [vmem:[%s28897_s29] sm:$0xff]   ;;  %v28704_v9 = vld [vmem:[%s28897_s29 + $0x8] sm:$0xff]   ;;  %v28706_v11 = vld [vmem:[%s28897_s29 + $0x10] sm:$0xff]   ;;  %s28960_s12 = scalar_lea.vmem [#allocation2], %s621_s30  ;;  %vm704_vm1 = vcmask (%p46_p0), 64512   ;;  %vm28797_vm2 = vmmov (%p46_p0), 0  }
   0x7   : > { %24321 = vmatprep.subr.bf16.mxu0 %v20861_v6  ;;  %27150 = vmatprep.subr.bf16.mxu1 %v20861_v6  ;;  %v28703_v8 = vld [vmem:[%s28897_s29 + $0x60] sm:$0xff]   ;;  %v28705_v10 = vld [vmem:[%s28897_s29 + $0x68] sm:$0xff]   ;;  %v28707_v12 = vld [vmem:[%s28897_s29 + $0x70] sm:$0xff]   ;;  %vm10370_vm3 = vcmask (%p46_p0), 130048  }
   0x8   : > { %24323 = vmatprep.mubr.msk.bf16.mxu0 %vm239_vm0, %v28702_v7  ;;  %24347 = vmatprep.mubr.msk.bf16.mxu1 %vm239_vm0, %v28703_v8  ;;  %v28708_v13 = vld [vmem:[%s28897_s29 + $0x18] sm:$0xff]   ;;  %v28710_v15 = vld [vmem:[%s28897_s29 + $0x20] sm:$0xff]   ;;  %v28712_v17 = vld [vmem:[%s28897_s29 + $0x28] sm:$0xff]  }
   0x9   : > { %v28709_v14 = vld [vmem:[%s28897_s29 + $0x78] sm:$0xff]   ;;  %v28711_v16 = vld [vmem:[%s28897_s29 + $0x80] sm:$0xff]   ;;  %v28713_v18 = vld [vmem:[%s28897_s29 + $0x88] sm:$0xff]  }
   0xa   : > { %24322 = vmatpush3.bf16.msra.mxu0 %v20861_v6  ;;  %27152 = vmatpush3.bf16.msra.mxu1 %v20861_v6  ;;  %v28714_v19 = vld [vmem:[%s28897_s29 + $0x30] sm:$0xff]   ;;  %v28716_v21 = vld [vmem:[%s28897_s29 + $0x38] sm:$0xff]   ;;  %v28718_v23 = vld [vmem:[%s28897_s29 + $0x40] sm:$0xff]  }
   0xb   : > { %v28715_v20 = vld [vmem:[%s28897_s29 + $0x90] sm:$0xff]   ;;  %v28717_v22 = vld [vmem:[%s28897_s29 + $0x98] sm:$0xff]   ;;  %v28719_v24 = vld [vmem:[%s28897_s29 + $0xa0] sm:$0xff]  }
   0xc   : > { %v28720_v25 = vld [vmem:[%s28897_s29 + $0x48] sm:$0xff]   ;;  %v28722_v27 = vld [vmem:[%s28897_s29 + $0x50] sm:$0xff]   ;;  %v28724_v29 = vld [vmem:[%s28897_s29 + $0x58] sm:$0xff]  }
   0xd   : > { %24324 = vmatmul.mubr.msk.bf16.vlgmr.msra.gmra.mrb[0].mxu0 %vm239_vm0, %v28704_v9  ;;  %24348 = vmatmul.mubr.msk.bf16.vlgmr.msra.gmra.mrb[0].mxu1 %vm239_vm0, %v28705_v10  ;;  %v28721_v26 = vld [vmem:[%s28897_s29 + $0xa8] sm:$0xff]   ;;  %v28723_v28 = vld [vmem:[%s28897_s29 + $0xb0] sm:$0xff]   ;;  %v28725_v30 = vld [vmem:[%s28897_s29 + $0xb8] sm:$0xff]  }
   0xe   : > { %24327 = vmatprep.mubr.msk.bf16.mxu0 %vm239_vm0, %v28706_v11  ;;  %24351 = vmatprep.mubr.msk.bf16.mxu1 %vm239_vm0, %v28707_v12 }
  0x15   : > { %24328 = vmatmul.mubr.msk.bf16.gmra.mrb[4].mxu0 %vm239_vm0, %v28708_v13  ;;  %24352 = vmatmul.mubr.msk.bf16.gmra.mrb[4].mxu1 %vm239_vm0, %v28709_v14 }
  0x16   : > { %24331 = vmatprep.mubr.msk.bf16.mxu0 %vm239_vm0, %v28710_v15  ;;  %24355 = vmatprep.mubr.msk.bf16.mxu1 %vm239_vm0, %v28711_v16 }
  0x1d   : > { %24332 = vmatmul.mubr.msk.bf16.gmra.mrb[8].mxu0 %vm239_vm0, %v28712_v17  ;;  %24356 = vmatmul.mubr.msk.bf16.gmra.mrb[8].mxu1 %vm239_vm0, %v28713_v18 }
  0x1e   : > { %24335 = vmatprep.mubr.msk.bf16.mxu0 %vm239_vm0, %v28714_v19  ;;  %24359 = vmatprep.mubr.msk.bf16.mxu1 %vm239_vm0, %v28715_v20 }
  0x25   : > { %24336 = vmatmul.mubr.msk.bf16.gmra.mrb[12].mxu0 %vm239_vm0, %v28716_v21  ;;  %24360 = vmatmul.mubr.msk.bf16.gmra.mrb[12].mxu1 %vm239_vm0, %v28717_v22 }
  0x26   : > { %24339 = vmatprep.mubr.msk.bf16.mxu0 %vm239_vm0, %v28718_v23  ;;  %24363 = vmatprep.mubr.msk.bf16.mxu1 %vm239_vm0, %v28719_v24 }
  0x2d   : > { %24340 = vmatmul.mubr.msk.bf16.gmra.mrb[16].mxu0 %vm239_vm0, %v28720_v25  ;;  %24364 = vmatmul.mubr.msk.bf16.gmra.mrb[16].mxu1 %vm239_vm0, %v28721_v26 }
  0x2e   : > { %24343 = vmatprep.mubr.msk.bf16.mxu0 %vm239_vm0, %v28722_v27  ;;  %24367 = vmatprep.mubr.msk.bf16.mxu1 %vm239_vm0, %v28723_v28 }
  0x35   : > { %24344 = vmatmul.mubr.msk.bf16.gmra.mrb[20].mxu0 %vm239_vm0, %v28724_v29  ;;  %24368 = vmatmul.mubr.msk.bf16.gmra.mrb[20].mxu1 %vm239_vm0, %v28725_v30 }
  0xe0   : > { %v24325_v31 = vpop.f32.mrb[0].mxu0  ;;  %v24349_v32 = vpop.f32.mrb[0].mxu1 }
  0xe1   : > { %v355_v33 = vadd.f32 %v24325_v31, %v28882_v4  ;;  %v451_v34 = vadd.f32 %v24349_v32, %v28882_v4  ;;  %v346_v35 = vpop.f32.mrb[1].mxu0  ;;  %v442_v36 = vpop.f32.mrb[1].mxu1 }
  0xe2   : > { %v347_v37 = vadd.f32 %v28882_v4, %v346_v35  ;;  %v443_v38 = vadd.f32 %v28882_v4, %v442_v36  ;;  %v24326_v39 = vpop.f32.mrb[2].mxu0  ;;  %v24350_v40 = vpop.f32.mrb[2].mxu1 }
  0xe3   : > { %v358_v41 = vadd.f32 %v24326_v39, %v28882_v4  ;;  %v454_v42 = vadd.f32 %v24350_v40, %v28882_v4  ;;  %v349_v43 = vpop.f32.mrb[3].mxu0  ;;  %v445_v44 = vpop.f32.mrb[3].mxu1  ;;  %v539_v47 = vmax.f32 %v355_v33, 0.0  ;;  %v563_v48 = vmax.f32 %v451_v34, 0.0 }
  0xe4   : > { %v350_v45 = vadd.f32 %v28882_v4, %v349_v43  ;;  %v446_v46 = vadd.f32 %v28882_v4, %v445_v44  ;;  %v537_v51 = vmax.f32 %v347_v37, 0.0  ;;  %v561_v52 = vmax.f32 %v443_v38, 0.0 }
  0xe5   : > { %v540_v49 = vmax.f32 %v358_v41, 0.0  ;;  %v564_v50 = vmax.f32 %v454_v42, 0.0 }
  0xe6   : > { %v538_v53 = vmax.f32 %v350_v45, 0.0  ;;  %v562_v54 = vmax.f32 %v446_v46, 0.0 }
  0xe7   : > { %v586_v55 = vmax.f32 %v539_v47, %v540_v49  ;;  %v598_v56 = vmax.f32 %v563_v48, %v564_v50 }
  0xe8   : > { %v585_v57 = vmax.f32 %v537_v51, %v538_v53  ;;  %v597_v58 = vmax.f32 %v561_v52, %v562_v54  ;;  %v24329_v59 = vpop.f32.mrb[4].mxu0  ;;  %v24353_v60 = vpop.f32.mrb[4].mxu1 }
  0xe9   : > { %v610_v61 = vmax.f32 %v586_v55, %v598_v56  ;;  %v371_v62 = vadd.f32 %v24329_v59, %v28882_v4  ;;  %v467_v63 = vadd.f32 %v24353_v60, %v28882_v4  ;;  %v362_v5 = vpop.f32.mrb[5].mxu0  ;;  %v458_v6 = vpop.f32.mrb[5].mxu1 }
  0xea   : > { %v609_v7 = vmax.f32 %v585_v57, %v597_v58  ;;  %v363_v8 = vadd.f32 %v28882_v4, %v362_v5  ;;  %v459_v9 = vadd.f32 %v28882_v4, %v458_v6  ;;  %v24330_v10 = vpop.f32.mrb[6].mxu0  ;;  %v24354_v11 = vpop.f32.mrb[6].mxu1 }
  0xeb   : > { %624 = vst [vmem:[%s28960_s12 + $0x8] sm:$0xff] %v610_v61  ;;  %v374_v12 = vadd.f32 %v24330_v10, %v28882_v4  ;;  %v470_v13 = vadd.f32 %v24354_v11, %v28882_v4  ;;  %v365_v14 = vpop.f32.mrb[7].mxu0  ;;  %v461_v15 = vpop.f32.mrb[7].mxu1  ;;  %v543_v18 = vmax.f32 %v371_v62, 0.0  ;;  %v567_v19 = vmax.f32 %v467_v63, 0.0 }
  0xec   : > { %623 = vst [vmem:[%s28960_s12] sm:$0xff] %v609_v7  ;;  %v366_v16 = vadd.f32 %v28882_v4, %v365_v14  ;;  %v462_v17 = vadd.f32 %v28882_v4, %v461_v15  ;;  %v541_v22 = vmax.f32 %v363_v8, 0.0  ;;  %v565_v23 = vmax.f32 %v459_v9, 0.0 }
  0xed   : > { %v544_v20 = vmax.f32 %v374_v12, 0.0  ;;  %v568_v21 = vmax.f32 %v470_v13, 0.0 }
  0xee   : > { %v542_v24 = vmax.f32 %v366_v16, 0.0  ;;  %v566_v25 = vmax.f32 %v462_v17, 0.0 }
  0xef   : > { %v588_v26 = vmax.f32 %v543_v18, %v544_v20  ;;  %v600_v27 = vmax.f32 %v567_v19, %v568_v21 }
  0xf0   : > { %v587_v28 = vmax.f32 %v541_v22, %v542_v24  ;;  %v599_v29 = vmax.f32 %v565_v23, %v566_v25  ;;  %v24333_v30 = vpop.f32.mrb[8].mxu0  ;;  %v24357_v31 = vpop.f32.mrb[8].mxu1 }
  0xf1   : > { %v612_v32 = vmax.f32 %v588_v26, %v600_v27  ;;  %v387_v33 = vadd.f32 %v24333_v30, %v28882_v4  ;;  %v483_v34 = vadd.f32 %v24357_v31, %v28882_v4  ;;  %v378_v35 = vpop.f32.mrb[9].mxu0  ;;  %v474_v36 = vpop.f32.mrb[9].mxu1 }
  0xf2   : > { %v611_v37 = vmax.f32 %v587_v28, %v599_v29  ;;  %v379_v38 = vadd.f32 %v28882_v4, %v378_v35  ;;  %v475_v39 = vadd.f32 %v28882_v4, %v474_v36  ;;  %v24334_v40 = vpop.f32.mrb[10].mxu0  ;;  %v24358_v41 = vpop.f32.mrb[10].mxu1 }
  0xf3   : > { %626 = vst [vmem:[%s28960_s12 + $0x18] sm:$0xff] %v612_v32  ;;  %v390_v42 = vadd.f32 %v24334_v40, %v28882_v4  ;;  %v486_v43 = vadd.f32 %v24358_v41, %v28882_v4  ;;  %v381_v44 = vpop.f32.mrb[11].mxu0  ;;  %v477_v45 = vpop.f32.mrb[11].mxu1  ;;  %v547_v48 = vmax.f32 %v387_v33, 0.0  ;;  %v571_v49 = vmax.f32 %v483_v34, 0.0 }
  0xf4   : > { %625 = vst [vmem:[%s28960_s12 + $0x10] sm:$0xff] %v611_v37  ;;  %v382_v46 = vadd.f32 %v28882_v4, %v381_v44  ;;  %v478_v47 = vadd.f32 %v28882_v4, %v477_v45  ;;  %v545_v52 = vmax.f32 %v379_v38, 0.0  ;;  %v569_v53 = vmax.f32 %v475_v39, 0.0 }
  0xf5   : > { %v548_v50 = vmax.f32 %v390_v42, 0.0  ;;  %v572_v51 = vmax.f32 %v486_v43, 0.0 }
  0xf6   : > { %v546_v54 = vmax.f32 %v382_v46, 0.0  ;;  %v570_v55 = vmax.f32 %v478_v47, 0.0 }
  0xf7   : > { %v590_v56 = vmax.f32 %v547_v48, %v548_v50  ;;  %v602_v57 = vmax.f32 %v571_v49, %v572_v51 }
  0xf8   : > { %v589_v58 = vmax.f32 %v545_v52, %v546_v54  ;;  %v601_v59 = vmax.f32 %v569_v53, %v570_v55  ;;  %v24337_v60 = vpop.f32.mrb[12].mxu0  ;;  %v24361_v61 = vpop.f32.mrb[12].mxu1 }
  0xf9   : > { %v614_v62 = vmax.f32 %v590_v56, %v602_v57  ;;  %v403_v63 = vadd.f32 %v24337_v60, %v28882_v4  ;;  %v499_v5 = vadd.f32 %v24361_v61, %v28882_v4  ;;  %v394_v6 = vpop.f32.mrb[13].mxu0  ;;  %v490_v7 = vpop.f32.mrb[13].mxu1 }
  0xfa   : > { %v613_v8 = vmax.f32 %v589_v58, %v601_v59  ;;  %v395_v9 = vadd.f32 %v28882_v4, %v394_v6  ;;  %v491_v10 = vadd.f32 %v28882_v4, %v490_v7  ;;  %v24338_v11 = vpop.f32.mrb[14].mxu0  ;;  %v24362_v12 = vpop.f32.mrb[14].mxu1 }
  0xfb   : > { %628 = vst [vmem:[%s28960_s12 + $0x28] sm:$0xff] %v614_v62  ;;  %v406_v13 = vadd.f32 %v24338_v11, %v28882_v4  ;;  %v502_v14 = vadd.f32 %v24362_v12, %v28882_v4  ;;  %v397_v15 = vpop.f32.mrb[15].mxu0  ;;  %v493_v16 = vpop.f32.mrb[15].mxu1  ;;  %v551_v19 = vmax.f32 %v403_v63, 0.0  ;;  %v575_v20 = vmax.f32 %v499_v5, 0.0 }
  0xfc   : > { %627 = vst [vmem:[%s28960_s12 + $0x20] sm:$0xff] %v613_v8  ;;  %v398_v17 = vadd.f32 %v28882_v4, %v397_v15  ;;  %v494_v18 = vadd.f32 %v28882_v4, %v493_v16  ;;  %v549_v23 = vmax.f32 %v395_v9, 0.0  ;;  %v573_v24 = vmax.f32 %v491_v10, 0.0 }
  0xfd   : > { %v552_v21 = vmax.f32 %v406_v13, 0.0  ;;  %v576_v22 = vmax.f32 %v502_v14, 0.0 }
  0xfe   : > { %v550_v25 = vmax.f32 %v398_v17, 0.0  ;;  %v574_v26 = vmax.f32 %v494_v18, 0.0 }
  0xff   : > { %v592_v27 = vmax.f32 %v551_v19, %v552_v21  ;;  %v604_v28 = vmax.f32 %v575_v20, %v576_v22 }
 0x100   : > { %v591_v29 = vmax.f32 %v549_v23, %v550_v25  ;;  %v603_v30 = vmax.f32 %v573_v24, %v574_v26  ;;  %v24341_v31 = vpop.f32.mrb[16].mxu0  ;;  %v24365_v32 = vpop.f32.mrb[16].mxu1 }
 0x101   : > { %v616_v33 = vmax.f32 %v592_v27, %v604_v28  ;;  %v419_v34 = vadd.f32 %v24341_v31, %v28882_v4  ;;  %v515_v35 = vadd.f32 %v24365_v32, %v28882_v4  ;;  %v410_v36 = vpop.f32.mrb[17].mxu0  ;;  %v506_v37 = vpop.f32.mrb[17].mxu1 }
 0x102   : > { %v615_v38 = vmax.f32 %v591_v29, %v603_v30  ;;  %v411_v39 = vadd.f32 %v28882_v4, %v410_v36  ;;  %v507_v40 = vadd.f32 %v28882_v4, %v506_v37  ;;  %v24342_v41 = vpop.f32.mrb[18].mxu0  ;;  %v24366_v42 = vpop.f32.mrb[18].mxu1  ;;  %v668_v37 = vld [vmem:[%s33221_s3] sm:$0xff] (%p46_p0) }
 0x103   : > { %630 = vst [vmem:[%s28960_s12 + $0x38] sm:$0xff] %v616_v33  ;;  %v422_v43 = vadd.f32 %v24342_v41, %v28882_v4  ;;  %v518_v44 = vadd.f32 %v24366_v42, %v28882_v4  ;;  %v413_v45 = vpop.f32.mrb[19].mxu0  ;;  %v509_v46 = vpop.f32.mrb[19].mxu1  ;;  %v555_v49 = vmax.f32 %v419_v34, 0.0  ;;  %v579_v50 = vmax.f32 %v515_v35, 0.0  ;;  %v20886_v34 = vld [vmem:[%s33221_s3 + $0x8] sm:$0xff] (%p46_p0) }
 0x104   : > { %629 = vst [vmem:[%s28960_s12 + $0x30] sm:$0xff] %v615_v38  ;;  %v414_v47 = vadd.f32 %v28882_v4, %v413_v45  ;;  %v510_v48 = vadd.f32 %v28882_v4, %v509_v46  ;;  %v553_v53 = vmax.f32 %v411_v39, 0.0  ;;  %v577_v54 = vmax.f32 %v507_v40, 0.0  ;;  %24371 = vmatprep.subr.mxu0 (%p46_p0), %v20886_v34  ;;  %27153 = vmatprep.subr.mxu1 (%p46_p0), %v20886_v34 }
 0x105   : > { %v556_v51 = vmax.f32 %v422_v43, 0.0  ;;  %v580_v52 = vmax.f32 %v518_v44, 0.0  ;;  %24372 = vmatpush3.msra.mxu0 (%p46_p0), %v20886_v34  ;;  %27154 = vmatpush3.msra.mxu1 (%p46_p0), %v20886_v34  ;;  %v21149_v34 = vld [vmem:[%s33221_s3 + $0x40] sm:$0xff] (%p46_p0) }
 0x106   : > { %v554_v55 = vmax.f32 %v414_v47, 0.0  ;;  %v578_v56 = vmax.f32 %v510_v48, 0.0  ;;  %24421 = vmatprep.subr.mxu0 (%p46_p0), %v668_v37 }
 0x107   : > { %v594_v57 = vmax.f32 %v555_v49, %v556_v51  ;;  %v606_v58 = vmax.f32 %v579_v50, %v580_v52 }
 0x108   : > { %v593_v59 = vmax.f32 %v553_v53, %v554_v55  ;;  %v605_v60 = vmax.f32 %v577_v54, %v578_v56  ;;  %v24345_v61 = vpop.f32.mrb[20].mxu0  ;;  %v24369_v62 = vpop.f32.mrb[20].mxu1 }
 0x109   : > { %v618_v63 = vmax.f32 %v594_v57, %v606_v58  ;;  %v435_v5 = vadd.f32 %v24345_v61, %v28882_v4  ;;  %v531_v6 = vadd.f32 %v24369_v62, %v28882_v4  ;;  %v426_v7 = vpop.f32.mrb[21].mxu0  ;;  %v522_v8 = vpop.f32.mrb[21].mxu1 }
 0x10a   : > { %v617_v9 = vmax.f32 %v593_v59, %v605_v60  ;;  %v427_v10 = vadd.f32 %v28882_v4, %v426_v7  ;;  %v523_v11 = vadd.f32 %v28882_v4, %v522_v8  ;;  %v24346_v12 = vpop.f32.mrb[22].mxu0  ;;  %v24370_v13 = vpop.f32.mrb[22].mxu1  ;;  %v20984_v59 = vld [vmem:[%s33221_s3 + $0x18] sm:$0xff] (%p46_p0) }
 0x10b   : > { %632 = vst [vmem:[%s28960_s12 + $0x48] sm:$0xff] %v618_v63  ;;  %v438_v14 = vadd.f32 %v24346_v12, %v28882_v4  ;;  %v534_v15 = vadd.f32 %v24370_v13, %v28882_v4  ;;  %v429_v16 = vpop.f32.mrb[23].mxu0  ;;  %v525_v17 = vpop.f32.mrb[23].mxu1  ;;  %v559_v20 = vmax.f32 %v435_v5, 0.0  ;;  %v583_v21 = vmax.f32 %v531_v6, 0.0 }
 0x10c   : > { %631 = vst [vmem:[%s28960_s12 + $0x40] sm:$0xff] %v617_v9  ;;  %v430_v18 = vadd.f32 %v28882_v4, %v429_v16  ;;  %v526_v19 = vadd.f32 %v28882_v4, %v525_v17  ;;  %v557_v24 = vmax.f32 %v427_v10, 0.0  ;;  %v581_v25 = vmax.f32 %v523_v11, 0.0  ;;  %v20951_v4 = vld [vmem:[%s33221_s3 + $0x10] sm:$0xff] (%p46_p0)  ;;  %v21017_v9 = vld [vmem:[%s33221_s3 + $0x20] sm:$0xff] (%p46_p0) }
 0x10d   : > { %v560_v22 = vmax.f32 %v438_v14, 0.0  ;;  %v584_v23 = vmax.f32 %v534_v15, 0.0  ;;  %v21050_v15 = vld [vmem:[%s33221_s3 + $0x28] sm:$0xff] (%p46_p0) }
 0x10e   : > { %v558_v26 = vmax.f32 %v430_v18, 0.0  ;;  %v582_v27 = vmax.f32 %v526_v19, 0.0  ;;  %48 = sbr.rel (!%p46_p0) target bundleno = 3 (0x3), region = 156 }
 0x10f   : > { %v596_v28 = vmax.f32 %v559_v20, %v560_v22  ;;  %v608_v29 = vmax.f32 %v583_v21, %v584_v23  ;;  %v21083_v20 = vld [vmem:[%s33221_s3 + $0x30] sm:$0xff] (%p46_p0) }
 0x110   : > { %v595_v30 = vmax.f32 %v557_v24, %v558_v26  ;;  %v607_v31 = vmax.f32 %v581_v25, %v582_v27  ;;  %v21116_v25 = vld [vmem:[%s33221_s3 + $0x38] sm:$0xff] (%p46_p0) }
 0x111   : > { %v620_v32 = vmax.f32 %v596_v28, %v608_v29 }
 0x112   : > { %v619_v33 = vmax.f32 %v595_v30, %v607_v31 }
 0x113   : > { %634 = vst [vmem:[%s28960_s12 + $0x58] sm:$0xff] %v620_v32 }
 0x114   : > { %633 = vst [vmem:[%s28960_s12 + $0x50] sm:$0xff] %v619_v33 }
 0x11b   :  { %v29016_v35 = vld [vmem:[#allocation2 + $0x8] sm:$0xff]  ;;  %v29018_v36 = vld [vmem:[#allocation2 + $0x10] sm:$0xff]  ;;  %v29025_v38 = vld [vmem:[#allocation2 + $0x18] sm:$0xff] }
 0x11c   :  { %24373 = vmatprep.mubr.msk.f32.mxu0 %vm704_vm1, %v29016_v35  ;;  %v29031_v0 = vld [vmem:[#allocation2 + $0x20] sm:$0xff]  ;;  %v29033_v1 = vld [vmem:[#allocation2 + $0x28] sm:$0xff]  ;;  %v29039_v2 = vld [vmem:[#allocation2 + $0x30] sm:$0xff] }
 0x11d   :  { %24374 = vmatmul.mubr.msk.f32.vlgmr.msra.gmra.mrb[0].mxu0 %vm704_vm1, %v29018_v36  ;;  %v29041_v3 = vld [vmem:[#allocation2 + $0x38] sm:$0xff]  ;;  %v29050_v39 = vld [vmem:[#allocation2 + $0x40] sm:$0xff]  ;;  %v29052_v40 = vld [vmem:[#allocation2 + $0x68] sm:$0xff] }
 0x11e   :  { %24422 = vmatpush3.msra.mxu0 %v668_v37  ;;  %24376 = vmatprep.mubr.msk.f32.mxu0 %vm704_vm1, %v29025_v38  ;;  %v29058_v41 = vld [vmem:[#allocation2 + $0x70] sm:$0xff]  ;;  %v29060_v42 = vld [vmem:[#allocation2 + $0x78] sm:$0xff]  ;;  %v29066_v43 = vld [vmem:[#allocation2 + $0x80] sm:$0xff] }
 0x11f   :  { %24471 = vmatprep.subr.mxu0 %v20951_v4  ;;  %v29068_v44 = vld [vmem:[#allocation2 + $0x88] sm:$0xff]  ;;  %v29074_v45 = vld [vmem:[#allocation2 + $0x90] sm:$0xff]  ;;  %v29076_v46 = vld [vmem:[#allocation2 + $0x98] sm:$0xff] }
 0x120   :  { %v29082_v47 = vld [vmem:[#allocation2 + $0xa0] sm:$0xff]  ;;  %v29084_v48 = vld [vmem:[#allocation2 + $0xc8] sm:$0xff]  ;;  %v29090_v49 = vld [vmem:[#allocation2 + $0xd0] sm:$0xff] }
 0x121   :  { %24377 = vmatmul.mubr.msk.f32.gmra.mrb[2].mxu0 %vm704_vm1, %v29031_v0  ;;  %v29092_v50 = vld [vmem:[#allocation2 + $0xd8] sm:$0xff]  ;;  %v29098_v51 = vld [vmem:[#allocation2 + $0xe0] sm:$0xff]  ;;  %v29100_v52 = vld [vmem:[#allocation2 + $0xe8] sm:$0xff] }
 0x122   :  { %24379 = vmatprep.mubr.msk.f32.mxu0 %vm704_vm1, %v29033_v1  ;;  %v29106_v53 = vld [vmem:[#allocation2 + $0xf0] sm:$0xff]  ;;  %v29108_v54 = vld [vmem:[#allocation2 + $0xf8] sm:$0xff]  ;;  %v29114_v55 = vld [vmem:[#allocation2 + $0x100] sm:$0xff] }
 0x123   :  { %v29116_v56 = vld [vmem:[#allocation2 + $0x128] sm:$0xff]  ;;  %v29122_v57 = vld [vmem:[#allocation2 + $0x130] sm:$0xff]  ;;  %v636_v58 = vld [vmem:[#allocation2] sm:$0xff] }
 0x124   :  { %v29142_v60 = vld [vmem:[#allocation2 + $0x60] sm:$0xff]  ;;  %v29188_v63 = vld [vmem:[#allocation2 + $0x138] sm:$0xff]  ;;  %v29196_v6 = vld [vmem:[#allocation2 + $0x148] sm:$0xff] }
 0x125   :  { %24380 = vmatmul.mubr.msk.f32.gmra.mrb[4].mxu0 %vm704_vm1, %v29039_v2  ;;  %v29160_v61 = vld [vmem:[#allocation2 + $0xc0] sm:$0xff]  ;;  %v29198_v7 = vld [vmem:[#allocation2 + $0x150] sm:$0xff]  ;;  %v29204_v8 = vld [vmem:[#allocation2 + $0x158] sm:$0xff] }
 0x126   :  { %24382 = vmatprep.mubr.msk.f32.mxu0 %vm704_vm1, %v29041_v3  ;;  %v29178_v62 = vld [vmem:[#allocation2 + $0x120] sm:$0xff]  ;;  %v29225_v10 = vld [vmem:[#allocation2 + $0x48] sm:$0xff]  ;;  %v1743_v16 = vld [vmem:[#allocation2 + $0x50] sm:$0xff] }
 0x127   :  { %v29190_v5 = vld [vmem:[#allocation2 + $0x140] sm:$0xff]  ;;  %v29243_v11 = vld [vmem:[#allocation2 + $0xa8] sm:$0xff]  ;;  %v29317_v17 = vld [vmem:[#allocation2 + $0xb0] sm:$0xff] }
 0x128   :  { %v29261_v12 = vld [vmem:[#allocation2 + $0x108] sm:$0xff]  ;;  %v29275_v13 = vld [vmem:[#allocation2 + $0x160] sm:$0xff]  ;;  %v29335_v18 = vld [vmem:[#allocation2 + $0x110] sm:$0xff] }
 0x129   :  { %24383 = vmatmul.mubr.msk.f32.gmra.mrb[6].mxu0 %vm704_vm1, %v29050_v39  ;;  %v29281_v14 = vld [vmem:[#allocation2 + $0x168] sm:$0xff]  ;;  %v29353_v19 = vld [vmem:[#allocation2 + $0x170] sm:$0xff]  ;;  %v2131_v21 = vld [vmem:[#allocation2 + $0x58] sm:$0xff] }
 0x12a   :  { %24385 = vmatprep.mubr.msk.f32.mxu0 %vm704_vm1, %v29052_v40  ;;  %v29388_v22 = vld [vmem:[#allocation2 + $0xb8] sm:$0xff]  ;;  %v29477_v26 = vld [vmem:[#allocation2 + $0x180] sm:$0xff]  ;;  %v29483_v27 = vld [vmem:[#allocation2 + $0x188] sm:$0xff] }
 0x12b   :  { %v29406_v23 = vld [vmem:[#allocation2 + $0x118] sm:$0xff]  ;;  %v29485_v28 = vld [vmem:[#allocation2 + $0x190] sm:$0xff]  ;;  %v29493_v30 = vld [vmem:[#allocation2 + $0x1a0] sm:$0xff] }
 0x12c   :  { %v29424_v24 = vld [vmem:[#allocation2 + $0x178] sm:$0xff]  ;;  %v29499_v31 = vld [vmem:[#allocation2 + $0x1a8] sm:$0xff]  ;;  %v29501_v32 = vld [vmem:[#allocation2 + $0x1b0] sm:$0xff] }
 0x12d   :  { %24386 = vmatmul.mubr.msk.f32.gmra.mrb[8].mxu0 %vm704_vm1, %v29058_v41  ;;  %v29491_v29 = vld [vmem:[#allocation2 + $0x198] sm:$0xff]  ;;  %v29645_v37 = vld [vmem:[#allocation2 + $0x1c8] sm:$0xff] }
 0x12e   :  { %24388 = vmatprep.mubr.msk.f32.mxu0 %vm704_vm1, %v29060_v42  ;;  %v29507_v33 = vld [vmem:[#allocation2 + $0x1b8] sm:$0xff] }
 0x131   :  { %24389 = vmatmul.mubr.msk.f32.gmra.mrb[10].mxu0 %vm704_vm1, %v29066_v43 }
 0x132   :  { %24391 = vmatprep.mubr.msk.f32.mxu0 %vm704_vm1, %v29068_v44 }
 0x135   :  { %24392 = vmatmul.mubr.msk.f32.gmra.mrb[12].mxu0 %vm704_vm1, %v29074_v45 }
 0x136   :  { %24394 = vmatprep.mubr.msk.f32.mxu0 %vm704_vm1, %v29076_v46 }
 0x139   :  { %24395 = vmatmul.mubr.msk.f32.gmra.mrb[14].mxu0 %vm704_vm1, %v29082_v47 }
 0x13a   :  { %24397 = vmatprep.mubr.msk.f32.mxu0 %vm704_vm1, %v29084_v48 }
 0x13d   :  { %24398 = vmatmul.mubr.msk.f32.gmra.mrb[16].mxu0 %vm704_vm1, %v29090_v49 }
 0x13e   :  { %24400 = vmatprep.mubr.msk.f32.mxu0 %vm704_vm1, %v29092_v50 }
 0x141   :  { %24401 = vmatmul.mubr.msk.f32.gmra.mrb[18].mxu0 %vm704_vm1, %v29098_v51 }
 0x142   :  { %24403 = vmatprep.mubr.msk.f32.mxu0 %vm704_vm1, %v29100_v52 }
 0x145   :  { %24404 = vmatmul.mubr.msk.f32.gmra.mrb[20].mxu0 %vm704_vm1, %v29106_v53 }
 0x146   :  { %24406 = vmatprep.mubr.msk.f32.mxu0 %vm704_vm1, %v29108_v54 }
 0x149   :  { %24407 = vmatmul.mubr.msk.f32.gmra.mrb[22].mxu0 %vm704_vm1, %v29114_v55 }
 0x14a   :  { %24409 = vmatprep.mubr.msk.f32.mxu0 %vm704_vm1, %v29116_v56 }
 0x14d   :  { %24410 = vmatmul.mubr.msk.f32.gmra.mrb[24].mxu0 %vm704_vm1, %v29122_v57 }
 0x14e   :  { %24423 = vmatprep.mubr.msk.f32.mxu0 %vm704_vm1, %v636_v58  ;;  %v29835_v58 = vld [vmem:[#allocation2 + $0x150] sm:$0xff] }
 0x151   :  { %24424 = vmatmul.mubr.msk.f32.vlgmr.msra.gmra.mrb[0].mxu0 %vm704_vm1, %v29016_v35  ;;  %v29576_v35 = vld [vmem:[#allocation2 + $0x1c0] sm:$0xff] }
 0x152   :  { %24472 = vmatpush3.msra.mxu0 %v20951_v4  ;;  %24426 = vmatprep.mubr.msk.f32.mxu0 %vm704_vm1, %v29018_v36  ;;  %v21248_v4 = vld [vmem:[%s33221_s3 + $0x58] sm:$0xff] }
 0x153   :  { %24521 = vmatprep.subr.mxu0 %v20984_v59 }
 0x155   :  { %24427 = vmatmul.mubr.msk.f32.gmra.mrb[2].mxu0 %vm704_vm1, %v29025_v38 }
 0x156   :  { %24429 = vmatprep.mubr.msk.f32.mxu0 %vm704_vm1, %v29031_v0 }
 0x159   :  { %24430 = vmatmul.mubr.msk.f32.gmra.mrb[4].mxu0 %vm704_vm1, %v29033_v1 }
 0x15a   :  { %24432 = vmatprep.mubr.msk.f32.mxu0 %vm704_vm1, %v29039_v2 }
 0x15d   :  { %24433 = vmatmul.mubr.msk.f32.gmra.mrb[6].mxu0 %vm704_vm1, %v29041_v3 }
 0x15e   :  { %24435 = vmatprep.mubr.msk.f32.mxu0 %vm704_vm1, %v29142_v60 }
 0x161   :  { %24436 = vmatmul.mubr.msk.f32.gmra.mrb[8].mxu0 %vm704_vm1, %v29052_v40 }
 0x162   :  { %24438 = vmatprep.mubr.msk.f32.mxu0 %vm704_vm1, %v29058_v41 }
 0x165   :  { %24439 = vmatmul.mubr.msk.f32.gmra.mrb[10].mxu0 %vm704_vm1, %v29060_v42 }
 0x166   :  { %24441 = vmatprep.mubr.msk.f32.mxu0 %vm704_vm1, %v29066_v43 }
 0x169   :  { %24442 = vmatmul.mubr.msk.f32.gmra.mrb[12].mxu0 %vm704_vm1, %v29068_v44 }
 0x16a   :  { %24444 = vmatprep.mubr.msk.f32.mxu0 %vm704_vm1, %v29074_v45 }
 0x16d   :  { %24445 = vmatmul.mubr.msk.f32.gmra.mrb[14].mxu0 %vm704_vm1, %v29076_v46 }
 0x16e   :  { %24447 = vmatprep.mubr.msk.f32.mxu0 %vm704_vm1, %v29160_v61 }
 0x171   :  { %24448 = vmatmul.mubr.msk.f32.gmra.mrb[16].mxu0 %vm704_vm1, %v29084_v48 }
 0x172   :  { %24450 = vmatprep.mubr.msk.f32.mxu0 %vm704_vm1, %v29090_v49 }
 0x175   :  { %24451 = vmatmul.mubr.msk.f32.gmra.mrb[18].mxu0 %vm704_vm1, %v29092_v50 }
 0x176   :  { %24453 = vmatprep.mubr.msk.f32.mxu0 %vm704_vm1, %v29098_v51 }
 0x179   :  { %24454 = vmatmul.mubr.msk.f32.gmra.mrb[20].mxu0 %vm704_vm1, %v29100_v52 }
 0x17a   :  { %24456 = vmatprep.mubr.msk.f32.mxu0 %vm704_vm1, %v29106_v53 }
 0x17d   :  { %24457 = vmatmul.mubr.msk.f32.gmra.mrb[22].mxu0 %vm704_vm1, %v29108_v54 }
 0x17e   :  { %24459 = vmatprep.mubr.msk.f32.mxu0 %vm704_vm1, %v29178_v62 }
 0x181   :  { %24460 = vmatmul.mubr.msk.f32.gmra.mrb[24].mxu0 %vm704_vm1, %v29116_v56 }
 0x182   :  { %24462 = vmatprep.mubr.msk.f32.mxu0 %vm704_vm1, %v29122_v57 }
 0x185   :  { %24463 = vmatmul.mubr.msk.f32.gmra.mrb[26].mxu0 %vm704_vm1, %v29188_v63 }
 0x186   :  { %24465 = vmatprep.mubr.msk.f32.mxu0 %vm704_vm1, %v29190_v5 }
 0x189   :  { %24466 = vmatmul.mubr.msk.f32.gmra.mrb[28].mxu0 %vm704_vm1, %v29196_v6 }
 0x18a   :  { %24468 = vmatprep.mubr.msk.f32.mxu0 %vm704_vm1, %v29198_v7 }
 0x18d   :  { %24469 = vmatmul.mubr.msk.f32.gmra.mrb[30].mxu0 %vm704_vm1, %v29204_v8 }
 0x18e   :  { %24473 = vmatprep.mubr.msk.f32.mxu0 %vm704_vm1, %v29018_v36  ;;  %v21182_v36 = vld [vmem:[%s33221_s3 + $0x48] sm:$0xff] }
 0x191   :  { %24474 = vmatmul.mubr.msk.f32.vlgmr.msra.gmra.mrb[0].mxu0 %vm704_vm1, %v29025_v38 }
 0x192   :  { %24522 = vmatpush3.msra.mxu0 %v20984_v59  ;;  %24476 = vmatprep.mubr.msk.f32.mxu0 %vm704_vm1, %v29031_v0  ;;  %v29841_v59 = vld [vmem:[#allocation2 + $0x158] sm:$0xff] }
 0x193   :  { %24571 = vmatprep.subr.mxu0 %v21017_v9 }
 0x195   :  { %24477 = vmatmul.mubr.msk.f32.gmra.mrb[2].mxu0 %vm704_vm1, %v29033_v1 }
 0x196   :  { %24479 = vmatprep.mubr.msk.f32.mxu0 %vm704_vm1, %v29039_v2 }
 0x199   :  { %24480 = vmatmul.mubr.msk.f32.gmra.mrb[4].mxu0 %vm704_vm1, %v29041_v3 }
 0x19a   :  { %24482 = vmatprep.mubr.msk.f32.mxu0 %vm704_vm1, %v29050_v39 }
 0x19d   :  { %24483 = vmatmul.mubr.msk.f32.gmra.mrb[6].mxu0 %vm704_vm1, %v29225_v10 }
 0x19e   :  { %24485 = vmatprep.mubr.msk.f32.mxu0 %vm704_vm1, %v29058_v41 }
 0x1a1   :  { %24486 = vmatmul.mubr.msk.f32.gmra.mrb[8].mxu0 %vm704_vm1, %v29060_v42 }
 0x1a2   :  { %24488 = vmatprep.mubr.msk.f32.mxu0 %vm704_vm1, %v29066_v43 }
 0x1a5   :  { %24489 = vmatmul.mubr.msk.f32.gmra.mrb[10].mxu0 %vm704_vm1, %v29068_v44 }
 0x1a6   :  { %24491 = vmatprep.mubr.msk.f32.mxu0 %vm704_vm1, %v29074_v45 }
 0x1a9   :  { %24492 = vmatmul.mubr.msk.f32.gmra.mrb[12].mxu0 %vm704_vm1, %v29076_v46 }
 0x1aa   :  { %24494 = vmatprep.mubr.msk.f32.mxu0 %vm704_vm1, %v29082_v47 }
 0x1ad   :  { %24495 = vmatmul.mubr.msk.f32.gmra.mrb[14].mxu0 %vm704_vm1, %v29243_v11 }
 0x1ae   :  { %24497 = vmatprep.mubr.msk.f32.mxu0 %vm704_vm1, %v29090_v49 }
 0x1b1   :  { %24498 = vmatmul.mubr.msk.f32.gmra.mrb[16].mxu0 %vm704_vm1, %v29092_v50 }
 0x1b2   :  { %24500 = vmatprep.mubr.msk.f32.mxu0 %vm704_vm1, %v29098_v51 }
 0x1b5   :  { %24501 = vmatmul.mubr.msk.f32.gmra.mrb[18].mxu0 %vm704_vm1, %v29100_v52 }
 0x1b6   :  { %24503 = vmatprep.mubr.msk.f32.mxu0 %vm704_vm1, %v29106_v53 }
 0x1b9   :  { %24504 = vmatmul.mubr.msk.f32.gmra.mrb[20].mxu0 %vm704_vm1, %v29108_v54 }
 0x1ba   :  { %24506 = vmatprep.mubr.msk.f32.mxu0 %vm704_vm1, %v29114_v55 }
 0x1bd   :  { %24507 = vmatmul.mubr.msk.f32.gmra.mrb[22].mxu0 %vm704_vm1, %v29261_v12 }
 0x1be   :  { %24509 = vmatprep.mubr.msk.f32.mxu0 %vm704_vm1, %v29122_v57 }
 0x1c1   :  { %24510 = vmatmul.mubr.msk.f32.gmra.mrb[24].mxu0 %vm704_vm1, %v29188_v63 }
 0x1c2   :  { %24512 = vmatprep.mubr.msk.f32.mxu0 %vm704_vm1, %v29190_v5 }
 0x1c5   :  { %24513 = vmatmul.mubr.msk.f32.gmra.mrb[26].mxu0 %vm704_vm1, %v29196_v6 }
 0x1c6   :  { %24515 = vmatprep.mubr.msk.f32.mxu0 %vm704_vm1, %v29198_v7 }
 0x1c9   :  { %24516 = vmatmul.mubr.msk.f32.gmra.mrb[28].mxu0 %vm704_vm1, %v29204_v8 }
 0x1ca   :  { %24518 = vmatprep.mubr.msk.f32.mxu0 %vm704_vm1, %v29275_v13 }
 0x1cd   :  { %24519 = vmatmul.mubr.msk.f32.gmra.mrb[30].mxu0 %vm704_vm1, %v29281_v14 }
 0x1ce   :  { %24523 = vmatprep.mubr.msk.f32.mxu0 %vm704_vm1, %v29025_v38  ;;  %v21215_v38 = vld [vmem:[%s33221_s3 + $0x50] sm:$0xff] }
 0x1d1   :  { %24524 = vmatmul.mubr.msk.f32.vlgmr.msra.gmra.mrb[0].mxu0 %vm704_vm1, %v29031_v0 }
 0x1d2   :  { %24572 = vmatpush3.msra.mxu0 %v21017_v9  ;;  %24526 = vmatprep.mubr.msk.f32.mxu0 %vm704_vm1, %v29033_v1  ;;  %v21314_v9 = vld [vmem:[%s33221_s3 + $0x68] sm:$0xff] }
 0x1d3   :  { %24621 = vmatprep.subr.mxu0 %v21050_v15 }
 0x1d5   :  { %24527 = vmatmul.mubr.msk.f32.gmra.mrb[2].mxu0 %vm704_vm1, %v29039_v2 }
 0x1d6   :  { %24529 = vmatprep.mubr.msk.f32.mxu0 %vm704_vm1, %v29041_v3 }
 0x1d9   :  { %24530 = vmatmul.mubr.msk.f32.gmra.mrb[4].mxu0 %vm704_vm1, %v29050_v39 }
 0x1da   :  { %24532 = vmatprep.mubr.msk.f32.mxu0 %vm704_vm1, %v29225_v10 }
 0x1dd   :  { %24533 = vmatmul.mubr.msk.f32.gmra.mrb[6].mxu0 %vm704_vm1, %v1743_v16 }
 0x1de   :  { %24535 = vmatprep.mubr.msk.f32.mxu0 %vm704_vm1, %v29060_v42 }
 0x1e1   :  { %24536 = vmatmul.mubr.msk.f32.gmra.mrb[8].mxu0 %vm704_vm1, %v29066_v43 }
 0x1e2   :  { %24538 = vmatprep.mubr.msk.f32.mxu0 %vm704_vm1, %v29068_v44 }
 0x1e5   :  { %24539 = vmatmul.mubr.msk.f32.gmra.mrb[10].mxu0 %vm704_vm1, %v29074_v45 }
 0x1e6   :  { %24541 = vmatprep.mubr.msk.f32.mxu0 %vm704_vm1, %v29076_v46 }
 0x1e9   :  { %24542 = vmatmul.mubr.msk.f32.gmra.mrb[12].mxu0 %vm704_vm1, %v29082_v47 }
 0x1ea   :  { %24544 = vmatprep.mubr.msk.f32.mxu0 %vm704_vm1, %v29243_v11 }
 0x1ed   :  { %24545 = vmatmul.mubr.msk.f32.gmra.mrb[14].mxu0 %vm704_vm1, %v29317_v17 }
 0x1ee   :  { %24547 = vmatprep.mubr.msk.f32.mxu0 %vm704_vm1, %v29092_v50 }
 0x1f1   :  { %24548 = vmatmul.mubr.msk.f32.gmra.mrb[16].mxu0 %vm704_vm1, %v29098_v51 }
 0x1f2   :  { %24550 = vmatprep.mubr.msk.f32.mxu0 %vm704_vm1, %v29100_v52 }
 0x1f5   :  { %24551 = vmatmul.mubr.msk.f32.gmra.mrb[18].mxu0 %vm704_vm1, %v29106_v53 }
 0x1f6   :  { %24553 = vmatprep.mubr.msk.f32.mxu0 %vm704_vm1, %v29108_v54 }
 0x1f9   :  { %24554 = vmatmul.mubr.msk.f32.gmra.mrb[20].mxu0 %vm704_vm1, %v29114_v55 }
 0x1fa   :  { %24556 = vmatprep.mubr.msk.f32.mxu0 %vm704_vm1, %v29261_v12 }
 0x1fd   :  { %24557 = vmatmul.mubr.msk.f32.gmra.mrb[22].mxu0 %vm704_vm1, %v29335_v18 }
 0x1fe   :  { %24559 = vmatprep.mubr.msk.f32.mxu0 %vm704_vm1, %v29188_v63 }
 0x201   :  { %24560 = vmatmul.mubr.msk.f32.gmra.mrb[24].mxu0 %vm704_vm1, %v29190_v5 }
 0x202   :  { %24562 = vmatprep.mubr.msk.f32.mxu0 %vm704_vm1, %v29196_v6 }
 0x205   :  { %24563 = vmatmul.mubr.msk.f32.gmra.mrb[26].mxu0 %vm704_vm1, %v29198_v7 }
 0x206   :  { %24565 = vmatprep.mubr.msk.f32.mxu0 %vm704_vm1, %v29204_v8 }
 0x209   :  { %24566 = vmatmul.mubr.msk.f32.gmra.mrb[28].mxu0 %vm704_vm1, %v29275_v13 }
 0x20a   :  { %24568 = vmatprep.mubr.msk.f32.mxu0 %vm704_vm1, %v29281_v14 }
 0x20d   :  { %24569 = vmatmul.mubr.msk.f32.gmra.mrb[30].mxu0 %vm704_vm1, %v29353_v19 }
 0x20e   :  { %24573 = vmatprep.mubr.msk.f32.mxu0 %vm704_vm1, %v29031_v0  ;;  %v29714_v0 = vld [vmem:[#allocation2 + $0x1d0] sm:$0xff] }
 0x211   :  { %24574 = vmatmul.mubr.msk.f32.vlgmr.msra.gmra.mrb[0].mxu0 %vm704_vm1, %v29033_v1  ;;  %v4064_v1 = vld [vmem:[#allocation2 + $0x80] sm:$0xff] }
 0x212   :  { %24622 = vmatpush3.msra.mxu0 %v21050_v15  ;;  %24576 = vmatprep.mubr.msk.f32.mxu0 %vm704_vm1, %v29039_v2  ;;  %v4065_v2 = vld [vmem:[#allocation2 + $0x88] sm:$0xff] }
 0x213   :  { %24671 = vmatprep.subr.mxu0 %v21083_v20  ;;  %v30032_v15 = vld [vmem:[#allocation2 + $0x228] sm:$0xff] }
 0x215   :  { %24577 = vmatmul.mubr.msk.f32.gmra.mrb[2].mxu0 %vm704_vm1, %v29041_v3  ;;  %v4066_v3 = vld [vmem:[#allocation2 + $0x90] sm:$0xff] }
 0x216   :  { %24579 = vmatprep.mubr.msk.f32.mxu0 %vm704_vm1, %v29050_v39  ;;  %v4067_v39 = vld [vmem:[#allocation2 + $0x98] sm:$0xff] }
 0x219   :  { %24580 = vmatmul.mubr.msk.f32.gmra.mrb[4].mxu0 %vm704_vm1, %v29225_v10  ;;  %v29925_v10 = vld [vmem:[#allocation2 + $0x160] sm:$0xff] }
 0x21a   :  { %24582 = vmatprep.mubr.msk.f32.mxu0 %vm704_vm1, %v1743_v16  ;;  %v21380_v16 = vld [vmem:[%s33221_s3 + $0x78] sm:$0xff] }
 0x21d   :  { %24583 = vmatmul.mubr.msk.f32.gmra.mrb[6].mxu0 %vm704_vm1, %v2131_v21  ;;  %v30078_v21 = vld [vmem:[#allocation2 + $0x1a8] sm:$0xff] }
 0x21e   :  { %24585 = vmatprep.mubr.msk.f32.mxu0 %vm704_vm1, %v29066_v43 }
 0x221   :  { %24586 = vmatmul.mubr.msk.f32.gmra.mrb[8].mxu0 %vm704_vm1, %v29068_v44 }
 0x222   :  { %24588 = vmatprep.mubr.msk.f32.mxu0 %vm704_vm1, %v29074_v45 }
 0x225   :  { %24589 = vmatmul.mubr.msk.f32.gmra.mrb[10].mxu0 %vm704_vm1, %v29076_v46 }
 0x226   :  { %24591 = vmatprep.mubr.msk.f32.mxu0 %vm704_vm1, %v29082_v47 }
 0x229   :  { %24592 = vmatmul.mubr.msk.f32.gmra.mrb[12].mxu0 %vm704_vm1, %v29243_v11 }
 0x22a   :  { %24594 = vmatprep.mubr.msk.f32.mxu0 %vm704_vm1, %v29317_v17 }
 0x22d   :  { %24595 = vmatmul.mubr.msk.f32.gmra.mrb[14].mxu0 %vm704_vm1, %v29388_v22 }
 0x22e   :  { %24597 = vmatprep.mubr.msk.f32.mxu0 %vm704_vm1, %v29098_v51 }
 0x231   :  { %24598 = vmatmul.mubr.msk.f32.gmra.mrb[16].mxu0 %vm704_vm1, %v29100_v52 }
 0x232   :  { %24600 = vmatprep.mubr.msk.f32.mxu0 %vm704_vm1, %v29106_v53 }
 0x235   :  { %24601 = vmatmul.mubr.msk.f32.gmra.mrb[18].mxu0 %vm704_vm1, %v29108_v54 }
 0x236   :  { %24603 = vmatprep.mubr.msk.f32.mxu0 %vm704_vm1, %v29114_v55 }
 0x239   :  { %24604 = vmatmul.mubr.msk.f32.gmra.mrb[20].mxu0 %vm704_vm1, %v29261_v12 }
 0x23a   :  { %24606 = vmatprep.mubr.msk.f32.mxu0 %vm704_vm1, %v29335_v18 }
 0x23d   :  { %24607 = vmatmul.mubr.msk.f32.gmra.mrb[22].mxu0 %vm704_vm1, %v29406_v23 }
 0x23e   :  { %24609 = vmatprep.mubr.msk.f32.mxu0 %vm704_vm1, %v29190_v5 }
 0x241   :  { %24610 = vmatmul.mubr.msk.f32.gmra.mrb[24].mxu0 %vm704_vm1, %v29196_v6 }
 0x242   :  { %24612 = vmatprep.mubr.msk.f32.mxu0 %vm704_vm1, %v29198_v7 }
 0x245   :  { %24613 = vmatmul.mubr.msk.f32.gmra.mrb[26].mxu0 %vm704_vm1, %v29204_v8 }
 0x246   :  { %24615 = vmatprep.mubr.msk.f32.mxu0 %vm704_vm1, %v29275_v13 }
 0x249   :  { %24616 = vmatmul.mubr.msk.f32.gmra.mrb[28].mxu0 %vm704_vm1, %v29281_v14 }
 0x24a   :  { %24618 = vmatprep.mubr.msk.f32.mxu0 %vm704_vm1, %v29353_v19 }
 0x24d   :  { %24619 = vmatmul.mubr.msk.f32.gmra.mrb[30].mxu0 %vm704_vm1, %v29424_v24 }
 0x24e   :  { %24623 = vmatprep.mubr.msk.f32.mxu0 %vm704_vm1, %v29142_v60  ;;  %v29859_v60 = vld [vmem:[#allocation2 + $0x1e0] sm:$0xff] }
 0x251   :  { %24624 = vmatmul.mubr.msk.f32.vlgmr.msra.gmra.mrb[0].mxu0 %vm704_vm1, %v29052_v40 }
 0x252   :  { %24672 = vmatpush3.msra.mxu0 %v21083_v20  ;;  %24626 = vmatprep.mubr.msk.f32.mxu0 %vm704_vm1, %v29058_v41  ;;  %v30076_v20 = vld [vmem:[#allocation2 + $0x1a0] sm:$0xff] }
 0x253   :  { %24721 = vmatprep.subr.mxu0 %v21116_v25 }
 0x255   :  { %24627 = vmatmul.mubr.msk.f32.gmra.mrb[2].mxu0 %vm704_vm1, %v29060_v42 }
 0x256   :  { %24629 = vmatprep.mubr.msk.f32.mxu0 %vm704_vm1, %v29066_v43 }
 0x259   :  { %24630 = vmatmul.mubr.msk.f32.gmra.mrb[4].mxu0 %vm704_vm1, %v29068_v44 }
 0x25a   :  { %24632 = vmatprep.mubr.msk.f32.mxu0 %vm704_vm1, %v29074_v45 }
 0x25d   :  { %24633 = vmatmul.mubr.msk.f32.gmra.mrb[6].mxu0 %vm704_vm1, %v29076_v46 }
 0x25e   :  { %24635 = vmatprep.mubr.msk.f32.mxu0 %vm704_vm1, %v29160_v61  ;;  %v29865_v61 = vld [vmem:[#allocation2 + $0x1e8] sm:$0xff] }
 0x261   :  { %24636 = vmatmul.mubr.msk.f32.gmra.mrb[8].mxu0 %vm704_vm1, %v29084_v48 }
 0x262   :  { %24638 = vmatprep.mubr.msk.f32.mxu0 %vm704_vm1, %v29090_v49 }
 0x265   :  { %24639 = vmatmul.mubr.msk.f32.gmra.mrb[10].mxu0 %vm704_vm1, %v29092_v50 }
 0x266   :  { %24641 = vmatprep.mubr.msk.f32.mxu0 %vm704_vm1, %v29098_v51 }
 0x269   :  { %24642 = vmatmul.mubr.msk.f32.gmra.mrb[12].mxu0 %vm704_vm1, %v29100_v52 }
 0x26a   :  { %24644 = vmatprep.mubr.msk.f32.mxu0 %vm704_vm1, %v29106_v53 }
 0x26d   :  { %24645 = vmatmul.mubr.msk.f32.gmra.mrb[14].mxu0 %vm704_vm1, %v29108_v54 }
 0x26e   :  { %24647 = vmatprep.mubr.msk.f32.mxu0 %vm704_vm1, %v29178_v62  ;;  %v29867_v62 = vld [vmem:[#allocation2 + $0x1f0] sm:$0xff] }
 0x271   :  { %24648 = vmatmul.mubr.msk.f32.gmra.mrb[16].mxu0 %vm704_vm1, %v29116_v56 }
 0x272   :  { %24650 = vmatprep.mubr.msk.f32.mxu0 %vm704_vm1, %v29122_v57 }
 0x275   :  { %24651 = vmatmul.mubr.msk.f32.gmra.mrb[18].mxu0 %vm704_vm1, %v29188_v63 }
 0x276   :  { %24653 = vmatprep.mubr.msk.f32.mxu0 %vm704_vm1, %v29190_v5 }
 0x279   :  { %24654 = vmatmul.mubr.msk.f32.gmra.mrb[20].mxu0 %vm704_vm1, %v29196_v6 }
 0x27a   :  { %24656 = vmatprep.mubr.msk.f32.mxu0 %vm704_vm1, %v29198_v7 }
 0x27d   :  { %24657 = vmatmul.mubr.msk.f32.gmra.mrb[22].mxu0 %vm704_vm1, %v29204_v8 }
 0x27e   :  { %24659 = vmatprep.mubr.msk.f32.mxu0 %vm704_vm1, %v29477_v26 }
 0x281   :  { %24660 = vmatmul.mubr.msk.f32.gmra.mrb[24].mxu0 %vm704_vm1, %v29483_v27 }
 0x282   :  { %24662 = vmatprep.mubr.msk.f32.mxu0 %vm704_vm1, %v29485_v28 }
 0x285   :  { %24663 = vmatmul.mubr.msk.f32.gmra.mrb[26].mxu0 %vm704_vm1, %v29491_v29 }
 0x286   :  { %24665 = vmatprep.mubr.msk.f32.mxu0 %vm704_vm1, %v29493_v30 }
 0x289   :  { %24666 = vmatmul.mubr.msk.f32.gmra.mrb[28].mxu0 %vm704_vm1, %v29499_v31 }
 0x28a   :  { %24668 = vmatprep.mubr.msk.f32.mxu0 %vm704_vm1, %v29501_v32 }
 0x28d   :  { %24669 = vmatmul.mubr.msk.f32.gmra.mrb[30].mxu0 %vm704_vm1, %v29507_v33 }
 0x28e   :  { %24673 = vmatprep.mubr.msk.f32.mxu0 %vm704_vm1, %v29052_v40  ;;  %v4068_v40 = vld [vmem:[#allocation2 + $0xa0] sm:$0xff] }
 0x291   :  { %24674 = vmatmul.mubr.msk.f32.vlgmr.msra.gmra.mrb[0].mxu0 %vm704_vm1, %v29058_v41 }
 0x292   :  { %24722 = vmatpush3.msra.mxu0 %v21116_v25  ;;  %24676 = vmatprep.mubr.msk.f32.mxu0 %vm704_vm1, %v29060_v42  ;;  %v21413_v25 = vld [vmem:[%s33221_s3 + $0x80] sm:$0xff] }
 0x293   :  { %24771 = vmatprep.subr.mxu0 %v21149_v34 }
 0x295   :  { %24677 = vmatmul.mubr.msk.f32.gmra.mrb[2].mxu0 %vm704_vm1, %v29066_v43 }
 0x296   :  { %24679 = vmatprep.mubr.msk.f32.mxu0 %vm704_vm1, %v29068_v44 }
 0x299   :  { %24680 = vmatmul.mubr.msk.f32.gmra.mrb[4].mxu0 %vm704_vm1, %v29074_v45 }
 0x29a   :  { %24682 = vmatprep.mubr.msk.f32.mxu0 %vm704_vm1, %v29076_v46 }
 0x29d   :  { %24683 = vmatmul.mubr.msk.f32.gmra.mrb[6].mxu0 %vm704_vm1, %v29082_v47 }
 0x29e   :  { %24685 = vmatprep.mubr.msk.f32.mxu0 %vm704_vm1, %v29084_v48  ;;  %v4453_v48 = vld [vmem:[#allocation2 + $0xc8] sm:$0xff] }
 0x2a1   :  { %24686 = vmatmul.mubr.msk.f32.gmra.mrb[8].mxu0 %vm704_vm1, %v29090_v49 }
 0x2a2   :  { %24688 = vmatprep.mubr.msk.f32.mxu0 %vm704_vm1, %v29092_v50 }
 0x2a5   :  { %24689 = vmatmul.mubr.msk.f32.gmra.mrb[10].mxu0 %vm704_vm1, %v29098_v51 }
 0x2a6   :  { %24691 = vmatprep.mubr.msk.f32.mxu0 %vm704_vm1, %v29100_v52 }
 0x2a9   :  { %24692 = vmatmul.mubr.msk.f32.gmra.mrb[12].mxu0 %vm704_vm1, %v29106_v53 }
 0x2aa   :  { %24694 = vmatprep.mubr.msk.f32.mxu0 %vm704_vm1, %v29108_v54 }
 0x2ad   :  { %24695 = vmatmul.mubr.msk.f32.gmra.mrb[14].mxu0 %vm704_vm1, %v29114_v55 }
 0x2ae   :  { %24697 = vmatprep.mubr.msk.f32.mxu0 %vm704_vm1, %v29116_v56  ;;  %v29827_v56 = vld [vmem:[#allocation2 + $0x140] sm:$0xff] }
 0x2b1   :  { %24698 = vmatmul.mubr.msk.f32.gmra.mrb[16].mxu0 %vm704_vm1, %v29122_v57 }
 0x2b2   :  { %24700 = vmatprep.mubr.msk.f32.mxu0 %vm704_vm1, %v29188_v63 }
 0x2b5   :  { %24701 = vmatmul.mubr.msk.f32.gmra.mrb[18].mxu0 %vm704_vm1, %v29190_v5 }
 0x2b6   :  { %24703 = vmatprep.mubr.msk.f32.mxu0 %vm704_vm1, %v29196_v6 }
 0x2b9   :  { %24704 = vmatmul.mubr.msk.f32.gmra.mrb[20].mxu0 %vm704_vm1, %v29198_v7 }
 0x2ba   :  { %24706 = vmatprep.mubr.msk.f32.mxu0 %vm704_vm1, %v29204_v8 }
 0x2bd   :  { %24707 = vmatmul.mubr.msk.f32.gmra.mrb[22].mxu0 %vm704_vm1, %v29275_v13 }
 0x2be   :  { %24709 = vmatprep.mubr.msk.f32.mxu0 %vm704_vm1, %v29483_v27 }
 0x2c1   :  { %24710 = vmatmul.mubr.msk.f32.gmra.mrb[24].mxu0 %vm704_vm1, %v29485_v28 }
 0x2c2   :  { %24712 = vmatprep.mubr.msk.f32.mxu0 %vm704_vm1, %v29491_v29 }
 0x2c5   :  { %24713 = vmatmul.mubr.msk.f32.gmra.mrb[26].mxu0 %vm704_vm1, %v29493_v30 }
 0x2c6   :  { %24715 = vmatprep.mubr.msk.f32.mxu0 %vm704_vm1, %v29499_v31 }
 0x2c9   :  { %24716 = vmatmul.mubr.msk.f32.gmra.mrb[28].mxu0 %vm704_vm1, %v29501_v32 }
 0x2ca   :  { %24718 = vmatprep.mubr.msk.f32.mxu0 %vm704_vm1, %v29507_v33 }
 0x2cd   :  { %24719 = vmatmul.mubr.msk.f32.gmra.mrb[30].mxu0 %vm704_vm1, %v29576_v35 }
 0x2ce   :  { %24723 = vmatprep.mubr.msk.f32.mxu0 %vm704_vm1, %v29058_v41  ;;  %v29730_v41 = vld [vmem:[#allocation2 + $0xe0] sm:$0xff] }
 0x2d1   :  { %24724 = vmatmul.mubr.msk.f32.vlgmr.msra.gmra.mrb[0].mxu0 %vm704_vm1, %v29060_v42 }
 0x2d2   :  { %24772 = vmatpush3.msra.mxu0 %v21149_v34  ;;  %24726 = vmatprep.mubr.msk.f32.mxu0 %vm704_vm1, %v29066_v43  ;;  %v30242_v34 = vld [vmem:[#allocation2 + $0x240] sm:$0xff] }
 0x2d3   :  { %24821 = vmatprep.subr.mxu0 %v21182_v36 }
 0x2d5   :  { %24727 = vmatmul.mubr.msk.f32.gmra.mrb[2].mxu0 %vm704_vm1, %v29068_v44 }
 0x2d6   :  { %24729 = vmatprep.mubr.msk.f32.mxu0 %vm704_vm1, %v29074_v45 }
 0x2d9   :  { %24730 = vmatmul.mubr.msk.f32.gmra.mrb[4].mxu0 %vm704_vm1, %v29076_v46 }
 0x2da   :  { %24732 = vmatprep.mubr.msk.f32.mxu0 %vm704_vm1, %v29082_v47 }
 0x2dd   :  { %24733 = vmatmul.mubr.msk.f32.gmra.mrb[6].mxu0 %vm704_vm1, %v29243_v11 }
 0x2de   :  { %24735 = vmatprep.mubr.msk.f32.mxu0 %vm704_vm1, %v29090_v49  ;;  %v29793_v49 = vld [vmem:[#allocation2 + $0xd0] sm:$0xff] }
 0x2e1   :  { %24736 = vmatmul.mubr.msk.f32.gmra.mrb[8].mxu0 %vm704_vm1, %v29092_v50 }
 0x2e2   :  { %24738 = vmatprep.mubr.msk.f32.mxu0 %vm704_vm1, %v29098_v51 }
 0x2e5   :  { %24739 = vmatmul.mubr.msk.f32.gmra.mrb[10].mxu0 %vm704_vm1, %v29100_v52 }
 0x2e6   :  { %24741 = vmatprep.mubr.msk.f32.mxu0 %vm704_vm1, %v29106_v53 }
 0x2e9   :  { %24742 = vmatmul.mubr.msk.f32.gmra.mrb[12].mxu0 %vm704_vm1, %v29108_v54 }
 0x2ea   :  { %24744 = vmatprep.mubr.msk.f32.mxu0 %vm704_vm1, %v29114_v55 }
 0x2ed   :  { %24745 = vmatmul.mubr.msk.f32.gmra.mrb[14].mxu0 %vm704_vm1, %v29261_v12 }
 0x2ee   :  { %24747 = vmatprep.mubr.msk.f32.mxu0 %vm704_vm1, %v29122_v57  ;;  %v29833_v57 = vld [vmem:[#allocation2 + $0x148] sm:$0xff] }
 0x2f1   :  { %24748 = vmatmul.mubr.msk.f32.gmra.mrb[16].mxu0 %vm704_vm1, %v29188_v63 }
 0x2f2   :  { %24750 = vmatprep.mubr.msk.f32.mxu0 %vm704_vm1, %v29190_v5 }
 0x2f5   :  { %24751 = vmatmul.mubr.msk.f32.gmra.mrb[18].mxu0 %vm704_vm1, %v29196_v6 }
 0x2f6   :  { %24753 = vmatprep.mubr.msk.f32.mxu0 %vm704_vm1, %v29198_v7 }
 0x2f9   :  { %24754 = vmatmul.mubr.msk.f32.gmra.mrb[20].mxu0 %vm704_vm1, %v29204_v8 }
 0x2fa   :  { %24756 = vmatprep.mubr.msk.f32.mxu0 %vm704_vm1, %v29275_v13 }
 0x2fd   :  { %24757 = vmatmul.mubr.msk.f32.gmra.mrb[22].mxu0 %vm704_vm1, %v29281_v14 }
 0x2fe   :  { %24759 = vmatprep.mubr.msk.f32.mxu0 %vm704_vm1, %v29485_v28 }
 0x301   :  { %24760 = vmatmul.mubr.msk.f32.gmra.mrb[24].mxu0 %vm704_vm1, %v29491_v29 }
 0x302   :  { %24762 = vmatprep.mubr.msk.f32.mxu0 %vm704_vm1, %v29493_v30 }
 0x305   :  { %24763 = vmatmul.mubr.msk.f32.gmra.mrb[26].mxu0 %vm704_vm1, %v29499_v31 }
 0x306   :  { %24765 = vmatprep.mubr.msk.f32.mxu0 %vm704_vm1, %v29501_v32 }
 0x309   :  { %24766 = vmatmul.mubr.msk.f32.gmra.mrb[28].mxu0 %vm704_vm1, %v29507_v33 }
 0x30a   :  { %24768 = vmatprep.mubr.msk.f32.mxu0 %vm704_vm1, %v29576_v35 }
 0x30d   :  { %24769 = vmatmul.mubr.msk.f32.gmra.mrb[30].mxu0 %vm704_vm1, %v29645_v37 }
 0x30e   :  { %24773 = vmatprep.mubr.msk.f32.mxu0 %vm704_vm1, %v29060_v42  ;;  %v29736_v42 = vld [vmem:[#allocation2 + $0xe8] sm:$0xff] }
 0x311   :  { %24774 = vmatmul.mubr.msk.f32.vlgmr.msra.gmra.mrb[0].mxu0 %vm704_vm1, %v29066_v43  ;;  %v29738_v43 = vld [vmem:[#allocation2 + $0xf0] sm:$0xff] }
 0x312   :  { %24822 = vmatpush3.msra.mxu0 %v21182_v36  ;;  %24776 = vmatprep.mubr.msk.f32.mxu0 %vm704_vm1, %v29068_v44  ;;  %v29744_v44 = vld [vmem:[#allocation2 + $0xf8] sm:$0xff]  ;;  %v30250_v36 = vld [vmem:[#allocation2 + $0x250] sm:$0xff] }
 0x313   :  { %24871 = vmatprep.subr.mxu0 %v21215_v38 }
 0x315   :  { %24777 = vmatmul.mubr.msk.f32.gmra.mrb[2].mxu0 %vm704_vm1, %v29074_v45  ;;  %v29746_v45 = vld [vmem:[#allocation2 + $0x100] sm:$0xff] }
 0x316   :  { %24779 = vmatprep.mubr.msk.f32.mxu0 %vm704_vm1, %v29076_v46  ;;  %v29788_v46 = vld [vmem:[#allocation2 + $0x1d8] sm:$0xff] }
 0x319   :  { %24780 = vmatmul.mubr.msk.f32.gmra.mrb[4].mxu0 %vm704_vm1, %v29082_v47  ;;  %v4452_v47 = vld [vmem:[#allocation2 + $0xc0] sm:$0xff] }
 0x31a   :  { %24782 = vmatprep.mubr.msk.f32.mxu0 %vm704_vm1, %v29243_v11 }
 0x31d   :  { %24783 = vmatmul.mubr.msk.f32.gmra.mrb[6].mxu0 %vm704_vm1, %v29317_v17 }
 0x31e   :  { %24785 = vmatprep.mubr.msk.f32.mxu0 %vm704_vm1, %v29092_v50  ;;  %v21281_v50 = vld [vmem:[%s33221_s3 + $0x60] sm:$0xff] }
 0x321   :  { %24786 = vmatmul.mubr.msk.f32.gmra.mrb[8].mxu0 %vm704_vm1, %v29098_v51  ;;  %v29801_v51 = vld [vmem:[#allocation2 + $0xd8] sm:$0xff] }
 0x322   :  { %24788 = vmatprep.mubr.msk.f32.mxu0 %vm704_vm1, %v29100_v52  ;;  %v29811_v52 = vld [vmem:[#allocation2 + $0x120] sm:$0xff] }
 0x325   :  { %24789 = vmatmul.mubr.msk.f32.gmra.mrb[10].mxu0 %vm704_vm1, %v29106_v53  ;;  %v29817_v53 = vld [vmem:[#allocation2 + $0x128] sm:$0xff] }
 0x326   :  { %24791 = vmatprep.mubr.msk.f32.mxu0 %vm704_vm1, %v29108_v54  ;;  %v29819_v54 = vld [vmem:[#allocation2 + $0x130] sm:$0xff] }
 0x329   :  { %24792 = vmatmul.mubr.msk.f32.gmra.mrb[12].mxu0 %vm704_vm1, %v29114_v55  ;;  %v29825_v55 = vld [vmem:[#allocation2 + $0x138] sm:$0xff] }
 0x32a   :  { %24794 = vmatprep.mubr.msk.f32.mxu0 %vm704_vm1, %v29261_v12 }
 0x32d   :  { %24795 = vmatmul.mubr.msk.f32.gmra.mrb[14].mxu0 %vm704_vm1, %v29335_v18 }
 0x32e   :  { %24797 = vmatprep.mubr.msk.f32.mxu0 %vm704_vm1, %v29188_v63  ;;  %v29873_v63 = vld [vmem:[#allocation2 + $0x1f8] sm:$0xff] }
 0x331   :  { %24798 = vmatmul.mubr.msk.f32.gmra.mrb[16].mxu0 %vm704_vm1, %v29190_v5 }
 0x332   :  { %24800 = vmatprep.mubr.msk.f32.mxu0 %vm704_vm1, %v29196_v6 }
 0x335   :  { %24801 = vmatmul.mubr.msk.f32.gmra.mrb[18].mxu0 %vm704_vm1, %v29198_v7 }
 0x336   :  { %24803 = vmatprep.mubr.msk.f32.mxu0 %vm704_vm1, %v29204_v8 }
 0x339   :  { %24804 = vmatmul.mubr.msk.f32.gmra.mrb[20].mxu0 %vm704_vm1, %v29275_v13 }
 0x33a   :  { %24806 = vmatprep.mubr.msk.f32.mxu0 %vm704_vm1, %v29281_v14 }
 0x33d   :  { %24807 = vmatmul.mubr.msk.f32.gmra.mrb[22].mxu0 %vm704_vm1, %v29353_v19 }
 0x33e   :  { %24809 = vmatprep.mubr.msk.f32.mxu0 %vm704_vm1, %v29491_v29 }
 0x341   :  { %24810 = vmatmul.mubr.msk.f32.gmra.mrb[24].mxu0 %vm704_vm1, %v29493_v30 }
 0x342   :  { %24812 = vmatprep.mubr.msk.f32.mxu0 %vm704_vm1, %v29499_v31 }
 0x345   :  { %24813 = vmatmul.mubr.msk.f32.gmra.mrb[26].mxu0 %vm704_vm1, %v29501_v32 }
 0x346   :  { %24815 = vmatprep.mubr.msk.f32.mxu0 %vm704_vm1, %v29507_v33 }
 0x349   :  { %24816 = vmatmul.mubr.msk.f32.gmra.mrb[28].mxu0 %vm704_vm1, %v29576_v35 }
 0x34a   :  { %24818 = vmatprep.mubr.msk.f32.mxu0 %vm704_vm1, %v29645_v37 }
 0x34d   :  { %24819 = vmatmul.mubr.msk.f32.gmra.mrb[30].mxu0 %vm704_vm1, %v29714_v0 }
 0x34e   :  { %24823 = vmatprep.mubr.msk.f32.mxu0 %vm704_vm1, %v4064_v1  ;;  %v30266_v1 = vld [vmem:[#allocation2 + $0x270] sm:$0xff] }
 0x351   :  { %24824 = vmatmul.mubr.msk.f32.vlgmr.msra.gmra.mrb[0].mxu0 %vm704_vm1, %v4065_v2  ;;  %v30272_v2 = vld [vmem:[#allocation2 + $0x278] sm:$0xff] }
 0x352   :  { %24872 = vmatpush3.msra.mxu0 %v21215_v38  ;;  %24826 = vmatprep.mubr.msk.f32.mxu0 %vm704_vm1, %v4066_v3  ;;  %v30258_v38 = vld [vmem:[#allocation2 + $0x260] sm:$0xff]  ;;  %v21479_v3 = vld [vmem:[%s33221_s3 + $0x90] sm:$0xff] }
 0x353   :  { %24921 = vmatprep.subr.mxu0 %v21248_v4 }
 0x355   :  { %24827 = vmatmul.mubr.msk.f32.gmra.mrb[2].mxu0 %vm704_vm1, %v4067_v39  ;;  %v21512_v39 = vld [vmem:[%s33221_s3 + $0x98] sm:$0xff] }
 0x356   :  { %24829 = vmatprep.mubr.msk.f32.mxu0 %vm704_vm1, %v4068_v40  ;;  %v30378_v40 = vld [vmem:[#allocation2 + $0x1c8] sm:$0xff] }
 0x359   :  { %24830 = vmatmul.mubr.msk.f32.gmra.mrb[4].mxu0 %vm704_vm1, %v29243_v11  ;;  %v29959_v11 = vld [vmem:[#allocation2 + $0x220] sm:$0xff] }
 0x35a   :  { %24832 = vmatprep.mubr.msk.f32.mxu0 %vm704_vm1, %v29317_v17  ;;  %v5623_v17 = vld [vmem:[#allocation2 + $0x110] sm:$0xff] }
 0x35d   :  { %24833 = vmatmul.mubr.msk.f32.gmra.mrb[6].mxu0 %vm704_vm1, %v29388_v22  ;;  %v30084_v22 = vld [vmem:[#allocation2 + $0x1b0] sm:$0xff] }
 0x35e   :  { %24835 = vmatprep.mubr.msk.f32.mxu0 %vm704_vm1, %v29730_v41 }
 0x361   :  { %24836 = vmatmul.mubr.msk.f32.gmra.mrb[8].mxu0 %vm704_vm1, %v29736_v42 }
 0x362   :  { %24838 = vmatprep.mubr.msk.f32.mxu0 %vm704_vm1, %v29738_v43 }
 0x365   :  { %24839 = vmatmul.mubr.msk.f32.gmra.mrb[10].mxu0 %vm704_vm1, %v29744_v44 }
 0x366   :  { %24841 = vmatprep.mubr.msk.f32.mxu0 %vm704_vm1, %v29746_v45 }
 0x369   :  { %24842 = vmatmul.mubr.msk.f32.gmra.mrb[12].mxu0 %vm704_vm1, %v29261_v12  ;;  %v21347_v12 = vld [vmem:[%s33221_s3 + $0x70] sm:$0xff] }
 0x36a   :  { %24844 = vmatprep.mubr.msk.f32.mxu0 %vm704_vm1, %v29335_v18  ;;  %v30068_v18 = vld [vmem:[#allocation2 + $0x170] sm:$0xff] }
 0x36d   :  { %24845 = vmatmul.mubr.msk.f32.gmra.mrb[14].mxu0 %vm704_vm1, %v29406_v23  ;;  %v30086_v23 = vld [vmem:[#allocation2 + $0x1b8] sm:$0xff] }
 0x36e   :  { %24847 = vmatprep.mubr.msk.f32.mxu0 %vm704_vm1, %v29190_v5  ;;  %v29875_v5 = vld [vmem:[#allocation2 + $0x200] sm:$0xff] }
 0x371   :  { %24848 = vmatmul.mubr.msk.f32.gmra.mrb[16].mxu0 %vm704_vm1, %v29196_v6  ;;  %v29881_v6 = vld [vmem:[#allocation2 + $0x208] sm:$0xff] }
 0x372   :  { %24850 = vmatprep.mubr.msk.f32.mxu0 %vm704_vm1, %v29198_v7  ;;  %v29883_v7 = vld [vmem:[#allocation2 + $0x210] sm:$0xff] }
 0x375   :  { %24851 = vmatmul.mubr.msk.f32.gmra.mrb[18].mxu0 %vm704_vm1, %v29204_v8  ;;  %v29889_v8 = vld [vmem:[#allocation2 + $0x218] sm:$0xff] }
 0x376   :  { %24853 = vmatprep.mubr.msk.f32.mxu0 %vm704_vm1, %v29275_v13  ;;  %v29980_v13 = vld [vmem:[#allocation2 + $0x108] sm:$0xff] }
 0x379   :  { %24854 = vmatmul.mubr.msk.f32.gmra.mrb[20].mxu0 %vm704_vm1, %v29281_v14  ;;  %v29998_v14 = vld [vmem:[#allocation2 + $0x168] sm:$0xff] }
 0x37a   :  { %24856 = vmatprep.mubr.msk.f32.mxu0 %vm704_vm1, %v29353_v19  ;;  %v30070_v19 = vld [vmem:[#allocation2 + $0x198] sm:$0xff] }
 0x37d   :  { %24857 = vmatmul.mubr.msk.f32.gmra.mrb[22].mxu0 %vm704_vm1, %v29424_v24  ;;  %v30112_v24 = vld [vmem:[#allocation2 + $0x230] sm:$0xff] }
 0x37e   :  { %24859 = vmatprep.mubr.msk.f32.mxu0 %vm704_vm1, %v29493_v30 }
 0x381   :  { %24860 = vmatmul.mubr.msk.f32.gmra.mrb[24].mxu0 %vm704_vm1, %v29499_v31 }
 0x382   :  { %24862 = vmatprep.mubr.msk.f32.mxu0 %vm704_vm1, %v29501_v32 }
 0x385   :  { %24863 = vmatmul.mubr.msk.f32.gmra.mrb[26].mxu0 %vm704_vm1, %v29507_v33 }
 0x386   :  { %24865 = vmatprep.mubr.msk.f32.mxu0 %vm704_vm1, %v29576_v35 }
 0x389   :  { %24866 = vmatmul.mubr.msk.f32.gmra.mrb[28].mxu0 %vm704_vm1, %v29645_v37 }
 0x38a   :  { %24868 = vmatprep.mubr.msk.f32.mxu0 %vm704_vm1, %v29714_v0 }
 0x38d   :  { %24869 = vmatmul.mubr.msk.f32.gmra.mrb[30].mxu0 %vm704_vm1, %v29788_v46 }
 0x38e   :  { %24873 = vmatprep.mubr.msk.f32.mxu0 %vm704_vm1, %v4452_v47  ;;  %v30457_v47 = vld [vmem:[#allocation2 + $0x1f8] sm:$0xff] }
 0x391   :  { %24874 = vmatmul.mubr.msk.f32.vlgmr.msra.gmra.mrb[0].mxu0 %vm704_vm1, %v4453_v48 }
 0x392   :  { %24922 = vmatpush3.msra.mxu0 %v21248_v4  ;;  %24876 = vmatprep.mubr.msk.f32.mxu0 %vm704_vm1, %v29793_v49  ;;  %v30341_v4 = vld [vmem:[#allocation2 + $0x280] sm:$0xff] }
 0x393   :  { %24971 = vmatprep.subr.mxu0 %v21281_v50 }
 0x395   :  { %24877 = vmatmul.mubr.msk.f32.gmra.mrb[2].mxu0 %vm704_vm1, %v29801_v51 }
 0x396   :  { %24879 = vmatprep.mubr.msk.f32.mxu0 %vm704_vm1, %v29730_v41 }
 0x399   :  { %24880 = vmatmul.mubr.msk.f32.gmra.mrb[4].mxu0 %vm704_vm1, %v29736_v42 }
 0x39a   :  { %24882 = vmatprep.mubr.msk.f32.mxu0 %vm704_vm1, %v29738_v43 }
 0x39d   :  { %24883 = vmatmul.mubr.msk.f32.gmra.mrb[6].mxu0 %vm704_vm1, %v29744_v44 }
 0x39e   :  { %24885 = vmatprep.mubr.msk.f32.mxu0 %vm704_vm1, %v29811_v52 }
 0x3a1   :  { %24886 = vmatmul.mubr.msk.f32.gmra.mrb[8].mxu0 %vm704_vm1, %v29817_v53 }
 0x3a2   :  { %24888 = vmatprep.mubr.msk.f32.mxu0 %vm704_vm1, %v29819_v54 }
 0x3a5   :  { %24889 = vmatmul.mubr.msk.f32.gmra.mrb[10].mxu0 %vm704_vm1, %v29825_v55 }
 0x3a6   :  { %24891 = vmatprep.mubr.msk.f32.mxu0 %vm704_vm1, %v29827_v56 }
 0x3a9   :  { %24892 = vmatmul.mubr.msk.f32.gmra.mrb[12].mxu0 %vm704_vm1, %v29833_v57 }
 0x3aa   :  { %24894 = vmatprep.mubr.msk.f32.mxu0 %vm704_vm1, %v29835_v58 }
 0x3ad   :  { %24895 = vmatmul.mubr.msk.f32.gmra.mrb[14].mxu0 %vm704_vm1, %v29841_v59 }
 0x3ae   :  { %24897 = vmatprep.mubr.msk.f32.mxu0 %vm704_vm1, %v29477_v26  ;;  %v6011_v26 = vld [vmem:[#allocation2 + $0x118] sm:$0xff] }
 0x3b1   :  { %24898 = vmatmul.mubr.msk.f32.gmra.mrb[16].mxu0 %vm704_vm1, %v29483_v27 }
 0x3b2   :  { %24900 = vmatprep.mubr.msk.f32.mxu0 %vm704_vm1, %v29485_v28 }
 0x3b5   :  { %24901 = vmatmul.mubr.msk.f32.gmra.mrb[18].mxu0 %vm704_vm1, %v29491_v29 }
 0x3b6   :  { %24903 = vmatprep.mubr.msk.f32.mxu0 %vm704_vm1, %v29493_v30 }
 0x3b9   :  { %24904 = vmatmul.mubr.msk.f32.gmra.mrb[20].mxu0 %vm704_vm1, %v29499_v31 }
 0x3ba   :  { %24906 = vmatprep.mubr.msk.f32.mxu0 %vm704_vm1, %v29501_v32 }
 0x3bd   :  { %24907 = vmatmul.mubr.msk.f32.gmra.mrb[22].mxu0 %vm704_vm1, %v29507_v33 }
 0x3be   :  { %24909 = vmatprep.mubr.msk.f32.mxu0 %vm704_vm1, %v29859_v60 }
 0x3c1   :  { %24910 = vmatmul.mubr.msk.f32.gmra.mrb[24].mxu0 %vm704_vm1, %v29865_v61 }
 0x3c2   :  { %24912 = vmatprep.mubr.msk.f32.mxu0 %vm704_vm1, %v29867_v62 }
 0x3c5   :  { %24913 = vmatmul.mubr.msk.f32.gmra.mrb[26].mxu0 %vm704_vm1, %v29873_v63 }
 0x3c6   :  { %24915 = vmatprep.mubr.msk.f32.mxu0 %vm704_vm1, %v29875_v5 }
 0x3c9   :  { %24916 = vmatmul.mubr.msk.f32.gmra.mrb[28].mxu0 %vm704_vm1, %v29881_v6 }
 0x3ca   :  { %24918 = vmatprep.mubr.msk.f32.mxu0 %vm704_vm1, %v29883_v7 }
 0x3cd   :  { %24919 = vmatmul.mubr.msk.f32.gmra.mrb[30].mxu0 %vm704_vm1, %v29889_v8 }
 0x3ce   :  { %24923 = vmatprep.mubr.msk.f32.mxu0 %vm704_vm1, %v4453_v48  ;;  %v30463_v48 = vld [vmem:[#allocation2 + $0x200] sm:$0xff] }
 0x3d1   :  { %24924 = vmatmul.mubr.msk.f32.vlgmr.msra.gmra.mrb[0].mxu0 %vm704_vm1, %v29793_v49 }
 0x3d2   :  { %24972 = vmatpush3.msra.mxu0 %v21281_v50  ;;  %24926 = vmatprep.mubr.msk.f32.mxu0 %vm704_vm1, %v29801_v51  ;;  %v30471_v50 = vld [vmem:[#allocation2 + $0x210] sm:$0xff] }
 0x3d3   :  { %25021 = vmatprep.subr.mxu0 %v21314_v9 }
 0x3d5   :  { %24927 = vmatmul.mubr.msk.f32.gmra.mrb[2].mxu0 %vm704_vm1, %v29730_v41 }
 0x3d6   :  { %24929 = vmatprep.mubr.msk.f32.mxu0 %vm704_vm1, %v29736_v42 }
 0x3d9   :  { %24930 = vmatmul.mubr.msk.f32.gmra.mrb[4].mxu0 %vm704_vm1, %v29738_v43 }
 0x3da   :  { %24932 = vmatprep.mubr.msk.f32.mxu0 %vm704_vm1, %v29744_v44 }
 0x3dd   :  { %24933 = vmatmul.mubr.msk.f32.gmra.mrb[6].mxu0 %vm704_vm1, %v29746_v45 }
 0x3de   :  { %24935 = vmatprep.mubr.msk.f32.mxu0 %vm704_vm1, %v29817_v53 }
 0x3e1   :  { %24936 = vmatmul.mubr.msk.f32.gmra.mrb[8].mxu0 %vm704_vm1, %v29819_v54 }
 0x3e2   :  { %24938 = vmatprep.mubr.msk.f32.mxu0 %vm704_vm1, %v29825_v55 }
 0x3e5   :  { %24939 = vmatmul.mubr.msk.f32.gmra.mrb[10].mxu0 %vm704_vm1, %v29827_v56 }
 0x3e6   :  { %24941 = vmatprep.mubr.msk.f32.mxu0 %vm704_vm1, %v29833_v57 }
 0x3e9   :  { %24942 = vmatmul.mubr.msk.f32.gmra.mrb[12].mxu0 %vm704_vm1, %v29835_v58 }
 0x3ea   :  { %24944 = vmatprep.mubr.msk.f32.mxu0 %vm704_vm1, %v29841_v59 }
 0x3ed   :  { %24945 = vmatmul.mubr.msk.f32.gmra.mrb[14].mxu0 %vm704_vm1, %v29925_v10 }
 0x3ee   :  { %24947 = vmatprep.mubr.msk.f32.mxu0 %vm704_vm1, %v29483_v27  ;;  %v30147_v27 = vld [vmem:[#allocation2 + $0x178] sm:$0xff] }
 0x3f1   :  { %24948 = vmatmul.mubr.msk.f32.gmra.mrb[16].mxu0 %vm704_vm1, %v29485_v28 }
 0x3f2   :  { %24950 = vmatprep.mubr.msk.f32.mxu0 %vm704_vm1, %v29491_v29 }
 0x3f5   :  { %24951 = vmatmul.mubr.msk.f32.gmra.mrb[18].mxu0 %vm704_vm1, %v29493_v30 }
 0x3f6   :  { %24953 = vmatprep.mubr.msk.f32.mxu0 %vm704_vm1, %v29499_v31 }
 0x3f9   :  { %24954 = vmatmul.mubr.msk.f32.gmra.mrb[20].mxu0 %vm704_vm1, %v29501_v32 }
 0x3fa   :  { %24956 = vmatprep.mubr.msk.f32.mxu0 %vm704_vm1, %v29507_v33 }
 0x3fd   :  { %24957 = vmatmul.mubr.msk.f32.gmra.mrb[22].mxu0 %vm704_vm1, %v29576_v35 }
 0x3fe   :  { %24959 = vmatprep.mubr.msk.f32.mxu0 %vm704_vm1, %v29865_v61 }
 0x401   :  { %24960 = vmatmul.mubr.msk.f32.gmra.mrb[24].mxu0 %vm704_vm1, %v29867_v62 }
 0x402   :  { %24962 = vmatprep.mubr.msk.f32.mxu0 %vm704_vm1, %v29873_v63 }
 0x405   :  { %24963 = vmatmul.mubr.msk.f32.gmra.mrb[26].mxu0 %vm704_vm1, %v29875_v5 }
 0x406   :  { %24965 = vmatprep.mubr.msk.f32.mxu0 %vm704_vm1, %v29881_v6 }
 0x409   :  { %24966 = vmatmul.mubr.msk.f32.gmra.mrb[28].mxu0 %vm704_vm1, %v29883_v7 }
 0x40a   :  { %24968 = vmatprep.mubr.msk.f32.mxu0 %vm704_vm1, %v29889_v8 }
 0x40d   :  { %24969 = vmatmul.mubr.msk.f32.gmra.mrb[30].mxu0 %vm704_vm1, %v29959_v11 }
 0x40e   :  { %24973 = vmatprep.mubr.msk.f32.mxu0 %vm704_vm1, %v29793_v49  ;;  %v30465_v49 = vld [vmem:[#allocation2 + $0x208] sm:$0xff] }
 0x411   :  { %24974 = vmatmul.mubr.msk.f32.vlgmr.msra.gmra.mrb[0].mxu0 %vm704_vm1, %v29801_v51 }
 0x412   :  { %25022 = vmatpush3.msra.mxu0 %v21314_v9  ;;  %24976 = vmatprep.mubr.msk.f32.mxu0 %vm704_vm1, %v29730_v41  ;;  %v30657_v9 = vld [vmem:[#allocation2 + $0x2c8] sm:$0xff] }
 0x413   :  { %25071 = vmatprep.subr.mxu0 %v21347_v12 }
 0x415   :  { %24977 = vmatmul.mubr.msk.f32.gmra.mrb[2].mxu0 %vm704_vm1, %v29736_v42 }
 0x416   :  { %24979 = vmatprep.mubr.msk.f32.mxu0 %vm704_vm1, %v29738_v43 }
 0x419   :  { %24980 = vmatmul.mubr.msk.f32.gmra.mrb[4].mxu0 %vm704_vm1, %v29744_v44 }
 0x41a   :  { %24982 = vmatprep.mubr.msk.f32.mxu0 %vm704_vm1, %v29746_v45 }
 0x41d   :  { %24983 = vmatmul.mubr.msk.f32.gmra.mrb[6].mxu0 %vm704_vm1, %v29980_v13 }
 0x41e   :  { %24985 = vmatprep.mubr.msk.f32.mxu0 %vm704_vm1, %v29819_v54 }
 0x421   :  { %24986 = vmatmul.mubr.msk.f32.gmra.mrb[8].mxu0 %vm704_vm1, %v29825_v55 }
 0x422   :  { %24988 = vmatprep.mubr.msk.f32.mxu0 %vm704_vm1, %v29827_v56 }
 0x425   :  { %24989 = vmatmul.mubr.msk.f32.gmra.mrb[10].mxu0 %vm704_vm1, %v29833_v57 }
 0x426   :  { %24991 = vmatprep.mubr.msk.f32.mxu0 %vm704_vm1, %v29835_v58 }
 0x429   :  { %24992 = vmatmul.mubr.msk.f32.gmra.mrb[12].mxu0 %vm704_vm1, %v29841_v59 }
 0x42a   :  { %24994 = vmatprep.mubr.msk.f32.mxu0 %vm704_vm1, %v29925_v10 }
 0x42d   :  { %24995 = vmatmul.mubr.msk.f32.gmra.mrb[14].mxu0 %vm704_vm1, %v29998_v14 }
 0x42e   :  { %24997 = vmatprep.mubr.msk.f32.mxu0 %vm704_vm1, %v29485_v28  ;;  %v30157_v28 = vld [vmem:[#allocation2 + $0x1c0] sm:$0xff] }
 0x431   :  { %24998 = vmatmul.mubr.msk.f32.gmra.mrb[16].mxu0 %vm704_vm1, %v29491_v29  ;;  %v30183_v29 = vld [vmem:[#allocation2 + $0x238] sm:$0xff] }
 0x432   :  { %25000 = vmatprep.mubr.msk.f32.mxu0 %vm704_vm1, %v29493_v30  ;;  %v21446_v30 = vld [vmem:[%s33221_s3 + $0x88] sm:$0xff] }
 0x435   :  { %25001 = vmatmul.mubr.msk.f32.gmra.mrb[18].mxu0 %vm704_vm1, %v29499_v31  ;;  %v30204_v31 = vld [vmem:[#allocation2 + $0x180] sm:$0xff] }
 0x436   :  { %25003 = vmatprep.mubr.msk.f32.mxu0 %vm704_vm1, %v29501_v32  ;;  %v30210_v32 = vld [vmem:[#allocation2 + $0x188] sm:$0xff] }
 0x439   :  { %25004 = vmatmul.mubr.msk.f32.gmra.mrb[20].mxu0 %vm704_vm1, %v29507_v33  ;;  %v30212_v33 = vld [vmem:[#allocation2 + $0x190] sm:$0xff] }
 0x43a   :  { %25006 = vmatprep.mubr.msk.f32.mxu0 %vm704_vm1, %v29576_v35 }
 0x43d   :  { %25007 = vmatmul.mubr.msk.f32.gmra.mrb[22].mxu0 %vm704_vm1, %v29645_v37 }
 0x43e   :  { %25009 = vmatprep.mubr.msk.f32.mxu0 %vm704_vm1, %v29867_v62 }
 0x441   :  { %25010 = vmatmul.mubr.msk.f32.gmra.mrb[24].mxu0 %vm704_vm1, %v29873_v63 }
 0x442   :  { %25012 = vmatprep.mubr.msk.f32.mxu0 %vm704_vm1, %v29875_v5 }
 0x445   :  { %25013 = vmatmul.mubr.msk.f32.gmra.mrb[26].mxu0 %vm704_vm1, %v29881_v6 }
 0x446   :  { %25015 = vmatprep.mubr.msk.f32.mxu0 %vm704_vm1, %v29883_v7 }
 0x449   :  { %25016 = vmatmul.mubr.msk.f32.gmra.mrb[28].mxu0 %vm704_vm1, %v29889_v8 }
 0x44a   :  { %25018 = vmatprep.mubr.msk.f32.mxu0 %vm704_vm1, %v29959_v11 }
 0x44d   :  { %25019 = vmatmul.mubr.msk.f32.gmra.mrb[30].mxu0 %vm704_vm1, %v30032_v15 }
 0x44e   :  { %25023 = vmatprep.mubr.msk.f32.mxu0 %vm704_vm1, %v29801_v51  ;;  %v30473_v51 = vld [vmem:[#allocation2 + $0x218] sm:$0xff] }
 0x451   :  { %25024 = vmatmul.mubr.msk.f32.vlgmr.msra.gmra.mrb[0].mxu0 %vm704_vm1, %v29730_v41 }
 0x452   :  { %25072 = vmatpush3.msra.mxu0 %v21347_v12  ;;  %25026 = vmatprep.mubr.msk.f32.mxu0 %vm704_vm1, %v29736_v42  ;;  %v21644_v12 = vld [vmem:[%s33221_s3 + $0xb8] sm:$0xff] }
 0x453   :  { %25121 = vmatprep.subr.mxu0 %v21380_v16 }
 0x455   :  { %25027 = vmatmul.mubr.msk.f32.gmra.mrb[2].mxu0 %vm704_vm1, %v29738_v43 }
 0x456   :  { %25029 = vmatprep.mubr.msk.f32.mxu0 %vm704_vm1, %v29744_v44 }
 0x459   :  { %25030 = vmatmul.mubr.msk.f32.gmra.mrb[4].mxu0 %vm704_vm1, %v29746_v45 }
 0x45a   :  { %25032 = vmatprep.mubr.msk.f32.mxu0 %vm704_vm1, %v29980_v13 }
 0x45d   :  { %25033 = vmatmul.mubr.msk.f32.gmra.mrb[6].mxu0 %vm704_vm1, %v5623_v17 }
 0x45e   :  { %25035 = vmatprep.mubr.msk.f32.mxu0 %vm704_vm1, %v29825_v55 }
 0x461   :  { %25036 = vmatmul.mubr.msk.f32.gmra.mrb[8].mxu0 %vm704_vm1, %v29827_v56 }
 0x462   :  { %25038 = vmatprep.mubr.msk.f32.mxu0 %vm704_vm1, %v29833_v57 }
 0x465   :  { %25039 = vmatmul.mubr.msk.f32.gmra.mrb[10].mxu0 %vm704_vm1, %v29835_v58 }
 0x466   :  { %25041 = vmatprep.mubr.msk.f32.mxu0 %vm704_vm1, %v29841_v59 }
 0x469   :  { %25042 = vmatmul.mubr.msk.f32.gmra.mrb[12].mxu0 %vm704_vm1, %v29925_v10 }
 0x46a   :  { %25044 = vmatprep.mubr.msk.f32.mxu0 %vm704_vm1, %v29998_v14 }
 0x46d   :  { %25045 = vmatmul.mubr.msk.f32.gmra.mrb[14].mxu0 %vm704_vm1, %v30068_v18 }
 0x46e   :  { %25047 = vmatprep.mubr.msk.f32.mxu0 %vm704_vm1, %v30070_v19 }
 0x471   :  { %25048 = vmatmul.mubr.msk.f32.gmra.mrb[16].mxu0 %vm704_vm1, %v30076_v20 }
 0x472   :  { %25050 = vmatprep.mubr.msk.f32.mxu0 %vm704_vm1, %v30078_v21 }
 0x475   :  { %25051 = vmatmul.mubr.msk.f32.gmra.mrb[18].mxu0 %vm704_vm1, %v30084_v22 }
 0x476   :  { %25053 = vmatprep.mubr.msk.f32.mxu0 %vm704_vm1, %v30086_v23 }
 0x479   :  { %25054 = vmatmul.mubr.msk.f32.gmra.mrb[20].mxu0 %vm704_vm1, %v29576_v35  ;;  %v30248_v35 = vld [vmem:[#allocation2 + $0x248] sm:$0xff] }
 0x47a   :  { %25056 = vmatprep.mubr.msk.f32.mxu0 %vm704_vm1, %v29645_v37 }
 0x47d   :  { %25057 = vmatmul.mubr.msk.f32.gmra.mrb[22].mxu0 %vm704_vm1, %v29714_v0 }
 0x47e   :  { %25059 = vmatprep.mubr.msk.f32.mxu0 %vm704_vm1, %v29873_v63 }
 0x481   :  { %25060 = vmatmul.mubr.msk.f32.gmra.mrb[24].mxu0 %vm704_vm1, %v29875_v5 }
 0x482   :  { %25062 = vmatprep.mubr.msk.f32.mxu0 %vm704_vm1, %v29881_v6 }
 0x485   :  { %25063 = vmatmul.mubr.msk.f32.gmra.mrb[26].mxu0 %vm704_vm1, %v29883_v7 }
 0x486   :  { %25065 = vmatprep.mubr.msk.f32.mxu0 %vm704_vm1, %v29889_v8 }
 0x489   :  { %25066 = vmatmul.mubr.msk.f32.gmra.mrb[28].mxu0 %vm704_vm1, %v29959_v11 }
 0x48a   :  { %25068 = vmatprep.mubr.msk.f32.mxu0 %vm704_vm1, %v30032_v15 }
 0x48d   :  { %25069 = vmatmul.mubr.msk.f32.gmra.mrb[30].mxu0 %vm704_vm1, %v30112_v24 }
 0x48e   :  { %25073 = vmatprep.mubr.msk.f32.mxu0 %vm704_vm1, %v29730_v41  ;;  %v30412_v41 = vld [vmem:[#allocation2 + $0x288] sm:$0xff] }
 0x491   :  { %25074 = vmatmul.mubr.msk.f32.vlgmr.msra.gmra.mrb[0].mxu0 %vm704_vm1, %v29736_v42  ;;  %v30418_v42 = vld [vmem:[#allocation2 + $0x148] sm:$0xff] }
 0x492   :  { %25122 = vmatpush3.msra.mxu0 %v21380_v16  ;;  %25076 = vmatprep.mubr.msk.f32.mxu0 %vm704_vm1, %v29738_v43  ;;  %v21545_v43 = vld [vmem:[%s33221_s3 + $0xa0] sm:$0xff] }
 0x493   :  { %25171 = vmatprep.subr.mxu0 %v21413_v25  ;;  %v21677_v16 = vld [vmem:[%s33221_s3 + $0xc0] sm:$0xff] }
 0x495   :  { %25077 = vmatmul.mubr.msk.f32.gmra.mrb[2].mxu0 %vm704_vm1, %v29744_v44  ;;  %v30427_v44 = vld [vmem:[#allocation2 + $0x150] sm:$0xff] }
 0x496   :  { %25079 = vmatprep.mubr.msk.f32.mxu0 %vm704_vm1, %v29746_v45  ;;  %v30429_v45 = vld [vmem:[#allocation2 + $0x158] sm:$0xff] }
 0x499   :  { %25080 = vmatmul.mubr.msk.f32.gmra.mrb[4].mxu0 %vm704_vm1, %v29980_v13  ;;  %v30734_v13 = vld [vmem:[#allocation2 + $0x2e0] sm:$0xff] }
 0x49a   :  { %25082 = vmatprep.mubr.msk.f32.mxu0 %vm704_vm1, %v5623_v17  ;;  %v30751_v17 = vld [vmem:[#allocation2 + $0x1a8] sm:$0xff] }
 0x49d   :  { %25083 = vmatmul.mubr.msk.f32.gmra.mrb[6].mxu0 %vm704_vm1, %v6011_v26  ;;  %v30870_v26 = vld [vmem:[#allocation2 + $0x260] sm:$0xff] }
 0x49e   :  { %25085 = vmatprep.mubr.msk.f32.mxu0 %vm704_vm1, %v29827_v56 }
 0x4a1   :  { %25086 = vmatmul.mubr.msk.f32.gmra.mrb[8].mxu0 %vm704_vm1, %v29833_v57 }
 0x4a2   :  { %25088 = vmatprep.mubr.msk.f32.mxu0 %vm704_vm1, %v29835_v58 }
 0x4a5   :  { %25089 = vmatmul.mubr.msk.f32.gmra.mrb[10].mxu0 %vm704_vm1, %v29841_v59 }
 0x4a6   :  { %25091 = vmatprep.mubr.msk.f32.mxu0 %vm704_vm1, %v29925_v10 }
 0x4a9   :  { %25092 = vmatmul.mubr.msk.f32.gmra.mrb[12].mxu0 %vm704_vm1, %v29998_v14 }
 0x4aa   :  { %25094 = vmatprep.mubr.msk.f32.mxu0 %vm704_vm1, %v30068_v18 }
 0x4ad   :  { %25095 = vmatmul.mubr.msk.f32.gmra.mrb[14].mxu0 %vm704_vm1, %v30147_v27 }
 0x4ae   :  { %25097 = vmatprep.mubr.msk.f32.mxu0 %vm704_vm1, %v30076_v20 }
 0x4b1   :  { %25098 = vmatmul.mubr.msk.f32.gmra.mrb[16].mxu0 %vm704_vm1, %v30078_v21 }
 0x4b2   :  { %25100 = vmatprep.mubr.msk.f32.mxu0 %vm704_vm1, %v30084_v22 }
 0x4b5   :  { %25101 = vmatmul.mubr.msk.f32.gmra.mrb[18].mxu0 %vm704_vm1, %v30086_v23 }
 0x4b6   :  { %25103 = vmatprep.mubr.msk.f32.mxu0 %vm704_vm1, %v30157_v28 }
 0x4b9   :  { %25104 = vmatmul.mubr.msk.f32.gmra.mrb[20].mxu0 %vm704_vm1, %v29645_v37  ;;  %v30256_v37 = vld [vmem:[#allocation2 + $0x258] sm:$0xff] }
 0x4ba   :  { %25106 = vmatprep.mubr.msk.f32.mxu0 %vm704_vm1, %v29714_v0  ;;  %v30264_v0 = vld [vmem:[#allocation2 + $0x268] sm:$0xff] }
 0x4bd   :  { %25107 = vmatmul.mubr.msk.f32.gmra.mrb[22].mxu0 %vm704_vm1, %v29788_v46  ;;  %v30455_v46 = vld [vmem:[#allocation2 + $0x1d0] sm:$0xff] }
 0x4be   :  { %25109 = vmatprep.mubr.msk.f32.mxu0 %vm704_vm1, %v29875_v5 }
 0x4c1   :  { %25110 = vmatmul.mubr.msk.f32.gmra.mrb[24].mxu0 %vm704_vm1, %v29881_v6 }
 0x4c2   :  { %25112 = vmatprep.mubr.msk.f32.mxu0 %vm704_vm1, %v29883_v7 }
 0x4c5   :  { %25113 = vmatmul.mubr.msk.f32.gmra.mrb[26].mxu0 %vm704_vm1, %v29889_v8 }
 0x4c6   :  { %25115 = vmatprep.mubr.msk.f32.mxu0 %vm704_vm1, %v29959_v11 }
 0x4c9   :  { %25116 = vmatmul.mubr.msk.f32.gmra.mrb[28].mxu0 %vm704_vm1, %v30032_v15 }
 0x4ca   :  { %25118 = vmatprep.mubr.msk.f32.mxu0 %vm704_vm1, %v30112_v24 }
 0x4cd   :  { %25119 = vmatmul.mubr.msk.f32.gmra.mrb[30].mxu0 %vm704_vm1, %v30183_v29 }
 0x4ce   :  { %25123 = vmatprep.mubr.msk.f32.mxu0 %vm704_vm1, %v29811_v52  ;;  %v30499_v52 = vld [vmem:[#allocation2 + $0x290] sm:$0xff] }
 0x4d1   :  { %25124 = vmatmul.mubr.msk.f32.vlgmr.msra.gmra.mrb[0].mxu0 %vm704_vm1, %v29817_v53 }
 0x4d2   :  { %25172 = vmatpush3.msra.mxu0 %v21413_v25  ;;  %25126 = vmatprep.mubr.msk.f32.mxu0 %vm704_vm1, %v29819_v54  ;;  %v30864_v25 = vld [vmem:[#allocation2 + $0x258] sm:$0xff] }
 0x4d3   :  { %25221 = vmatprep.subr.mxu0 %v21446_v30 }
 0x4d5   :  { %25127 = vmatmul.mubr.msk.f32.gmra.mrb[2].mxu0 %vm704_vm1, %v29825_v55 }
 0x4d6   :  { %25129 = vmatprep.mubr.msk.f32.mxu0 %vm704_vm1, %v29827_v56 }
 0x4d9   :  { %25130 = vmatmul.mubr.msk.f32.gmra.mrb[4].mxu0 %vm704_vm1, %v29833_v57 }
 0x4da   :  { %25132 = vmatprep.mubr.msk.f32.mxu0 %vm704_vm1, %v29835_v58 }
 0x4dd   :  { %25133 = vmatmul.mubr.msk.f32.gmra.mrb[6].mxu0 %vm704_vm1, %v29841_v59 }
 0x4de   :  { %25135 = vmatprep.mubr.msk.f32.mxu0 %vm704_vm1, %v30204_v31 }
 0x4e1   :  { %25136 = vmatmul.mubr.msk.f32.gmra.mrb[8].mxu0 %vm704_vm1, %v30210_v32 }
 0x4e2   :  { %25138 = vmatprep.mubr.msk.f32.mxu0 %vm704_vm1, %v30212_v33 }
 0x4e5   :  { %25139 = vmatmul.mubr.msk.f32.gmra.mrb[10].mxu0 %vm704_vm1, %v30070_v19 }
 0x4e6   :  { %25141 = vmatprep.mubr.msk.f32.mxu0 %vm704_vm1, %v30076_v20 }
 0x4e9   :  { %25142 = vmatmul.mubr.msk.f32.gmra.mrb[12].mxu0 %vm704_vm1, %v30078_v21 }
 0x4ea   :  { %25144 = vmatprep.mubr.msk.f32.mxu0 %vm704_vm1, %v30084_v22 }
 0x4ed   :  { %25145 = vmatmul.mubr.msk.f32.gmra.mrb[14].mxu0 %vm704_vm1, %v30086_v23 }
 0x4ee   :  { %25147 = vmatprep.mubr.msk.f32.mxu0 %vm704_vm1, %v29859_v60  ;;  %v30597_v60 = vld [vmem:[#allocation2 + $0x1e0] sm:$0xff] }
 0x4f1   :  { %25148 = vmatmul.mubr.msk.f32.gmra.mrb[16].mxu0 %vm704_vm1, %v29865_v61 }
 0x4f2   :  { %25150 = vmatprep.mubr.msk.f32.mxu0 %vm704_vm1, %v29867_v62 }
 0x4f5   :  { %25151 = vmatmul.mubr.msk.f32.gmra.mrb[18].mxu0 %vm704_vm1, %v29873_v63 }
 0x4f6   :  { %25153 = vmatprep.mubr.msk.f32.mxu0 %vm704_vm1, %v29875_v5 }
 0x4f9   :  { %25154 = vmatmul.mubr.msk.f32.gmra.mrb[20].mxu0 %vm704_vm1, %v29881_v6 }
 0x4fa   :  { %25156 = vmatprep.mubr.msk.f32.mxu0 %vm704_vm1, %v29883_v7 }
 0x4fd   :  { %25157 = vmatmul.mubr.msk.f32.gmra.mrb[22].mxu0 %vm704_vm1, %v29889_v8 }
 0x4fe   :  { %25159 = vmatprep.mubr.msk.f32.mxu0 %vm704_vm1, %v30242_v34 }
 0x501   :  { %25160 = vmatmul.mubr.msk.f32.gmra.mrb[24].mxu0 %vm704_vm1, %v30248_v35 }
 0x502   :  { %25162 = vmatprep.mubr.msk.f32.mxu0 %vm704_vm1, %v30250_v36 }
 0x505   :  { %25163 = vmatmul.mubr.msk.f32.gmra.mrb[26].mxu0 %vm704_vm1, %v30256_v37 }
 0x506   :  { %25165 = vmatprep.mubr.msk.f32.mxu0 %vm704_vm1, %v30258_v38 }
 0x509   :  { %25166 = vmatmul.mubr.msk.f32.gmra.mrb[28].mxu0 %vm704_vm1, %v30264_v0 }
 0x50a   :  { %25168 = vmatprep.mubr.msk.f32.mxu0 %vm704_vm1, %v30266_v1 }
 0x50d   :  { %25169 = vmatmul.mubr.msk.f32.gmra.mrb[30].mxu0 %vm704_vm1, %v30272_v2 }
 0x50e   :  { %25173 = vmatprep.mubr.msk.f32.mxu0 %vm704_vm1, %v29817_v53  ;;  %v30501_v53 = vld [vmem:[#allocation2 + $0x140] sm:$0xff] }
 0x511   :  { %25174 = vmatmul.mubr.msk.f32.vlgmr.msra.gmra.mrb[0].mxu0 %vm704_vm1, %v29819_v54 }
 0x512   :  { %25222 = vmatpush3.msra.mxu0 %v21446_v30  ;;  %25176 = vmatprep.mubr.msk.f32.mxu0 %vm704_vm1, %v29825_v55  ;;  %v30906_v30 = vld [vmem:[#allocation2 + $0x2f0] sm:$0xff] }
 0x513   :  { %25271 = vmatprep.subr.mxu0 %v21479_v3 }
 0x515   :  { %25177 = vmatmul.mubr.msk.f32.gmra.mrb[2].mxu0 %vm704_vm1, %v29827_v56 }
 0x516   :  { %25179 = vmatprep.mubr.msk.f32.mxu0 %vm704_vm1, %v29833_v57 }
 0x519   :  { %25180 = vmatmul.mubr.msk.f32.gmra.mrb[4].mxu0 %vm704_vm1, %v29835_v58 }
 0x51a   :  { %25182 = vmatprep.mubr.msk.f32.mxu0 %vm704_vm1, %v29841_v59 }
 0x51d   :  { %25183 = vmatmul.mubr.msk.f32.gmra.mrb[6].mxu0 %vm704_vm1, %v29925_v10 }
 0x51e   :  { %25185 = vmatprep.mubr.msk.f32.mxu0 %vm704_vm1, %v30210_v32 }
 0x521   :  { %25186 = vmatmul.mubr.msk.f32.gmra.mrb[8].mxu0 %vm704_vm1, %v30212_v33 }
 0x522   :  { %25188 = vmatprep.mubr.msk.f32.mxu0 %vm704_vm1, %v30070_v19 }
 0x525   :  { %25189 = vmatmul.mubr.msk.f32.gmra.mrb[10].mxu0 %vm704_vm1, %v30076_v20 }
 0x526   :  { %25191 = vmatprep.mubr.msk.f32.mxu0 %vm704_vm1, %v30078_v21 }
 0x529   :  { %25192 = vmatmul.mubr.msk.f32.gmra.mrb[12].mxu0 %vm704_vm1, %v30084_v22 }
 0x52a   :  { %25194 = vmatprep.mubr.msk.f32.mxu0 %vm704_vm1, %v30086_v23 }
 0x52d   :  { %25195 = vmatmul.mubr.msk.f32.gmra.mrb[14].mxu0 %vm704_vm1, %v30157_v28 }
 0x52e   :  { %25197 = vmatprep.mubr.msk.f32.mxu0 %vm704_vm1, %v29865_v61  ;;  %v30603_v61 = vld [vmem:[#allocation2 + $0x1e8] sm:$0xff] }
 0x531   :  { %25198 = vmatmul.mubr.msk.f32.gmra.mrb[16].mxu0 %vm704_vm1, %v29867_v62 }
 0x532   :  { %25200 = vmatprep.mubr.msk.f32.mxu0 %vm704_vm1, %v29873_v63 }
 0x535   :  { %25201 = vmatmul.mubr.msk.f32.gmra.mrb[18].mxu0 %vm704_vm1, %v29875_v5 }
 0x536   :  { %25203 = vmatprep.mubr.msk.f32.mxu0 %vm704_vm1, %v29881_v6 }
 0x539   :  { %25204 = vmatmul.mubr.msk.f32.gmra.mrb[20].mxu0 %vm704_vm1, %v29883_v7 }
 0x53a   :  { %25206 = vmatprep.mubr.msk.f32.mxu0 %vm704_vm1, %v29889_v8 }
 0x53d   :  { %25207 = vmatmul.mubr.msk.f32.gmra.mrb[22].mxu0 %vm704_vm1, %v29959_v11 }
 0x53e   :  { %25209 = vmatprep.mubr.msk.f32.mxu0 %vm704_vm1, %v30248_v35 }
 0x541   :  { %25210 = vmatmul.mubr.msk.f32.gmra.mrb[24].mxu0 %vm704_vm1, %v30250_v36 }
 0x542   :  { %25212 = vmatprep.mubr.msk.f32.mxu0 %vm704_vm1, %v30256_v37 }
 0x545   :  { %25213 = vmatmul.mubr.msk.f32.gmra.mrb[26].mxu0 %vm704_vm1, %v30258_v38 }
 0x546   :  { %25215 = vmatprep.mubr.msk.f32.mxu0 %vm704_vm1, %v30264_v0 }
 0x549   :  { %25216 = vmatmul.mubr.msk.f32.gmra.mrb[28].mxu0 %vm704_vm1, %v30266_v1 }
 0x54a   :  { %25218 = vmatprep.mubr.msk.f32.mxu0 %vm704_vm1, %v30272_v2 }
 0x54d   :  { %25219 = vmatmul.mubr.msk.f32.gmra.mrb[30].mxu0 %vm704_vm1, %v30341_v4 }
 0x54e   :  { %25223 = vmatprep.mubr.msk.f32.mxu0 %vm704_vm1, %v29819_v54  ;;  %v21578_v54 = vld [vmem:[%s33221_s3 + $0xa8] sm:$0xff] }
 0x551   :  { %25224 = vmatmul.mubr.msk.f32.vlgmr.msra.gmra.mrb[0].mxu0 %vm704_vm1, %v29825_v55 }
 0x552   :  { %25272 = vmatpush3.msra.mxu0 %v21479_v3  ;;  %25226 = vmatprep.mubr.msk.f32.mxu0 %vm704_vm1, %v29827_v56 }
 0x553   :  { %25321 = vmatprep.subr.mxu0 %v21512_v39 }
 0x555   :  { %25227 = vmatmul.mubr.msk.f32.gmra.mrb[2].mxu0 %vm704_vm1, %v29833_v57  ;;  %v30550_v57 = vld [vmem:[#allocation2 + $0x220] sm:$0xff] }
 0x556   :  { %25229 = vmatprep.mubr.msk.f32.mxu0 %vm704_vm1, %v29835_v58  ;;  %v30576_v58 = vld [vmem:[#allocation2 + $0x298] sm:$0xff] }
 0x559   :  { %25230 = vmatmul.mubr.msk.f32.gmra.mrb[4].mxu0 %vm704_vm1, %v29841_v59  ;;  %v21611_v59 = vld [vmem:[%s33221_s3 + $0xb0] sm:$0xff] }
 0x55a   :  { %25232 = vmatprep.mubr.msk.f32.mxu0 %vm704_vm1, %v29925_v10 }
 0x55d   :  { %25233 = vmatmul.mubr.msk.f32.gmra.mrb[6].mxu0 %vm704_vm1, %v29998_v14 }
 0x55e   :  { %25235 = vmatprep.mubr.msk.f32.mxu0 %vm704_vm1, %v30212_v33 }
 0x561   :  { %25236 = vmatmul.mubr.msk.f32.gmra.mrb[8].mxu0 %vm704_vm1, %v30070_v19 }
 0x562   :  { %25238 = vmatprep.mubr.msk.f32.mxu0 %vm704_vm1, %v30076_v20 }
 0x565   :  { %25239 = vmatmul.mubr.msk.f32.gmra.mrb[10].mxu0 %vm704_vm1, %v30078_v21 }
 0x566   :  { %25241 = vmatprep.mubr.msk.f32.mxu0 %vm704_vm1, %v30084_v22 }
 0x569   :  { %25242 = vmatmul.mubr.msk.f32.gmra.mrb[12].mxu0 %vm704_vm1, %v30086_v23 }
 0x56a   :  { %25244 = vmatprep.mubr.msk.f32.mxu0 %vm704_vm1, %v30157_v28 }
 0x56d   :  { %25245 = vmatmul.mubr.msk.f32.gmra.mrb[14].mxu0 %vm704_vm1, %v30378_v40 }
 0x56e   :  { %25247 = vmatprep.mubr.msk.f32.mxu0 %vm704_vm1, %v29867_v62  ;;  %v30605_v62 = vld [vmem:[#allocation2 + $0x1f0] sm:$0xff] }
 0x571   :  { %25248 = vmatmul.mubr.msk.f32.gmra.mrb[16].mxu0 %vm704_vm1, %v29873_v63  ;;  %v30635_v63 = vld [vmem:[#allocation2 + $0x2a0] sm:$0xff] }
 0x572   :  { %25250 = vmatprep.mubr.msk.f32.mxu0 %vm704_vm1, %v29875_v5  ;;  %v30641_v5 = vld [vmem:[#allocation2 + $0x2a8] sm:$0xff] }
 0x575   :  { %25251 = vmatmul.mubr.msk.f32.gmra.mrb[18].mxu0 %vm704_vm1, %v29881_v6  ;;  %v30643_v6 = vld [vmem:[#allocation2 + $0x2b0] sm:$0xff] }
 0x576   :  { %25253 = vmatprep.mubr.msk.f32.mxu0 %vm704_vm1, %v29883_v7  ;;  %v30649_v7 = vld [vmem:[#allocation2 + $0x2b8] sm:$0xff] }
 0x579   :  { %25254 = vmatmul.mubr.msk.f32.gmra.mrb[20].mxu0 %vm704_vm1, %v29889_v8  ;;  %v30651_v8 = vld [vmem:[#allocation2 + $0x2c0] sm:$0xff] }
 0x57a   :  { %25256 = vmatprep.mubr.msk.f32.mxu0 %vm704_vm1, %v29959_v11 }
 0x57d   :  { %25257 = vmatmul.mubr.msk.f32.gmra.mrb[22].mxu0 %vm704_vm1, %v30032_v15 }
 0x57e   :  { %25259 = vmatprep.mubr.msk.f32.mxu0 %vm704_vm1, %v30250_v36 }
 0x581   :  { %25260 = vmatmul.mubr.msk.f32.gmra.mrb[24].mxu0 %vm704_vm1, %v30256_v37 }
 0x582   :  { %25262 = vmatprep.mubr.msk.f32.mxu0 %vm704_vm1, %v30258_v38 }
 0x585   :  { %25263 = vmatmul.mubr.msk.f32.gmra.mrb[26].mxu0 %vm704_vm1, %v30264_v0 }
 0x586   :  { %25265 = vmatprep.mubr.msk.f32.mxu0 %vm704_vm1, %v30266_v1 }
 0x589   :  { %25266 = vmatmul.mubr.msk.f32.gmra.mrb[28].mxu0 %vm704_vm1, %v30272_v2 }
 0x58a   :  { %25268 = vmatprep.mubr.msk.f32.mxu0 %vm704_vm1, %v30341_v4 }
 0x58d   :  { %25269 = vmatmul.mubr.msk.f32.gmra.mrb[30].mxu0 %vm704_vm1, %v30412_v41 }
 0x58e   :  { %25273 = vmatprep.mubr.msk.f32.mxu0 %vm704_vm1, %v29825_v55  ;;  %v30514_v55 = vld [vmem:[#allocation2 + $0x160] sm:$0xff] }
 0x591   :  { %25274 = vmatmul.mubr.msk.f32.vlgmr.msra.gmra.mrb[0].mxu0 %vm704_vm1, %v29827_v56  ;;  %v30540_v56 = vld [vmem:[#allocation2 + $0x1d8] sm:$0xff] }
 0x592   :  { %25322 = vmatpush3.msra.mxu0 %v21512_v39  ;;  %25276 = vmatprep.mubr.msk.f32.mxu0 %vm704_vm1, %v30418_v42  ;;  %v31006_v39 = vld [vmem:[%s33222_s4] ss:$0 sm:$0xff] }
 0x593   :  { %25371 = vmatprep.subr.mxu0 %v21545_v43 }
 0x595   :  { %25277 = vmatmul.mubr.msk.f32.gmra.mrb[2].mxu0 %vm704_vm1, %v30427_v44 }
 0x596   :  { %25279 = vmatprep.mubr.msk.f32.mxu0 %vm704_vm1, %v30429_v45 }
 0x599   :  { %25280 = vmatmul.mubr.msk.f32.gmra.mrb[4].mxu0 %vm704_vm1, %v29925_v10  ;;  %v30659_v10 = vld [vmem:[#allocation2 + $0x2d0] sm:$0xff] }
 0x59a   :  { %25282 = vmatprep.mubr.msk.f32.mxu0 %vm704_vm1, %v29998_v14 }
 0x59d   :  { %25283 = vmatmul.mubr.msk.f32.gmra.mrb[6].mxu0 %vm704_vm1, %v30068_v18 }
 0x59e   :  { %25285 = vmatprep.mubr.msk.f32.mxu0 %vm704_vm1, %v30070_v19 }
 0x5a1   :  { %25286 = vmatmul.mubr.msk.f32.gmra.mrb[8].mxu0 %vm704_vm1, %v30076_v20 }
 0x5a2   :  { %25288 = vmatprep.mubr.msk.f32.mxu0 %vm704_vm1, %v30078_v21 }
 0x5a5   :  { %25289 = vmatmul.mubr.msk.f32.gmra.mrb[10].mxu0 %vm704_vm1, %v30084_v22 }
 0x5a6   :  { %25291 = vmatprep.mubr.msk.f32.mxu0 %vm704_vm1, %v30086_v23 }
 0x5a9   :  { %25292 = vmatmul.mubr.msk.f32.gmra.mrb[12].mxu0 %vm704_vm1, %v30157_v28 }
 0x5aa   :  { %25294 = vmatprep.mubr.msk.f32.mxu0 %vm704_vm1, %v30378_v40 }
 0x5ad   :  { %25295 = vmatmul.mubr.msk.f32.gmra.mrb[14].mxu0 %vm704_vm1, %v30455_v46 }
 0x5ae   :  { %25297 = vmatprep.mubr.msk.f32.mxu0 %vm704_vm1, %v30457_v47 }
 0x5b1   :  { %25298 = vmatmul.mubr.msk.f32.gmra.mrb[16].mxu0 %vm704_vm1, %v30463_v48 }
 0x5b2   :  { %25300 = vmatprep.mubr.msk.f32.mxu0 %vm704_vm1, %v30465_v49 }
 0x5b5   :  { %25301 = vmatmul.mubr.msk.f32.gmra.mrb[18].mxu0 %vm704_vm1, %v30471_v50 }
 0x5b6   :  { %25303 = vmatprep.mubr.msk.f32.mxu0 %vm704_vm1, %v30473_v51 }
 0x5b9   :  { %25304 = vmatmul.mubr.msk.f32.gmra.mrb[20].mxu0 %vm704_vm1, %v29959_v11  ;;  %v30665_v11 = vld [vmem:[#allocation2 + $0x2d8] sm:$0xff] }
 0x5ba   :  { %25306 = vmatprep.mubr.msk.f32.mxu0 %vm704_vm1, %v30032_v15 }
 0x5bd   :  { %25307 = vmatmul.mubr.msk.f32.gmra.mrb[22].mxu0 %vm704_vm1, %v30112_v24 }
 0x5be   :  { %25309 = vmatprep.mubr.msk.f32.mxu0 %vm704_vm1, %v30256_v37 }
 0x5c1   :  { %25310 = vmatmul.mubr.msk.f32.gmra.mrb[24].mxu0 %vm704_vm1, %v30258_v38 }
 0x5c2   :  { %25312 = vmatprep.mubr.msk.f32.mxu0 %vm704_vm1, %v30264_v0 }
 0x5c5   :  { %25313 = vmatmul.mubr.msk.f32.gmra.mrb[26].mxu0 %vm704_vm1, %v30266_v1 }
 0x5c6   :  { %25315 = vmatprep.mubr.msk.f32.mxu0 %vm704_vm1, %v30272_v2 }
 0x5c9   :  { %25316 = vmatmul.mubr.msk.f32.gmra.mrb[28].mxu0 %vm704_vm1, %v30341_v4 }
 0x5ca   :  { %25318 = vmatprep.mubr.msk.f32.mxu0 %vm704_vm1, %v30412_v41 }
 0x5cd   :  { %25319 = vmatmul.mubr.msk.f32.gmra.mrb[30].mxu0 %vm704_vm1, %v30499_v52 }
 0x5ce   :  { %25323 = vmatprep.mubr.msk.f32.mxu0 %vm704_vm1, %v30501_v53 }
 0x5d1   :  { %25324 = vmatmul.mubr.msk.f32.vlgmr.msra.gmra.mrb[0].mxu0 %vm704_vm1, %v30418_v42 }
 0x5d2   :  { %25372 = vmatpush3.msra.mxu0 %v21545_v43  ;;  %25326 = vmatprep.mubr.msk.f32.mxu0 %vm704_vm1, %v30427_v44 }
 0x5d3   :  { %25421 = vmatprep.subr.mxu0 %v21578_v54 }
 0x5d5   :  { %25327 = vmatmul.mubr.msk.f32.gmra.mrb[2].mxu0 %vm704_vm1, %v30429_v45 }
 0x5d6   :  { %25329 = vmatprep.mubr.msk.f32.mxu0 %vm704_vm1, %v30514_v55 }
 0x5d9   :  { %25330 = vmatmul.mubr.msk.f32.gmra.mrb[4].mxu0 %vm704_vm1, %v29998_v14  ;;  %v30740_v14 = vld [vmem:[#allocation2 + $0x198] sm:$0xff] }
 0x5da   :  { %25332 = vmatprep.mubr.msk.f32.mxu0 %vm704_vm1, %v30068_v18  ;;  %v30753_v18 = vld [vmem:[#allocation2 + $0x1b0] sm:$0xff] }
 0x5dd   :  { %25333 = vmatmul.mubr.msk.f32.gmra.mrb[6].mxu0 %vm704_vm1, %v30147_v27  ;;  %v30872_v27 = vld [vmem:[#allocation2 + $0x268] sm:$0xff] }
 0x5de   :  { %25335 = vmatprep.mubr.msk.f32.mxu0 %vm704_vm1, %v30076_v20 }
 0x5e1   :  { %25336 = vmatmul.mubr.msk.f32.gmra.mrb[8].mxu0 %vm704_vm1, %v30078_v21 }
 0x5e2   :  { %25338 = vmatprep.mubr.msk.f32.mxu0 %vm704_vm1, %v30084_v22 }
 0x5e5   :  { %25339 = vmatmul.mubr.msk.f32.gmra.mrb[10].mxu0 %vm704_vm1, %v30086_v23 }
 0x5e6   :  { %25341 = vmatprep.mubr.msk.f32.mxu0 %vm704_vm1, %v30157_v28 }
 0x5e9   :  { %25342 = vmatmul.mubr.msk.f32.gmra.mrb[12].mxu0 %vm704_vm1, %v30378_v40 }
 0x5ea   :  { %25344 = vmatprep.mubr.msk.f32.mxu0 %vm704_vm1, %v30455_v46 }
 0x5ed   :  { %25345 = vmatmul.mubr.msk.f32.gmra.mrb[14].mxu0 %vm704_vm1, %v30540_v56 }
 0x5ee   :  { %25347 = vmatprep.mubr.msk.f32.mxu0 %vm704_vm1, %v30463_v48 }
 0x5f1   :  { %25348 = vmatmul.mubr.msk.f32.gmra.mrb[16].mxu0 %vm704_vm1, %v30465_v49 }
 0x5f2   :  { %25350 = vmatprep.mubr.msk.f32.mxu0 %vm704_vm1, %v30471_v50 }
 0x5f5   :  { %25351 = vmatmul.mubr.msk.f32.gmra.mrb[18].mxu0 %vm704_vm1, %v30473_v51 }
 0x5f6   :  { %25353 = vmatprep.mubr.msk.f32.mxu0 %vm704_vm1, %v30550_v57 }
 0x5f9   :  { %25354 = vmatmul.mubr.msk.f32.gmra.mrb[20].mxu0 %vm704_vm1, %v30032_v15  ;;  %v30742_v15 = vld [vmem:[#allocation2 + $0x1a0] sm:$0xff] }
 0x5fa   :  { %25356 = vmatprep.mubr.msk.f32.mxu0 %vm704_vm1, %v30112_v24  ;;  %v30862_v24 = vld [vmem:[#allocation2 + $0x230] sm:$0xff] }
 0x5fd   :  { %25357 = vmatmul.mubr.msk.f32.gmra.mrb[22].mxu0 %vm704_vm1, %v30183_v29  ;;  %v30880_v29 = vld [vmem:[#allocation2 + $0x278] sm:$0xff] }
 0x5fe   :  { %25359 = vmatprep.mubr.msk.f32.mxu0 %vm704_vm1, %v30258_v38 }
 0x601   :  { %25360 = vmatmul.mubr.msk.f32.gmra.mrb[24].mxu0 %vm704_vm1, %v30264_v0 }
 0x602   :  { %25362 = vmatprep.mubr.msk.f32.mxu0 %vm704_vm1, %v30266_v1 }
 0x605   :  { %25363 = vmatmul.mubr.msk.f32.gmra.mrb[26].mxu0 %vm704_vm1, %v30272_v2 }
 0x606   :  { %25365 = vmatprep.mubr.msk.f32.mxu0 %vm704_vm1, %v30341_v4 }
 0x609   :  { %25366 = vmatmul.mubr.msk.f32.gmra.mrb[28].mxu0 %vm704_vm1, %v30412_v41 }
 0x60a   :  { %25368 = vmatprep.mubr.msk.f32.mxu0 %vm704_vm1, %v30499_v52 }
 0x60d   :  { %25369 = vmatmul.mubr.msk.f32.gmra.mrb[30].mxu0 %vm704_vm1, %v30576_v58 }
 0x60e   :  { %25373 = vmatprep.mubr.msk.f32.mxu0 %vm704_vm1, %v30204_v31  ;;  %v30940_v31 = vld [vmem:[#allocation2 + $0x238] sm:$0xff] }
 0x60f   :  { %33236 = vst [vmem:[#allocation3_spill] sm:$0xff] %v30940_v31 }
 0x611   :  { %25374 = vmatmul.mubr.msk.f32.vlgmr.msra.gmra.mrb[0].mxu0 %vm704_vm1, %v30210_v32 }
 0x612   :  { %25422 = vmatpush3.msra.mxu0 %v21578_v54  ;;  %25376 = vmatprep.mubr.msk.f32.mxu0 %vm704_vm1, %v30212_v33 }
 0x613   :  { %25471 = vmatprep.subr.mxu0 %v21611_v59 }
 0x615   :  { %25377 = vmatmul.mubr.msk.f32.gmra.mrb[2].mxu0 %vm704_vm1, %v30070_v19 }
 0x616   :  { %25379 = vmatprep.mubr.msk.f32.mxu0 %vm704_vm1, %v30076_v20 }
 0x619   :  { %25380 = vmatmul.mubr.msk.f32.gmra.mrb[4].mxu0 %vm704_vm1, %v30078_v21 }
 0x61a   :  { %25382 = vmatprep.mubr.msk.f32.mxu0 %vm704_vm1, %v30084_v22 }
 0x61d   :  { %25383 = vmatmul.mubr.msk.f32.gmra.mrb[6].mxu0 %vm704_vm1, %v30086_v23 }
 0x61e   :  { %25385 = vmatprep.mubr.msk.f32.mxu0 %vm704_vm1, %v30597_v60 }
 0x621   :  { %25386 = vmatmul.mubr.msk.f32.gmra.mrb[8].mxu0 %vm704_vm1, %v30603_v61 }
 0x622   :  { %25388 = vmatprep.mubr.msk.f32.mxu0 %vm704_vm1, %v30605_v62 }
 0x625   :  { %25389 = vmatmul.mubr.msk.f32.gmra.mrb[10].mxu0 %vm704_vm1, %v30457_v47 }
 0x626   :  { %25391 = vmatprep.mubr.msk.f32.mxu0 %vm704_vm1, %v30463_v48 }
 0x629   :  { %25392 = vmatmul.mubr.msk.f32.gmra.mrb[12].mxu0 %vm704_vm1, %v30465_v49 }
 0x62a   :  { %25394 = vmatprep.mubr.msk.f32.mxu0 %vm704_vm1, %v30471_v50 }
 0x62d   :  { %25395 = vmatmul.mubr.msk.f32.gmra.mrb[14].mxu0 %vm704_vm1, %v30473_v51 }
 0x62e   :  { %25397 = vmatprep.mubr.msk.f32.mxu0 %vm704_vm1, %v30242_v34  ;;  %v21712_v34 = vld [vmem:[%s33223_s5 + $0x18] sm:$0xff] }
 0x631   :  { %25398 = vmatmul.mubr.msk.f32.gmra.mrb[16].mxu0 %vm704_vm1, %v30248_v35 }
 0x632   :  { %25400 = vmatprep.mubr.msk.f32.mxu0 %vm704_vm1, %v30250_v36 }
 0x635   :  { %25401 = vmatmul.mubr.msk.f32.gmra.mrb[18].mxu0 %vm704_vm1, %v30256_v37 }
 0x636   :  { %25403 = vmatprep.mubr.msk.f32.mxu0 %vm704_vm1, %v30258_v38 }
 0x639   :  { %25404 = vmatmul.mubr.msk.f32.gmra.mrb[20].mxu0 %vm704_vm1, %v30264_v0 }
 0x63a   :  { %25406 = vmatprep.mubr.msk.f32.mxu0 %vm704_vm1, %v30266_v1 }
 0x63d   :  { %25407 = vmatmul.mubr.msk.f32.gmra.mrb[22].mxu0 %vm704_vm1, %v30272_v2 }
 0x63e   :  { %25409 = vmatprep.mubr.msk.f32.mxu0 %vm704_vm1, %v30635_v63 }
 0x641   :  { %25410 = vmatmul.mubr.msk.f32.gmra.mrb[24].mxu0 %vm704_vm1, %v30641_v5 }
 0x642   :  { %25412 = vmatprep.mubr.msk.f32.mxu0 %vm704_vm1, %v30643_v6 }
 0x645   :  { %25413 = vmatmul.mubr.msk.f32.gmra.mrb[26].mxu0 %vm704_vm1, %v30649_v7 }
 0x646   :  { %25415 = vmatprep.mubr.msk.f32.mxu0 %vm704_vm1, %v30651_v8 }
 0x649   :  { %25416 = vmatmul.mubr.msk.f32.gmra.mrb[28].mxu0 %vm704_vm1, %v30657_v9 }
 0x64a   :  { %25418 = vmatprep.mubr.msk.f32.mxu0 %vm704_vm1, %v30659_v10 }
 0x64d   :  { %25419 = vmatmul.mubr.msk.f32.gmra.mrb[30].mxu0 %vm704_vm1, %v30665_v11 }
 0x64e   :  { %25423 = vmatprep.mubr.msk.f32.mxu0 %vm704_vm1, %v30210_v32  ;;  %v30974_v32 = vld [vmem:[#allocation2 + $0x2f8] sm:$0xff] }
 0x64f   :  { %33237 = vst [vmem:[#allocation4_spill] sm:$0xff] %v30974_v32 }
 0x651   :  { %25424 = vmatmul.mubr.msk.f32.vlgmr.msra.gmra.mrb[0].mxu0 %vm704_vm1, %v30212_v33 }
 0x652   :  { %25472 = vmatpush3.msra.mxu0 %v21611_v59  ;;  %25426 = vmatprep.mubr.msk.f32.mxu0 %vm704_vm1, %v30070_v19  ;;  %v30759_v19 = vld [vmem:[#allocation2 + $0x1b8] sm:$0xff] }
 0x653   :  { %25521 = vmatprep.subr.mxu0 %v21644_v12 }
 0x655   :  { %25427 = vmatmul.mubr.msk.f32.gmra.mrb[2].mxu0 %vm704_vm1, %v30076_v20  ;;  %v30781_v20 = vld [vmem:[#allocation2 + $0x228] sm:$0xff] }
 0x656   :  { %25429 = vmatprep.mubr.msk.f32.mxu0 %vm704_vm1, %v30078_v21  ;;  %v696_v21 = vld [vmem:[#allocation2 + $0x138] sm:$0xff] }
 0x657   :  { %24412 = vmatprep.mubr.msk.f32.mxu1 %vm704_vm1, %v696_v21 }
 0x658   :  { %24413 = vmatmul.mubr.msk.f32.vlgmr.msra.gmra.mrb[0].mxu1 %vm704_vm1, %v30501_v53 }
 0x659   :  { %25430 = vmatmul.mubr.msk.f32.gmra.mrb[4].mxu0 %vm704_vm1, %v30084_v22  ;;  %24415 = vmatprep.mubr.msk.f32.mxu1 %vm704_vm1, %v30418_v42  ;;  %v30824_v22 = vld [vmem:[#allocation2 + $0x2e8] sm:$0xff] }
 0x65a   :  { %25432 = vmatprep.mubr.msk.f32.mxu0 %vm704_vm1, %v30086_v23  ;;  %v30840_v23 = vld [vmem:[#allocation2 + $0x1c0] sm:$0xff] }
 0x65c   :  { %24416 = vmatmul.mubr.msk.f32.gmra.mrb[2].mxu1 %vm704_vm1, %v30427_v44 }
 0x65d   :  { %25433 = vmatmul.mubr.msk.f32.gmra.mrb[6].mxu0 %vm704_vm1, %v30157_v28  ;;  %24418 = vmatprep.mubr.msk.f32.mxu1 %vm704_vm1, %v30429_v45 }
 0x65e   :  { %25435 = vmatprep.mubr.msk.f32.mxu0 %vm704_vm1, %v30603_v61 }
 0x660   :  { %24419 = vmatmul.mubr.msk.f32.gmra.mrb[4].mxu1 %vm704_vm1, %v30514_v55 }
 0x661   :  { %25436 = vmatmul.mubr.msk.f32.gmra.mrb[8].mxu0 %vm704_vm1, %v30605_v62 }
 0x662   :  { %25438 = vmatprep.mubr.msk.f32.mxu0 %vm704_vm1, %v30457_v47 }
 0x665   :  { %25439 = vmatmul.mubr.msk.f32.gmra.mrb[10].mxu0 %vm704_vm1, %v30463_v48 }
 0x666   :  { %25441 = vmatprep.mubr.msk.f32.mxu0 %vm704_vm1, %v30465_v49 }
 0x669   :  { %25442 = vmatmul.mubr.msk.f32.gmra.mrb[12].mxu0 %vm704_vm1, %v30471_v50 }
 0x66a   :  { %25444 = vmatprep.mubr.msk.f32.mxu0 %vm704_vm1, %v30473_v51 }
 0x66d   :  { %25445 = vmatmul.mubr.msk.f32.gmra.mrb[14].mxu0 %vm704_vm1, %v30550_v57 }
 0x66e   :  { %25447 = vmatprep.mubr.msk.f32.mxu0 %vm704_vm1, %v30248_v35 }
 0x671   :  { %25448 = vmatmul.mubr.msk.f32.gmra.mrb[16].mxu0 %vm704_vm1, %v30250_v36 }
 0x672   :  { %25450 = vmatprep.mubr.msk.f32.mxu0 %vm704_vm1, %v30256_v37 }
 0x675   :  { %25451 = vmatmul.mubr.msk.f32.gmra.mrb[18].mxu0 %vm704_vm1, %v30258_v38 }
 0x676   :  { %25453 = vmatprep.mubr.msk.f32.mxu0 %vm704_vm1, %v30264_v0 }
 0x679   :  { %25454 = vmatmul.mubr.msk.f32.gmra.mrb[20].mxu0 %vm704_vm1, %v30266_v1 }
 0x67a   :  { %25456 = vmatprep.mubr.msk.f32.mxu0 %vm704_vm1, %v30272_v2 }
 0x67d   :  { %25457 = vmatmul.mubr.msk.f32.gmra.mrb[22].mxu0 %vm704_vm1, %v30341_v4 }
 0x67e   :  { %25459 = vmatprep.mubr.msk.f32.mxu0 %vm704_vm1, %v30641_v5 }
 0x681   :  { %25460 = vmatmul.mubr.msk.f32.gmra.mrb[24].mxu0 %vm704_vm1, %v30643_v6 }
 0x682   :  { %25462 = vmatprep.mubr.msk.f32.mxu0 %vm704_vm1, %v30649_v7 }
 0x685   :  { %25463 = vmatmul.mubr.msk.f32.gmra.mrb[26].mxu0 %vm704_vm1, %v30651_v8 }
 0x686   :  { %25465 = vmatprep.mubr.msk.f32.mxu0 %vm704_vm1, %v30657_v9 }
 0x689   :  { %25466 = vmatmul.mubr.msk.f32.gmra.mrb[28].mxu0 %vm704_vm1, %v30659_v10 }
 0x68a   :  { %25468 = vmatprep.mubr.msk.f32.mxu0 %vm704_vm1, %v30665_v11 }
 0x68d   :  { %25469 = vmatmul.mubr.msk.f32.gmra.mrb[30].mxu0 %vm704_vm1, %v30734_v13 }
 0x68e   :  { %25473 = vmatprep.mubr.msk.f32.mxu0 %vm704_vm1, %v30212_v33  ;;  %v21711_v33 = vld [vmem:[%s33223_s5 + $0x10] sm:$0xff] }
 0x68f   :  { %v27054_v35 = vpack.c.bf16 %v21712_v34, %v21711_v33 }
 0x691   :  { %25474 = vmatmul.mubr.msk.f32.vlgmr.msra.gmra.mrb[0].mxu0 %vm704_vm1, %v30740_v14 }
 0x692   :  { %25522 = vmatpush3.msra.mxu0 %v21644_v12  ;;  %25476 = vmatprep.mubr.msk.f32.mxu0 %vm704_vm1, %v30742_v15 }
 0x693   :  { %25571 = vmatprep.subr.mxu0 %v21677_v16 }
 0x695   :  { %25477 = vmatmul.mubr.msk.f32.gmra.mrb[2].mxu0 %vm704_vm1, %v30751_v17 }
 0x696   :  { %25479 = vmatprep.mubr.msk.f32.mxu0 %vm704_vm1, %v30753_v18 }
 0x699   :  { %25480 = vmatmul.mubr.msk.f32.gmra.mrb[4].mxu0 %vm704_vm1, %v30759_v19 }
 0x69a   :  { %25482 = vmatprep.mubr.msk.f32.mxu0 %vm704_vm1, %v30157_v28  ;;  %v30878_v28 = vld [vmem:[#allocation2 + $0x270] sm:$0xff] }
 0x69d   :  { %25483 = vmatmul.mubr.msk.f32.gmra.mrb[6].mxu0 %vm704_vm1, %v30378_v40 }
 0x69e   :  { %25485 = vmatprep.mubr.msk.f32.mxu0 %vm704_vm1, %v30605_v62 }
 0x6a1   :  { %25486 = vmatmul.mubr.msk.f32.gmra.mrb[8].mxu0 %vm704_vm1, %v30457_v47 }
 0x6a2   :  { %25488 = vmatprep.mubr.msk.f32.mxu0 %vm704_vm1, %v30463_v48 }
 0x6a5   :  { %25489 = vmatmul.mubr.msk.f32.gmra.mrb[10].mxu0 %vm704_vm1, %v30465_v49 }
 0x6a6   :  { %25491 = vmatprep.mubr.msk.f32.mxu0 %vm704_vm1, %v30471_v50 }
 0x6a9   :  { %25492 = vmatmul.mubr.msk.f32.gmra.mrb[12].mxu0 %vm704_vm1, %v30473_v51 }
 0x6aa   :  { %25494 = vmatprep.mubr.msk.f32.mxu0 %vm704_vm1, %v30550_v57 }
 0x6ad   :  { %25495 = vmatmul.mubr.msk.f32.gmra.mrb[14].mxu0 %vm704_vm1, %v30781_v20 }
 0x6ae   :  { %25497 = vmatprep.mubr.msk.f32.mxu0 %vm704_vm1, %v30250_v36  ;;  %v33230_v36 = vmov 0.0|0.0  }
 0x6af   :  { %27053 = vmatprep.subr.bf16.mxu1 %v33230_v36 }
 0x6b0   :  { %27055 = vmatpush3.bf16.msra.mxu1 %v27054_v35 }
 0x6b1   :  { %25498 = vmatmul.mubr.msk.f32.gmra.mrb[16].mxu0 %vm704_vm1, %v30256_v37  ;;  %27056 = vmatprep.subr.bf16.mxu1 %v33230_v36  ;;  %v33232_v37 = vmov 0.0  }
 0x6b2   :  { %25500 = vmatprep.mubr.msk.f32.mxu0 %vm704_vm1, %v30258_v38  ;;  %25625 = vmatprep.mubr.msk.f32.mxu1 %vm28797_vm2, %v33232_v37 }
 0x6b5   :  { %25501 = vmatmul.mubr.msk.f32.gmra.mrb[18].mxu0 %vm704_vm1, %v30264_v0 }
 0x6b6   :  { %25503 = vmatprep.mubr.msk.f32.mxu0 %vm704_vm1, %v30266_v1 }
 0x6b9   :  { %25504 = vmatmul.mubr.msk.f32.gmra.mrb[20].mxu0 %vm704_vm1, %v30272_v2 }
 0x6ba   :  { %25506 = vmatprep.mubr.msk.f32.mxu0 %vm704_vm1, %v30341_v4 }
 0x6bd   :  { %25507 = vmatmul.mubr.msk.f32.gmra.mrb[22].mxu0 %vm704_vm1, %v30412_v41 }
 0x6be   :  { %25509 = vmatprep.mubr.msk.f32.mxu0 %vm704_vm1, %v30643_v6 }
 0x6c1   :  { %25510 = vmatmul.mubr.msk.f32.gmra.mrb[24].mxu0 %vm704_vm1, %v30649_v7 }
 0x6c2   :  { %25512 = vmatprep.mubr.msk.f32.mxu0 %vm704_vm1, %v30651_v8 }
 0x6c5   :  { %25513 = vmatmul.mubr.msk.f32.gmra.mrb[26].mxu0 %vm704_vm1, %v30657_v9 }
 0x6c6   :  { %25515 = vmatprep.mubr.msk.f32.mxu0 %vm704_vm1, %v30659_v10 }
 0x6c9   :  { %25516 = vmatmul.mubr.msk.f32.gmra.mrb[28].mxu0 %vm704_vm1, %v30665_v11 }
 0x6ca   :  { %25518 = vmatprep.mubr.msk.f32.mxu0 %vm704_vm1, %v30734_v13 }
 0x6cd   :  { %25519 = vmatmul.mubr.msk.f32.gmra.mrb[30].mxu0 %vm704_vm1, %v30824_v22 }
 0x6ce   :  { %25523 = vmatprep.mubr.msk.f32.mxu0 %vm704_vm1, %v30740_v14 }
 0x6d1   :  { %25524 = vmatmul.mubr.msk.f32.vlgmr.msra.gmra.mrb[0].mxu0 %vm704_vm1, %v30742_v15 }
 0x6d2   :  { %25572 = vmatpush3.msra.mxu0 %v21677_v16  ;;  %25526 = vmatprep.mubr.msk.f32.mxu0 %vm704_vm1, %v30751_v17 }
 0x6d3   :  { %27077 = vmatprep.subr.bf16.mxu0 %v33230_v36 }
 0x6d5   :  { %25527 = vmatmul.mubr.msk.f32.gmra.mrb[2].mxu0 %vm704_vm1, %v30753_v18 }
 0x6d6   :  { %25529 = vmatprep.mubr.msk.f32.mxu0 %vm704_vm1, %v30759_v19 }
 0x6d9   :  { %25530 = vmatmul.mubr.msk.f32.gmra.mrb[4].mxu0 %vm704_vm1, %v30840_v23 }
 0x6da   :  { %25532 = vmatprep.mubr.msk.f32.mxu0 %vm704_vm1, %v30378_v40 }
 0x6dd   :  { %25533 = vmatmul.mubr.msk.f32.gmra.mrb[6].mxu0 %vm704_vm1, %v30455_v46 }
 0x6de   :  { %25535 = vmatprep.mubr.msk.f32.mxu0 %vm704_vm1, %v30457_v47 }
 0x6e1   :  { %25536 = vmatmul.mubr.msk.f32.gmra.mrb[8].mxu0 %vm704_vm1, %v30463_v48 }
 0x6e2   :  { %25538 = vmatprep.mubr.msk.f32.mxu0 %vm704_vm1, %v30465_v49 }
 0x6e5   :  { %25539 = vmatmul.mubr.msk.f32.gmra.mrb[10].mxu0 %vm704_vm1, %v30471_v50 }
 0x6e6   :  { %25541 = vmatprep.mubr.msk.f32.mxu0 %vm704_vm1, %v30473_v51 }
 0x6e9   :  { %25542 = vmatmul.mubr.msk.f32.gmra.mrb[12].mxu0 %vm704_vm1, %v30550_v57 }
 0x6ea   :  { %25544 = vmatprep.mubr.msk.f32.mxu0 %vm704_vm1, %v30781_v20 }
 0x6ed   :  { %25545 = vmatmul.mubr.msk.f32.gmra.mrb[14].mxu0 %vm704_vm1, %v30862_v24 }
 0x6ee   :  { %25547 = vmatprep.mubr.msk.f32.mxu0 %vm704_vm1, %v30864_v25 }
 0x6f1   :  { %25548 = vmatmul.mubr.msk.f32.gmra.mrb[16].mxu0 %vm704_vm1, %v30870_v26 }
 0x6f2   :  { %25550 = vmatprep.mubr.msk.f32.mxu0 %vm704_vm1, %v30872_v27 }
 0x6f5   :  { %25551 = vmatmul.mubr.msk.f32.gmra.mrb[18].mxu0 %vm704_vm1, %v30878_v28 }
 0x6f6   :  { %25553 = vmatprep.mubr.msk.f32.mxu0 %vm704_vm1, %v30880_v29 }
 0x6f9   :  { %25554 = vmatmul.mubr.msk.f32.gmra.mrb[20].mxu0 %vm704_vm1, %v30341_v4 }
 0x6fa   :  { %25556 = vmatprep.mubr.msk.f32.mxu0 %vm704_vm1, %v30412_v41 }
 0x6fd   :  { %25557 = vmatmul.mubr.msk.f32.gmra.mrb[22].mxu0 %vm704_vm1, %v30499_v52 }
 0x6fe   :  { %25559 = vmatprep.mubr.msk.f32.mxu0 %vm704_vm1, %v30649_v7 }
 0x701   :  { %25560 = vmatmul.mubr.msk.f32.gmra.mrb[24].mxu0 %vm704_vm1, %v30651_v8 }
 0x702   :  { %25562 = vmatprep.mubr.msk.f32.mxu0 %vm704_vm1, %v30657_v9 }
 0x705   :  { %25563 = vmatmul.mubr.msk.f32.gmra.mrb[26].mxu0 %vm704_vm1, %v30659_v10 }
 0x706   :  { %25565 = vmatprep.mubr.msk.f32.mxu0 %vm704_vm1, %v30665_v11 }
 0x709   :  { %25566 = vmatmul.mubr.msk.f32.gmra.mrb[28].mxu0 %vm704_vm1, %v30734_v13 }
 0x70a   :  { %25568 = vmatprep.mubr.msk.f32.mxu0 %vm704_vm1, %v30824_v22 }
 0x70d   :  { %25569 = vmatmul.mubr.msk.f32.gmra.mrb[30].mxu0 %vm704_vm1, %v30906_v30 }
 0x70e   :  { %25573 = vmatprep.mubr.msk.f32.mxu0 %vm704_vm1, %v30742_v15 }
 0x711   :  { %25574 = vmatmul.mubr.msk.f32.vlgmr.msra.gmra.mrb[0].mxu0 %vm704_vm1, %v30751_v17 }
 0x712   :  { %25576 = vmatprep.mubr.msk.f32.mxu0 %vm704_vm1, %v30753_v18 }
 0x715   :  { %25577 = vmatmul.mubr.msk.f32.gmra.mrb[2].mxu0 %vm704_vm1, %v30759_v19 }
 0x716   :  { %25579 = vmatprep.mubr.msk.f32.mxu0 %vm704_vm1, %v30840_v23 }
 0x719   :  { %25580 = vmatmul.mubr.msk.f32.gmra.mrb[4].mxu0 %vm704_vm1, %v30378_v40 }
 0x71a   :  { %25582 = vmatprep.mubr.msk.f32.mxu0 %vm704_vm1, %v30455_v46 }
 0x71d   :  { %25583 = vmatmul.mubr.msk.f32.gmra.mrb[6].mxu0 %vm704_vm1, %v30540_v56 }
 0x71e   :  { %25585 = vmatprep.mubr.msk.f32.mxu0 %vm704_vm1, %v30463_v48 }
 0x721   :  { %25586 = vmatmul.mubr.msk.f32.gmra.mrb[8].mxu0 %vm704_vm1, %v30465_v49 }
 0x722   :  { %25588 = vmatprep.mubr.msk.f32.mxu0 %vm704_vm1, %v30471_v50 }
 0x725   :  { %25589 = vmatmul.mubr.msk.f32.gmra.mrb[10].mxu0 %vm704_vm1, %v30473_v51 }
 0x726   :  { %25591 = vmatprep.mubr.msk.f32.mxu0 %vm704_vm1, %v30550_v57 }
 0x729   :  { %25592 = vmatmul.mubr.msk.f32.gmra.mrb[12].mxu0 %vm704_vm1, %v30781_v20 }
 0x72a   :  { %25594 = vmatprep.mubr.msk.f32.mxu0 %vm704_vm1, %v30862_v24 }
 0x72b   :  { %v30991_v38 = vpop.f32.mrb[0].mxu1 }
 0x72c   :  { %v30993_v0 = vpop.f32.mrb[1].mxu1 }
 0x72d   :  { %25595 = vmatmul.mubr.msk.f32.gmra.mrb[14].mxu0 %vm704_vm1, %v30940_v31 }
 0x72e   :  { %25597 = vmatprep.mubr.msk.f32.mxu0 %vm704_vm1, %v30870_v26 }
 0x72f   :  { %v30995_v1 = vpop.f32.mrb[2].mxu1 }
 0x730   :  { %v30997_v2 = vpop.f32.mrb[3].mxu1 }
 0x731   :  { %25598 = vmatmul.mubr.msk.f32.gmra.mrb[16].mxu0 %vm704_vm1, %v30872_v27 }
 0x732   :  { %25600 = vmatprep.mubr.msk.f32.mxu0 %vm704_vm1, %v30878_v28 }
 0x733   :  { %v30999_v3 = vpop.f32.mrb[4].mxu1 }
 0x735   :  { %25601 = vmatmul.mubr.msk.f32.gmra.mrb[18].mxu0 %vm704_vm1, %v30880_v29 }
 0x736   :  { %25603 = vmatprep.mubr.msk.f32.mxu0 %vm704_vm1, %v30341_v4  ;;  %v31001_v4 = vpop.f32.mrb[5].mxu1 }
 0x739   :  { %25604 = vmatmul.mubr.msk.f32.gmra.mrb[20].mxu0 %vm704_vm1, %v30412_v41 }
 0x73a   :  { %25606 = vmatprep.mubr.msk.f32.mxu0 %vm704_vm1, %v30499_v52 }
 0x73d   :  { %25607 = vmatmul.mubr.msk.f32.gmra.mrb[22].mxu0 %vm704_vm1, %v30576_v58 }
 0x73e   :  { %25609 = vmatprep.mubr.msk.f32.mxu0 %vm704_vm1, %v30651_v8 }
 0x741   :  { %25610 = vmatmul.mubr.msk.f32.gmra.mrb[24].mxu0 %vm704_vm1, %v30657_v9 }
 0x742   :  { %25612 = vmatprep.mubr.msk.f32.mxu0 %vm704_vm1, %v30659_v10 }
 0x745   :  { %25613 = vmatmul.mubr.msk.f32.gmra.mrb[26].mxu0 %vm704_vm1, %v30665_v11 }
 0x746   :  { %25615 = vmatprep.mubr.msk.f32.mxu0 %vm704_vm1, %v30734_v13 }
 0x749   :  { %25616 = vmatmul.mubr.msk.f32.gmra.mrb[28].mxu0 %vm704_vm1, %v30824_v22 }
 0x74a   :  { %25618 = vmatprep.mubr.msk.f32.mxu0 %vm704_vm1, %v30906_v30 }
 0x74d   :  { %25619 = vmatmul.mubr.msk.f32.gmra.mrb[30].mxu0 %vm704_vm1, %v30974_v32 }
 0x74e   :  { %26931 = vmatprep.mubr.msk.f32.mxu0 %vm28797_vm2, %v33232_v37 }
 0x7e4   :  { %v25575_v40 = vpop.f32.mrb[0].mxu0 }
 0x7e5   :  { %v10278_v41 = vadd.f32 %v25575_v40, %v31006_v39  ;;  %v10080_v42 = vpop.f32.mrb[1].mxu0 }
 0x7e6   :  { %v10277_v43 = vadd.f32 %v31006_v39, %v10080_v42 }
 0x7e7   :  { %v10310_v44 = vmax.f32 %v10278_v41, 0.0 }
 0x7e8   :  { %v10309_v45 = vmax.f32 %v10277_v43, 0.0  ;;  %v25578_v46 = vpop.f32.mrb[2].mxu0 }
 0x7e9   :  { %v10280_v52 = vadd.f32 %v25578_v46, %v31006_v39  ;;  %v10090_v53 = vpop.f32.mrb[3].mxu0 }
 0x7ea   :  { %v31011_v54 = vmax.f32 %v10309_v45, %v10310_v44  ;;  %v10279_v55 = vadd.f32 %v31006_v39, %v10090_v53 }
 0x7eb   :  { %v10312_v56 = vmax.f32 %v10280_v52, 0.0 }
 0x7ec   :  { %v10311_v58 = vmax.f32 %v10279_v55, 0.0  ;;  %v25581_v59 = vpop.f32.mrb[4].mxu0 }
 0x7ed   :  { %v10282_v12 = vadd.f32 %v25581_v59, %v31006_v39  ;;  %v10100_v16 = vpop.f32.mrb[5].mxu0 }
 0x7ee   :  { %v10342_v21 = vmax.f32 %v10311_v58, %v10312_v56  ;;  %v10281_v33 = vadd.f32 %v31006_v39, %v10100_v16 }
 0x7ef   :  { %v10314_v34 = vmax.f32 %v10282_v12, 0.0 }
 0x7f0   :  { %v10313_v35 = vmax.f32 %v10281_v33, 0.0  ;;  %v25584_v40 = vpop.f32.mrb[6].mxu0 }
 0x7f1   :  { %v10284_v41 = vadd.f32 %v25584_v40, %v31006_v39  ;;  %v10110_v42 = vpop.f32.mrb[7].mxu0 }
 0x7f2   :  { %v31017_v43 = vmax.f32 %v10313_v35, %v10314_v34  ;;  %v10283_v44 = vadd.f32 %v31006_v39, %v10110_v42 }
 0x7f3   :  { %v10316_v45 = vmax.f32 %v10284_v41, 0.0 }
 0x7f4   :  { %v10315_v46 = vmax.f32 %v10283_v44, 0.0  ;;  %v25587_v52 = vpop.f32.mrb[8].mxu0 }
 0x7f5   :  { %v10286_v53 = vadd.f32 %v25587_v52, %v31006_v39  ;;  %v10120_v55 = vpop.f32.mrb[9].mxu0 }
 0x7f6   :  { %v31021_v59 = vmax.f32 %v10315_v46, %v10316_v45  ;;  %v10285_v56 = vadd.f32 %v31006_v39, %v10120_v55  ;;  %v10365_v45 = vld [vmem:[%s33223_s5] sm:$0xff]  ;;  %v10366_v46 = vld [vmem:[%s33223_s5 + $0x8] sm:$0xff] }
 0x7f7   :  { %v10318_v58 = vmax.f32 %v10286_v53, 0.0 }
 0x7f8   :  { %v10317_v12 = vmax.f32 %v10285_v56, 0.0  ;;  %v25590_v16 = vpop.f32.mrb[10].mxu0 }
 0x7f9   :  { %v10288_v33 = vadd.f32 %v25590_v16, %v31006_v39  ;;  %v10130_v40 = vpop.f32.mrb[11].mxu0 }
 0x7fa   :  { %v10349_v34 = vmax.f32 %v10317_v12, %v10318_v58  ;;  %v10287_v35 = vadd.f32 %v31006_v39, %v10130_v40  ;;  %v27057_v12 = vpack.c.bf16 %v10366_v46, %v10365_v45  ;;  %v21715_v40 = vld [vmem:[%s33223_s5 + $0x20] sm:$0xff] }
 0x7fb   :  { %v10320_v42 = vmax.f32 %v10288_v33, 0.0 }
 0x7fc   :  { %v10357_v41 = vmax.f32 %v31011_v54, %v10349_v34  ;;  %v10319_v44 = vmax.f32 %v10287_v35, 0.0  ;;  %v25593_v36 = vpop.f32.mrb[12].mxu0  ;;  %v21716_v34 = vld [vmem:[%s33223_s5 + $0x28] sm:$0xff] }
 0x7fd   :  { %v10290_v52 = vadd.f32 %v25593_v36, %v31006_v39  ;;  %v10140_v53 = vpop.f32.mrb[13].mxu0 }
 0x7fe   :  { %v10350_v55 = vmax.f32 %v10319_v44, %v10320_v42  ;;  %v10289_v56 = vadd.f32 %v31006_v39, %v10140_v53 }
 0x7ff   :  { %v10322_v58 = vmax.f32 %v10290_v52, 0.0 }
 0x800   :  { %v10358_v54 = vmax.f32 %v10342_v21, %v10350_v55  ;;  %v10321_v16 = vmax.f32 %v10289_v56, 0.0  ;;  %v25596_v33 = vpop.f32.mrb[14].mxu0  ;;  %v27060_v21 = vpack.c.bf16 %v21716_v34, %v21715_v40  ;;  %v33238_v55 = vmov 0.0|0.0   ;;  %v21718_v56 = vld [vmem:[%s33223_s5 + $0x30] sm:$0xff] }
 0x801   :  { %v10292_v36 = vadd.f32 %v25596_v33, %v31006_v39  ;;  %v10150_v35 = vpop.f32.mrb[15].mxu0 }
 0x802   :  { %v10351_v42 = vmax.f32 %v10321_v16, %v10322_v58  ;;  %v10291_v44 = vadd.f32 %v31006_v39, %v10150_v35  ;;  %25626 = vmatmul.mubr.msk.f32.vlgmr.msra.gmra.mrb[6].mxu1 %vm10370_vm3, %v10358_v54  ;;  %v21719_v58 = vld [vmem:[%s33223_s5 + $0x38] sm:$0xff] }
 0x803   :  { %v10324_v45 = vmax.f32 %v10292_v36, 0.0  ;;  %27058 = vmatpush3.bf16.msra.mxu1 %v27057_v12  ;;  %25632 = vmatprep.mubr.msk.f32.mxu1 %vm28797_vm2, %v33232_v37  ;;  %v27063_v40 = vpack.c.bf16 %v21719_v58, %v21718_v56 }
 0x804   :  { %v10359_v46 = vmax.f32 %v31017_v43, %v10351_v42  ;;  %v10323_v52 = vmax.f32 %v10291_v44, 0.0  ;;  %v25599_v53 = vpop.f32.mrb[16].mxu0  ;;  %27059 = vmatprep.subr.bf16.mxu1 %v33238_v55  ;;  %v21721_v42 = vld [vmem:[%s33223_s5 + $0x40] sm:$0xff] }
 0x805   :  { %v10294_v12 = vadd.f32 %v25599_v53, %v31006_v39  ;;  %v10160_v54 = vpop.f32.mrb[17].mxu0 }
 0x806   :  { %v10352_v16 = vmax.f32 %v10323_v52, %v10324_v45  ;;  %v10293_v33 = vadd.f32 %v31006_v39, %v10160_v54  ;;  %25633 = vmatmul.mubr.msk.f32.vlgmr.msra.gmra.mrb[8].mxu1 %vm10370_vm3, %v10357_v41  ;;  %v21722_v41 = vld [vmem:[%s33223_s5 + $0x48] sm:$0xff] }
 0x807   :  { %v10326_v43 = vmax.f32 %v10294_v12, 0.0  ;;  %27061 = vmatpush3.bf16.msra.mxu1 %v27060_v21  ;;  %25639 = vmatprep.mubr.msk.f32.mxu1 %vm28797_vm2, %v33232_v37  ;;  %v27066_v53 = vpack.c.bf16 %v21722_v41, %v21721_v42 }
 0x808   :  { %v10360_v34 = vmax.f32 %v31021_v59, %v10352_v16  ;;  %v10325_v36 = vmax.f32 %v10293_v33, 0.0  ;;  %v25602_v35 = vpop.f32.mrb[18].mxu0  ;;  %27062 = vmatprep.subr.bf16.mxu1 %v33238_v55 }
 0x809   :  { %v10296_v44 = vadd.f32 %v25602_v35, %v31006_v39  ;;  %v10170_v45 = vpop.f32.mrb[19].mxu0 }
 0x80a   :  { %v10345_v21 = vmax.f32 %v10325_v36, %v10326_v43  ;;  %v10295_v52 = vadd.f32 %v31006_v39, %v10170_v45  ;;  %25640 = vmatmul.mubr.msk.f32.vlgmr.msra.gmra.mrb[10].mxu1 %vm10370_vm3, %v10359_v46 }
 0x80b   :  { %v10328_v59 = vmax.f32 %v10296_v44, 0.0  ;;  %27064 = vmatpush3.bf16.msra.mxu1 %v27063_v40  ;;  %25646 = vmatprep.mubr.msk.f32.mxu1 %vm28797_vm2, %v33232_v37 }
 0x80c   :  { %v10327_v56 = vmax.f32 %v10295_v52, 0.0  ;;  %v25605_v58 = vpop.f32.mrb[20].mxu0  ;;  %27065 = vmatprep.subr.bf16.mxu1 %v33238_v55 }
 0x80d   :  { %v10298_v12 = vadd.f32 %v25605_v58, %v31006_v39  ;;  %v10180_v54 = vpop.f32.mrb[21].mxu0 }
 0x80e   :  { %v10346_v16 = vmax.f32 %v10327_v56, %v10328_v59  ;;  %v10297_v33 = vadd.f32 %v31006_v39, %v10180_v54  ;;  %25647 = vmatmul.mubr.msk.f32.vlgmr.msra.gmra.mrb[12].mxu1 %vm10370_vm3, %v10360_v34 }
 0x80f   :  { %v10330_v43 = vmax.f32 %v10298_v12, 0.0  ;;  %27067 = vmatpush3.bf16.msra.mxu1 %v27066_v53  ;;  %25653 = vmatprep.mubr.msk.f32.mxu1 %vm28797_vm2, %v33232_v37 }
 0x810   :  { %v10329_v46 = vmax.f32 %v10297_v33, 0.0  ;;  %v25608_v40 = vpop.f32.mrb[22].mxu0  ;;  %27068 = vmatprep.subr.bf16.mxu1 %v33238_v55  ;;  %v21724_v33 = vld [vmem:[%s33223_s5 + $0x50] sm:$0xff] }
 0x811   :  { %v10300_v36 = vadd.f32 %v25608_v40, %v31006_v39  ;;  %v10190_v35 = vpop.f32.mrb[23].mxu0 }
 0x812   :  { %v10347_v42 = vmax.f32 %v10329_v46, %v10330_v43  ;;  %v10299_v41 = vadd.f32 %v31006_v39, %v10190_v35  ;;  %v21725_v43 = vld [vmem:[%s33223_s5 + $0x58] sm:$0xff] }
 0x813   :  { %v10332_v44 = vmax.f32 %v10300_v36, 0.0 }
 0x814   :  { %v10331_v45 = vmax.f32 %v10299_v41, 0.0  ;;  %v25611_v52 = vpop.f32.mrb[24].mxu0 }
 0x815   :  { %v10302_v34 = vadd.f32 %v25611_v52, %v31006_v39  ;;  %v10200_v59 = vpop.f32.mrb[25].mxu0 }
 0x816   :  { %v10348_v53 = vmax.f32 %v10331_v45, %v10332_v44  ;;  %v10301_v56 = vadd.f32 %v31006_v39, %v10200_v59  ;;  %v27069_v44 = vpack.c.bf16 %v21725_v43, %v21724_v33 }
 0x817   :  { %v10334_v58 = vmax.f32 %v10302_v34, 0.0 }
 0x818   :  { %v10333_v12 = vmax.f32 %v10301_v56, 0.0  ;;  %v25614_v54 = vpop.f32.mrb[26].mxu0 }
 0x819   :  { %v27155_v46 = vadd.f32 %v25614_v54, %v30991_v38  ;;  %v10210_v40 = vpop.f32.mrb[27].mxu0  ;;  %v21727_v38 = vld [vmem:[%s33223_s5 + $0x60] sm:$0xff] }
 0x81a   :  { %v10353_v36 = vmax.f32 %v10333_v12, %v10334_v58  ;;  %v27156_v35 = vadd.f32 %v10210_v40, %v30993_v0  ;;  %v21728_v0 = vld [vmem:[%s33223_s5 + $0x68] sm:$0xff]  ;;  %v33239_v58 = vmov 0.0  }
 0x81b   :  { %v10304_v41 = vadd.f32 %v27155_v46, %v31006_v39  ;;  %v27072_v43 = vpack.c.bf16 %v21728_v0, %v21727_v38  ;;  %v28731_v38 = vld [vmem:[%s33221_s3 + $0x10] sm:$0xff]  ;;  %v28732_v0 = vld [vmem:[#allocation2 + $0x1a0] sm:$0xff] }
 0x81c   :  { %v10361_v45 = vmax.f32 %v10345_v21, %v10353_v36  ;;  %v10303_v52 = vadd.f32 %v27156_v35, %v31006_v39  ;;  %v25617_v34 = vpop.f32.mrb[28].mxu0  ;;  %v21730_v35 = vld [vmem:[%s33223_s5 + $0x70] sm:$0xff] }
 0x81d   :  { %v10336_v59 = vmax.f32 %v10304_v41, 0.0  ;;  %v27157_v56 = vadd.f32 %v25617_v34, %v30995_v1  ;;  %v10220_v37 = vpop.f32.mrb[29].mxu0  ;;  %v28726_v34 = vld [vmem:[%s33221_s3 + $0x8] sm:$0xff] }
 0x81e   :  { %v10335_v32 = vmax.f32 %v10303_v52, 0.0  ;;  %v27158_v31 = vadd.f32 %v10220_v37, %v30997_v2  ;;  %25654 = vmatmul.mubr.msk.f32.vlgmr.msra.gmra.mrb[14].mxu1 %vm10370_vm3, %v10361_v45 }
 0x81f   :  { %v10306_v21 = vadd.f32 %v27157_v56, %v31006_v39  ;;  %27070 = vmatpush3.bf16.msra.mxu1 %v27069_v44  ;;  %25660 = vmatprep.mubr.msk.f32.mxu1 %vm28797_vm2, %v33239_v58  ;;  %v31132_v56 = vld [vmem:[#allocation2 + $0x190] sm:$0xff] }
 0x820   :  { %v10354_v1 = vmax.f32 %v10335_v32, %v10336_v59  ;;  %v10305_v12 = vadd.f32 %v27158_v31, %v31006_v39  ;;  %v25620_v37 = vpop.f32.mrb[30].mxu0  ;;  %27071 = vmatprep.subr.bf16.mxu1 %v33238_v55  ;;  %v21731_v31 = vld [vmem:[%s33223_s5 + $0x78] sm:$0xff]  ;;  %v28728_v59 = vld [vmem:[%s33221_s3] sm:$0xff] }
 0x821   :  { %v10338_v2 = vmax.f32 %v10306_v21, 0.0  ;;  %v27159_v54 = vadd.f32 %v25620_v37, %v30999_v3  ;;  %v10230_v33 = vpop.f32.mrb[31].mxu0  ;;  %v28733_v21 = vld [vmem:[#allocation2 + $0x1a8] sm:$0xff]  ;;  %v31144_v37 = vld [vmem:[#allocation2 + $0x1c0] sm:$0xff] }
 0x822   :  { %v10362_v46 = vmax.f32 %v10346_v16, %v10354_v1  ;;  %v10337_v40 = vmax.f32 %v10305_v12, 0.0  ;;  %v27160_v36 = vadd.f32 %v10230_v33, %v31001_v4  ;;  %v27075_v4 = vpack.c.bf16 %v21731_v31, %v21730_v35  ;;  %v28734_v1 = vld [vmem:[#allocation2 + $0x1b0] sm:$0xff]  ;;  %v28735_v12 = vld [vmem:[#allocation2 + $0x1b8] sm:$0xff]  ;;  %v31231_v31 = vld [vmem:[#allocation2 + $0x200] sm:$0xff] }
 0x823   :  { %v10308_v32 = vadd.f32 %v27159_v54, %v31006_v39  ;;  %v31165_v54 = vld [vmem:[#allocation2 + $0x250] sm:$0xff]  ;;  %v31227_v35 = vld [vmem:[#allocation2 + $0x1f8] sm:$0xff] }
 0x824   :  { %v10355_v41 = vmax.f32 %v10337_v40, %v10338_v2  ;;  %v10307_v44 = vadd.f32 %v27160_v36, %v31006_v39  ;;  %25661 = vmatmul.mubr.msk.f32.vlgmr.msra.gmra.mrb[16].mxu1 %vm10370_vm3, %v10362_v46  ;;  %v28737_v2 = vld [vmem:[#allocation2 + $0x248] sm:$0xff]  ;;  %v31181_v33 = vld [vmem:[#allocation2 + $0x270] sm:$0xff]  ;;  %v31189_v46 = vld [vmem:[#allocation2 + $0x280] sm:$0xff] }
 0x825   :  { %v10340_v3 = vmax.f32 %v10308_v32, 0.0  ;;  %27073 = vmatpush3.bf16.msra.mxu1 %v27072_v43  ;;  %25667 = vmatprep.mubr.msk.f32.mxu1 %vm28797_vm2, %v33239_v58  ;;  %v31185_v43 = vld [vmem:[#allocation2 + $0x278] sm:$0xff]  ;;  %v28745_v40 = vld [vmem:[#allocation2 + $0x180] sm:$0xff]  ;;  %v31235_v32 = vld [vmem:[#allocation2 + $0x208] sm:$0xff] }
 0x826   :  { %v10363_v16 = vmax.f32 %v10347_v42, %v10355_v41  ;;  %v10339_v45 = vmax.f32 %v10307_v44, 0.0  ;;  %27074 = vmatprep.subr.bf16.mxu1 %v33238_v55  ;;  %v28727_v42 = vld [vmem:[#allocation2 + $0x188] sm:$0xff]  ;;  %v28746_v36 = vld [vmem:[%s33221_s3 + $0x18] sm:$0xff] }
 0x828   :  { %v10356_v52 = vmax.f32 %v10339_v45, %v10340_v3  ;;  %25668 = vmatmul.mubr.msk.f32.vlgmr.msra.gmra.mrb[18].mxu1 %vm10370_vm3, %v10363_v16  ;;  %v31328_v3 = vld [vmem:[#allocation2 + $0x288] sm:$0xff] }
 0x829   :  { %27076 = vmatpush3.bf16.msra.mxu1 %v27075_v4  ;;  %25674 = vmatprep.mubr.msk.f32.mxu1 %vm28797_vm2, %v33239_v58 }
 0x82a   :  { %v10364_v39 = vmax.f32 %v10348_v53, %v10356_v52  ;;  %25677 = vmatprep.subr.mxu1 %v28726_v34  ;;  %v28730_v53 = vld [vmem:[#allocation2 + $0x198] sm:$0xff] }
 0x82c   :  { %25675 = vmatmul.mubr.msk.f32.vlgmr.msra.gmra.mrb[20].mxu1 %vm10370_vm3, %v10364_v39 }
 0x82d   :  { %25678 = vmatpush3.msra.mxu1 %v28726_v34  ;;  %25679 = vmatprep.mubr.msk.f32.mxu1 %vm704_vm1, %v28727_v42 }
 0x82e   :  { %25727 = vmatprep.subr.mxu1 %v28728_v59 }
 0x830   :  { %25680 = vmatmul.mubr.msk.f32.vlgmr.msra.gmra.mrb[22].mxu1 %vm704_vm1, %v31132_v56 }
 0x831   :  { %25728 = vmatpush3.msra.mxu1 %v28728_v59  ;;  %25682 = vmatprep.mubr.msk.f32.mxu1 %vm704_vm1, %v28730_v53 }
 0x832   :  { %25777 = vmatprep.subr.mxu1 %v28731_v38 }
 0x834   :  { %25683 = vmatmul.mubr.msk.f32.gmra.mrb[24].mxu1 %vm704_vm1, %v28732_v0 }
 0x835   :  { %25685 = vmatprep.mubr.msk.f32.mxu1 %vm704_vm1, %v28733_v21 }
 0x838   :  { %25686 = vmatmul.mubr.msk.f32.gmra.mrb[26].mxu1 %vm704_vm1, %v28734_v1 }
 0x839   :  { %25688 = vmatprep.mubr.msk.f32.mxu1 %vm704_vm1, %v28735_v12 }
 0x83c   :  { %25689 = vmatmul.mubr.msk.f32.gmra.mrb[28].mxu1 %vm704_vm1, %v31144_v37 }
 0x83d   :  { %25691 = vmatprep.mubr.msk.f32.mxu1 %vm704_vm1, %v30603_v61 }
 0x840   :  { %25692 = vmatmul.mubr.msk.f32.gmra.mrb[30].mxu1 %vm704_vm1, %v30605_v62 }
 0x841   :  { %25694 = vmatprep.mubr.msk.f32.mxu1 %vm704_vm1, %v30457_v47  ;;  %v31169_v47 = vld [vmem:[#allocation2 + $0x258] sm:$0xff] }
 0x844   :  { %25695 = vmatmul.mubr.msk.f32.gmra.mrb[32].mxu1 %vm704_vm1, %v30463_v48  ;;  %v31173_v48 = vld [vmem:[#allocation2 + $0x260] sm:$0xff] }
 0x845   :  { %25697 = vmatprep.mubr.msk.f32.mxu1 %vm704_vm1, %v30465_v49  ;;  %v31177_v49 = vld [vmem:[#allocation2 + $0x268] sm:$0xff] }
 0x848   :  { %25698 = vmatmul.mubr.msk.f32.gmra.mrb[34].mxu1 %vm704_vm1, %v30471_v50 }
 0x849   :  { %25700 = vmatprep.mubr.msk.f32.mxu1 %vm704_vm1, %v30473_v51 }
 0x84c   :  { %25701 = vmatmul.mubr.msk.f32.gmra.mrb[36].mxu1 %vm704_vm1, %v30550_v57 }
 0x84d   :  { %25703 = vmatprep.mubr.msk.f32.mxu1 %vm704_vm1, %v28737_v2 }
 0x850   :  { %25704 = vmatmul.mubr.msk.f32.gmra.mrb[38].mxu1 %vm704_vm1, %v31165_v54 }
 0x851   :  { %25706 = vmatprep.mubr.msk.f32.mxu1 %vm704_vm1, %v31169_v47 }
 0x854   :  { %25707 = vmatmul.mubr.msk.f32.gmra.mrb[40].mxu1 %vm704_vm1, %v31173_v48 }
 0x855   :  { %25709 = vmatprep.mubr.msk.f32.mxu1 %vm704_vm1, %v31177_v49 }
 0x858   :  { %25710 = vmatmul.mubr.msk.f32.gmra.mrb[42].mxu1 %vm704_vm1, %v31181_v33 }
 0x859   :  { %25712 = vmatprep.mubr.msk.f32.mxu1 %vm704_vm1, %v31185_v43 }
 0x85c   :  { %25713 = vmatmul.mubr.msk.f32.gmra.mrb[44].mxu1 %vm704_vm1, %v31189_v46 }
 0x85d   :  { %25715 = vmatprep.mubr.msk.f32.mxu1 %vm704_vm1, %v30641_v5 }
 0x860   :  { %25716 = vmatmul.mubr.msk.f32.gmra.mrb[46].mxu1 %vm704_vm1, %v30643_v6 }
 0x861   :  { %25718 = vmatprep.mubr.msk.f32.mxu1 %vm704_vm1, %v30649_v7 }
 0x864   :  { %25719 = vmatmul.mubr.msk.f32.gmra.mrb[48].mxu1 %vm704_vm1, %v30651_v8 }
 0x865   :  { %25721 = vmatprep.mubr.msk.f32.mxu1 %vm704_vm1, %v30657_v9 }
 0x868   :  { %25722 = vmatmul.mubr.msk.f32.gmra.mrb[50].mxu1 %vm704_vm1, %v30659_v10 }
 0x869   :  { %25724 = vmatprep.mubr.msk.f32.mxu1 %vm704_vm1, %v30665_v11 }
 0x86c   :  { %25725 = vmatmul.mubr.msk.f32.gmra.mrb[52].mxu1 %vm704_vm1, %v30734_v13 }
 0x86d   :  { %25729 = vmatprep.mubr.msk.f32.mxu1 %vm704_vm1, %v28745_v40  ;;  %v31512_v40 = vld [vmem:[#allocation2 + $0x260] sm:$0xff] }
 0x870   :  { %25730 = vmatmul.mubr.msk.f32.vlgmr.msra.gmra.mrb[22].mxu1 %vm704_vm1, %v28727_v42 }
 0x871   :  { %25778 = vmatpush3.msra.mxu1 %v28731_v38  ;;  %25732 = vmatprep.mubr.msk.f32.mxu1 %vm704_vm1, %v31132_v56 }
 0x872   :  { %25827 = vmatprep.subr.mxu1 %v28746_v36 }
 0x874   :  { %25733 = vmatmul.mubr.msk.f32.gmra.mrb[24].mxu1 %vm704_vm1, %v28730_v53  ;;  %v28757_v53 = vld [vmem:[#allocation2 + $0x1d0] sm:$0xff] }
 0x875   :  { %25735 = vmatprep.mubr.msk.f32.mxu1 %vm704_vm1, %v28732_v0 }
 0x878   :  { %25736 = vmatmul.mubr.msk.f32.gmra.mrb[26].mxu1 %vm704_vm1, %v28733_v21 }
 0x879   :  { %25738 = vmatprep.mubr.msk.f32.mxu1 %vm704_vm1, %v28734_v1  ;;  %v28758_v1 = vld [vmem:[#allocation2 + $0x220] sm:$0xff] }
 0x87c   :  { %25739 = vmatmul.mubr.msk.f32.gmra.mrb[28].mxu1 %vm704_vm1, %v28735_v12  ;;  %v28759_v12 = vld [vmem:[#allocation2 + $0x290] sm:$0xff] }
 0x87d   :  { %25741 = vmatprep.mubr.msk.f32.mxu1 %vm704_vm1, %v30597_v60  ;;  %v28750_v60 = vld [vmem:[#allocation2 + $0x240] sm:$0xff] }
 0x880   :  { %25742 = vmatmul.mubr.msk.f32.gmra.mrb[30].mxu1 %vm704_vm1, %v30603_v61  ;;  %v31302_v61 = vld [vmem:[#allocation2 + $0x210] sm:$0xff] }
 0x881   :  { %25744 = vmatprep.mubr.msk.f32.mxu1 %vm704_vm1, %v30605_v62 }
 0x884   :  { %25745 = vmatmul.mubr.msk.f32.gmra.mrb[32].mxu1 %vm704_vm1, %v31227_v35 }
 0x885   :  { %25747 = vmatprep.mubr.msk.f32.mxu1 %vm704_vm1, %v31231_v31 }
 0x888   :  { %25748 = vmatmul.mubr.msk.f32.gmra.mrb[34].mxu1 %vm704_vm1, %v31235_v32 }
 0x889   :  { %25750 = vmatprep.mubr.msk.f32.mxu1 %vm704_vm1, %v30471_v50  ;;  %v28751_v50 = vld [vmem:[%s33221_s3 + $0x20] sm:$0xff] }
 0x88c   :  { %25751 = vmatmul.mubr.msk.f32.gmra.mrb[36].mxu1 %vm704_vm1, %v30473_v51  ;;  %v31290_v51 = vld [vmem:[#allocation2 + $0x1c8] sm:$0xff] }
 0x88d   :  { %25753 = vmatprep.mubr.msk.f32.mxu1 %vm704_vm1, %v28750_v60  ;;  %v31534_v60 = vld [vmem:[#allocation2 + $0x2a8] sm:$0xff] }
 0x890   :  { %25754 = vmatmul.mubr.msk.f32.gmra.mrb[38].mxu1 %vm704_vm1, %v28737_v2  ;;  %v28762_v2 = vld [vmem:[#allocation2 + $0x2c8] sm:$0xff] }
 0x891   :  { %25756 = vmatprep.mubr.msk.f32.mxu1 %vm704_vm1, %v31165_v54 }
 0x894   :  { %25757 = vmatmul.mubr.msk.f32.gmra.mrb[40].mxu1 %vm704_vm1, %v31169_v47 }
 0x895   :  { %25759 = vmatprep.mubr.msk.f32.mxu1 %vm704_vm1, %v31173_v48 }
 0x898   :  { %25760 = vmatmul.mubr.msk.f32.gmra.mrb[42].mxu1 %vm704_vm1, %v31177_v49 }
 0x899   :  { %25762 = vmatprep.mubr.msk.f32.mxu1 %vm704_vm1, %v31181_v33 }
 0x89c   :  { %25763 = vmatmul.mubr.msk.f32.gmra.mrb[44].mxu1 %vm704_vm1, %v31185_v43 }
 0x89d   :  { %25765 = vmatprep.mubr.msk.f32.mxu1 %vm704_vm1, %v30635_v63  ;;  %v31306_v63 = vld [vmem:[#allocation2 + $0x218] sm:$0xff] }
 0x8a0   :  { %25766 = vmatmul.mubr.msk.f32.gmra.mrb[46].mxu1 %vm704_vm1, %v30641_v5 }
 0x8a1   :  { %25768 = vmatprep.mubr.msk.f32.mxu1 %vm704_vm1, %v30643_v6 }
 0x8a4   :  { %25769 = vmatmul.mubr.msk.f32.gmra.mrb[48].mxu1 %vm704_vm1, %v30649_v7 }
 0x8a5   :  { %25771 = vmatprep.mubr.msk.f32.mxu1 %vm704_vm1, %v30651_v8 }
 0x8a8   :  { %25772 = vmatmul.mubr.msk.f32.gmra.mrb[50].mxu1 %vm704_vm1, %v30657_v9 }
 0x8a9   :  { %25774 = vmatprep.mubr.msk.f32.mxu1 %vm704_vm1, %v30659_v10 }
 0x8ac   :  { %25775 = vmatmul.mubr.msk.f32.gmra.mrb[52].mxu1 %vm704_vm1, %v30665_v11 }
 0x8ad   :  { %25779 = vmatprep.mubr.msk.f32.mxu1 %vm704_vm1, %v31132_v56 }
 0x8b0   :  { %25780 = vmatmul.mubr.msk.f32.vlgmr.msra.gmra.mrb[22].mxu1 %vm704_vm1, %v30740_v14 }
 0x8b1   :  { %25828 = vmatpush3.msra.mxu1 %v28746_v36  ;;  %25782 = vmatprep.mubr.msk.f32.mxu1 %vm704_vm1, %v30742_v15  ;;  %v31518_v36 = vld [vmem:[#allocation2 + $0x268] sm:$0xff] }
 0x8b2   :  { %25877 = vmatprep.subr.mxu1 %v28751_v50 }
 0x8b4   :  { %25783 = vmatmul.mubr.msk.f32.gmra.mrb[24].mxu1 %vm704_vm1, %v30751_v17 }
 0x8b5   :  { %25785 = vmatprep.mubr.msk.f32.mxu1 %vm704_vm1, %v30753_v18 }
 0x8b8   :  { %25786 = vmatmul.mubr.msk.f32.gmra.mrb[26].mxu1 %vm704_vm1, %v30759_v19 }
 0x8b9   :  { %25788 = vmatprep.mubr.msk.f32.mxu1 %vm704_vm1, %v31144_v37  ;;  %v28761_v37 = vld [vmem:[#allocation2 + $0x2c0] sm:$0xff] }
 0x8bc   :  { %25789 = vmatmul.mubr.msk.f32.gmra.mrb[28].mxu1 %vm704_vm1, %v31290_v51 }
 0x8bd   :  { %25791 = vmatprep.mubr.msk.f32.mxu1 %vm704_vm1, %v30605_v62 }
 0x8c0   :  { %25792 = vmatmul.mubr.msk.f32.gmra.mrb[30].mxu1 %vm704_vm1, %v31227_v35 }
 0x8c1   :  { %25794 = vmatprep.mubr.msk.f32.mxu1 %vm704_vm1, %v31231_v31 }
 0x8c4   :  { %25795 = vmatmul.mubr.msk.f32.gmra.mrb[32].mxu1 %vm704_vm1, %v31235_v32 }
 0x8c5   :  { %25797 = vmatprep.mubr.msk.f32.mxu1 %vm704_vm1, %v31302_v61 }
 0x8c8   :  { %25798 = vmatmul.mubr.msk.f32.gmra.mrb[34].mxu1 %vm704_vm1, %v31306_v63 }
 0x8c9   :  { %25800 = vmatprep.mubr.msk.f32.mxu1 %vm704_vm1, %v30550_v57 }
 0x8cc   :  { %25801 = vmatmul.mubr.msk.f32.gmra.mrb[36].mxu1 %vm704_vm1, %v30781_v20 }
 0x8cd   :  { %25803 = vmatprep.mubr.msk.f32.mxu1 %vm704_vm1, %v31165_v54  ;;  %v28763_v54 = vld [vmem:[#allocation2 + $0x2d0] sm:$0xff] }
 0x8d0   :  { %25804 = vmatmul.mubr.msk.f32.gmra.mrb[38].mxu1 %vm704_vm1, %v31169_v47  ;;  %v28764_v47 = vld [vmem:[#allocation2 + $0x2d8] sm:$0xff] }
 0x8d1   :  { %25806 = vmatprep.mubr.msk.f32.mxu1 %vm704_vm1, %v31173_v48  ;;  %v31494_v48 = vld [vmem:[#allocation2 + $0x218] sm:$0xff] }
 0x8d4   :  { %25807 = vmatmul.mubr.msk.f32.gmra.mrb[40].mxu1 %vm704_vm1, %v31177_v49  ;;  %v31496_v49 = vld [vmem:[#allocation2 + $0x240] sm:$0xff] }
 0x8d5   :  { %v10440_v62 = vpop.f32.mrb[6].mxu1  ;;  %25809 = vmatprep.mubr.msk.f32.mxu1 %vm704_vm1, %v31181_v33  ;;  %v31502_v33 = vld [vmem:[#allocation2 + $0x248] sm:$0xff] }
 0x8d6   :  { %v25627_v57 = vpop.f32.mrb[7].mxu1 }
 0x8d7   :  { %v31558_v57 = vld [vmem:[#allocation2 + $0x2d8] sm:$0xff] }
 0x8d8   :  { %25810 = vmatmul.mubr.msk.f32.gmra.mrb[42].mxu1 %vm704_vm1, %v31185_v43  ;;  %v31504_v43 = vld [vmem:[#allocation2 + $0x250] sm:$0xff] }
 0x8d9   :  { %v10513_v5 = vpop.f32.mrb[8].mxu1  ;;  %25812 = vmatprep.mubr.msk.f32.mxu1 %vm704_vm1, %v31189_v46 }
 0x8da   :  { %v10514_v41 = vadd.f32 %v10513_v5, %v10440_v62  ;;  %v25634_v44 = vpop.f32.mrb[9].mxu1  ;;  %v31552_v62 = vld [vmem:[#allocation2 + $0x2d0] sm:$0xff]  ;;  %v31560_v5 = vld [vmem:[#allocation2 + $0x300] sm:$0xff] }
 0x8db   :  { %v31568_v44 = vld [vmem:[#allocation2 + $0x310] sm:$0xff] }
 0x8dc   :  { %25813 = vmatmul.mubr.msk.f32.gmra.mrb[44].mxu1 %vm704_vm1, %v31328_v3 }
 0x8dd   :  { %v10589_v4 = vpop.f32.mrb[10].mxu1  ;;  %25815 = vmatprep.mubr.msk.f32.mxu1 %vm704_vm1, %v30643_v6 }
 0x8de   :  { %v10593_v16 = vadd.f32 %v10589_v4, %v10514_v41  ;;  %v25641_v45 = vpop.f32.mrb[11].mxu1  ;;  %v31566_v41 = vld [vmem:[#allocation2 + $0x308] sm:$0xff]  ;;  %v31576_v4 = vld [vmem:[#allocation2 + $0x320] sm:$0xff] }
 0x8df   :  { %v31584_v45 = vld [vmem:[#allocation2 + $0x330] sm:$0xff] }
 0x8e0   :  { %25816 = vmatmul.mubr.msk.f32.gmra.mrb[46].mxu1 %vm704_vm1, %v30649_v7 }
 0x8e1   :  { %v10666_v52 = vpop.f32.mrb[12].mxu1  ;;  %25818 = vmatprep.mubr.msk.f32.mxu1 %vm704_vm1, %v30651_v8 }
 0x8e2   :  { %v10670_v39 = vadd.f32 %v10666_v52, %v10593_v16  ;;  %v25648_v34 = vpop.f32.mrb[13].mxu1  ;;  %v31582_v16 = vld [vmem:[#allocation2 + $0x328] sm:$0xff]  ;;  %v31590_v52 = vld [vmem:[#allocation2 + $0x338] sm:$0xff] }
 0x8e3   :  { %v31611_v34 = vld [vmem:[#allocation2 + $0x220] sm:$0xff] }
 0x8e4   :  { %25819 = vmatmul.mubr.msk.f32.gmra.mrb[48].mxu1 %vm704_vm1, %v30657_v9  ;;  %v28756_v9 = vld [vmem:[%s33221_s3 + $0x28] sm:$0xff] }
 0x8e5   :  { %25821 = vmatprep.mubr.msk.f32.mxu1 %vm704_vm1, %v30659_v10 }
 0x8e8   :  { %25822 = vmatmul.mubr.msk.f32.gmra.mrb[50].mxu1 %vm704_vm1, %v30665_v11 }
 0x8e9   :  { %25824 = vmatprep.mubr.msk.f32.mxu1 %vm704_vm1, %v30734_v13 }
 0x8ec   :  { %25825 = vmatmul.mubr.msk.f32.gmra.mrb[52].mxu1 %vm704_vm1, %v30824_v22 }
 0x8ed   :  { %25829 = vmatprep.mubr.msk.f32.mxu1 %vm704_vm1, %v30740_v14 }
 0x8f0   :  { %25830 = vmatmul.mubr.msk.f32.vlgmr.msra.gmra.mrb[22].mxu1 %vm704_vm1, %v30742_v15 }
 0x8f1   :  { %v10743_v6 = vpop.f32.mrb[14].mxu1  ;;  %25878 = vmatpush3.msra.mxu1 %v28751_v50  ;;  %25832 = vmatprep.mubr.msk.f32.mxu1 %vm704_vm1, %v30751_v17  ;;  %v31536_v50 = vld [vmem:[#allocation2 + $0x2b0] sm:$0xff] }
 0x8f2   :  { %v10747_v7 = vadd.f32 %v10743_v6, %v10670_v39  ;;  %v25655_v8 = vpop.f32.mrb[15].mxu1  ;;  %25927 = vmatprep.subr.mxu1 %v28756_v9  ;;  %v28770_v39 = vld [vmem:[%s33221_s3 + $0x40] sm:$0xff] }
 0x8f3   :  { %v31629_v6 = vld [vmem:[#allocation2 + $0x280] sm:$0xff] }
 0x8f4   :  { %25833 = vmatmul.mubr.msk.f32.gmra.mrb[24].mxu1 %vm704_vm1, %v30753_v18  ;;  %v31665_v8 = vld [vmem:[#allocation2 + $0x340] sm:$0xff] }
 0x8f5   :  { %25835 = vmatprep.mubr.msk.f32.mxu1 %vm704_vm1, %v30759_v19 }
 0x8f7   :  { %v10820_v10 = vpop.f32.mrb[16].mxu1 }
 0x8f8   :  { %v10824_v11 = vadd.f32 %v10820_v10, %v10747_v7  ;;  %v25662_v14 = vpop.f32.mrb[17].mxu1  ;;  %25836 = vmatmul.mubr.msk.f32.gmra.mrb[26].mxu1 %vm704_vm1, %v30840_v23  ;;  %v31647_v7 = vld [vmem:[#allocation2 + $0x2e0] sm:$0xff]  ;;  %v31686_v10 = vld [vmem:[#allocation2 + $0x228] sm:$0xff] }
 0x8f9   :  { %25838 = vmatprep.mubr.msk.f32.mxu1 %vm704_vm1, %v31290_v51  ;;  %v31722_v14 = vld [vmem:[#allocation2 + $0x2e8] sm:$0xff] }
 0x8fb   :  { %v10897_v42 = vpop.f32.mrb[18].mxu1 }
 0x8fc   :  { %v10901_v59 = vadd.f32 %v10897_v42, %v10824_v11  ;;  %v25669_v56 = vpop.f32.mrb[19].mxu1  ;;  %25839 = vmatmul.mubr.msk.f32.gmra.mrb[28].mxu1 %vm704_vm1, %v28757_v53  ;;  %v31704_v11 = vld [vmem:[#allocation2 + $0x288] sm:$0xff] }
 0x8fd   :  { %25841 = vmatprep.mubr.msk.f32.mxu1 %vm704_vm1, %v31227_v35  ;;  %v31520_v35 = vld [vmem:[#allocation2 + $0x270] sm:$0xff]  ;;  %v31740_v42 = vld [vmem:[#allocation2 + $0x348] sm:$0xff] }
 0x8fe   :  { %v13366_v56 = vld [vmem:[#allocation2 + $0x230] sm:$0xff] }
 0x8ff   :  { %v10974_v38 = vpop.f32.mrb[20].mxu1 }
 0x900   :  { %v31368_v0 = vadd.f32 %v10974_v38, %v10901_v59  ;;  %v25676_v21 = vpop.f32.mrb[21].mxu1  ;;  %25842 = vmatmul.mubr.msk.f32.gmra.mrb[30].mxu1 %vm704_vm1, %v31231_v31  ;;  %v28772_v59 = vld [vmem:[%s33221_s3 + $0x50] sm:$0xff] }
 0x901   :  { %25844 = vmatprep.mubr.msk.f32.mxu1 %vm704_vm1, %v31235_v32  ;;  %v31794_v38 = vld [vmem:[#allocation2 + $0x2f0] sm:$0xff] }
 0x902   :  { %v31812_v21 = vld [vmem:[#allocation2 + $0x350] sm:$0xff] }
 0x904   :  { %25845 = vmatmul.mubr.msk.f32.gmra.mrb[32].mxu1 %vm704_vm1, %v31302_v61 }
 0x905   :  { %25847 = vmatprep.mubr.msk.f32.mxu1 %vm704_vm1, %v31306_v63 }
 0x908   :  { %25848 = vmatmul.mubr.msk.f32.gmra.mrb[34].mxu1 %vm704_vm1, %v28758_v1 }
 0x909   :  { %25850 = vmatprep.mubr.msk.f32.mxu1 %vm704_vm1, %v30781_v20 }
 0x90c   :  { %25851 = vmatmul.mubr.msk.f32.gmra.mrb[36].mxu1 %vm704_vm1, %v30862_v24 }
 0x90d   :  { %25853 = vmatprep.mubr.msk.f32.mxu1 %vm704_vm1, %v30864_v25  ;;  %v28760_v25 = vld [vmem:[#allocation2 + $0x2b8] sm:$0xff] }
 0x910   :  { %25854 = vmatmul.mubr.msk.f32.gmra.mrb[38].mxu1 %vm704_vm1, %v30870_v26 }
 0x911   :  { %25856 = vmatprep.mubr.msk.f32.mxu1 %vm704_vm1, %v30872_v27 }
 0x914   :  { %25857 = vmatmul.mubr.msk.f32.gmra.mrb[40].mxu1 %vm704_vm1, %v30878_v28 }
 0x915   :  { %25859 = vmatprep.mubr.msk.f32.mxu1 %vm704_vm1, %v30880_v29 }
 0x918   :  { %25860 = vmatmul.mubr.msk.f32.gmra.mrb[42].mxu1 %vm704_vm1, %v31189_v46 }
 0x919   :  { %25862 = vmatprep.mubr.msk.f32.mxu1 %vm704_vm1, %v31328_v3 }
 0x91c   :  { %25863 = vmatmul.mubr.msk.f32.gmra.mrb[44].mxu1 %vm704_vm1, %v28759_v12 }
 0x91d   :  { %25865 = vmatprep.mubr.msk.f32.mxu1 %vm704_vm1, %v28760_v25  ;;  %v31847_v25 = vld [vmem:[#allocation2 + $0x298] sm:$0xff] }
 0x920   :  { %25866 = vmatmul.mubr.msk.f32.gmra.mrb[46].mxu1 %vm704_vm1, %v28761_v37 }
 0x921   :  { %25868 = vmatprep.mubr.msk.f32.mxu1 %vm704_vm1, %v28762_v2 }
 0x924   :  { %25869 = vmatmul.mubr.msk.f32.gmra.mrb[48].mxu1 %vm704_vm1, %v28763_v54 }
 0x925   :  { %25871 = vmatprep.mubr.msk.f32.mxu1 %vm704_vm1, %v28764_v47 }
 0x928   :  { %25872 = vmatmul.mubr.msk.f32.gmra.mrb[50].mxu1 %vm704_vm1, %v30734_v13  ;;  %v28765_v13 = vld [vmem:[%s33221_s3 + $0x30] sm:$0xff] }
 0x929   :  { %25874 = vmatprep.mubr.msk.f32.mxu1 %vm704_vm1, %v30824_v22 }
 0x92c   :  { %25875 = vmatmul.mubr.msk.f32.gmra.mrb[52].mxu1 %vm704_vm1, %v30906_v30 }
 0x92d   :  { %25879 = vmatprep.mubr.msk.f32.mxu1 %vm704_vm1, %v30742_v15  ;;  %v28766_v15 = vld [vmem:[#allocation2 + $0x1d8] sm:$0xff] }
 0x930   :  { %25880 = vmatmul.mubr.msk.f32.vlgmr.msra.gmra.mrb[22].mxu1 %vm704_vm1, %v30751_v17  ;;  %v33240_v17 = vld [vmem:[#allocation3_spill] sm:$0xff] }
 0x931   :  { %25928 = vmatpush3.msra.mxu1 %v28756_v9  ;;  %25882 = vmatprep.mubr.msk.f32.mxu1 %vm704_vm1, %v30753_v18  ;;  %v28767_v18 = vld [vmem:[#allocation2 + $0x298] sm:$0xff]  ;;  %v28771_v9 = vld [vmem:[%s33221_s3 + $0x48] sm:$0xff] }
 0x932   :  { %25977 = vmatprep.subr.mxu1 %v28765_v13 }
 0x934   :  { %25883 = vmatmul.mubr.msk.f32.gmra.mrb[24].mxu1 %vm704_vm1, %v30759_v19  ;;  %v28768_v19 = vld [vmem:[#allocation2 + $0x2e0] sm:$0xff] }
 0x935   :  { %25885 = vmatprep.mubr.msk.f32.mxu1 %vm704_vm1, %v30840_v23  ;;  %v33241_v23 = vld [vmem:[#allocation4_spill] sm:$0xff] }
 0x938   :  { %25886 = vmatmul.mubr.msk.f32.gmra.mrb[26].mxu1 %vm704_vm1, %v31290_v51  ;;  %v31542_v51 = vld [vmem:[#allocation2 + $0x2b8] sm:$0xff] }
 0x939   :  { %25888 = vmatprep.mubr.msk.f32.mxu1 %vm704_vm1, %v28757_v53  ;;  %v31776_v53 = vld [vmem:[#allocation2 + $0x290] sm:$0xff] }
 0x93c   :  { %25889 = vmatmul.mubr.msk.f32.gmra.mrb[28].mxu1 %vm704_vm1, %v28766_v15  ;;  %v31944_v15 = vld [vmem:[#allocation2 + $0x370] sm:$0xff] }
 0x93d   :  { %25891 = vmatprep.mubr.msk.f32.mxu1 %vm704_vm1, %v31231_v31  ;;  %v31526_v31 = vld [vmem:[#allocation2 + $0x278] sm:$0xff] }
 0x940   :  { %25892 = vmatmul.mubr.msk.f32.gmra.mrb[30].mxu1 %vm704_vm1, %v31235_v32  ;;  %v31528_v32 = vld [vmem:[#allocation2 + $0x2a0] sm:$0xff] }
 0x941   :  { %25894 = vmatprep.mubr.msk.f32.mxu1 %vm704_vm1, %v31302_v61  ;;  %v31544_v61 = vld [vmem:[#allocation2 + $0x2c0] sm:$0xff] }
 0x944   :  { %25895 = vmatmul.mubr.msk.f32.gmra.mrb[32].mxu1 %vm704_vm1, %v31306_v63  ;;  %v31550_v63 = vld [vmem:[#allocation2 + $0x2c8] sm:$0xff] }
 0x945   :  { %25897 = vmatprep.mubr.msk.f32.mxu1 %vm704_vm1, %v28758_v1  ;;  %v28773_v1 = vld [vmem:[%s33221_s3 + $0x58] sm:$0xff] }
 0x948   :  { %25898 = vmatmul.mubr.msk.f32.gmra.mrb[34].mxu1 %vm704_vm1, %v30781_v20  ;;  %v12201_v20 = vld [vmem:[#allocation2 + $0x1e0] sm:$0xff] }
 0x949   :  { %25900 = vmatprep.mubr.msk.f32.mxu1 %vm704_vm1, %v30862_v24  ;;  %v31467_v24 = vld [vmem:[#allocation2 + $0x1e8] sm:$0xff] }
 0x94c   :  { %25901 = vmatmul.mubr.msk.f32.gmra.mrb[36].mxu1 %vm704_vm1, %v33240_v17  ;;  %v31950_v17 = vld [vmem:[#allocation2 + $0x378] sm:$0xff] }
 0x94d   :  { %25903 = vmatprep.mubr.msk.f32.mxu1 %vm704_vm1, %v30870_v26  ;;  %v31469_v26 = vld [vmem:[#allocation2 + $0x1f0] sm:$0xff] }
 0x950   :  { %25904 = vmatmul.mubr.msk.f32.gmra.mrb[38].mxu1 %vm704_vm1, %v30872_v27  ;;  %v31477_v27 = vld [vmem:[#allocation2 + $0x200] sm:$0xff] }
 0x951   :  { %25906 = vmatprep.mubr.msk.f32.mxu1 %vm704_vm1, %v30878_v28  ;;  %v28769_v28 = vld [vmem:[%s33221_s3 + $0x38] sm:$0xff] }
 0x954   :  { %25907 = vmatmul.mubr.msk.f32.gmra.mrb[40].mxu1 %vm704_vm1, %v30880_v29  ;;  %v31486_v29 = vld [vmem:[#allocation2 + $0x208] sm:$0xff] }
 0x955   :  { %25909 = vmatprep.mubr.msk.f32.mxu1 %vm704_vm1, %v31189_v46  ;;  %v31510_v46 = vld [vmem:[#allocation2 + $0x258] sm:$0xff] }
 0x958   :  { %25910 = vmatmul.mubr.msk.f32.gmra.mrb[42].mxu1 %vm704_vm1, %v31328_v3  ;;  %v31574_v3 = vld [vmem:[#allocation2 + $0x318] sm:$0xff] }
 0x959   :  { %25912 = vmatprep.mubr.msk.f32.mxu1 %vm704_vm1, %v28759_v12  ;;  %v13752_v12 = vld [vmem:[#allocation2 + $0x238] sm:$0xff] }
 0x95c   :  { %25913 = vmatmul.mubr.msk.f32.gmra.mrb[44].mxu1 %vm704_vm1, %v28767_v18  ;;  %v31952_v18 = vld [vmem:[#allocation2 + $0x380] sm:$0xff] }
 0x95d   :  { %25915 = vmatprep.mubr.msk.f32.mxu1 %vm704_vm1, %v28761_v37  ;;  %v31865_v37 = vld [vmem:[#allocation2 + $0x2f8] sm:$0xff] }
 0x960   :  { %25916 = vmatmul.mubr.msk.f32.gmra.mrb[46].mxu1 %vm704_vm1, %v28762_v2  ;;  %v31883_v2 = vld [vmem:[#allocation2 + $0x358] sm:$0xff] }
 0x961   :  { %25918 = vmatprep.mubr.msk.f32.mxu1 %vm704_vm1, %v28763_v54  ;;  %v28774_v54 = vld [vmem:[%s33221_s3 + $0x60] sm:$0xff] }
 0x964   :  { %25919 = vmatmul.mubr.msk.f32.gmra.mrb[48].mxu1 %vm704_vm1, %v28764_v47  ;;  %v31936_v47 = vld [vmem:[#allocation2 + $0x360] sm:$0xff] }
 0x965   :  { %25921 = vmatprep.mubr.msk.f32.mxu1 %vm704_vm1, %v28768_v19  ;;  %v31958_v19 = vld [vmem:[#allocation2 + $0x388] sm:$0xff] }
 0x968   :  { %25922 = vmatmul.mubr.msk.f32.gmra.mrb[50].mxu1 %vm704_vm1, %v30824_v22  ;;  %v31475_v22 = vld [vmem:[#allocation2 + $0x1f8] sm:$0xff] }
 0x969   :  { %25924 = vmatprep.mubr.msk.f32.mxu1 %vm704_vm1, %v30906_v30  ;;  %v31488_v30 = vld [vmem:[#allocation2 + $0x210] sm:$0xff] }
 0x96c   :  { %25925 = vmatmul.mubr.msk.f32.gmra.mrb[52].mxu1 %vm704_vm1, %v33241_v23  ;;  %v31966_v23 = vld [vmem:[#allocation2 + $0x398] sm:$0xff] }
 0x96d   :  { %25929 = vmatprep.mubr.msk.f32.mxu1 %vm704_vm1, %v12201_v20  ;;  %v31960_v20 = vld [vmem:[#allocation2 + $0x390] sm:$0xff] }
 0x970   :  { %25930 = vmatmul.mubr.msk.f32.vlgmr.msra.gmra.mrb[22].mxu1 %vm704_vm1, %v31467_v24 }
 0x971   :  { %25978 = vmatpush3.msra.mxu1 %v28765_v13  ;;  %25932 = vmatprep.mubr.msk.f32.mxu1 %vm704_vm1, %v31469_v26  ;;  %v31942_v13 = vld [vmem:[#allocation2 + $0x368] sm:$0xff] }
 0x972   :  { %26027 = vmatprep.subr.mxu1 %v28769_v28 }
 0x974   :  { %25933 = vmatmul.mubr.msk.f32.gmra.mrb[24].mxu1 %vm704_vm1, %v31475_v22 }
 0x975   :  { %25935 = vmatprep.mubr.msk.f32.mxu1 %vm704_vm1, %v31477_v27 }
 0x978   :  { %25936 = vmatmul.mubr.msk.f32.gmra.mrb[26].mxu1 %vm704_vm1, %v31486_v29 }
 0x979   :  { %25938 = vmatprep.mubr.msk.f32.mxu1 %vm704_vm1, %v31488_v30 }
 0x97c   :  { %25939 = vmatmul.mubr.msk.f32.gmra.mrb[28].mxu1 %vm704_vm1, %v31494_v48 }
 0x97d   :  { %25941 = vmatprep.mubr.msk.f32.mxu1 %vm704_vm1, %v31496_v49 }
 0x980   :  { %25942 = vmatmul.mubr.msk.f32.gmra.mrb[30].mxu1 %vm704_vm1, %v31502_v33 }
 0x981   :  { %25944 = vmatprep.mubr.msk.f32.mxu1 %vm704_vm1, %v31504_v43 }
 0x984   :  { %25945 = vmatmul.mubr.msk.f32.gmra.mrb[32].mxu1 %vm704_vm1, %v31510_v46 }
 0x985   :  { %25947 = vmatprep.mubr.msk.f32.mxu1 %vm704_vm1, %v31512_v40 }
 0x988   :  { %25948 = vmatmul.mubr.msk.f32.gmra.mrb[34].mxu1 %vm704_vm1, %v31518_v36 }
 0x989   :  { %25950 = vmatprep.mubr.msk.f32.mxu1 %vm704_vm1, %v31520_v35 }
 0x98c   :  { %25951 = vmatmul.mubr.msk.f32.gmra.mrb[36].mxu1 %vm704_vm1, %v31526_v31 }
 0x98d   :  { %25953 = vmatprep.mubr.msk.f32.mxu1 %vm704_vm1, %v31528_v32 }
 0x990   :  { %25954 = vmatmul.mubr.msk.f32.gmra.mrb[38].mxu1 %vm704_vm1, %v31534_v60 }
 0x991   :  { %25956 = vmatprep.mubr.msk.f32.mxu1 %vm704_vm1, %v31536_v50 }
 0x994   :  { %25957 = vmatmul.mubr.msk.f32.gmra.mrb[40].mxu1 %vm704_vm1, %v31542_v51 }
 0x995   :  { %25959 = vmatprep.mubr.msk.f32.mxu1 %vm704_vm1, %v31544_v61 }
 0x998   :  { %25960 = vmatmul.mubr.msk.f32.gmra.mrb[42].mxu1 %vm704_vm1, %v31550_v63 }
 0x999   :  { %25962 = vmatprep.mubr.msk.f32.mxu1 %vm704_vm1, %v31552_v62 }
 0x99c   :  { %25963 = vmatmul.mubr.msk.f32.gmra.mrb[44].mxu1 %vm704_vm1, %v31558_v57 }
 0x99d   :  { %25965 = vmatprep.mubr.msk.f32.mxu1 %vm704_vm1, %v31560_v5 }
 0x9a0   :  { %25966 = vmatmul.mubr.msk.f32.gmra.mrb[46].mxu1 %vm704_vm1, %v31566_v41 }
 0x9a1   :  { %25968 = vmatprep.mubr.msk.f32.mxu1 %vm704_vm1, %v31568_v44 }
 0x9a4   :  { %25969 = vmatmul.mubr.msk.f32.gmra.mrb[48].mxu1 %vm704_vm1, %v31574_v3 }
 0x9a5   :  { %25971 = vmatprep.mubr.msk.f32.mxu1 %vm704_vm1, %v31576_v4 }
 0x9a8   :  { %25972 = vmatmul.mubr.msk.f32.gmra.mrb[50].mxu1 %vm704_vm1, %v31582_v16 }
 0x9a9   :  { %25974 = vmatprep.mubr.msk.f32.mxu1 %vm704_vm1, %v31584_v45 }
 0x9ac   :  { %25975 = vmatmul.mubr.msk.f32.gmra.mrb[52].mxu1 %vm704_vm1, %v31590_v52 }
 0x9ad   :  { %25979 = vmatprep.mubr.msk.f32.mxu1 %vm704_vm1, %v31467_v24  ;;  %v28775_v24 = vld [vmem:[%s33221_s3 + $0x68] sm:$0xff] }
 0x9b0   :  { %25980 = vmatmul.mubr.msk.f32.vlgmr.msra.gmra.mrb[22].mxu1 %vm704_vm1, %v31469_v26 }
 0x9b1   :  { %26028 = vmatpush3.msra.mxu1 %v28769_v28  ;;  %25982 = vmatprep.mubr.msk.f32.mxu1 %vm704_vm1, %v31475_v22  ;;  %v28777_v28 = vld [vmem:[%s33221_s3 + $0x78] sm:$0xff] }
 0x9b2   :  { %26077 = vmatprep.subr.mxu1 %v28770_v39 }
 0x9b4   :  { %25983 = vmatmul.mubr.msk.f32.gmra.mrb[24].mxu1 %vm704_vm1, %v31477_v27 }
 0x9b5   :  { %25985 = vmatprep.mubr.msk.f32.mxu1 %vm704_vm1, %v31486_v29 }
 0x9b8   :  { %25986 = vmatmul.mubr.msk.f32.gmra.mrb[26].mxu1 %vm704_vm1, %v31488_v30 }
 0x9b9   :  { %25988 = vmatprep.mubr.msk.f32.mxu1 %vm704_vm1, %v31494_v48 }
 0x9bc   :  { %25989 = vmatmul.mubr.msk.f32.gmra.mrb[28].mxu1 %vm704_vm1, %v31611_v34 }
 0x9bd   :  { %25991 = vmatprep.mubr.msk.f32.mxu1 %vm704_vm1, %v31502_v33 }
 0x9c0   :  { %25992 = vmatmul.mubr.msk.f32.gmra.mrb[30].mxu1 %vm704_vm1, %v31504_v43 }
 0x9c1   :  { %25994 = vmatprep.mubr.msk.f32.mxu1 %vm704_vm1, %v31510_v46 }
 0x9c4   :  { %25995 = vmatmul.mubr.msk.f32.gmra.mrb[32].mxu1 %vm704_vm1, %v31512_v40 }
 0x9c5   :  { %25997 = vmatprep.mubr.msk.f32.mxu1 %vm704_vm1, %v31518_v36 }
 0x9c8   :  { %25998 = vmatmul.mubr.msk.f32.gmra.mrb[34].mxu1 %vm704_vm1, %v31520_v35 }
 0x9c9   :  { %26000 = vmatprep.mubr.msk.f32.mxu1 %vm704_vm1, %v31526_v31 }
 0x9cc   :  { %26001 = vmatmul.mubr.msk.f32.gmra.mrb[36].mxu1 %vm704_vm1, %v31629_v6 }
 0x9cd   :  { %26003 = vmatprep.mubr.msk.f32.mxu1 %vm704_vm1, %v31534_v60 }
 0x9d0   :  { %26004 = vmatmul.mubr.msk.f32.gmra.mrb[38].mxu1 %vm704_vm1, %v31536_v50 }
 0x9d1   :  { %26006 = vmatprep.mubr.msk.f32.mxu1 %vm704_vm1, %v31542_v51 }
 0x9d4   :  { %26007 = vmatmul.mubr.msk.f32.gmra.mrb[40].mxu1 %vm704_vm1, %v31544_v61 }
 0x9d5   :  { %26009 = vmatprep.mubr.msk.f32.mxu1 %vm704_vm1, %v31550_v63 }
 0x9d8   :  { %26010 = vmatmul.mubr.msk.f32.gmra.mrb[42].mxu1 %vm704_vm1, %v31552_v62 }
 0x9d9   :  { %26012 = vmatprep.mubr.msk.f32.mxu1 %vm704_vm1, %v31558_v57 }
 0x9dc   :  { %26013 = vmatmul.mubr.msk.f32.gmra.mrb[44].mxu1 %vm704_vm1, %v31647_v7 }
 0x9dd   :  { %26015 = vmatprep.mubr.msk.f32.mxu1 %vm704_vm1, %v31566_v41 }
 0x9e0   :  { %26016 = vmatmul.mubr.msk.f32.gmra.mrb[46].mxu1 %vm704_vm1, %v31568_v44 }
 0x9e1   :  { %26018 = vmatprep.mubr.msk.f32.mxu1 %vm704_vm1, %v31574_v3 }
 0x9e4   :  { %26019 = vmatmul.mubr.msk.f32.gmra.mrb[48].mxu1 %vm704_vm1, %v31576_v4 }
 0x9e5   :  { %26021 = vmatprep.mubr.msk.f32.mxu1 %vm704_vm1, %v31582_v16 }
 0x9e8   :  { %26022 = vmatmul.mubr.msk.f32.gmra.mrb[50].mxu1 %vm704_vm1, %v31584_v45 }
 0x9e9   :  { %26024 = vmatprep.mubr.msk.f32.mxu1 %vm704_vm1, %v31590_v52 }
 0x9ec   :  { %26025 = vmatmul.mubr.msk.f32.gmra.mrb[52].mxu1 %vm704_vm1, %v31665_v8 }
 0x9ed   :  { %26029 = vmatprep.mubr.msk.f32.mxu1 %vm704_vm1, %v31469_v26  ;;  %v32035_v26 = vld [vmem:[#allocation2 + $0x3a0] sm:$0xff] }
 0x9f0   :  { %26030 = vmatmul.mubr.msk.f32.vlgmr.msra.gmra.mrb[22].mxu1 %vm704_vm1, %v31475_v22 }
 0x9f1   :  { %26078 = vmatpush3.msra.mxu1 %v28770_v39  ;;  %26032 = vmatprep.mubr.msk.f32.mxu1 %vm704_vm1, %v31477_v27  ;;  %v32331_v39 = vld [vmem:[#allocation2 + $0x3d8] sm:$0xff] }
 0x9f2   :  { %26127 = vmatprep.subr.mxu1 %v28771_v9 }
 0x9f4   :  { %26033 = vmatmul.mubr.msk.f32.gmra.mrb[24].mxu1 %vm704_vm1, %v31486_v29 }
 0x9f5   :  { %26035 = vmatprep.mubr.msk.f32.mxu1 %vm704_vm1, %v31488_v30 }
 0x9f8   :  { %26036 = vmatmul.mubr.msk.f32.gmra.mrb[26].mxu1 %vm704_vm1, %v31494_v48 }
 0x9f9   :  { %26038 = vmatprep.mubr.msk.f32.mxu1 %vm704_vm1, %v31611_v34 }
 0x9fc   :  { %26039 = vmatmul.mubr.msk.f32.gmra.mrb[28].mxu1 %vm704_vm1, %v31686_v10 }
 0x9fd   :  { %26041 = vmatprep.mubr.msk.f32.mxu1 %vm704_vm1, %v31504_v43 }
 0xa00   :  { %26042 = vmatmul.mubr.msk.f32.gmra.mrb[30].mxu1 %vm704_vm1, %v31510_v46 }
 0xa01   :  { %26044 = vmatprep.mubr.msk.f32.mxu1 %vm704_vm1, %v31512_v40 }
 0xa04   :  { %26045 = vmatmul.mubr.msk.f32.gmra.mrb[32].mxu1 %vm704_vm1, %v31518_v36 }
 0xa05   :  { %26047 = vmatprep.mubr.msk.f32.mxu1 %vm704_vm1, %v31520_v35 }
 0xa08   :  { %26048 = vmatmul.mubr.msk.f32.gmra.mrb[34].mxu1 %vm704_vm1, %v31526_v31 }
 0xa09   :  { %26050 = vmatprep.mubr.msk.f32.mxu1 %vm704_vm1, %v31629_v6 }
 0xa0c   :  { %26051 = vmatmul.mubr.msk.f32.gmra.mrb[36].mxu1 %vm704_vm1, %v31704_v11 }
 0xa0d   :  { %26053 = vmatprep.mubr.msk.f32.mxu1 %vm704_vm1, %v31536_v50 }
 0xa10   :  { %26054 = vmatmul.mubr.msk.f32.gmra.mrb[38].mxu1 %vm704_vm1, %v31542_v51 }
 0xa11   :  { %26056 = vmatprep.mubr.msk.f32.mxu1 %vm704_vm1, %v31544_v61 }
 0xa14   :  { %26057 = vmatmul.mubr.msk.f32.gmra.mrb[40].mxu1 %vm704_vm1, %v31550_v63 }
 0xa15   :  { %26059 = vmatprep.mubr.msk.f32.mxu1 %vm704_vm1, %v31552_v62 }
 0xa18   :  { %26060 = vmatmul.mubr.msk.f32.gmra.mrb[42].mxu1 %vm704_vm1, %v31558_v57 }
 0xa19   :  { %26062 = vmatprep.mubr.msk.f32.mxu1 %vm704_vm1, %v31647_v7 }
 0xa1c   :  { %26063 = vmatmul.mubr.msk.f32.gmra.mrb[44].mxu1 %vm704_vm1, %v31722_v14 }
 0xa1d   :  { %26065 = vmatprep.mubr.msk.f32.mxu1 %vm704_vm1, %v31568_v44 }
 0xa20   :  { %26066 = vmatmul.mubr.msk.f32.gmra.mrb[46].mxu1 %vm704_vm1, %v31574_v3 }
 0xa21   :  { %26068 = vmatprep.mubr.msk.f32.mxu1 %vm704_vm1, %v31576_v4 }
 0xa24   :  { %26069 = vmatmul.mubr.msk.f32.gmra.mrb[48].mxu1 %vm704_vm1, %v31582_v16 }
 0xa25   :  { %26071 = vmatprep.mubr.msk.f32.mxu1 %vm704_vm1, %v31584_v45 }
 0xa28   :  { %26072 = vmatmul.mubr.msk.f32.gmra.mrb[50].mxu1 %vm704_vm1, %v31590_v52 }
 0xa29   :  { %26074 = vmatprep.mubr.msk.f32.mxu1 %vm704_vm1, %v31665_v8 }
 0xa2c   :  { %26075 = vmatmul.mubr.msk.f32.gmra.mrb[52].mxu1 %vm704_vm1, %v31740_v42 }
 0xa2d   :  { %26079 = vmatprep.mubr.msk.f32.mxu1 %vm704_vm1, %v31475_v22  ;;  %v28776_v22 = vld [vmem:[%s33221_s3 + $0x70] sm:$0xff] }
 0xa30   :  { %26080 = vmatmul.mubr.msk.f32.vlgmr.msra.gmra.mrb[22].mxu1 %vm704_vm1, %v31477_v27 }
 0xa31   :  { %26128 = vmatpush3.msra.mxu1 %v28771_v9  ;;  %26082 = vmatprep.mubr.msk.f32.mxu1 %vm704_vm1, %v31486_v29  ;;  %v28780_v9 = vld [vmem:[%s33221_s3 + $0x90] sm:$0xff] }
 0xa32   :  { %26177 = vmatprep.subr.mxu1 %v28772_v59 }
 0xa34   :  { %26083 = vmatmul.mubr.msk.f32.gmra.mrb[24].mxu1 %vm704_vm1, %v31488_v30 }
 0xa35   :  { %26085 = vmatprep.mubr.msk.f32.mxu1 %vm704_vm1, %v31494_v48 }
 0xa38   :  { %26086 = vmatmul.mubr.msk.f32.gmra.mrb[26].mxu1 %vm704_vm1, %v31611_v34 }
 0xa39   :  { %26088 = vmatprep.mubr.msk.f32.mxu1 %vm704_vm1, %v31686_v10 }
 0xa3c   :  { %26089 = vmatmul.mubr.msk.f32.gmra.mrb[28].mxu1 %vm704_vm1, %v13366_v56 }
 0xa3d   :  { %26091 = vmatprep.mubr.msk.f32.mxu1 %vm704_vm1, %v31510_v46 }
 0xa40   :  { %26092 = vmatmul.mubr.msk.f32.gmra.mrb[30].mxu1 %vm704_vm1, %v31512_v40 }
 0xa41   :  { %26094 = vmatprep.mubr.msk.f32.mxu1 %vm704_vm1, %v31518_v36 }
 0xa44   :  { %26095 = vmatmul.mubr.msk.f32.gmra.mrb[32].mxu1 %vm704_vm1, %v31520_v35 }
 0xa45   :  { %26097 = vmatprep.mubr.msk.f32.mxu1 %vm704_vm1, %v31526_v31 }
 0xa48   :  { %26098 = vmatmul.mubr.msk.f32.gmra.mrb[34].mxu1 %vm704_vm1, %v31629_v6 }
 0xa49   :  { %26100 = vmatprep.mubr.msk.f32.mxu1 %vm704_vm1, %v31704_v11 }
 0xa4c   :  { %26101 = vmatmul.mubr.msk.f32.gmra.mrb[36].mxu1 %vm704_vm1, %v31776_v53 }
 0xa4d   :  { %26103 = vmatprep.mubr.msk.f32.mxu1 %vm704_vm1, %v31542_v51 }
 0xa50   :  { %26104 = vmatmul.mubr.msk.f32.gmra.mrb[38].mxu1 %vm704_vm1, %v31544_v61 }
 0xa51   :  { %26106 = vmatprep.mubr.msk.f32.mxu1 %vm704_vm1, %v31550_v63 }
 0xa54   :  { %26107 = vmatmul.mubr.msk.f32.gmra.mrb[40].mxu1 %vm704_vm1, %v31552_v62 }
 0xa55   :  { %26109 = vmatprep.mubr.msk.f32.mxu1 %vm704_vm1, %v31558_v57 }
 0xa58   :  { %26110 = vmatmul.mubr.msk.f32.gmra.mrb[42].mxu1 %vm704_vm1, %v31647_v7 }
 0xa59   :  { %26112 = vmatprep.mubr.msk.f32.mxu1 %vm704_vm1, %v31722_v14 }
 0xa5c   :  { %26113 = vmatmul.mubr.msk.f32.gmra.mrb[44].mxu1 %vm704_vm1, %v31794_v38 }
 0xa5d   :  { %26115 = vmatprep.mubr.msk.f32.mxu1 %vm704_vm1, %v31574_v3 }
 0xa60   :  { %26116 = vmatmul.mubr.msk.f32.gmra.mrb[46].mxu1 %vm704_vm1, %v31576_v4 }
 0xa61   :  { %26118 = vmatprep.mubr.msk.f32.mxu1 %vm704_vm1, %v31582_v16 }
 0xa64   :  { %26119 = vmatmul.mubr.msk.f32.gmra.mrb[48].mxu1 %vm704_vm1, %v31584_v45 }
 0xa65   :  { %26121 = vmatprep.mubr.msk.f32.mxu1 %vm704_vm1, %v31590_v52 }
 0xa68   :  { %26122 = vmatmul.mubr.msk.f32.gmra.mrb[50].mxu1 %vm704_vm1, %v31665_v8 }
 0xa69   :  { %26124 = vmatprep.mubr.msk.f32.mxu1 %vm704_vm1, %v31740_v42 }
 0xa6c   :  { %26125 = vmatmul.mubr.msk.f32.gmra.mrb[52].mxu1 %vm704_vm1, %v31812_v21 }
 0xa6d   :  { %26129 = vmatprep.mubr.msk.f32.mxu1 %vm704_vm1, %v31477_v27  ;;  %v32104_v27 = vld [vmem:[#allocation2 + $0x3a8] sm:$0xff] }
 0xa70   :  { %26130 = vmatmul.mubr.msk.f32.vlgmr.msra.gmra.mrb[22].mxu1 %vm704_vm1, %v31486_v29  ;;  %v32173_v29 = vld [vmem:[#allocation2 + $0x3b0] sm:$0xff] }
 0xa71   :  { %26178 = vmatpush3.msra.mxu1 %v28772_v59  ;;  %26132 = vmatprep.mubr.msk.f32.mxu1 %vm704_vm1, %v31488_v30  ;;  %v15675_v30 = vld [vmem:[#allocation2 + $0x260] sm:$0xff]  ;;  %v32440_v59 = vld [vmem:[#allocation2 + $0x2e8] sm:$0xff] }
 0xa72   :  { %26227 = vmatprep.subr.mxu1 %v28773_v1 }
 0xa74   :  { %26133 = vmatmul.mubr.msk.f32.gmra.mrb[24].mxu1 %vm704_vm1, %v31494_v48  ;;  %v15676_v48 = vld [vmem:[#allocation2 + $0x268] sm:$0xff] }
 0xa75   :  { %26135 = vmatprep.mubr.msk.f32.mxu1 %vm704_vm1, %v31611_v34  ;;  %v32333_v34 = vld [vmem:[#allocation2 + $0x3e0] sm:$0xff] }
 0xa78   :  { %26136 = vmatmul.mubr.msk.f32.gmra.mrb[26].mxu1 %vm704_vm1, %v31686_v10  ;;  %v32367_v10 = vld [vmem:[#allocation2 + $0x2e0] sm:$0xff] }
 0xa79   :  { %26138 = vmatprep.mubr.msk.f32.mxu1 %vm704_vm1, %v13366_v56  ;;  %v32458_v56 = vld [vmem:[#allocation2 + $0x348] sm:$0xff] }
 0xa7c   :  { %26139 = vmatmul.mubr.msk.f32.gmra.mrb[28].mxu1 %vm704_vm1, %v13752_v12  ;;  %v32562_v12 = vld [vmem:[#allocation2 + $0x410] sm:$0xff] }
 0xa7d   :  { %26141 = vmatprep.mubr.msk.f32.mxu1 %vm704_vm1, %v31512_v40 }
 0xa80   :  { %26142 = vmatmul.mubr.msk.f32.gmra.mrb[30].mxu1 %vm704_vm1, %v31518_v36 }
 0xa81   :  { %26144 = vmatprep.mubr.msk.f32.mxu1 %vm704_vm1, %v31520_v35 }
 0xa84   :  { %26145 = vmatmul.mubr.msk.f32.gmra.mrb[32].mxu1 %vm704_vm1, %v31526_v31 }
 0xa85   :  { %26147 = vmatprep.mubr.msk.f32.mxu1 %vm704_vm1, %v31629_v6 }
 0xa88   :  { %26148 = vmatmul.mubr.msk.f32.gmra.mrb[34].mxu1 %vm704_vm1, %v31704_v11 }
 0xa89   :  { %26150 = vmatprep.mubr.msk.f32.mxu1 %vm704_vm1, %v31776_v53 }
 0xa8c   :  { %26151 = vmatmul.mubr.msk.f32.gmra.mrb[36].mxu1 %vm704_vm1, %v31847_v25 }
 0xa8d   :  { %26153 = vmatprep.mubr.msk.f32.mxu1 %vm704_vm1, %v31544_v61 }
 0xa90   :  { %26154 = vmatmul.mubr.msk.f32.gmra.mrb[38].mxu1 %vm704_vm1, %v31550_v63 }
 0xa91   :  { %26156 = vmatprep.mubr.msk.f32.mxu1 %vm704_vm1, %v31552_v62 }
 0xa94   :  { %26157 = vmatmul.mubr.msk.f32.gmra.mrb[40].mxu1 %vm704_vm1, %v31558_v57 }
 0xa95   :  { %26159 = vmatprep.mubr.msk.f32.mxu1 %vm704_vm1, %v31647_v7 }
 0xa98   :  { %26160 = vmatmul.mubr.msk.f32.gmra.mrb[42].mxu1 %vm704_vm1, %v31722_v14 }
 0xa99   :  { %26162 = vmatprep.mubr.msk.f32.mxu1 %vm704_vm1, %v31794_v38 }
 0xa9c   :  { %26163 = vmatmul.mubr.msk.f32.gmra.mrb[44].mxu1 %vm704_vm1, %v31865_v37 }
 0xa9d   :  { %26165 = vmatprep.mubr.msk.f32.mxu1 %vm704_vm1, %v31576_v4 }
 0xaa0   :  { %26166 = vmatmul.mubr.msk.f32.gmra.mrb[46].mxu1 %vm704_vm1, %v31582_v16 }
 0xaa1   :  { %26168 = vmatprep.mubr.msk.f32.mxu1 %vm704_vm1, %v31584_v45 }
 0xaa4   :  { %26169 = vmatmul.mubr.msk.f32.gmra.mrb[48].mxu1 %vm704_vm1, %v31590_v52 }
 0xaa5   :  { %26171 = vmatprep.mubr.msk.f32.mxu1 %vm704_vm1, %v31665_v8 }
 0xaa8   :  { %26172 = vmatmul.mubr.msk.f32.gmra.mrb[50].mxu1 %vm704_vm1, %v31740_v42 }
 0xaa9   :  { %26174 = vmatprep.mubr.msk.f32.mxu1 %vm704_vm1, %v31812_v21 }
 0xaac   :  { %26175 = vmatmul.mubr.msk.f32.gmra.mrb[52].mxu1 %vm704_vm1, %v31883_v2 }
 0xaad   :  { %26179 = vmatprep.mubr.msk.f32.mxu1 %vm704_vm1, %v31496_v49  ;;  %v15677_v49 = vld [vmem:[#allocation2 + $0x270] sm:$0xff] }
 0xab0   :  { %26180 = vmatmul.mubr.msk.f32.vlgmr.msra.gmra.mrb[22].mxu1 %vm704_vm1, %v31502_v33 }
 0xab1   :  { %26228 = vmatpush3.msra.mxu1 %v28773_v1  ;;  %26182 = vmatprep.mubr.msk.f32.mxu1 %vm704_vm1, %v31504_v43  ;;  %v32528_v1 = vld [vmem:[#allocation2 + $0x350] sm:$0xff] }
 0xab2   :  { %26277 = vmatprep.subr.mxu1 %v28774_v54 }
 0xab4   :  { %26183 = vmatmul.mubr.msk.f32.gmra.mrb[24].mxu1 %vm704_vm1, %v31510_v46 }
 0xab5   :  { %26185 = vmatprep.mubr.msk.f32.mxu1 %vm704_vm1, %v31512_v40 }
 0xab8   :  { %26186 = vmatmul.mubr.msk.f32.gmra.mrb[26].mxu1 %vm704_vm1, %v31518_v36 }
 0xab9   :  { %26188 = vmatprep.mubr.msk.f32.mxu1 %vm704_vm1, %v31520_v35 }
 0xabc   :  { %26189 = vmatmul.mubr.msk.f32.gmra.mrb[28].mxu1 %vm704_vm1, %v31526_v31 }
 0xabd   :  { %26191 = vmatprep.mubr.msk.f32.mxu1 %vm704_vm1, %v31528_v32  ;;  %v32220_v32 = vld [vmem:[#allocation2 + $0x328] sm:$0xff] }
 0xac0   :  { %26192 = vmatmul.mubr.msk.f32.gmra.mrb[30].mxu1 %vm704_vm1, %v31534_v60 }
 0xac1   :  { %26194 = vmatprep.mubr.msk.f32.mxu1 %vm704_vm1, %v31536_v50 }
 0xac4   :  { %26195 = vmatmul.mubr.msk.f32.gmra.mrb[32].mxu1 %vm704_vm1, %v31542_v51 }
 0xac5   :  { %26197 = vmatprep.mubr.msk.f32.mxu1 %vm704_vm1, %v31544_v61 }
 0xac8   :  { %26198 = vmatmul.mubr.msk.f32.gmra.mrb[34].mxu1 %vm704_vm1, %v31550_v63 }
 0xac9   :  { %26200 = vmatprep.mubr.msk.f32.mxu1 %vm704_vm1, %v31552_v62 }
 0xacc   :  { %26201 = vmatmul.mubr.msk.f32.gmra.mrb[36].mxu1 %vm704_vm1, %v31558_v57 }
 0xacd   :  { %26203 = vmatprep.mubr.msk.f32.mxu1 %vm704_vm1, %v31560_v5  ;;  %v28779_v5 = vld [vmem:[%s33221_s3 + $0x88] sm:$0xff] }
 0xad0   :  { %26204 = vmatmul.mubr.msk.f32.gmra.mrb[38].mxu1 %vm704_vm1, %v31566_v41 }
 0xad1   :  { %26206 = vmatprep.mubr.msk.f32.mxu1 %vm704_vm1, %v31568_v44 }
 0xad4   :  { %26207 = vmatmul.mubr.msk.f32.gmra.mrb[40].mxu1 %vm704_vm1, %v31574_v3 }
 0xad5   :  { %26209 = vmatprep.mubr.msk.f32.mxu1 %vm704_vm1, %v31576_v4 }
 0xad8   :  { %26210 = vmatmul.mubr.msk.f32.gmra.mrb[42].mxu1 %vm704_vm1, %v31582_v16 }
 0xad9   :  { %26212 = vmatprep.mubr.msk.f32.mxu1 %vm704_vm1, %v31584_v45 }
 0xadc   :  { %26213 = vmatmul.mubr.msk.f32.gmra.mrb[44].mxu1 %vm704_vm1, %v31590_v52 }
 0xadd   :  { %26215 = vmatprep.mubr.msk.f32.mxu1 %vm704_vm1, %v31936_v47 }
 0xae0   :  { %26216 = vmatmul.mubr.msk.f32.gmra.mrb[46].mxu1 %vm704_vm1, %v31942_v13 }
 0xae1   :  { %26218 = vmatprep.mubr.msk.f32.mxu1 %vm704_vm1, %v31944_v15 }
 0xae4   :  { %26219 = vmatmul.mubr.msk.f32.gmra.mrb[48].mxu1 %vm704_vm1, %v31950_v17 }
 0xae5   :  { %26221 = vmatprep.mubr.msk.f32.mxu1 %vm704_vm1, %v31952_v18 }
 0xae8   :  { %26222 = vmatmul.mubr.msk.f32.gmra.mrb[50].mxu1 %vm704_vm1, %v31958_v19 }
 0xae9   :  { %26224 = vmatprep.mubr.msk.f32.mxu1 %vm704_vm1, %v31960_v20 }
 0xaec   :  { %26225 = vmatmul.mubr.msk.f32.gmra.mrb[52].mxu1 %vm704_vm1, %v31966_v23 }
 0xaed   :  { %26229 = vmatprep.mubr.msk.f32.mxu1 %vm704_vm1, %v31502_v33  ;;  %v15678_v33 = vld [vmem:[#allocation2 + $0x278] sm:$0xff] }
 0xaf0   :  { %26230 = vmatmul.mubr.msk.f32.vlgmr.msra.gmra.mrb[22].mxu1 %vm704_vm1, %v31504_v43 }
 0xaf1   :  { %26278 = vmatpush3.msra.mxu1 %v28774_v54  ;;  %26232 = vmatprep.mubr.msk.f32.mxu1 %vm704_vm1, %v31510_v46  ;;  %v32599_v54 = vld [vmem:[#allocation2 + $0x380] sm:$0xff] }
 0xaf2   :  { %26327 = vmatprep.subr.mxu1 %v28775_v24 }
 0xaf4   :  { %26233 = vmatmul.mubr.msk.f32.gmra.mrb[24].mxu1 %vm704_vm1, %v31512_v40 }
 0xaf5   :  { %26235 = vmatprep.mubr.msk.f32.mxu1 %vm704_vm1, %v31518_v36 }
 0xaf8   :  { %26236 = vmatmul.mubr.msk.f32.gmra.mrb[26].mxu1 %vm704_vm1, %v31520_v35 }
 0xaf9   :  { %26238 = vmatprep.mubr.msk.f32.mxu1 %vm704_vm1, %v31526_v31 }
 0xafc   :  { %26239 = vmatmul.mubr.msk.f32.gmra.mrb[28].mxu1 %vm704_vm1, %v31629_v6 }
 0xafd   :  { %26241 = vmatprep.mubr.msk.f32.mxu1 %vm704_vm1, %v31534_v60  ;;  %v32222_v60 = vld [vmem:[#allocation2 + $0x330] sm:$0xff] }
 0xb00   :  { %26242 = vmatmul.mubr.msk.f32.gmra.mrb[30].mxu1 %vm704_vm1, %v31536_v50 }
 0xb01   :  { %26244 = vmatprep.mubr.msk.f32.mxu1 %vm704_vm1, %v31542_v51 }
 0xb04   :  { %26245 = vmatmul.mubr.msk.f32.gmra.mrb[32].mxu1 %vm704_vm1, %v31544_v61 }
 0xb05   :  { %26247 = vmatprep.mubr.msk.f32.mxu1 %vm704_vm1, %v31550_v63 }
 0xb08   :  { %26248 = vmatmul.mubr.msk.f32.gmra.mrb[34].mxu1 %vm704_vm1, %v31552_v62 }
 0xb09   :  { %26250 = vmatprep.mubr.msk.f32.mxu1 %vm704_vm1, %v31558_v57 }
 0xb0c   :  { %26251 = vmatmul.mubr.msk.f32.gmra.mrb[36].mxu1 %vm704_vm1, %v31647_v7 }
 0xb0d   :  { %26253 = vmatprep.mubr.msk.f32.mxu1 %vm704_vm1, %v31566_v41  ;;  %v32277_v41 = vld [vmem:[#allocation2 + $0x300] sm:$0xff] }
 0xb10   :  { %26254 = vmatmul.mubr.msk.f32.gmra.mrb[38].mxu1 %vm704_vm1, %v31568_v44 }
 0xb11   :  { %26256 = vmatprep.mubr.msk.f32.mxu1 %vm704_vm1, %v31574_v3 }
 0xb14   :  { %26257 = vmatmul.mubr.msk.f32.gmra.mrb[40].mxu1 %vm704_vm1, %v31576_v4 }
 0xb15   :  { %26259 = vmatprep.mubr.msk.f32.mxu1 %vm704_vm1, %v31582_v16 }
 0xb18   :  { %26260 = vmatmul.mubr.msk.f32.gmra.mrb[42].mxu1 %vm704_vm1, %v31584_v45 }
 0xb19   :  { %26262 = vmatprep.mubr.msk.f32.mxu1 %vm704_vm1, %v31590_v52 }
 0xb1c   :  { %26263 = vmatmul.mubr.msk.f32.gmra.mrb[44].mxu1 %vm704_vm1, %v31665_v8 }
 0xb1d   :  { %26265 = vmatprep.mubr.msk.f32.mxu1 %vm704_vm1, %v31942_v13 }
 0xb20   :  { %26266 = vmatmul.mubr.msk.f32.gmra.mrb[46].mxu1 %vm704_vm1, %v31944_v15 }
 0xb21   :  { %26268 = vmatprep.mubr.msk.f32.mxu1 %vm704_vm1, %v31950_v17 }
 0xb24   :  { %26269 = vmatmul.mubr.msk.f32.gmra.mrb[48].mxu1 %vm704_vm1, %v31952_v18 }
 0xb25   :  { %26271 = vmatprep.mubr.msk.f32.mxu1 %vm704_vm1, %v31958_v19 }
 0xb28   :  { %26272 = vmatmul.mubr.msk.f32.gmra.mrb[50].mxu1 %vm704_vm1, %v31960_v20 }
 0xb29   :  { %26274 = vmatprep.mubr.msk.f32.mxu1 %vm704_vm1, %v31966_v23 }
 0xb2c   :  { %26275 = vmatmul.mubr.msk.f32.gmra.mrb[52].mxu1 %vm704_vm1, %v32035_v26 }
 0xb2d   :  { %26279 = vmatprep.mubr.msk.f32.mxu1 %vm704_vm1, %v31504_v43  ;;  %v28778_v43 = vld [vmem:[%s33221_s3 + $0x80] sm:$0xff] }
 0xb30   :  { %26280 = vmatmul.mubr.msk.f32.vlgmr.msra.gmra.mrb[22].mxu1 %vm704_vm1, %v31510_v46 }
 0xb31   :  { %26328 = vmatpush3.msra.mxu1 %v28775_v24  ;;  %26282 = vmatprep.mubr.msk.f32.mxu1 %vm704_vm1, %v31512_v40  ;;  %v32668_v24 = vld [vmem:[#allocation2 + $0x378] sm:$0xff] }
 0xb32   :  { %26377 = vmatprep.subr.mxu1 %v28776_v22 }
 0xb34   :  { %26283 = vmatmul.mubr.msk.f32.gmra.mrb[24].mxu1 %vm704_vm1, %v31518_v36 }
 0xb35   :  { %26285 = vmatprep.mubr.msk.f32.mxu1 %vm704_vm1, %v31520_v35 }
 0xb38   :  { %26286 = vmatmul.mubr.msk.f32.gmra.mrb[26].mxu1 %vm704_vm1, %v31526_v31 }
 0xb39   :  { %26288 = vmatprep.mubr.msk.f32.mxu1 %vm704_vm1, %v31629_v6 }
 0xb3c   :  { %26289 = vmatmul.mubr.msk.f32.gmra.mrb[28].mxu1 %vm704_vm1, %v31704_v11 }
 0xb3d   :  { %26291 = vmatprep.mubr.msk.f32.mxu1 %vm704_vm1, %v31536_v50  ;;  %v32228_v50 = vld [vmem:[#allocation2 + $0x338] sm:$0xff] }
 0xb40   :  { %26292 = vmatmul.mubr.msk.f32.gmra.mrb[30].mxu1 %vm704_vm1, %v31542_v51 }
 0xb41   :  { %26294 = vmatprep.mubr.msk.f32.mxu1 %vm704_vm1, %v31544_v61 }
 0xb44   :  { %26295 = vmatmul.mubr.msk.f32.gmra.mrb[32].mxu1 %vm704_vm1, %v31550_v63 }
 0xb45   :  { %26297 = vmatprep.mubr.msk.f32.mxu1 %vm704_vm1, %v31552_v62 }
 0xb48   :  { %26298 = vmatmul.mubr.msk.f32.gmra.mrb[34].mxu1 %vm704_vm1, %v31558_v57 }
 0xb49   :  { %26300 = vmatprep.mubr.msk.f32.mxu1 %vm704_vm1, %v31647_v7 }
 0xb4c   :  { %26301 = vmatmul.mubr.msk.f32.gmra.mrb[36].mxu1 %vm704_vm1, %v31722_v14 }
 0xb4d   :  { %26303 = vmatprep.mubr.msk.f32.mxu1 %vm704_vm1, %v31568_v44  ;;  %v32283_v44 = vld [vmem:[#allocation2 + $0x308] sm:$0xff] }
 0xb50   :  { %26304 = vmatmul.mubr.msk.f32.gmra.mrb[38].mxu1 %vm704_vm1, %v31574_v3 }
 0xb51   :  { %26306 = vmatprep.mubr.msk.f32.mxu1 %vm704_vm1, %v31576_v4 }
 0xb54   :  { %26307 = vmatmul.mubr.msk.f32.gmra.mrb[40].mxu1 %vm704_vm1, %v31582_v16 }
 0xb55   :  { %26309 = vmatprep.mubr.msk.f32.mxu1 %vm704_vm1, %v31584_v45 }
 0xb58   :  { %26310 = vmatmul.mubr.msk.f32.gmra.mrb[42].mxu1 %vm704_vm1, %v31590_v52 }
 0xb59   :  { %26312 = vmatprep.mubr.msk.f32.mxu1 %vm704_vm1, %v31665_v8 }
 0xb5c   :  { %26313 = vmatmul.mubr.msk.f32.gmra.mrb[44].mxu1 %vm704_vm1, %v31740_v42 }
 0xb5d   :  { %26315 = vmatprep.mubr.msk.f32.mxu1 %vm704_vm1, %v31944_v15 }
 0xb60   :  { %26316 = vmatmul.mubr.msk.f32.gmra.mrb[46].mxu1 %vm704_vm1, %v31950_v17 }
 0xb61   :  { %26318 = vmatprep.mubr.msk.f32.mxu1 %vm704_vm1, %v31952_v18 }
 0xb64   :  { %26319 = vmatmul.mubr.msk.f32.gmra.mrb[48].mxu1 %vm704_vm1, %v31958_v19 }
 0xb65   :  { %26321 = vmatprep.mubr.msk.f32.mxu1 %vm704_vm1, %v31960_v20 }
 0xb68   :  { %26322 = vmatmul.mubr.msk.f32.gmra.mrb[50].mxu1 %vm704_vm1, %v31966_v23 }
 0xb69   :  { %26324 = vmatprep.mubr.msk.f32.mxu1 %vm704_vm1, %v32035_v26 }
 0xb6c   :  { %26325 = vmatmul.mubr.msk.f32.gmra.mrb[52].mxu1 %vm704_vm1, %v32104_v27 }
 0xb6d   :  { %26329 = vmatprep.mubr.msk.f32.mxu1 %vm704_vm1, %v31510_v46  ;;  %v32190_v46 = vld [vmem:[#allocation2 + $0x2c0] sm:$0xff] }
 0xb70   :  { %26330 = vmatmul.mubr.msk.f32.vlgmr.msra.gmra.mrb[22].mxu1 %vm704_vm1, %v31512_v40  ;;  %v32196_v40 = vld [vmem:[#allocation2 + $0x2c8] sm:$0xff] }
 0xb71   :  { %26378 = vmatpush3.msra.mxu1 %v28776_v22  ;;  %26332 = vmatprep.mubr.msk.f32.mxu1 %vm704_vm1, %v31518_v36  ;;  %v32198_v36 = vld [vmem:[#allocation2 + $0x2d0] sm:$0xff]  ;;  %v18016_v22 = vld [vmem:[#allocation2 + $0x428] sm:$0xff] }
 0xb72   :  { %26427 = vmatprep.subr.mxu1 %v28777_v28 }
 0xb74   :  { %26333 = vmatmul.mubr.msk.f32.gmra.mrb[24].mxu1 %vm704_vm1, %v31520_v35  ;;  %v32204_v35 = vld [vmem:[#allocation2 + $0x2d8] sm:$0xff] }
 0xb75   :  { %26335 = vmatprep.mubr.msk.f32.mxu1 %vm704_vm1, %v31526_v31  ;;  %v32214_v31 = vld [vmem:[#allocation2 + $0x320] sm:$0xff] }
 0xb78   :  { %26336 = vmatmul.mubr.msk.f32.gmra.mrb[26].mxu1 %vm704_vm1, %v31629_v6 }
 0xb79   :  { %26338 = vmatprep.mubr.msk.f32.mxu1 %vm704_vm1, %v31704_v11 }
 0xb7c   :  { %26339 = vmatmul.mubr.msk.f32.gmra.mrb[28].mxu1 %vm704_vm1, %v31776_v53 }
 0xb7d   :  { %26341 = vmatprep.mubr.msk.f32.mxu1 %vm704_vm1, %v31542_v51  ;;  %v32254_v51 = vld [vmem:[#allocation2 + $0x3b8] sm:$0xff] }
 0xb80   :  { %26342 = vmatmul.mubr.msk.f32.gmra.mrb[30].mxu1 %vm704_vm1, %v31544_v61  ;;  %v16061_v61 = vld [vmem:[#allocation2 + $0x2a0] sm:$0xff] }
 0xb81   :  { %26344 = vmatprep.mubr.msk.f32.mxu1 %vm704_vm1, %v31550_v63  ;;  %v16062_v63 = vld [vmem:[#allocation2 + $0x2a8] sm:$0xff] }
 0xb84   :  { %26345 = vmatmul.mubr.msk.f32.gmra.mrb[32].mxu1 %vm704_vm1, %v31552_v62  ;;  %v32259_v62 = vld [vmem:[#allocation2 + $0x2b0] sm:$0xff] }
 0xb85   :  { %26347 = vmatprep.mubr.msk.f32.mxu1 %vm704_vm1, %v31558_v57  ;;  %v32264_v57 = vld [vmem:[#allocation2 + $0x2b8] sm:$0xff] }
 0xb88   :  { %26348 = vmatmul.mubr.msk.f32.gmra.mrb[34].mxu1 %vm704_vm1, %v31647_v7 }
 0xb89   :  { %26350 = vmatprep.mubr.msk.f32.mxu1 %vm704_vm1, %v31722_v14 }
 0xb8c   :  { %26351 = vmatmul.mubr.msk.f32.gmra.mrb[36].mxu1 %vm704_vm1, %v31794_v38 }
 0xb8d   :  { %26353 = vmatprep.mubr.msk.f32.mxu1 %vm704_vm1, %v31574_v3  ;;  %v32285_v3 = vld [vmem:[#allocation2 + $0x310] sm:$0xff] }
 0xb90   :  { %26354 = vmatmul.mubr.msk.f32.gmra.mrb[38].mxu1 %vm704_vm1, %v31576_v4  ;;  %v32291_v4 = vld [vmem:[#allocation2 + $0x318] sm:$0xff] }
 0xb91   :  { %26356 = vmatprep.mubr.msk.f32.mxu1 %vm704_vm1, %v31582_v16  ;;  %v32317_v16 = vld [vmem:[#allocation2 + $0x3c0] sm:$0xff] }
 0xb94   :  { %26357 = vmatmul.mubr.msk.f32.gmra.mrb[40].mxu1 %vm704_vm1, %v31584_v45  ;;  %v32323_v45 = vld [vmem:[#allocation2 + $0x3c8] sm:$0xff] }
 0xb95   :  { %26359 = vmatprep.mubr.msk.f32.mxu1 %vm704_vm1, %v31590_v52  ;;  %v32325_v52 = vld [vmem:[#allocation2 + $0x3d0] sm:$0xff] }
 0xb98   :  { %26360 = vmatmul.mubr.msk.f32.gmra.mrb[42].mxu1 %vm704_vm1, %v31665_v8 }
 0xb99   :  { %26362 = vmatprep.mubr.msk.f32.mxu1 %vm704_vm1, %v31740_v42 }
 0xb9c   :  { %26363 = vmatmul.mubr.msk.f32.gmra.mrb[44].mxu1 %vm704_vm1, %v31812_v21 }
 0xb9d   :  { %26365 = vmatprep.mubr.msk.f32.mxu1 %vm704_vm1, %v31950_v17 }
 0xba0   :  { %26366 = vmatmul.mubr.msk.f32.gmra.mrb[46].mxu1 %vm704_vm1, %v31952_v18 }
 0xba1   :  { %26368 = vmatprep.mubr.msk.f32.mxu1 %vm704_vm1, %v31958_v19 }
 0xba4   :  { %26369 = vmatmul.mubr.msk.f32.gmra.mrb[48].mxu1 %vm704_vm1, %v31960_v20 }
 0xba5   :  { %26371 = vmatprep.mubr.msk.f32.mxu1 %vm704_vm1, %v31966_v23 }
 0xba8   :  { %26372 = vmatmul.mubr.msk.f32.gmra.mrb[50].mxu1 %vm704_vm1, %v32035_v26 }
 0xba9   :  { %26374 = vmatprep.mubr.msk.f32.mxu1 %vm704_vm1, %v32104_v27 }
 0xbac   :  { %26375 = vmatmul.mubr.msk.f32.gmra.mrb[52].mxu1 %vm704_vm1, %v32173_v29 }
 0xbad   :  { %26379 = vmatprep.mubr.msk.f32.mxu1 %vm704_vm1, %v15675_v30  ;;  %v32710_v30 = vld [vmem:[#allocation2 + $0x448] sm:$0xff] }
 0xbb0   :  { %26380 = vmatmul.mubr.msk.f32.vlgmr.msra.gmra.mrb[22].mxu1 %vm704_vm1, %v15676_v48  ;;  %v32712_v48 = vld [vmem:[#allocation2 + $0x450] sm:$0xff] }
 0xbb1   :  { %26428 = vmatpush3.msra.mxu1 %v28777_v28  ;;  %26382 = vmatprep.mubr.msk.f32.mxu1 %vm704_vm1, %v15677_v49  ;;  %v32702_v28 = vld [vmem:[#allocation2 + $0x438] sm:$0xff] }
 0xbb2   :  { %26477 = vmatprep.subr.mxu1 %v28778_v43  ;;  %v32718_v49 = vld [vmem:[#allocation2 + $0x458] sm:$0xff] }
 0xbb4   :  { %26383 = vmatmul.mubr.msk.f32.gmra.mrb[24].mxu1 %vm704_vm1, %v15678_v33  ;;  %v28785_v33 = vld [vmem:[%s33221_s3 + $0xb8] sm:$0xff] }
 0xbb5   :  { %26385 = vmatprep.mubr.msk.f32.mxu1 %vm704_vm1, %v31629_v6  ;;  %v32339_v6 = vld [vmem:[#allocation2 + $0x3e8] sm:$0xff] }
 0xbb8   :  { %26386 = vmatmul.mubr.msk.f32.gmra.mrb[26].mxu1 %vm704_vm1, %v31704_v11  ;;  %v32385_v11 = vld [vmem:[#allocation2 + $0x340] sm:$0xff] }
 0xbb9   :  { %26388 = vmatprep.mubr.msk.f32.mxu1 %vm704_vm1, %v31776_v53  ;;  %v32492_v53 = vld [vmem:[#allocation2 + $0x408] sm:$0xff] }
 0xbbc   :  { %26389 = vmatmul.mubr.msk.f32.gmra.mrb[28].mxu1 %vm704_vm1, %v31847_v25  ;;  %v28783_v25 = vld [vmem:[%s33221_s3 + $0xa8] sm:$0xff] }
 0xbbd   :  { %26391 = vmatprep.mubr.msk.f32.mxu1 %vm704_vm1, %v32190_v46 }
 0xbc0   :  { %26392 = vmatmul.mubr.msk.f32.gmra.mrb[30].mxu1 %vm704_vm1, %v32196_v40 }
 0xbc1   :  { %26394 = vmatprep.mubr.msk.f32.mxu1 %vm704_vm1, %v32198_v36 }
 0xbc4   :  { %26395 = vmatmul.mubr.msk.f32.gmra.mrb[32].mxu1 %vm704_vm1, %v32204_v35 }
 0xbc5   :  { %26397 = vmatprep.mubr.msk.f32.mxu1 %vm704_vm1, %v31647_v7  ;;  %v32341_v7 = vld [vmem:[#allocation2 + $0x3f0] sm:$0xff] }
 0xbc8   :  { %26398 = vmatmul.mubr.msk.f32.gmra.mrb[34].mxu1 %vm704_vm1, %v31722_v14  ;;  %v32419_v14 = vld [vmem:[#allocation2 + $0x400] sm:$0xff] }
 0xbc9   :  { %26400 = vmatprep.mubr.msk.f32.mxu1 %vm704_vm1, %v31794_v38  ;;  %v28782_v38 = vld [vmem:[%s33221_s3 + $0xa0] sm:$0xff] }
 0xbcc   :  { %26401 = vmatmul.mubr.msk.f32.gmra.mrb[36].mxu1 %vm704_vm1, %v31865_v37  ;;  %v17612_v37 = vld [vmem:[#allocation2 + $0x2f8] sm:$0xff] }
 0xbcd   :  { %26403 = vmatprep.mubr.msk.f32.mxu1 %vm704_vm1, %v32214_v31 }
 0xbd0   :  { %26404 = vmatmul.mubr.msk.f32.gmra.mrb[38].mxu1 %vm704_vm1, %v32220_v32 }
 0xbd1   :  { %26406 = vmatprep.mubr.msk.f32.mxu1 %vm704_vm1, %v32222_v60 }
 0xbd4   :  { %26407 = vmatmul.mubr.msk.f32.gmra.mrb[40].mxu1 %vm704_vm1, %v32228_v50 }
 0xbd5   :  { %26409 = vmatprep.mubr.msk.f32.mxu1 %vm704_vm1, %v31665_v8  ;;  %v32347_v8 = vld [vmem:[#allocation2 + $0x3f8] sm:$0xff] }
 0xbd8   :  { %26410 = vmatmul.mubr.msk.f32.gmra.mrb[42].mxu1 %vm704_vm1, %v31740_v42  ;;  %v28781_v42 = vld [vmem:[%s33221_s3 + $0x98] sm:$0xff] }
 0xbd9   :  { %26412 = vmatprep.mubr.msk.f32.mxu1 %vm704_vm1, %v31812_v21  ;;  %v17226_v21 = vld [vmem:[#allocation2 + $0x2f0] sm:$0xff] }
 0xbdc   :  { %26413 = vmatmul.mubr.msk.f32.gmra.mrb[44].mxu1 %vm704_vm1, %v31883_v2  ;;  %v32597_v2 = vld [vmem:[#allocation2 + $0x358] sm:$0xff] }
 0xbdd   :  { %26415 = vmatprep.mubr.msk.f32.mxu1 %vm704_vm1, %v31952_v18 }
 0xbe0   :  { %26416 = vmatmul.mubr.msk.f32.gmra.mrb[46].mxu1 %vm704_vm1, %v31958_v19 }
 0xbe1   :  { %26418 = vmatprep.mubr.msk.f32.mxu1 %vm704_vm1, %v31960_v20 }
 0xbe4   :  { %26419 = vmatmul.mubr.msk.f32.gmra.mrb[48].mxu1 %vm704_vm1, %v31966_v23 }
 0xbe5   :  { %26421 = vmatprep.mubr.msk.f32.mxu1 %vm704_vm1, %v32035_v26 }
 0xbe8   :  { %26422 = vmatmul.mubr.msk.f32.gmra.mrb[50].mxu1 %vm704_vm1, %v32104_v27 }
 0xbe9   :  { %26424 = vmatprep.mubr.msk.f32.mxu1 %vm704_vm1, %v32173_v29 }
 0xbec   :  { %26425 = vmatmul.mubr.msk.f32.gmra.mrb[52].mxu1 %vm704_vm1, %v32254_v51 }
 0xbed   :  { %26429 = vmatprep.mubr.msk.f32.mxu1 %vm704_vm1, %v16061_v61  ;;  %v19152_v61 = vld [vmem:[#allocation2 + $0x330] sm:$0xff] }
 0xbf0   :  { %26430 = vmatmul.mubr.msk.f32.vlgmr.msra.gmra.mrb[22].mxu1 %vm704_vm1, %v16062_v63 }
 0xbf1   :  { %26478 = vmatpush3.msra.mxu1 %v28778_v43  ;;  %26432 = vmatprep.mubr.msk.f32.mxu1 %vm704_vm1, %v32259_v62  ;;  %v32754_v43 = vld [vmem:[#allocation2 + $0x3a0] sm:$0xff] }
 0xbf2   :  { %26527 = vmatprep.subr.mxu1 %v28779_v5 }
 0xbf4   :  { %26433 = vmatmul.mubr.msk.f32.gmra.mrb[24].mxu1 %vm704_vm1, %v32264_v57 }
 0xbf5   :  { %26435 = vmatprep.mubr.msk.f32.mxu1 %vm704_vm1, %v32190_v46 }
 0xbf8   :  { %26436 = vmatmul.mubr.msk.f32.gmra.mrb[26].mxu1 %vm704_vm1, %v32196_v40 }
 0xbf9   :  { %26438 = vmatprep.mubr.msk.f32.mxu1 %vm704_vm1, %v32198_v36 }
 0xbfc   :  { %26439 = vmatmul.mubr.msk.f32.gmra.mrb[28].mxu1 %vm704_vm1, %v32204_v35 }
 0xbfd   :  { %26441 = vmatprep.mubr.msk.f32.mxu1 %vm704_vm1, %v32277_v41 }
 0xc00   :  { %26442 = vmatmul.mubr.msk.f32.gmra.mrb[30].mxu1 %vm704_vm1, %v32283_v44 }
 0xc01   :  { %26444 = vmatprep.mubr.msk.f32.mxu1 %vm704_vm1, %v32285_v3 }
 0xc04   :  { %26445 = vmatmul.mubr.msk.f32.gmra.mrb[32].mxu1 %vm704_vm1, %v32291_v4 }
 0xc05   :  { %26447 = vmatprep.mubr.msk.f32.mxu1 %vm704_vm1, %v32214_v31 }
 0xc08   :  { %26448 = vmatmul.mubr.msk.f32.gmra.mrb[34].mxu1 %vm704_vm1, %v32220_v32 }
 0xc09   :  { %26450 = vmatprep.mubr.msk.f32.mxu1 %vm704_vm1, %v32222_v60 }
 0xc0c   :  { %26451 = vmatmul.mubr.msk.f32.gmra.mrb[36].mxu1 %vm704_vm1, %v32228_v50 }
 0xc0d   :  { %26453 = vmatprep.mubr.msk.f32.mxu1 %vm704_vm1, %v31936_v47  ;;  %v32605_v47 = vld [vmem:[#allocation2 + $0x388] sm:$0xff] }
 0xc10   :  { %26454 = vmatmul.mubr.msk.f32.gmra.mrb[38].mxu1 %vm704_vm1, %v31942_v13 }
 0xc11   :  { %26456 = vmatprep.mubr.msk.f32.mxu1 %vm704_vm1, %v31944_v15 }
 0xc14   :  { %26457 = vmatmul.mubr.msk.f32.gmra.mrb[40].mxu1 %vm704_vm1, %v31950_v17 }
 0xc15   :  { %26459 = vmatprep.mubr.msk.f32.mxu1 %vm704_vm1, %v31952_v18 }
 0xc18   :  { %26460 = vmatmul.mubr.msk.f32.gmra.mrb[42].mxu1 %vm704_vm1, %v31958_v19 }
 0xc19   :  { %26462 = vmatprep.mubr.msk.f32.mxu1 %vm704_vm1, %v31960_v20 }
 0xc1c   :  { %26463 = vmatmul.mubr.msk.f32.gmra.mrb[44].mxu1 %vm704_vm1, %v31966_v23 }
 0xc1d   :  { %26465 = vmatprep.mubr.msk.f32.mxu1 %vm704_vm1, %v32317_v16 }
 0xc20   :  { %26466 = vmatmul.mubr.msk.f32.gmra.mrb[46].mxu1 %vm704_vm1, %v32323_v45 }
 0xc21   :  { %26468 = vmatprep.mubr.msk.f32.mxu1 %vm704_vm1, %v32325_v52 }
 0xc24   :  { %26469 = vmatmul.mubr.msk.f32.gmra.mrb[48].mxu1 %vm704_vm1, %v32331_v39 }
 0xc25   :  { %26471 = vmatprep.mubr.msk.f32.mxu1 %vm704_vm1, %v32333_v34 }
 0xc28   :  { %26472 = vmatmul.mubr.msk.f32.gmra.mrb[50].mxu1 %vm704_vm1, %v32339_v6 }
 0xc29   :  { %26474 = vmatprep.mubr.msk.f32.mxu1 %vm704_vm1, %v32341_v7 }
 0xc2c   :  { %26475 = vmatmul.mubr.msk.f32.gmra.mrb[52].mxu1 %vm704_vm1, %v32347_v8 }
 0xc2d   :  { %26479 = vmatprep.mubr.msk.f32.mxu1 %vm704_vm1, %v16062_v63  ;;  %v19153_v63 = vld [vmem:[#allocation2 + $0x338] sm:$0xff] }
 0xc30   :  { %26480 = vmatmul.mubr.msk.f32.vlgmr.msra.gmra.mrb[22].mxu1 %vm704_vm1, %v32259_v62 }
 0xc31   :  { %26528 = vmatpush3.msra.mxu1 %v28779_v5  ;;  %26482 = vmatprep.mubr.msk.f32.mxu1 %vm704_vm1, %v32264_v57  ;;  %v19550_v5 = vld [vmem:[#allocation2 + $0x3b8] sm:$0xff] }
 0xc32   :  { %26577 = vmatprep.subr.mxu1 %v28780_v9 }
 0xc34   :  { %26483 = vmatmul.mubr.msk.f32.gmra.mrb[24].mxu1 %vm704_vm1, %v32190_v46 }
 0xc35   :  { %26485 = vmatprep.mubr.msk.f32.mxu1 %vm704_vm1, %v32196_v40 }
 0xc38   :  { %26486 = vmatmul.mubr.msk.f32.gmra.mrb[26].mxu1 %vm704_vm1, %v32198_v36 }
 0xc39   :  { %26488 = vmatprep.mubr.msk.f32.mxu1 %vm704_vm1, %v32204_v35 }
 0xc3c   :  { %26489 = vmatmul.mubr.msk.f32.gmra.mrb[28].mxu1 %vm704_vm1, %v32367_v10 }
 0xc3d   :  { %26491 = vmatprep.mubr.msk.f32.mxu1 %vm704_vm1, %v32283_v44 }
 0xc40   :  { %26492 = vmatmul.mubr.msk.f32.gmra.mrb[30].mxu1 %vm704_vm1, %v32285_v3 }
 0xc41   :  { %26494 = vmatprep.mubr.msk.f32.mxu1 %vm704_vm1, %v32291_v4 }
 0xc44   :  { %26495 = vmatmul.mubr.msk.f32.gmra.mrb[32].mxu1 %vm704_vm1, %v32214_v31 }
 0xc45   :  { %26497 = vmatprep.mubr.msk.f32.mxu1 %vm704_vm1, %v32220_v32 }
 0xc48   :  { %26498 = vmatmul.mubr.msk.f32.gmra.mrb[34].mxu1 %vm704_vm1, %v32222_v60 }
 0xc49   :  { %26500 = vmatprep.mubr.msk.f32.mxu1 %vm704_vm1, %v32228_v50 }
 0xc4c   :  { %26501 = vmatmul.mubr.msk.f32.gmra.mrb[36].mxu1 %vm704_vm1, %v32385_v11 }
 0xc4d   :  { %26503 = vmatprep.mubr.msk.f32.mxu1 %vm704_vm1, %v31942_v13  ;;  %v32607_v13 = vld [vmem:[#allocation2 + $0x390] sm:$0xff] }
 0xc50   :  { %26504 = vmatmul.mubr.msk.f32.gmra.mrb[38].mxu1 %vm704_vm1, %v31944_v15 }
 0xc51   :  { %26506 = vmatprep.mubr.msk.f32.mxu1 %vm704_vm1, %v31950_v17 }
 0xc54   :  { %26507 = vmatmul.mubr.msk.f32.gmra.mrb[40].mxu1 %vm704_vm1, %v31952_v18 }
 0xc55   :  { %26509 = vmatprep.mubr.msk.f32.mxu1 %vm704_vm1, %v31958_v19 }
 0xc58   :  { %26510 = vmatmul.mubr.msk.f32.gmra.mrb[42].mxu1 %vm704_vm1, %v31960_v20 }
 0xc59   :  { %26512 = vmatprep.mubr.msk.f32.mxu1 %vm704_vm1, %v31966_v23 }
 0xc5c   :  { %26513 = vmatmul.mubr.msk.f32.gmra.mrb[44].mxu1 %vm704_vm1, %v32035_v26 }
 0xc5d   :  { %26515 = vmatprep.mubr.msk.f32.mxu1 %vm704_vm1, %v32323_v45 }
 0xc60   :  { %26516 = vmatmul.mubr.msk.f32.gmra.mrb[46].mxu1 %vm704_vm1, %v32325_v52 }
 0xc61   :  { %26518 = vmatprep.mubr.msk.f32.mxu1 %vm704_vm1, %v32331_v39 }
 0xc64   :  { %26519 = vmatmul.mubr.msk.f32.gmra.mrb[48].mxu1 %vm704_vm1, %v32333_v34 }
 0xc65   :  { %26521 = vmatprep.mubr.msk.f32.mxu1 %vm704_vm1, %v32339_v6 }
 0xc68   :  { %26522 = vmatmul.mubr.msk.f32.gmra.mrb[50].mxu1 %vm704_vm1, %v32341_v7 }
 0xc69   :  { %26524 = vmatprep.mubr.msk.f32.mxu1 %vm704_vm1, %v32347_v8 }
 0xc6c   :  { %26525 = vmatmul.mubr.msk.f32.gmra.mrb[52].mxu1 %vm704_vm1, %v32419_v14 }
 0xc6d   :  { %26529 = vmatprep.mubr.msk.f32.mxu1 %vm704_vm1, %v32259_v62  ;;  %v19164_v62 = vld [vmem:[#allocation2 + $0x3b0] sm:$0xff] }
 0xc70   :  { %26530 = vmatmul.mubr.msk.f32.vlgmr.msra.gmra.mrb[22].mxu1 %vm704_vm1, %v32264_v57 }
 0xc71   :  { %26578 = vmatpush3.msra.mxu1 %v28780_v9  ;;  %26532 = vmatprep.mubr.msk.f32.mxu1 %vm704_vm1, %v32190_v46  ;;  %v32999_v9 = vld [vmem:[%s33222_s4] ss:$0 sm:$0xff] }
 0xc72   :  { %26627 = vmatprep.subr.mxu1 %v28781_v42 }
 0xc74   :  { %26533 = vmatmul.mubr.msk.f32.gmra.mrb[24].mxu1 %vm704_vm1, %v32196_v40 }
 0xc75   :  { %26535 = vmatprep.mubr.msk.f32.mxu1 %vm704_vm1, %v32198_v36 }
 0xc78   :  { %26536 = vmatmul.mubr.msk.f32.gmra.mrb[26].mxu1 %vm704_vm1, %v32204_v35 }
 0xc79   :  { %26538 = vmatprep.mubr.msk.f32.mxu1 %vm704_vm1, %v32367_v10 }
 0xc7c   :  { %26539 = vmatmul.mubr.msk.f32.gmra.mrb[28].mxu1 %vm704_vm1, %v32440_v59 }
 0xc7d   :  { %26541 = vmatprep.mubr.msk.f32.mxu1 %vm704_vm1, %v32285_v3 }
 0xc80   :  { %26542 = vmatmul.mubr.msk.f32.gmra.mrb[30].mxu1 %vm704_vm1, %v32291_v4 }
 0xc81   :  { %26544 = vmatprep.mubr.msk.f32.mxu1 %vm704_vm1, %v32214_v31 }
 0xc84   :  { %26545 = vmatmul.mubr.msk.f32.gmra.mrb[32].mxu1 %vm704_vm1, %v32220_v32 }
 0xc85   :  { %26547 = vmatprep.mubr.msk.f32.mxu1 %vm704_vm1, %v32222_v60 }
 0xc88   :  { %26548 = vmatmul.mubr.msk.f32.gmra.mrb[34].mxu1 %vm704_vm1, %v32228_v50 }
 0xc89   :  { %26550 = vmatprep.mubr.msk.f32.mxu1 %vm704_vm1, %v32385_v11 }
 0xc8c   :  { %26551 = vmatmul.mubr.msk.f32.gmra.mrb[36].mxu1 %vm704_vm1, %v32458_v56 }
 0xc8d   :  { %26553 = vmatprep.mubr.msk.f32.mxu1 %vm704_vm1, %v31944_v15  ;;  %v32613_v15 = vld [vmem:[#allocation2 + $0x398] sm:$0xff] }
 0xc90   :  { %26554 = vmatmul.mubr.msk.f32.gmra.mrb[38].mxu1 %vm704_vm1, %v31950_v17 }
 0xc91   :  { %26556 = vmatprep.mubr.msk.f32.mxu1 %vm704_vm1, %v31952_v18 }
 0xc94   :  { %26557 = vmatmul.mubr.msk.f32.gmra.mrb[40].mxu1 %vm704_vm1, %v31958_v19 }
 0xc95   :  { %26559 = vmatprep.mubr.msk.f32.mxu1 %vm704_vm1, %v31960_v20 }
 0xc98   :  { %26560 = vmatmul.mubr.msk.f32.gmra.mrb[42].mxu1 %vm704_vm1, %v31966_v23 }
 0xc99   :  { %26562 = vmatprep.mubr.msk.f32.mxu1 %vm704_vm1, %v32035_v26 }
 0xc9c   :  { %26563 = vmatmul.mubr.msk.f32.gmra.mrb[44].mxu1 %vm704_vm1, %v32104_v27 }
 0xc9d   :  { %26565 = vmatprep.mubr.msk.f32.mxu1 %vm704_vm1, %v32325_v52 }
 0xca0   :  { %26566 = vmatmul.mubr.msk.f32.gmra.mrb[46].mxu1 %vm704_vm1, %v32331_v39 }
 0xca1   :  { %26568 = vmatprep.mubr.msk.f32.mxu1 %vm704_vm1, %v32333_v34 }
 0xca4   :  { %26569 = vmatmul.mubr.msk.f32.gmra.mrb[48].mxu1 %vm704_vm1, %v32339_v6 }
 0xca5   :  { %26571 = vmatprep.mubr.msk.f32.mxu1 %vm704_vm1, %v32341_v7 }
 0xca8   :  { %26572 = vmatmul.mubr.msk.f32.gmra.mrb[50].mxu1 %vm704_vm1, %v32347_v8 }
 0xca9   :  { %26574 = vmatprep.mubr.msk.f32.mxu1 %vm704_vm1, %v32419_v14 }
 0xcac   :  { %26575 = vmatmul.mubr.msk.f32.gmra.mrb[52].mxu1 %vm704_vm1, %v32492_v53 }
 0xcad   :  { %26579 = vmatprep.mubr.msk.f32.mxu1 %vm704_vm1, %v32264_v57  ;;  %v19180_v57 = vld [vmem:[#allocation2 + $0x470] sm:$0xff] }
 0xcb0   :  { %26580 = vmatmul.mubr.msk.f32.vlgmr.msra.gmra.mrb[22].mxu1 %vm704_vm1, %v32190_v46 }
 0xcb1   :  { %26628 = vmatpush3.msra.mxu1 %v28781_v42  ;;  %26582 = vmatprep.mubr.msk.f32.mxu1 %vm704_vm1, %v32196_v40 }
 0xcb2   :  { %26677 = vmatprep.subr.mxu1 %v28782_v38 }
 0xcb4   :  { %26583 = vmatmul.mubr.msk.f32.gmra.mrb[24].mxu1 %vm704_vm1, %v32198_v36 }
 0xcb5   :  { %26585 = vmatprep.mubr.msk.f32.mxu1 %vm704_vm1, %v32204_v35 }
 0xcb8   :  { %26586 = vmatmul.mubr.msk.f32.gmra.mrb[26].mxu1 %vm704_vm1, %v32367_v10 }
 0xcb9   :  { %26588 = vmatprep.mubr.msk.f32.mxu1 %vm704_vm1, %v32440_v59 }
 0xcbc   :  { %26589 = vmatmul.mubr.msk.f32.gmra.mrb[28].mxu1 %vm704_vm1, %v17226_v21 }
 0xcbd   :  { %26591 = vmatprep.mubr.msk.f32.mxu1 %vm704_vm1, %v32291_v4 }
 0xcc0   :  { %26592 = vmatmul.mubr.msk.f32.gmra.mrb[30].mxu1 %vm704_vm1, %v32214_v31 }
 0xcc1   :  { %26594 = vmatprep.mubr.msk.f32.mxu1 %vm704_vm1, %v32220_v32 }
 0xcc4   :  { %26595 = vmatmul.mubr.msk.f32.gmra.mrb[32].mxu1 %vm704_vm1, %v32222_v60 }
 0xcc5   :  { %26597 = vmatprep.mubr.msk.f32.mxu1 %vm704_vm1, %v32228_v50 }
 0xcc8   :  { %26598 = vmatmul.mubr.msk.f32.gmra.mrb[34].mxu1 %vm704_vm1, %v32385_v11 }
 0xcc9   :  { %26600 = vmatprep.mubr.msk.f32.mxu1 %vm704_vm1, %v32458_v56 }
 0xccc   :  { %26601 = vmatmul.mubr.msk.f32.gmra.mrb[36].mxu1 %vm704_vm1, %v32528_v1 }
 0xccd   :  { %26603 = vmatprep.mubr.msk.f32.mxu1 %vm704_vm1, %v31950_v17  ;;  %v32639_v17 = vld [vmem:[#allocation2 + $0x418] sm:$0xff] }
 0xcd0   :  { %26604 = vmatmul.mubr.msk.f32.gmra.mrb[38].mxu1 %vm704_vm1, %v31952_v18  ;;  %v28784_v18 = vld [vmem:[%s33221_s3 + $0xb0] sm:$0xff] }
 0xcd1   :  { %26606 = vmatprep.mubr.msk.f32.mxu1 %vm704_vm1, %v31958_v19  ;;  %v17999_v19 = vld [vmem:[#allocation2 + $0x360] sm:$0xff] }
 0xcd4   :  { %26607 = vmatmul.mubr.msk.f32.gmra.mrb[40].mxu1 %vm704_vm1, %v31960_v20  ;;  %v18000_v20 = vld [vmem:[#allocation2 + $0x368] sm:$0xff] }
 0xcd5   :  { %26609 = vmatprep.mubr.msk.f32.mxu1 %vm704_vm1, %v31966_v23  ;;  %v32663_v23 = vld [vmem:[#allocation2 + $0x370] sm:$0xff] }
 0xcd8   :  { %26610 = vmatmul.mubr.msk.f32.gmra.mrb[42].mxu1 %vm704_vm1, %v32035_v26 }
 0xcd9   :  { %26612 = vmatprep.mubr.msk.f32.mxu1 %vm704_vm1, %v32104_v27 }
 0xcdc   :  { %26613 = vmatmul.mubr.msk.f32.gmra.mrb[44].mxu1 %vm704_vm1, %v32173_v29 }
 0xcdd   :  { %26615 = vmatprep.mubr.msk.f32.mxu1 %vm704_vm1, %v32331_v39 }
 0xce0   :  { %26616 = vmatmul.mubr.msk.f32.gmra.mrb[46].mxu1 %vm704_vm1, %v32333_v34 }
 0xce1   :  { %26618 = vmatprep.mubr.msk.f32.mxu1 %vm704_vm1, %v32339_v6 }
 0xce4   :  { %26619 = vmatmul.mubr.msk.f32.gmra.mrb[48].mxu1 %vm704_vm1, %v32341_v7 }
 0xce5   :  { %26621 = vmatprep.mubr.msk.f32.mxu1 %vm704_vm1, %v32347_v8 }
 0xce8   :  { %26622 = vmatmul.mubr.msk.f32.gmra.mrb[50].mxu1 %vm704_vm1, %v32419_v14 }
 0xce9   :  { %26624 = vmatprep.mubr.msk.f32.mxu1 %vm704_vm1, %v32492_v53 }
 0xcec   :  { %26625 = vmatmul.mubr.msk.f32.gmra.mrb[52].mxu1 %vm704_vm1, %v32562_v12 }
 0xced   :  { %26629 = vmatprep.mubr.msk.f32.mxu1 %vm704_vm1, %v32190_v46  ;;  %v32787_v46 = vld [vmem:[#allocation2 + $0x460] sm:$0xff] }
 0xcf0   :  { %26630 = vmatmul.mubr.msk.f32.vlgmr.msra.gmra.mrb[22].mxu1 %vm704_vm1, %v32196_v40  ;;  %v28786_v40 = vld [vmem:[%s33221_s3 + $0xc0] sm:$0xff] }
 0xcf1   :  { %26678 = vmatpush3.msra.mxu1 %v28782_v38  ;;  %26632 = vmatprep.mubr.msk.f32.mxu1 %vm704_vm1, %v32198_v36  ;;  %v32824_v36 = vld [vmem:[#allocation2 + $0x3a8] sm:$0xff] }
 0xcf2   :  { %26727 = vmatprep.subr.mxu1 %v28783_v25 }
 0xcf4   :  { %26633 = vmatmul.mubr.msk.f32.gmra.mrb[24].mxu1 %vm704_vm1, %v32204_v35  ;;  %v32858_v35 = vld [vmem:[#allocation2 + $0x468] sm:$0xff] }
 0xcf5   :  { %26635 = vmatprep.mubr.msk.f32.mxu1 %vm704_vm1, %v32367_v10 }
 0xcf8   :  { %26636 = vmatmul.mubr.msk.f32.gmra.mrb[26].mxu1 %vm704_vm1, %v32440_v59 }
 0xcf9   :  { %26638 = vmatprep.mubr.msk.f32.mxu1 %vm704_vm1, %v17226_v21 }
 0xcfc   :  { %26639 = vmatmul.mubr.msk.f32.gmra.mrb[28].mxu1 %vm704_vm1, %v17612_v37 }
 0xcfd   :  { %26641 = vmatprep.mubr.msk.f32.mxu1 %vm704_vm1, %v32214_v31 }
 0xd00   :  { %26642 = vmatmul.mubr.msk.f32.gmra.mrb[30].mxu1 %vm704_vm1, %v32220_v32 }
 0xd01   :  { %26644 = vmatprep.mubr.msk.f32.mxu1 %vm704_vm1, %v32222_v60 }
 0xd04   :  { %26645 = vmatmul.mubr.msk.f32.gmra.mrb[32].mxu1 %vm704_vm1, %v32228_v50 }
 0xd05   :  { %26647 = vmatprep.mubr.msk.f32.mxu1 %vm704_vm1, %v32385_v11 }
 0xd08   :  { %26648 = vmatmul.mubr.msk.f32.gmra.mrb[34].mxu1 %vm704_vm1, %v32458_v56 }
 0xd09   :  { %26650 = vmatprep.mubr.msk.f32.mxu1 %vm704_vm1, %v32528_v1 }
 0xd0c   :  { %26651 = vmatmul.mubr.msk.f32.gmra.mrb[36].mxu1 %vm704_vm1, %v32597_v2 }
 0xd0d   :  { %26653 = vmatprep.mubr.msk.f32.mxu1 %vm704_vm1, %v32599_v54 }
 0xd10   :  { %26654 = vmatmul.mubr.msk.f32.gmra.mrb[38].mxu1 %vm704_vm1, %v32605_v47 }
 0xd11   :  { %26656 = vmatprep.mubr.msk.f32.mxu1 %vm704_vm1, %v32607_v13 }
 0xd14   :  { %26657 = vmatmul.mubr.msk.f32.gmra.mrb[40].mxu1 %vm704_vm1, %v32613_v15 }
 0xd15   :  { %26659 = vmatprep.mubr.msk.f32.mxu1 %vm704_vm1, %v32035_v26  ;;  %v18015_v26 = vld [vmem:[#allocation2 + $0x420] sm:$0xff] }
 0xd18   :  { %26660 = vmatmul.mubr.msk.f32.gmra.mrb[42].mxu1 %vm704_vm1, %v32104_v27  ;;  %v32697_v27 = vld [vmem:[#allocation2 + $0x430] sm:$0xff] }
 0xd19   :  { %26662 = vmatprep.mubr.msk.f32.mxu1 %vm704_vm1, %v32173_v29  ;;  %v32704_v29 = vld [vmem:[#allocation2 + $0x440] sm:$0xff] }
 0xd1c   :  { %26663 = vmatmul.mubr.msk.f32.gmra.mrb[44].mxu1 %vm704_vm1, %v32254_v51  ;;  %v19151_v51 = vld [vmem:[#allocation2 + $0x328] sm:$0xff] }
 0xd1d   :  { %26665 = vmatprep.mubr.msk.f32.mxu1 %vm704_vm1, %v32333_v34 }
 0xd20   :  { %26666 = vmatmul.mubr.msk.f32.gmra.mrb[46].mxu1 %vm704_vm1, %v32339_v6 }
 0xd21   :  { %26668 = vmatprep.mubr.msk.f32.mxu1 %vm704_vm1, %v32341_v7 }
 0xd24   :  { %26669 = vmatmul.mubr.msk.f32.gmra.mrb[48].mxu1 %vm704_vm1, %v32347_v8 }
 0xd25   :  { %26671 = vmatprep.mubr.msk.f32.mxu1 %vm704_vm1, %v32419_v14 }
 0xd28   :  { %26672 = vmatmul.mubr.msk.f32.gmra.mrb[50].mxu1 %vm704_vm1, %v32492_v53 }
 0xd29   :  { %26674 = vmatprep.mubr.msk.f32.mxu1 %vm704_vm1, %v32562_v12 }
 0xd2c   :  { %26675 = vmatmul.mubr.msk.f32.gmra.mrb[52].mxu1 %vm704_vm1, %v32639_v17 }
 0xd2d   :  { %26679 = vmatprep.mubr.msk.f32.mxu1 %vm704_vm1, %v32277_v41  ;;  %v19551_v41 = vld [vmem:[#allocation2 + $0x3e0] sm:$0xff] }
 0xd30   :  { %26680 = vmatmul.mubr.msk.f32.vlgmr.msra.gmra.mrb[22].mxu1 %vm704_vm1, %v32283_v44 }
 0xd31   :  { %26728 = vmatpush3.msra.mxu1 %v28783_v25  ;;  %26682 = vmatprep.mubr.msk.f32.mxu1 %vm704_vm1, %v32285_v3 }
 0xd32   :  { %26777 = vmatprep.subr.mxu1 %v28784_v18 }
 0xd34   :  { %26683 = vmatmul.mubr.msk.f32.gmra.mrb[24].mxu1 %vm704_vm1, %v32291_v4 }
 0xd35   :  { %26685 = vmatprep.mubr.msk.f32.mxu1 %vm704_vm1, %v32214_v31 }
 0xd38   :  { %26686 = vmatmul.mubr.msk.f32.gmra.mrb[26].mxu1 %vm704_vm1, %v32220_v32 }
 0xd39   :  { %26688 = vmatprep.mubr.msk.f32.mxu1 %vm704_vm1, %v32222_v60 }
 0xd3c   :  { %26689 = vmatmul.mubr.msk.f32.gmra.mrb[28].mxu1 %vm704_vm1, %v32228_v50 }
 0xd3d   :  { %26691 = vmatprep.mubr.msk.f32.mxu1 %vm704_vm1, %v17999_v19 }
 0xd40   :  { %26692 = vmatmul.mubr.msk.f32.gmra.mrb[30].mxu1 %vm704_vm1, %v18000_v20 }
 0xd41   :  { %26694 = vmatprep.mubr.msk.f32.mxu1 %vm704_vm1, %v32663_v23 }
 0xd44   :  { %26695 = vmatmul.mubr.msk.f32.gmra.mrb[32].mxu1 %vm704_vm1, %v32668_v24 }
 0xd45   :  { %26697 = vmatprep.mubr.msk.f32.mxu1 %vm704_vm1, %v32599_v54 }
 0xd48   :  { %26698 = vmatmul.mubr.msk.f32.gmra.mrb[34].mxu1 %vm704_vm1, %v32605_v47 }
 0xd49   :  { %26700 = vmatprep.mubr.msk.f32.mxu1 %vm704_vm1, %v32607_v13 }
 0xd4c   :  { %26701 = vmatmul.mubr.msk.f32.gmra.mrb[36].mxu1 %vm704_vm1, %v32613_v15 }
 0xd4d   :  { %26703 = vmatprep.mubr.msk.f32.mxu1 %vm704_vm1, %v32317_v16  ;;  %v19566_v16 = vld [vmem:[#allocation2 + $0x478] sm:$0xff] }
 0xd50   :  { %26704 = vmatmul.mubr.msk.f32.gmra.mrb[38].mxu1 %vm704_vm1, %v32323_v45 }
 0xd51   :  { %26706 = vmatprep.mubr.msk.f32.mxu1 %vm704_vm1, %v32325_v52 }
 0xd54   :  { %26707 = vmatmul.mubr.msk.f32.gmra.mrb[40].mxu1 %vm704_vm1, %v32331_v39 }
 0xd55   :  { %26709 = vmatprep.mubr.msk.f32.mxu1 %vm704_vm1, %v32333_v34 }
 0xd58   :  { %26710 = vmatmul.mubr.msk.f32.gmra.mrb[42].mxu1 %vm704_vm1, %v32339_v6 }
 0xd59   :  { %26712 = vmatprep.mubr.msk.f32.mxu1 %vm704_vm1, %v32341_v7 }
 0xd5c   :  { %26713 = vmatmul.mubr.msk.f32.gmra.mrb[44].mxu1 %vm704_vm1, %v32347_v8 }
 0xd5d   :  { %26715 = vmatprep.mubr.msk.f32.mxu1 %vm704_vm1, %v18015_v26 }
 0xd60   :  { %26716 = vmatmul.mubr.msk.f32.gmra.mrb[46].mxu1 %vm704_vm1, %v18016_v22 }
 0xd61   :  { %26718 = vmatprep.mubr.msk.f32.mxu1 %vm704_vm1, %v32697_v27 }
 0xd64   :  { %26719 = vmatmul.mubr.msk.f32.gmra.mrb[48].mxu1 %vm704_vm1, %v32702_v28 }
 0xd65   :  { %26721 = vmatprep.mubr.msk.f32.mxu1 %vm704_vm1, %v32704_v29 }
 0xd68   :  { %26722 = vmatmul.mubr.msk.f32.gmra.mrb[50].mxu1 %vm704_vm1, %v32710_v30 }
 0xd69   :  { %26724 = vmatprep.mubr.msk.f32.mxu1 %vm704_vm1, %v32712_v48 }
 0xd6c   :  { %26725 = vmatmul.mubr.msk.f32.gmra.mrb[52].mxu1 %vm704_vm1, %v32718_v49 }
 0xd6d   :  { %26729 = vmatprep.mubr.msk.f32.mxu1 %vm704_vm1, %v32283_v44  ;;  %v19552_v44 = vld [vmem:[#allocation2 + $0x3e8] sm:$0xff] }
 0xd70   :  { %26730 = vmatmul.mubr.msk.f32.vlgmr.msra.gmra.mrb[22].mxu1 %vm704_vm1, %v32285_v3 }
 0xd71   :  { %26778 = vmatpush3.msra.mxu1 %v28784_v18  ;;  %26732 = vmatprep.mubr.msk.f32.mxu1 %vm704_vm1, %v32291_v4 }
 0xd72   :  { %26827 = vmatprep.subr.mxu1 %v28785_v33 }
 0xd74   :  { %26733 = vmatmul.mubr.msk.f32.gmra.mrb[24].mxu1 %vm704_vm1, %v32214_v31 }
 0xd75   :  { %26735 = vmatprep.mubr.msk.f32.mxu1 %vm704_vm1, %v32220_v32 }
 0xd78   :  { %26736 = vmatmul.mubr.msk.f32.gmra.mrb[26].mxu1 %vm704_vm1, %v32222_v60 }
 0xd79   :  { %26738 = vmatprep.mubr.msk.f32.mxu1 %vm704_vm1, %v32228_v50 }
 0xd7c   :  { %26739 = vmatmul.mubr.msk.f32.gmra.mrb[28].mxu1 %vm704_vm1, %v32385_v11 }
 0xd7d   :  { %26741 = vmatprep.mubr.msk.f32.mxu1 %vm704_vm1, %v18000_v20 }
 0xd80   :  { %26742 = vmatmul.mubr.msk.f32.gmra.mrb[30].mxu1 %vm704_vm1, %v32663_v23 }
 0xd81   :  { %26744 = vmatprep.mubr.msk.f32.mxu1 %vm704_vm1, %v32668_v24 }
 0xd84   :  { %26745 = vmatmul.mubr.msk.f32.gmra.mrb[32].mxu1 %vm704_vm1, %v32599_v54 }
 0xd85   :  { %26747 = vmatprep.mubr.msk.f32.mxu1 %vm704_vm1, %v32605_v47 }
 0xd88   :  { %26748 = vmatmul.mubr.msk.f32.gmra.mrb[34].mxu1 %vm704_vm1, %v32607_v13 }
 0xd89   :  { %26750 = vmatprep.mubr.msk.f32.mxu1 %vm704_vm1, %v32613_v15 }
 0xd8c   :  { %26751 = vmatmul.mubr.msk.f32.gmra.mrb[36].mxu1 %vm704_vm1, %v32754_v43 }
 0xd8d   :  { %26753 = vmatprep.mubr.msk.f32.mxu1 %vm704_vm1, %v32323_v45  ;;  %v20633_v45 = vld [vmem:[%s33225_s7] sm:$0xff] }
 0xd90   :  { %26754 = vmatmul.mubr.msk.f32.gmra.mrb[38].mxu1 %vm704_vm1, %v32325_v52 }
 0xd91   :  { %26756 = vmatprep.mubr.msk.f32.mxu1 %vm704_vm1, %v32331_v39 }
 0xd94   :  { %26757 = vmatmul.mubr.msk.f32.gmra.mrb[40].mxu1 %vm704_vm1, %v32333_v34 }
 0xd95   :  { %26759 = vmatprep.mubr.msk.f32.mxu1 %vm704_vm1, %v32339_v6 }
 0xd98   :  { %26760 = vmatmul.mubr.msk.f32.gmra.mrb[42].mxu1 %vm704_vm1, %v32341_v7 }
 0xd99   :  { %26762 = vmatprep.mubr.msk.f32.mxu1 %vm704_vm1, %v32347_v8 }
 0xd9c   :  { %26763 = vmatmul.mubr.msk.f32.gmra.mrb[44].mxu1 %vm704_vm1, %v32419_v14 }
 0xd9d   :  { %26765 = vmatprep.mubr.msk.f32.mxu1 %vm704_vm1, %v18016_v22 }
 0xda0   :  { %26766 = vmatmul.mubr.msk.f32.gmra.mrb[46].mxu1 %vm704_vm1, %v32697_v27 }
 0xda1   :  { %26768 = vmatprep.mubr.msk.f32.mxu1 %vm704_vm1, %v32702_v28 }
 0xda4   :  { %26769 = vmatmul.mubr.msk.f32.gmra.mrb[48].mxu1 %vm704_vm1, %v32704_v29 }
 0xda5   :  { %26771 = vmatprep.mubr.msk.f32.mxu1 %vm704_vm1, %v32710_v30 }
 0xda8   :  { %26772 = vmatmul.mubr.msk.f32.gmra.mrb[50].mxu1 %vm704_vm1, %v32712_v48 }
 0xda9   :  { %26774 = vmatprep.mubr.msk.f32.mxu1 %vm704_vm1, %v32718_v49 }
 0xdac   :  { %26775 = vmatmul.mubr.msk.f32.gmra.mrb[52].mxu1 %vm704_vm1, %v32787_v46 }
 0xdad   :  { %26779 = vmatprep.mubr.msk.f32.mxu1 %vm704_vm1, %v32285_v3  ;;  %v19553_v3 = vld [vmem:[#allocation2 + $0x3f0] sm:$0xff] }
 0xdb0   :  { %26780 = vmatmul.mubr.msk.f32.vlgmr.msra.gmra.mrb[22].mxu1 %vm704_vm1, %v32291_v4 }
 0xdb1   :  { %26828 = vmatpush3.msra.mxu1 %v28785_v33  ;;  %26782 = vmatprep.mubr.msk.f32.mxu1 %vm704_vm1, %v32214_v31  ;;  %v22533_v31 = vld [vmem:[%s33223_s5 + $0x80] sm:$0xff] }
 0xdb2   :  { %26877 = vmatprep.subr.mxu1 %v28786_v40 }
 0xdb4   :  { %26783 = vmatmul.mubr.msk.f32.gmra.mrb[24].mxu1 %vm704_vm1, %v32220_v32  ;;  %v22534_v32 = vld [vmem:[%s33223_s5 + $0x88] sm:$0xff] }
 0xdb5   :  { %26785 = vmatprep.mubr.msk.f32.mxu1 %vm704_vm1, %v32222_v60  ;;  %v19150_v60 = vld [vmem:[#allocation2 + $0x320] sm:$0xff] }
 0xdb8   :  { %26786 = vmatmul.mubr.msk.f32.gmra.mrb[26].mxu1 %vm704_vm1, %v32228_v50  ;;  %v27078_v50 = vpack.c.bf16 %v22534_v32, %v22533_v31 }
 0xdb9   :  { %26788 = vmatprep.mubr.msk.f32.mxu1 %vm704_vm1, %v32385_v11 }
 0xdba   :  { %27079 = vmatpush3.bf16.msra.mxu0 %v27078_v50 }
 0xdbb   :  { %27080 = vmatprep.subr.bf16.mxu0 %v33238_v55 }
 0xdbc   :  { %26789 = vmatmul.mubr.msk.f32.gmra.mrb[28].mxu1 %vm704_vm1, %v32458_v56 }
 0xdbd   :  { %26791 = vmatprep.mubr.msk.f32.mxu1 %vm704_vm1, %v32663_v23 }
 0xdc0   :  { %26792 = vmatmul.mubr.msk.f32.gmra.mrb[30].mxu1 %vm704_vm1, %v32668_v24 }
 0xdc1   :  { %26794 = vmatprep.mubr.msk.f32.mxu1 %vm704_vm1, %v32599_v54 }
 0xdc4   :  { %26795 = vmatmul.mubr.msk.f32.gmra.mrb[32].mxu1 %vm704_vm1, %v32605_v47 }
 0xdc5   :  { %26797 = vmatprep.mubr.msk.f32.mxu1 %vm704_vm1, %v32607_v13 }
 0xdc8   :  { %26798 = vmatmul.mubr.msk.f32.gmra.mrb[34].mxu1 %vm704_vm1, %v32613_v15 }
 0xdc9   :  { %26800 = vmatprep.mubr.msk.f32.mxu1 %vm704_vm1, %v32754_v43 }
 0xdcc   :  { %26801 = vmatmul.mubr.msk.f32.gmra.mrb[36].mxu1 %vm704_vm1, %v32824_v36 }
 0xdcd   :  { %26803 = vmatprep.mubr.msk.f32.mxu1 %vm704_vm1, %v32325_v52  ;;  %v20634_v52 = vld [vmem:[%s33225_s7 + $0x8] sm:$0xff] }
 0xdd0   :  { %26804 = vmatmul.mubr.msk.f32.gmra.mrb[38].mxu1 %vm704_vm1, %v32331_v39 }
 0xdd1   :  { %26806 = vmatprep.mubr.msk.f32.mxu1 %vm704_vm1, %v32333_v34 }
 0xdd4   :  { %26807 = vmatmul.mubr.msk.f32.gmra.mrb[40].mxu1 %vm704_vm1, %v32339_v6 }
 0xdd5   :  { %26809 = vmatprep.mubr.msk.f32.mxu1 %vm704_vm1, %v32341_v7 }
 0xdd8   :  { %26810 = vmatmul.mubr.msk.f32.gmra.mrb[42].mxu1 %vm704_vm1, %v32347_v8 }
 0xdd9   :  { %26812 = vmatprep.mubr.msk.f32.mxu1 %vm704_vm1, %v32419_v14 }
 0xddc   :  { %26813 = vmatmul.mubr.msk.f32.gmra.mrb[44].mxu1 %vm704_vm1, %v32492_v53 }
 0xddd   :  { %26815 = vmatprep.mubr.msk.f32.mxu1 %vm704_vm1, %v32697_v27 }
 0xde0   :  { %26816 = vmatmul.mubr.msk.f32.gmra.mrb[46].mxu1 %vm704_vm1, %v32702_v28 }
 0xde1   :  { %26818 = vmatprep.mubr.msk.f32.mxu1 %vm704_vm1, %v32704_v29 }
 0xde4   :  { %26819 = vmatmul.mubr.msk.f32.gmra.mrb[48].mxu1 %vm704_vm1, %v32710_v30 }
 0xde5   :  { %26821 = vmatprep.mubr.msk.f32.mxu1 %vm704_vm1, %v32712_v48 }
 0xde8   :  { %26822 = vmatmul.mubr.msk.f32.gmra.mrb[50].mxu1 %vm704_vm1, %v32718_v49 }
 0xde9   :  { %26824 = vmatprep.mubr.msk.f32.mxu1 %vm704_vm1, %v32787_v46 }
 0xdec   :  { %26825 = vmatmul.mubr.msk.f32.gmra.mrb[52].mxu1 %vm704_vm1, %v32858_v35 }
 0xded   :  { %26829 = vmatprep.mubr.msk.f32.mxu1 %vm704_vm1, %v32291_v4  ;;  %v19554_v4 = vld [vmem:[#allocation2 + $0x3f8] sm:$0xff] }
 0xdf0   :  { %26830 = vmatmul.mubr.msk.f32.vlgmr.msra.gmra.mrb[22].mxu1 %vm704_vm1, %v19150_v60 }
 0xdf1   :  { %26878 = vmatpush3.msra.mxu1 %v28786_v40  ;;  %26832 = vmatprep.mubr.msk.f32.mxu1 %vm704_vm1, %v19151_v51  ;;  %v22537_v40 = vld [vmem:[%s33223_s5 + $0x98] sm:$0xff] }
 0xdf2   :  { %27101 = vmatprep.subr.bf16.mxu1 %v33238_v55 }
 0xdf4   :  { %26833 = vmatmul.mubr.msk.f32.gmra.mrb[24].mxu1 %vm704_vm1, %v19152_v61 }
 0xdf5   :  { %26835 = vmatprep.mubr.msk.f32.mxu1 %vm704_vm1, %v19153_v63 }
 0xdf8   :  { %26836 = vmatmul.mubr.msk.f32.gmra.mrb[26].mxu1 %vm704_vm1, %v32385_v11 }
 0xdf9   :  { %26838 = vmatprep.mubr.msk.f32.mxu1 %vm704_vm1, %v32458_v56 }
 0xdfc   :  { %26839 = vmatmul.mubr.msk.f32.gmra.mrb[28].mxu1 %vm704_vm1, %v32528_v1 }
 0xdfd   :  { %26841 = vmatprep.mubr.msk.f32.mxu1 %vm704_vm1, %v32668_v24 }
 0xe00   :  { %26842 = vmatmul.mubr.msk.f32.gmra.mrb[30].mxu1 %vm704_vm1, %v32599_v54 }
 0xe01   :  { %26844 = vmatprep.mubr.msk.f32.mxu1 %vm704_vm1, %v32605_v47 }
 0xe04   :  { %26845 = vmatmul.mubr.msk.f32.gmra.mrb[32].mxu1 %vm704_vm1, %v32607_v13 }
 0xe05   :  { %26847 = vmatprep.mubr.msk.f32.mxu1 %vm704_vm1, %v32613_v15 }
 0xe08   :  { %26848 = vmatmul.mubr.msk.f32.gmra.mrb[34].mxu1 %vm704_vm1, %v32754_v43 }
 0xe09   :  { %26850 = vmatprep.mubr.msk.f32.mxu1 %vm704_vm1, %v32824_v36 }
 0xe0c   :  { %26851 = vmatmul.mubr.msk.f32.gmra.mrb[36].mxu1 %vm704_vm1, %v19164_v62 }
 0xe0d   :  { %26853 = vmatprep.mubr.msk.f32.mxu1 %vm704_vm1, %v32331_v39  ;;  %v20635_v39 = vld [vmem:[%s33225_s7 + $0x10] sm:$0xff] }
 0xe10   :  { %26854 = vmatmul.mubr.msk.f32.gmra.mrb[38].mxu1 %vm704_vm1, %v32333_v34  ;;  %v27102_v34 = vpack.c.bf16 %v20634_v52, %v20633_v45 }
 0xe11   :  { %26856 = vmatprep.mubr.msk.f32.mxu1 %vm704_vm1, %v32339_v6  ;;  %v20636_v6 = vld [vmem:[%s33225_s7 + $0x18] sm:$0xff] }
 0xe14   :  { %26857 = vmatmul.mubr.msk.f32.gmra.mrb[40].mxu1 %vm704_vm1, %v32341_v7  ;;  %v27105_v7 = vpack.c.bf16 %v20636_v6, %v20635_v39  ;;  %v22543_v6 = vld [vmem:[%s33223_s5 + $0xb8] sm:$0xff] }
 0xe15   :  { %26859 = vmatprep.mubr.msk.f32.mxu1 %vm704_vm1, %v32347_v8 }
 0xe18   :  { %26860 = vmatmul.mubr.msk.f32.gmra.mrb[42].mxu1 %vm704_vm1, %v32419_v14 }
 0xe19   :  { %26862 = vmatprep.mubr.msk.f32.mxu1 %vm704_vm1, %v32492_v53 }
 0xe1c   :  { %26863 = vmatmul.mubr.msk.f32.gmra.mrb[44].mxu1 %vm704_vm1, %v32562_v12 }
 0xe1d   :  { %26865 = vmatprep.mubr.msk.f32.mxu1 %vm704_vm1, %v32702_v28 }
 0xe20   :  { %26866 = vmatmul.mubr.msk.f32.gmra.mrb[46].mxu1 %vm704_vm1, %v32704_v29 }
 0xe21   :  { %26868 = vmatprep.mubr.msk.f32.mxu1 %vm704_vm1, %v32710_v30 }
 0xe24   :  { %26869 = vmatmul.mubr.msk.f32.gmra.mrb[48].mxu1 %vm704_vm1, %v32712_v48 }
 0xe25   :  { %26871 = vmatprep.mubr.msk.f32.mxu1 %vm704_vm1, %v32718_v49 }
 0xe28   :  { %26872 = vmatmul.mubr.msk.f32.gmra.mrb[50].mxu1 %vm704_vm1, %v32787_v46 }
 0xe29   :  { %26874 = vmatprep.mubr.msk.f32.mxu1 %vm704_vm1, %v32858_v35 }
 0xe2c   :  { %26875 = vmatmul.mubr.msk.f32.gmra.mrb[52].mxu1 %vm704_vm1, %v19180_v57 }
 0xe2d   :  { %26879 = vmatprep.mubr.msk.f32.mxu1 %vm704_vm1, %v19150_v60 }
 0xe30   :  { %26880 = vmatmul.mubr.msk.f32.vlgmr.msra.gmra.mrb[22].mxu1 %vm704_vm1, %v19151_v51 }
 0xe31   :  { %26882 = vmatprep.mubr.msk.f32.mxu1 %vm704_vm1, %v19152_v61  ;;  %27103 = vmatpush3.bf16.msra.mxu1 %v27102_v34  ;;  %v22542_v34 = vld [vmem:[%s33223_s5 + $0xb0] sm:$0xff] }
 0xe32   :  { %27104 = vmatprep.subr.bf16.mxu1 %v33238_v55 }
 0xe34   :  { %26883 = vmatmul.mubr.msk.f32.gmra.mrb[24].mxu1 %vm704_vm1, %v19153_v63 }
 0xe35   :  { %26885 = vmatprep.mubr.msk.f32.mxu1 %vm704_vm1, %v32385_v11  ;;  %27106 = vmatpush3.bf16.msra.mxu1 %v27105_v7 }
 0xe36   :  { %27107 = vmatprep.subr.bf16.mxu1 %v33238_v55 }
 0xe38   :  { %26886 = vmatmul.mubr.msk.f32.gmra.mrb[26].mxu1 %vm704_vm1, %v32458_v56 }
 0xe39   :  { %26888 = vmatprep.mubr.msk.f32.mxu1 %vm704_vm1, %v32528_v1 }
 0xe3c   :  { %26889 = vmatmul.mubr.msk.f32.gmra.mrb[28].mxu1 %vm704_vm1, %v32597_v2 }
 0xe3d   :  { %26891 = vmatprep.mubr.msk.f32.mxu1 %vm704_vm1, %v32599_v54 }
 0xe40   :  { %26892 = vmatmul.mubr.msk.f32.gmra.mrb[30].mxu1 %vm704_vm1, %v32605_v47 }
 0xe41   :  { %26894 = vmatprep.mubr.msk.f32.mxu1 %vm704_vm1, %v32607_v13 }
 0xe44   :  { %26895 = vmatmul.mubr.msk.f32.gmra.mrb[32].mxu1 %vm704_vm1, %v32613_v15 }
 0xe45   :  { %26897 = vmatprep.mubr.msk.f32.mxu1 %vm704_vm1, %v32754_v43 }
 0xe48   :  { %26898 = vmatmul.mubr.msk.f32.gmra.mrb[34].mxu1 %vm704_vm1, %v32824_v36 }
 0xe49   :  { %26900 = vmatprep.mubr.msk.f32.mxu1 %vm704_vm1, %v19164_v62  ;;  %v22539_v62 = vld [vmem:[%s33223_s5 + $0xa0] sm:$0xff] }
 0xe4c   :  { %26901 = vmatmul.mubr.msk.f32.gmra.mrb[36].mxu1 %vm704_vm1, %v19550_v5 }
 0xe4d   :  { %26903 = vmatprep.mubr.msk.f32.mxu1 %vm704_vm1, %v19551_v41 }
 0xe50   :  { %26904 = vmatmul.mubr.msk.f32.gmra.mrb[38].mxu1 %vm704_vm1, %v19552_v44 }
 0xe51   :  { %26906 = vmatprep.mubr.msk.f32.mxu1 %vm704_vm1, %v19553_v3 }
 0xe54   :  { %26907 = vmatmul.mubr.msk.f32.gmra.mrb[40].mxu1 %vm704_vm1, %v19554_v4 }
 0xe55   :  { %26909 = vmatprep.mubr.msk.f32.mxu1 %vm704_vm1, %v32419_v14 }
 0xe58   :  { %26910 = vmatmul.mubr.msk.f32.gmra.mrb[42].mxu1 %vm704_vm1, %v32492_v53 }
 0xe59   :  { %26912 = vmatprep.mubr.msk.f32.mxu1 %vm704_vm1, %v32562_v12 }
 0xe5c   :  { %26913 = vmatmul.mubr.msk.f32.gmra.mrb[44].mxu1 %vm704_vm1, %v32639_v17 }
 0xe5d   :  { %26915 = vmatprep.mubr.msk.f32.mxu1 %vm704_vm1, %v32704_v29 }
 0xe60   :  { %26916 = vmatmul.mubr.msk.f32.gmra.mrb[46].mxu1 %vm704_vm1, %v32710_v30 }
 0xe61   :  { %26918 = vmatprep.mubr.msk.f32.mxu1 %vm704_vm1, %v32712_v48 }
 0xe64   :  { %26919 = vmatmul.mubr.msk.f32.gmra.mrb[48].mxu1 %vm704_vm1, %v32718_v49 }
 0xe65   :  { %26921 = vmatprep.mubr.msk.f32.mxu1 %vm704_vm1, %v32787_v46  ;;  %v22536_v46 = vld [vmem:[%s33223_s5 + $0x90] sm:$0xff] }
 0xe66   :  { %v27081_v50 = vpack.c.bf16 %v22537_v40, %v22536_v46 }
 0xe68   :  { %26922 = vmatmul.mubr.msk.f32.gmra.mrb[50].mxu1 %vm704_vm1, %v32858_v35 }
 0xe69   :  { %26924 = vmatprep.mubr.msk.f32.mxu1 %vm704_vm1, %v19180_v57  ;;  %v22540_v57 = vld [vmem:[%s33223_s5 + $0xa8] sm:$0xff] }
 0xe6c   :  { %26925 = vmatmul.mubr.msk.f32.gmra.mrb[52].mxu1 %vm704_vm1, %v19566_v16  ;;  %v27084_v16 = vpack.c.bf16 %v22540_v57, %v22539_v62  ;;  %v22548_v57 = vld [vmem:[%s33223_s5 + $0xd0] sm:$0xff] }
 0xe6d   :  { %27015 = vmatprep.mubr.msk.f32.mxu1 %vm28797_vm2, %v33239_v58 }
 0xf03   :  { %v26881_v8 = vpop.f32.mrb[22].mxu1 }
 0xf04   :  { %v19921_v10 = vadd.f32 %v32999_v9, %v26881_v8  ;;  %v19729_v11 = vpop.f32.mrb[23].mxu1 }
 0xf05   :  { %v19920_v14 = vadd.f32 %v32999_v9, %v19729_v11 }
 0xf06   :  { %v19953_v42 = vmax.f32 %v19921_v10, 0.0 }
 0xf07   :  { %v19952_v59 = vmax.f32 %v19920_v14, 0.0  ;;  %v26884_v56 = vpop.f32.mrb[24].mxu1 }
 0xf08   :  { %v19923_v53 = vadd.f32 %v32999_v9, %v26884_v56  ;;  %v19739_v38 = vpop.f32.mrb[25].mxu1 }
 0xf09   :  { %v19984_v21 = vmax.f32 %v19952_v59, %v19953_v42  ;;  %v19922_v1 = vadd.f32 %v32999_v9, %v19739_v38  ;;  %v27087_v42 = vpack.c.bf16 %v22543_v6, %v22542_v34  ;;  %v22545_v38 = vld [vmem:[%s33223_s5 + $0xc0] sm:$0xff] }
 0xf0a   :  { %v19955_v12 = vmax.f32 %v19923_v53, 0.0  ;;  %v22551_v6 = vld [vmem:[%s33223_s5 + $0xe0] sm:$0xff] }
 0xf0b   :  { %v19954_v25 = vmax.f32 %v19922_v1, 0.0  ;;  %v26887_v37 = vpop.f32.mrb[26].mxu1 }
 0xf0c   :  { %v19925_v2 = vadd.f32 %v32999_v9, %v26887_v37  ;;  %v19749_v54 = vpop.f32.mrb[27].mxu1 }
 0xf0d   :  { %v19985_v47 = vmax.f32 %v19954_v25, %v19955_v12  ;;  %v19924_v13 = vadd.f32 %v32999_v9, %v19749_v54 }
 0xf0e   :  { %v19957_v15 = vmax.f32 %v19925_v2, 0.0 }
 0xf0f   :  { %v19956_v17 = vmax.f32 %v19924_v13, 0.0  ;;  %v26890_v18 = vpop.f32.mrb[28].mxu1 }
 0xf10   :  { %v19927_v19 = vadd.f32 %v32999_v9, %v26890_v18  ;;  %v19759_v20 = vpop.f32.mrb[29].mxu1 }
 0xf11   :  { %v19986_v23 = vmax.f32 %v19956_v17, %v19957_v15  ;;  %v19926_v24 = vadd.f32 %v32999_v9, %v19759_v20 }
 0xf12   :  { %v19959_v26 = vmax.f32 %v19927_v19, 0.0 }
 0xf13   :  { %v19958_v22 = vmax.f32 %v19926_v24, 0.0  ;;  %v26893_v27 = vpop.f32.mrb[30].mxu1 }
 0xf14   :  { %v19929_v28 = vadd.f32 %v32999_v9, %v26893_v27  ;;  %v19769_v29 = vpop.f32.mrb[31].mxu1 }
 0xf15   :  { %v33010_v30 = vmax.f32 %v19958_v22, %v19959_v26  ;;  %v19928_v48 = vadd.f32 %v32999_v9, %v19769_v29 }
 0xf16   :  { %v19961_v49 = vmax.f32 %v19929_v28, 0.0 }
 0xf17   :  { %v19960_v33 = vmax.f32 %v19928_v48, 0.0  ;;  %v26896_v43 = vpop.f32.mrb[32].mxu1 }
 0xf18   :  { %v19931_v36 = vadd.f32 %v32999_v9, %v26896_v43  ;;  %v19779_v35 = vpop.f32.mrb[33].mxu1 }
 0xf19   :  { %v19992_v31 = vmax.f32 %v19960_v33, %v19961_v49  ;;  %v19930_v32 = vadd.f32 %v32999_v9, %v19779_v35 }
 0xf1a   :  { %v19963_v60 = vmax.f32 %v19931_v36, 0.0 }
 0xf1b   :  { %v20000_v51 = vmax.f32 %v19984_v21, %v19992_v31  ;;  %v19962_v61 = vmax.f32 %v19930_v32, 0.0  ;;  %v26899_v63 = vpop.f32.mrb[34].mxu1  ;;  %v22546_v21 = vld [vmem:[%s33223_s5 + $0xc8] sm:$0xff] }
 0xf1c   :  { %v19933_v5 = vadd.f32 %v32999_v9, %v26899_v63  ;;  %v19789_v41 = vpop.f32.mrb[35].mxu1  ;;  %v27090_v54 = vpack.c.bf16 %v22546_v21, %v22545_v38  ;;  %v22554_v21 = vld [vmem:[%s33223_s5 + $0xf0] sm:$0xff] }
 0xf1d   :  { %v19993_v44 = vmax.f32 %v19962_v61, %v19963_v60  ;;  %v19932_v3 = vadd.f32 %v32999_v9, %v19789_v41  ;;  %26932 = vmatmul.mubr.msk.f32.vlgmr.msra.gmra.mrb[32].mxu0 %vm10370_vm3, %v20000_v51 }
 0xf1e   :  { %v19965_v4 = vmax.f32 %v19933_v5, 0.0  ;;  %27082 = vmatpush3.bf16.msra.mxu0 %v27081_v50  ;;  %26938 = vmatprep.mubr.msk.f32.mxu0 %vm28797_vm2, %v33239_v58  ;;  %v22549_v5 = vld [vmem:[%s33223_s5 + $0xd8] sm:$0xff] }
 0xf1f   :  { %v20001_v45 = vmax.f32 %v19985_v47, %v19993_v44  ;;  %v19964_v52 = vmax.f32 %v19932_v3, 0.0  ;;  %v26902_v39 = vpop.f32.mrb[36].mxu1  ;;  %27083 = vmatprep.subr.bf16.mxu0 %v33238_v55 }
 0xf20   :  { %v19935_v7 = vadd.f32 %v32999_v9, %v26902_v39  ;;  %v19799_v8 = vpop.f32.mrb[37].mxu1 }
 0xf21   :  { %v19994_v10 = vmax.f32 %v19964_v52, %v19965_v4  ;;  %v19934_v11 = vadd.f32 %v32999_v9, %v19799_v8  ;;  %26939 = vmatmul.mubr.msk.f32.vlgmr.msra.gmra.mrb[34].mxu0 %vm10370_vm3, %v20001_v45  ;;  %v27093_v45 = vpack.c.bf16 %v22549_v5, %v22548_v57  ;;  %v20733_v57 = vld [vmem:[%s33227_s9 + $0x38] sm:$0xff] }
 0xf22   :  { %v19967_v14 = vmax.f32 %v19935_v7, 0.0  ;;  %27085 = vmatpush3.bf16.msra.mxu0 %v27084_v16  ;;  %26945 = vmatprep.mubr.msk.f32.mxu0 %vm28797_vm2, %v33239_v58  ;;  %v22552_v7 = vld [vmem:[%s33223_s5 + $0xe8] sm:$0xff] }
 0xf23   :  { %v20002_v59 = vmax.f32 %v19986_v23, %v19994_v10  ;;  %v19966_v56 = vmax.f32 %v19934_v11, 0.0  ;;  %v26905_v53 = vpop.f32.mrb[38].mxu1  ;;  %27086 = vmatprep.subr.bf16.mxu0 %v33238_v55 }
 0xf24   :  { %v19937_v1 = vadd.f32 %v32999_v9, %v26905_v53  ;;  %v19809_v12 = vpop.f32.mrb[39].mxu1 }
 0xf25   :  { %v19995_v25 = vmax.f32 %v19966_v56, %v19967_v14  ;;  %v19936_v37 = vadd.f32 %v32999_v9, %v19809_v12  ;;  %26946 = vmatmul.mubr.msk.f32.vlgmr.msra.gmra.mrb[36].mxu0 %vm10370_vm3, %v20002_v59  ;;  %v27096_v59 = vpack.c.bf16 %v22552_v7, %v22551_v6 }
 0xf26   :  { %v19969_v2 = vmax.f32 %v19937_v1, 0.0  ;;  %27088 = vmatpush3.bf16.msra.mxu0 %v27087_v42  ;;  %26952 = vmatprep.mubr.msk.f32.mxu0 %vm28797_vm2, %v33239_v58  ;;  %v22555_v1 = vld [vmem:[%s33223_s5 + $0xf8] sm:$0xff] }
 0xf27   :  { %v20003_v47 = vmax.f32 %v33010_v30, %v19995_v25  ;;  %v19968_v13 = vmax.f32 %v19936_v37, 0.0  ;;  %v26908_v15 = vpop.f32.mrb[40].mxu1  ;;  %27089 = vmatprep.subr.bf16.mxu0 %v33238_v55 }
 0xf28   :  { %v19939_v17 = vadd.f32 %v32999_v9, %v26908_v15  ;;  %v19819_v18 = vpop.f32.mrb[41].mxu1 }
 0xf29   :  { %v19988_v19 = vmax.f32 %v19968_v13, %v19969_v2  ;;  %v19938_v20 = vadd.f32 %v32999_v9, %v19819_v18  ;;  %26953 = vmatmul.mubr.msk.f32.vlgmr.msra.gmra.mrb[38].mxu0 %vm10370_vm3, %v20003_v47  ;;  %v27099_v47 = vpack.c.bf16 %v22555_v1, %v22554_v21  ;;  %v20637_v18 = vld [vmem:[%s33225_s7 + $0x20] sm:$0xff] }
 0xf2a   :  { %v19971_v23 = vmax.f32 %v19939_v17, 0.0  ;;  %27091 = vmatpush3.bf16.msra.mxu0 %v27090_v54  ;;  %26959 = vmatprep.mubr.msk.f32.mxu0 %vm28797_vm2, %v33239_v58 }
 0xf2b   :  { %v19970_v24 = vmax.f32 %v19938_v20, 0.0  ;;  %v26911_v26 = vpop.f32.mrb[42].mxu1  ;;  %27092 = vmatprep.subr.bf16.mxu0 %v33238_v55 }
 0xf2c   :  { %v19941_v22 = vadd.f32 %v32999_v9, %v26911_v26  ;;  %v19829_v27 = vpop.f32.mrb[43].mxu1 }
 0xf2d   :  { %v19989_v28 = vmax.f32 %v19970_v24, %v19971_v23  ;;  %v19940_v29 = vadd.f32 %v32999_v9, %v19829_v27  ;;  %v20639_v23 = vld [vmem:[%s33225_s7 + $0x30] sm:$0xff]  ;;  %v20641_v24 = vld [vmem:[%s33225_s7 + $0x40] sm:$0xff] }
 0xf2e   :  { %v19973_v30 = vmax.f32 %v19941_v22, 0.0  ;;  %v20642_v22 = vld [vmem:[%s33225_s7 + $0x48] sm:$0xff] }
 0xf2f   :  { %v19972_v48 = vmax.f32 %v19940_v29, 0.0  ;;  %v26914_v49 = vpop.f32.mrb[44].mxu1  ;;  %v27114_v27 = vpack.c.bf16 %v20642_v22, %v20641_v24  ;;  %v20644_v29 = vld [vmem:[%s33225_s7 + $0x58] sm:$0xff]  ;;  %v22558_v24 = vld [vmem:[%s33226_s8] ss:$0 sm:$0xff] }
 0xf30   :  { %v19943_v33 = vadd.f32 %v32999_v9, %v26914_v49  ;;  %v19839_v43 = vpop.f32.mrb[45].mxu1  ;;  %v20646_v49 = vld [vmem:[%s33225_s7 + $0x68] sm:$0xff] }
 0xf31   :  { %v19990_v46 = vmax.f32 %v19972_v48, %v19973_v30  ;;  %v19942_v40 = vadd.f32 %v32999_v9, %v19839_v43  ;;  %v20645_v48 = vld [vmem:[%s33225_s7 + $0x60] sm:$0xff]  ;;  %v20647_v43 = vld [vmem:[%s33225_s7 + $0x70] sm:$0xff] }
 0xf32   :  { %v19975_v36 = vmax.f32 %v19943_v33, 0.0  ;;  %v27120_v33 = vpack.c.bf16 %v20646_v49, %v20645_v48 }
 0xf33   :  { %v19974_v35 = vmax.f32 %v19942_v40, 0.0  ;;  %v26917_v31 = vpop.f32.mrb[46].mxu1 }
 0xf34   :  { %v19945_v32 = vadd.f32 %v32999_v9, %v26917_v31  ;;  %v19849_v60 = vpop.f32.mrb[47].mxu1  ;;  %v20728_v31 = vld [vmem:[%s33227_s9 + $0x10] sm:$0xff] }
 0xf35   :  { %v19991_v50 = vmax.f32 %v19974_v35, %v19975_v36  ;;  %v19944_v51 = vadd.f32 %v32999_v9, %v19849_v60  ;;  %v20726_v36 = vld [vmem:[%s33227_s9] sm:$0xff]  ;;  %v20727_v35 = vld [vmem:[%s33227_s9 + $0x8] sm:$0xff]  ;;  %v20729_v60 = vld [vmem:[%s33227_s9 + $0x18] sm:$0xff] }
 0xf36   :  { %v19977_v61 = vmax.f32 %v19945_v32, 0.0  ;;  %v27126_v32 = vpack.c.bf16 %v20727_v35, %v20726_v36 }
 0xf37   :  { %v19976_v63 = vmax.f32 %v19944_v51, 0.0  ;;  %v26920_v62 = vpop.f32.mrb[48].mxu1  ;;  %v20730_v51 = vld [vmem:[%s33227_s9 + $0x20] sm:$0xff] }
 0xf38   :  { %v19947_v41 = vadd.f32 %v32999_v9, %v26920_v62  ;;  %v19859_v44 = vpop.f32.mrb[49].mxu1  ;;  %v20732_v62 = vld [vmem:[%s33227_s9 + $0x30] sm:$0xff] }
 0xf39   :  { %v19996_v3 = vmax.f32 %v19976_v63, %v19977_v61  ;;  %v19946_v4 = vadd.f32 %v32999_v9, %v19859_v44  ;;  %v20731_v61 = vld [vmem:[%s33227_s9 + $0x28] sm:$0xff]  ;;  %v27135_v5 = vpack.c.bf16 %v20733_v57, %v20732_v62 }
 0xf3a   :  { %v19979_v16 = vmax.f32 %v19947_v41, 0.0  ;;  %v27132_v63 = vpack.c.bf16 %v20731_v61, %v20730_v51  ;;  %v20734_v41 = vld [vmem:[%s33227_s9 + $0x40] sm:$0xff]  ;;  %v20735_v44 = vld [vmem:[%s33227_s9 + $0x48] sm:$0xff] }
 0xf3b   :  { %v20004_v52 = vmax.f32 %v19988_v19, %v19996_v3  ;;  %v19978_v39 = vmax.f32 %v19946_v4, 0.0  ;;  %v26923_v34 = vpop.f32.mrb[50].mxu1  ;;  %v20638_v19 = vld [vmem:[%s33225_s7 + $0x28] sm:$0xff]  ;;  %v27138_v3 = vpack.c.bf16 %v20735_v44, %v20734_v41  ;;  %v20736_v4 = vld [vmem:[%s33227_s9 + $0x50] sm:$0xff] }
 0xf3c   :  { %v19949_v8 = vadd.f32 %v32999_v9, %v26923_v34  ;;  %v19869_v10 = vpop.f32.mrb[51].mxu1  ;;  %v27108_v20 = vpack.c.bf16 %v20638_v19, %v20637_v18 }
 0xf3d   :  { %v19997_v11 = vmax.f32 %v19978_v39, %v19979_v16  ;;  %v19948_v14 = vadd.f32 %v32999_v9, %v19869_v10  ;;  %26960 = vmatmul.mubr.msk.f32.vlgmr.msra.gmra.mrb[40].mxu0 %vm10370_vm3, %v20004_v52  ;;  %v20737_v16 = vld [vmem:[%s33227_s9 + $0x58] sm:$0xff]  ;;  %v20738_v52 = vld [vmem:[%s33227_s9 + $0x60] sm:$0xff]  ;;  %v20739_v39 = vld [vmem:[%s33227_s9 + $0x68] sm:$0xff] }
 0xf3e   :  { %v19981_v42 = vmax.f32 %v19949_v8, 0.0  ;;  %27094 = vmatpush3.bf16.msra.mxu0 %v27093_v45  ;;  %26966 = vmatprep.mubr.msk.f32.mxu0 %vm28797_vm2, %v33239_v58  ;;  %v27141_v45 = vpack.c.bf16 %v20737_v16, %v20736_v4  ;;  %v27144_v34 = vpack.c.bf16 %v20739_v39, %v20738_v52 }
 0xf3f   :  { %v20005_v56 = vmax.f32 %v19989_v28, %v19997_v11  ;;  %v19980_v53 = vmax.f32 %v19948_v14, 0.0  ;;  %v26926_v38 = vpop.f32.mrb[52].mxu1  ;;  %27095 = vmatprep.subr.bf16.mxu0 %v33238_v55  ;;  %27109 = vmatpush3.bf16.msra.mxu1 %v27108_v20  ;;  %v20643_v28 = vld [vmem:[%s33225_s7 + $0x50] sm:$0xff] }
 0xf40   :  { %v19951_v12 = vadd.f32 %v32999_v9, %v26926_v38  ;;  %v19879_v25 = vpop.f32.mrb[53].mxu1  ;;  %27110 = vmatprep.subr.bf16.mxu1 %v33238_v55  ;;  %v27117_v30 = vpack.c.bf16 %v20644_v29, %v20643_v28  ;;  %v20740_v20 = vld [vmem:[%s33227_s9 + $0x70] sm:$0xff]  ;;  %v22559_v28 = vld [vmem:[%s33228_s10] ss:$0 sm:$0xff] }
 0xf41   :  { %v19998_v37 = vmax.f32 %v19980_v53, %v19981_v42  ;;  %v19950_v2 = vadd.f32 %v32999_v9, %v19879_v25  ;;  %26967 = vmatmul.mubr.msk.f32.vlgmr.msra.gmra.mrb[42].mxu0 %vm10370_vm3, %v20005_v56 }
 0xf42   :  { %v19983_v54 = vmax.f32 %v19951_v12, 0.0  ;;  %27097 = vmatpush3.bf16.msra.mxu0 %v27096_v59  ;;  %26973 = vmatprep.mubr.msk.f32.mxu0 %vm28797_vm2, %v33239_v58 }
 0xf43   :  { %v20006_v13 = vmax.f32 %v19990_v46, %v19998_v37  ;;  %v19982_v15 = vmax.f32 %v19950_v2, 0.0  ;;  %27098 = vmatprep.subr.bf16.mxu0 %v33238_v55  ;;  %v20648_v46 = vld [vmem:[%s33225_s7 + $0x78] sm:$0xff] }
 0xf44   :  { %v27123_v40 = vpack.c.bf16 %v20648_v46, %v20647_v43 }
 0xf45   :  { %v19999_v17 = vmax.f32 %v19982_v15, %v19983_v54  ;;  %26974 = vmatmul.mubr.msk.f32.vlgmr.msra.gmra.mrb[44].mxu0 %vm10370_vm3, %v20006_v13  ;;  %v22557_v15 = vld [vmem:[%s33224_s6] ss:$0 sm:$0xff] }
 0xf46   :  { %27100 = vmatpush3.bf16.msra.mxu0 %v27099_v47  ;;  %26980 = vmatprep.mubr.msk.f32.mxu0 %vm28797_vm2, %v33239_v58 }
 0xf47   :  { %v20007_v9 = vmax.f32 %v19991_v50, %v19999_v17  ;;  %27125 = vmatprep.subr.bf16.mxu0 %v33238_v55  ;;  %v27129_v50 = vpack.c.bf16 %v20729_v60, %v20728_v31 }
 0xf49   :  { %26981 = vmatmul.mubr.msk.f32.vlgmr.msra.gmra.mrb[46].mxu0 %vm10370_vm3, %v20007_v9 }
 0xf4a   :  { %27050 = vmatprep.mubr.msk.f32.mxu0 %vm28797_vm2, %v33239_v58  ;;  %v20640_v58 = vld [vmem:[%s33225_s7 + $0x38] sm:$0xff]  ;;  %27127 = vmatpush3.bf16.msra.mxu0 %v27126_v32 }
 0xf4b   :  { %v27111_v26 = vpack.c.bf16 %v20640_v58, %v20639_v23  ;;  %27128 = vmatprep.subr.bf16.mxu0 %v33238_v55  ;;  %v20741_v23 = vld [vmem:[%s33227_s9 + $0x78] sm:$0xff] }
 0xf4c   :  { %v27147_v58 = vpack.c.bf16 %v20741_v23, %v20740_v20 }
 0xf4d   :  { %27112 = vmatpush3.bf16.msra.mxu1 %v27111_v26 }
 0xf4e   :  { %27113 = vmatprep.subr.bf16.mxu1 %v33238_v55  ;;  %27130 = vmatpush3.bf16.msra.mxu0 %v27129_v50 }
 0xf4f   :  { %27131 = vmatprep.subr.bf16.mxu0 %v33238_v55 }
 0xf51   :  { %27115 = vmatpush3.bf16.msra.mxu1 %v27114_v27 }
 0xf52   :  { %27116 = vmatprep.subr.bf16.mxu1 %v33238_v55  ;;  %27133 = vmatpush3.bf16.msra.mxu0 %v27132_v63 }
 0xf53   :  { %27134 = vmatprep.subr.bf16.mxu0 %v33238_v55 }
 0xf55   :  { %27118 = vmatpush3.bf16.msra.mxu1 %v27117_v30 }
 0xf56   :  { %27119 = vmatprep.subr.bf16.mxu1 %v33238_v55  ;;  %27136 = vmatpush3.bf16.msra.mxu0 %v27135_v5 }
 0xf57   :  { %27137 = vmatprep.subr.bf16.mxu0 %v33238_v55 }
 0xf59   :  { %27121 = vmatpush3.bf16.msra.mxu1 %v27120_v33 }
 0xf5a   :  { %27122 = vmatprep.subr.bf16.mxu1 %v33238_v55  ;;  %27139 = vmatpush3.bf16.msra.mxu0 %v27138_v3 }
 0xf5b   :  { %27140 = vmatprep.subr.bf16.mxu0 %v33238_v55 }
 0xf5d   :  { %27124 = vmatpush3.bf16.msra.mxu1 %v27123_v40 }
 0xf5e   :  { %27142 = vmatpush3.bf16.msra.mxu0 %v27141_v45 }
 0xf5f   :  { %27143 = vmatprep.subr.bf16.mxu0 %v33238_v55 }
 0xf62   :  { %27145 = vmatpush3.bf16.msra.mxu0 %v27144_v34 }
 0xf63   :  { %27146 = vmatprep.subr.bf16.mxu0 %v33238_v55 }
 0xf66   :  { %27148 = vmatpush3.bf16.msra.mxu0 %v27147_v58 }
 0xff0   :  { %v20080_v6 = vpop.f32.mrb[32].mxu0 }
 0xff1   :  { %v20084_v7 = vadd.f32 %v20080_v6, %v31368_v0  ;;  %v26933_v8 = vpop.f32.mrb[33].mxu0 }
 0xff4   :  { %v20157_v10 = vpop.f32.mrb[34].mxu0 }
 0xff5   :  { %v20161_v11 = vadd.f32 %v20157_v10, %v20084_v7  ;;  %v26940_v14 = vpop.f32.mrb[35].mxu0 }
 0xff8   :  { %v20234_v42 = vpop.f32.mrb[36].mxu0 }
 0xff9   :  { %v20238_v59 = vadd.f32 %v20234_v42, %v20161_v11  ;;  %v26947_v56 = vpop.f32.mrb[37].mxu0 }
 0xffc   :  { %v20311_v53 = vpop.f32.mrb[38].mxu0 }
 0xffd   :  { %v20315_v38 = vadd.f32 %v20311_v53, %v20238_v59  ;;  %v26954_v21 = vpop.f32.mrb[39].mxu0 }
0x1010   :  { %v20388_v1 = vpop.f32.mrb[40].mxu0 }
0x1011   :  { %v20392_v12 = vadd.f32 %v20388_v1, %v20315_v38  ;;  %v26961_v25 = vpop.f32.mrb[41].mxu0 }
0x1014   :  { %v20465_v37 = vpop.f32.mrb[42].mxu0 }
0x1015   :  { %v20469_v2 = vadd.f32 %v20465_v37, %v20392_v12  ;;  %v26968_v54 = vpop.f32.mrb[43].mxu0 }
0x1018   :  { %v20542_v55 = vpop.f32.mrb[44].mxu0 }
0x1019   :  { %v20546_v47 = vadd.f32 %v20542_v55, %v20469_v2  ;;  %v26975_v13 = vpop.f32.mrb[45].mxu0 }
0x101c   :  { %v20619_v0 = vpop.f32.mrb[46].mxu0 }
0x101d   :  { %v20623_v17 = vadd.f32 %v20619_v0, %v20546_v47  ;;  %v26982_v9 = vpop.f32.mrb[47].mxu0 }
0x101f   :  { %v20631_v18 = vadd.f32 %v22557_v15, %v20623_v17 }
0x1021   :  { %v20632_v19 = vmax.f32 %v20631_v18, 0.0 }
0x1023   :  { %27016 = vmatmul.mubr.f32.vlgmr.msra.gmra.mrb[54].mxu1 %v20632_v19 }
0x10f6   :  { %v20722_v26 = vpop.f32.mrb[54].mxu1 }
0x10f7   :  { %v20723_v22 = vadd.f32 %v22558_v24, %v20722_v26  ;;  %v27017_v27 = vpop.f32.mrb[55].mxu1 }
0x10f9   :  { %27051 = vmatmul.mubr.f32.vlgmr.msra.gmra.mrb[48].mxu0 %v20723_v22 }
0x11cc   :  { %v20815_v29 = vpop.f32.mrb[48].mxu0 }
0x11cd   :  { %v20816_v30 = vadd.f32 %v22559_v28, %v20815_v29  ;;  %v27052_v48 = vpop.f32.mrb[49].mxu0 }
0x11cf   :  { %v20819_v49 = vmax.f32 %v20816_v30, 0.0 }
0x11d1   :  { %20820 = vst [vmem:[%s33229_s11] sm:$0xff] %v20819_v49 }

</bundles_post_ra>
